<compile_context>
chip_gen: v7x
topology: tpu7x:2x2x1
jax: 0.10.0
libtpu: 0.0.40
codegen_flags: <defaults>
</compile_context>

<pallas_src>
import math

import jax
import jax.numpy as jnp
from jax import lax
from jax.experimental import pallas as pl
from jax.experimental.pallas import tpu as pltpu

# ----------------------------- configuration -------------------------------
C_LAT = 4            # latent channels
H_LAT = W_LAT = 16   # latent spatial size
PATCH = 2
PATCH_DIM = C_LAT * PATCH * PATCH              # 16
T_IMG = (H_LAT // PATCH) * (W_LAT // PATCH)    # 64
T_TXT = 8
T_ALL = T_IMG + T_TXT                          # 72
TXT_EMB = 32
D = 64               # hidden size
N_HEADS = 2
HEAD_DIM = D // N_HEADS                        # 32
DEPTH = 2
VOCAB = 97
NUM_STEPS = 28
GUIDANCE = 7.0

# Weights that stay resident in VMEM for the whole sampler kernel.
KERNEL_PARAM_ORDER = (
    "patch_w", "patch_b", "fproj_w", "fproj_b",
    "bi_qkv_w", "bi_qkv_b", "bt_qkv_w", "bt_qkv_b",
    "bi_proj_w", "bi_proj_b", "bt_proj_w", "bt_proj_b",
    "bi_mlp1_w", "bi_mlp1_b", "bi_mlp2_w", "bi_mlp2_b",
    "bt_mlp1_w", "bt_mlp1_b", "bt_mlp2_w", "bt_mlp2_b",
)


# ------------------------ the fused sampler kernel ---------------------------

def _sd3_sampler_kernel(
    dts_ref, noise_ref, txt0_ref,
    imod_ref, tmod_ref, fmod_ref,
    patch_w, patch_b, fproj_w, fproj_b,
    bi_qkv_w, bi_qkv_b, bt_qkv_w, bt_qkv_b,
    bi_proj_w, bi_proj_b, bt_proj_w, bt_proj_b,
    bi_mlp1_w, bi_mlp1_b, bi_mlp2_w, bi_mlp2_b,
    bt_mlp1_w, bt_mlp1_b, bt_mlp2_w, bt_mlp2_b,
    lat_out_ref,
):
    """All 28 Euler flow-matching steps in one kernel; latent is the loop carry."""
    bf16 = jnp.bfloat16
    f32 = jnp.float32
    attn_scale = 1.0 / math.sqrt(HEAD_DIM)

    txt0 = txt0_ref[...]                         # [2*T_TXT, D] bf16, step-invariant

    def mm(x_bf, w_bf, b=None):
        # bf16 MXU operands, f32 accumulation, f32 bias.
        y = jnp.dot(x_bf, w_bf, preferred_element_type=f32)
        return y if b is None else y + b

    def adaln(x_bf, shift, scale):
        # adaLN: LayerNorm (no affine, f32 stats) then x * (1 + scale) + shift.
        x = x_bf.astype(f32)
        mu = jnp.mean(x, axis=-1, keepdims=True)
        xc = x - mu
        var = jnp.mean(xc * xc, axis=-1, keepdims=True)
        xn = xc * jax.lax.rsqrt(var + 1e-6)
        return (xn * (1.0 + scale) + shift).astype(bf16)

    def softmax_last(s):
        m = jnp.max(s, axis=-1, keepdims=True)
        p = jnp.exp(s - m)
        l = jnp.sum(p, axis=-1, keepdims=True)
        return p * pl.reciprocal(l, approx=True)

    def step_fn(step, x_lat):
        dt = dts_ref[step]                                        # scalar from SMEM

        # ---- patch-embed latent; stack cond/uncond rows ----
        img0 = mm(x_lat.astype(bf16), patch_w[...], patch_b[...]).astype(bf16)
        # TODO(synk): cond/uncond image rows are identical until after layer-0
        # attention and could be de-duplicated there.
        img = jnp.concatenate([img0, img0], axis=0)               # [2*T_IMG, D] bf16
        txt = txt0                                                 # [2*T_TXT, D] bf16

        for d in range(DEPTH):
            # per-step / per-depth adaLN modulation, precomputed host-side
            imod = imod_ref[step * DEPTH + d]                      # [6, D] f32
            tmod = tmod_ref[step * DEPTH + d]
            i_sh1, i_sc1, i_g1 = imod[0:1], imod[1:2], imod[2:3]
            i_sh2, i_sc2, i_g2 = imod[3:4], imod[4:5], imod[5:6]
            t_sh1, t_sc1, t_g1 = tmod[0:1], tmod[1:2], tmod[2:3]
            t_sh2, t_sc2, t_g2 = tmod[3:4], tmod[4:5], tmod[5:6]

            # -------- joint attention, batched over (cond, uncond) --------
            img_n = adaln(img, i_sh1, i_sc1)                       # [128, D] bf16
            txt_n = adaln(txt, t_sh1, t_sc1)                       # [16, D] bf16
            qkv_i = mm(img_n, bi_qkv_w[d], bi_qkv_b[d])            # [128, 3D] f32
            qkv_t = mm(txt_n, bt_qkv_w[d], bt_qkv_b[d])            # [16, 3D] f32
            # single sublane-aligned concat: [2, T_ALL, 3D] (img tokens then txt)
            qkv = jnp.concatenate(
                [qkv_i.reshape(2, T_IMG, 3 * D),
                 qkv_t.reshape(2, T_TXT, 3 * D)], axis=1)

            head_outs = []
            for hh in range(N_HEADS):                              # N_HEADS = 2
                c0 = hh * HEAD_DIM
                q = qkv[:, :, c0:c0 + HEAD_DIM].astype(bf16)               # [2,72,32]
                k = qkv[:, :, D + c0:D + c0 + HEAD_DIM].astype(bf16)
                v = qkv[:, :, 2 * D + c0:2 * D + c0 + HEAD_DIM].astype(bf16)
                s = jnp.einsum('bqd,bkd->bqk', q, k,
                               preferred_element_type=f32) * attn_scale    # [2,72,72]
                p = softmax_last(s)
                head_outs.append(
                    jnp.einsum('bqk,bkd->bqd', p.astype(bf16), v,
                               preferred_element_type=f32))                 # [2,72,32]
            o = jnp.concatenate(head_outs, axis=-1)                # [2, T_ALL, D] f32

            # merged K=D output projections (one GEMM per stream, not per head)
            o_img = o[:, :T_IMG, :].reshape(2 * T_IMG, D).astype(bf16)
            o_txt = o[:, T_IMG:, :].reshape(2 * T_TXT, D).astype(bf16)
            attn_i = mm(o_img, bi_proj_w[d], bi_proj_b[d])         # [128, D] f32
            attn_t = mm(o_txt, bt_proj_w[d], bt_proj_b[d])         # [16, D] f32
            img = img + (i_g1 * attn_i).astype(bf16)
            txt = txt + (t_g1 * attn_t).astype(bf16)

            # -------- MLPs --------
            img_n = adaln(img, i_sh2, i_sc2)
            hi = jax.nn.gelu(mm(img_n, bi_mlp1_w[d], bi_mlp1_b[d]),
                             approximate=True).astype(bf16)
            img = img + (i_g2 * mm(hi, bi_mlp2_w[d], bi_mlp2_b[d])).astype(bf16)

            txt_n = adaln(txt, t_sh2, t_sc2)
            ht = jax.nn.gelu(mm(txt_n, bt_mlp1_w[d], bt_mlp1_b[d]),
                             approximate=True).astype(bf16)
            txt = txt + (t_g2 * mm(ht, bt_mlp2_w[d], bt_mlp2_b[d])).astype(bf16)

        # -------- final adaLN + projection + CFG combine + Euler step --------
        fm = fmod_ref[step]                                        # [2, D] f32
        img_n = adaln(img, fm[0:1], fm[1:2])
        v_all = mm(img_n, fproj_w[...], fproj_b[...])              # [128, PATCH_DIM]
        v_cond, v_uncond = v_all[:T_IMG], v_all[T_IMG:]
        vel = v_uncond + GUIDANCE * (v_cond - v_uncond)
        return x_lat + dt * vel                                    # f32 carry

    x_final = lax.fori_loop(0, NUM_STEPS, step_fn, noise_ref[...])
    lat_out_ref[...] = x_final


# ------------------------------ sampler wrapper ------------------------------

@jax.jit
def sample(params, txt_tok, noise_tok):
    """Full 28-step Euler flow-matching sampling with CFG=7.0, one pallas_call."""
    f32 = jnp.float32

    # flow-matching schedule
    sigmas = jnp.linspace(1.0, 0.0, NUM_STEPS + 1).astype(f32)
    dts = sigmas[1:] - sigmas[:-1]                                 # [NUM_STEPS]

    # ---- conditioning hoisted out of the kernel (perf feedback) ----
    # timestep embedding -> time-MLP -> all adaLN modulation vectors for all 28
    # steps, precomputed as small tables (~190 KB) that stay resident in VMEM.
    half = D // 2
    freqs = jnp.exp(-math.log(10000.0) * jnp.arange(half, dtype=f32) / half)
    ang = sigmas[:NUM_STEPS, None] * 1000.0 * freqs[None, :]
    temb = jnp.concatenate([jnp.cos(ang), jnp.sin(ang)], axis=1)   # [NUM_STEPS, D]

    def dense(x, w, b):
        return jnp.dot(x, w.astype(f32)) + b

    h = jax.nn.silu(dense(temb, params["time1_w"], params["time1_b"]))
    c = jax.nn.silu(dense(h, params["time2_w"], params["time2_b"]))  # [NUM_STEPS, D]

    imod = jnp.stack([dense(c, params["bi_mod_w"][d], params["bi_mod_b"][d])
                      for d in range(DEPTH)], axis=1)              # [S, DEPTH, 6D]
    tmod = jnp.stack([dense(c, params["bt_mod_w"][d], params["bt_mod_b"][d])
                      for d in range(DEPTH)], axis=1)
    imod_tab = imod.reshape(NUM_STEPS * DEPTH, 6, D)               # [56, 6, D]
    tmod_tab = tmod.reshape(NUM_STEPS * DEPTH, 6, D)
    fmod_tab = dense(c, params["fmod_w"], params["fmod_b"]).reshape(NUM_STEPS, 2, D)

    # text-token embedding is step-invariant -> hoisted too
    txt0 = dense(txt_tok, params["txtin_w"], params["txtin_b"]).astype(jnp.bfloat16)

    weights = tuple(params[name] for name in KERNEL_PARAM_ORDER)
    tables = (dts, noise_tok, txt0, imod_tab, tmod_tab, fmod_tab)

    # No grid: a single program, all operands DMA'd to VMEM once (no
    # multi-buffering needed); dts lives in SMEM for scalar per-step reads.
    in_specs = ([pl.BlockSpec(memory_space=pltpu.MemorySpace.SMEM)]
                + [pl.BlockSpec(memory_space=pltpu.MemorySpace.VMEM)]
                * (len(tables) - 1 + len(weights)))

    return pl.pallas_call(
        _sd3_sampler_kernel,
        out_shape=jax.ShapeDtypeStruct((T_IMG, PATCH_DIM), jnp.float32),
        in_specs=in_specs,
        out_specs=pl.BlockSpec(memory_space=pltpu.MemorySpace.VMEM),
    )(*tables, *weights)                                            # [T_IMG, PATCH_DIM]


# ------------------------------ VAE decode -----------------------------------

@jax.jit
def decode(params, lat_tok):
    """Tiny linear 'VAE' decode: each latent pixel (C_LAT) -> 2x2 RGB patch.

    Kept in plain XLA per perf feedback: the [.,4]x[4,12] GEMM is far below
    MXU / lane granularity, so a dedicated pallas_call only adds launch cost.
    """
    # TODO(synk): real SD3 uses the full SD-VAE decoder; synthetic linear decode here.
    lat = unpatchify(lat_tok[None])                                 # [1, C, H, W]
    x = lat[0].transpose(1, 2, 0).reshape(H_LAT * W_LAT, C_LAT)
    y = jax.nn.sigmoid(jnp.dot(x, params["vae_w"]) + params["vae_b"])
    y = y.reshape(H_LAT, W_LAT, 2, 2, 3).transpose(0, 2, 1, 3, 4)
    return y.reshape(H_LAT * 2, W_LAT * 2, 3)                       # HWC in [0, 1]


# ------------------------------ glue (plain JAX) -----------------------------

def patchify(x):
    # [B, C, H, W] -> [B, T_IMG, C*p*p]
    B, C, H, W = x.shape
    p = PATCH
    x = x.reshape(B, C, H // p, p, W // p, p)
    x = x.transpose(0, 2, 4, 1, 3, 5)
    return x.reshape(B, (H // p) * (W // p), C * p * p)


def unpatchify(x, C=C_LAT, H=H_LAT, W=W_LAT):
    # [B, T_IMG, C*p*p] -> [B, C, H, W]
    B = x.shape[0]
    p = PATCH
    x = x.reshape(B, H // p, W // p, C, p, p)
    x = x.transpose(0, 3, 1, 4, 2, 5)
    return x.reshape(B, C, H, W)


def encode_prompt(prompt, tok_emb, seq_len=T_TXT):
    # TODO(synk): real SD3 uses CLIP-L/G + T5 text encoders; synthetic table lookup here.
    ids = [(ord(ch) % VOCAB) for ch in prompt][:seq_len]
    ids = ids + [0] * (seq_len - len(ids))
    return tok_emb[jnp.array(ids, jnp.int32)]                       # [seq_len, TXT_EMB]


# ------------------------------ params ---------------------------------------

def init_params(key):
    keys = iter(jax.random.split(key, 32))

    def w_(din, dout):   # bf16 matmul weights (f32 accumulation in-kernel)
        return (jax.random.normal(next(keys), (din, dout), jnp.float32)
                / math.sqrt(din)).astype(jnp.bfloat16)

    def bw_(din, dout):  # per-block weights stacked over DEPTH
        return (jax.random.normal(next(keys), (DEPTH, din, dout), jnp.float32)
                / math.sqrt(din)).astype(jnp.bfloat16)

    def b_(dout):
        return jnp.zeros((1, dout), jnp.float32)

    def bb_(dout):
        return jnp.zeros((DEPTH, 1, dout), jnp.float32)

    params = {
        # kernel-resident weights
        "patch_w": w_(PATCH_DIM, D), "patch_b": b_(D),
        "fproj_w": w_(D, PATCH_DIM), "fproj_b": b_(PATCH_DIM),
        "bi_qkv_w": bw_(D, 3 * D), "bi_qkv_b": bb_(3 * D),
        "bt_qkv_w": bw_(D, 3 * D), "bt_qkv_b": bb_(3 * D),
        "bi_proj_w": bw_(D, D), "bi_proj_b": bb_(D),
        "bt_proj_w": bw_(D, D), "bt_proj_b": bb_(D),
        "bi_mlp1_w": bw_(D, 4 * D), "bi_mlp1_b": bb_(4 * D),
        "bi_mlp2_w": bw_(4 * D, D), "bi_mlp2_b": bb_(D),
        "bt_mlp1_w": bw_(D, 4 * D), "bt_mlp1_b": bb_(4 * D),
        "bt_mlp2_w": bw_(4 * D, D), "bt_mlp2_b": bb_(D),
        # conditioning / text-embed weights (used host-side to build the tables)
        "txtin_w": w_(TXT_EMB, D), "txtin_b": b_(D),
        "time1_w": w_(D, D), "time1_b": b_(D),
        "time2_w": w_(D, D), "time2_b": b_(D),
        "bi_mod_w": bw_(D, 6 * D), "bi_mod_b": bb_(6 * D),
        "bt_mod_w": bw_(D, 6 * D), "bt_mod_b": bb_(6 * D),
        "fmod_w": w_(D, 2 * D), "fmod_b": b_(2 * D),
        # tiny "VAE" decode + text token embedding (host/XLA side)
        "vae_w": (jax.random.normal(next(keys), (C_LAT, 12), jnp.float32)
                  / math.sqrt(C_LAT)),
        "vae_b": jnp.zeros((1, 12), jnp.float32),
        "tok_emb": jax.random.normal(next(keys), (VOCAB, TXT_EMB), jnp.float32) * 0.02,
    }
    return params


# ------------------------------ main ------------------------------------------

if __name__ == "__main__":
    key = jax.random.PRNGKey(0)
    params = init_params(key)

    prompt = "a photo of an astronaut riding a horse on mars"
    txt_cond = encode_prompt(prompt, params["tok_emb"])             # [T_TXT, TXT_EMB]
    txt_uncond = encode_prompt("", params["tok_emb"])               # negative_prompt=''
    txt_tok = jnp.concatenate([txt_cond, txt_uncond], axis=0)       # [2*T_TXT, TXT_EMB]
    txt_tok = txt_tok.astype(jnp.float32)

    noise = jax.random.normal(jax.random.PRNGKey(0),
                              (1, C_LAT, H_LAT, W_LAT), jnp.float32)
    noise_tok = patchify(noise)[0]                                   # [T_IMG, PATCH_DIM]

    lat_tok = sample(params, txt_tok, noise_tok)                     # [64, 16]
    image = decode(params, lat_tok)                                  # [32, 32, 3] HWC
    image = jax.block_until_ready(image)

    assert image.shape == (H_LAT * 2, W_LAT * 2, 3)
    assert bool(jnp.all(jnp.isfinite(image)))
    print("KERNEL_OK")
</pallas_src>

<mosaic_0001>
module attributes {stable_mosaic.version = 11 : i64} {
  func.func @_sd3_sampler_kernel(%arg0: memref<28xf32, #tpu.memory_space<smem>>, %arg1: memref<64x16xf32, #tpu.memory_space<vmem>>, %arg2: memref<16x64xbf16, #tpu.memory_space<vmem>>, %arg3: memref<56x6x64xf32, #tpu.memory_space<vmem>>, %arg4: memref<56x6x64xf32, #tpu.memory_space<vmem>>, %arg5: memref<28x2x64xf32, #tpu.memory_space<vmem>>, %arg6: memref<16x64xbf16, #tpu.memory_space<vmem>>, %arg7: memref<1x64xf32, #tpu.memory_space<vmem>>, %arg8: memref<64x16xbf16, #tpu.memory_space<vmem>>, %arg9: memref<1x16xf32, #tpu.memory_space<vmem>>, %arg10: memref<2x64x192xbf16, #tpu.memory_space<vmem>>, %arg11: memref<2x1x192xf32, #tpu.memory_space<vmem>>, %arg12: memref<2x64x192xbf16, #tpu.memory_space<vmem>>, %arg13: memref<2x1x192xf32, #tpu.memory_space<vmem>>, %arg14: memref<2x64x64xbf16, #tpu.memory_space<vmem>>, %arg15: memref<2x1x64xf32, #tpu.memory_space<vmem>>, %arg16: memref<2x64x64xbf16, #tpu.memory_space<vmem>>, %arg17: memref<2x1x64xf32, #tpu.memory_space<vmem>>, %arg18: memref<2x64x256xbf16, #tpu.memory_space<vmem>>, %arg19: memref<2x1x256xf32, #tpu.memory_space<vmem>>, %arg20: memref<2x256x64xbf16, #tpu.memory_space<vmem>>, %arg21: memref<2x1x64xf32, #tpu.memory_space<vmem>>, %arg22: memref<2x64x256xbf16, #tpu.memory_space<vmem>>, %arg23: memref<2x1x256xf32, #tpu.memory_space<vmem>>, %arg24: memref<2x256x64xbf16, #tpu.memory_space<vmem>>, %arg25: memref<2x1x64xf32, #tpu.memory_space<vmem>>, %arg26: memref<64x16xf32, #tpu.memory_space<vmem>>) attributes {dimension_semantics = [], scalar_prefetch = 0 : i64, scratch_operands = 0 : i64, tpu.core_type = #tpu.core_type<tc>} {
    %c0 = arith.constant 0 : index
    %c0_0 = arith.constant 0 : index
    %0 = vector.load %arg2[%c0, %c0_0] : memref<16x64xbf16, #tpu.memory_space<vmem>>, vector<16x64xbf16>
    %c0_1 = arith.constant 0 : index
    %c0_2 = arith.constant 0 : index
    %1 = vector.load %arg1[%c0_1, %c0_2] : memref<64x16xf32, #tpu.memory_space<vmem>>, vector<64x16xf32>
    %c0_i32 = arith.constant 0 : i32
    %c28_i32 = arith.constant 28 : i32
    %2 = arith.addi %c0_i32, %c28_i32 : i32
    %c1_i32 = arith.constant 1 : i32
    %3 = scf.for %arg27 = %c0_i32 to %2 step %c1_i32 iter_args(%arg28 = %1) -> (vector<64x16xf32>)  : i32 {
      %5 = arith.index_cast %arg27 : i32 to index
      %6 = memref.load %arg0[%5] : memref<28xf32, #tpu.memory_space<smem>>
      %7 = arith.truncf %arg28 : vector<64x16xf32> to vector<64x16xbf16>
      %c0_6 = arith.constant 0 : index
      %c0_7 = arith.constant 0 : index
      %8 = vector.load %arg6[%c0_6, %c0_7] : memref<16x64xbf16, #tpu.memory_space<vmem>>, vector<16x64xbf16>
      %c0_8 = arith.constant 0 : index
      %c0_9 = arith.constant 0 : index
      %9 = vector.load %arg7[%c0_8, %c0_9] : memref<1x64xf32, #tpu.memory_space<vmem>>, vector<1x64xf32>
      %cst = arith.constant dense<0.000000e+00> : vector<64x64xf32>
      %10 = tpu.matmul %7, %8, %cst {dimension_numbers = #tpu.dot_dimension_numbers<[1], [0], [0], [1], [0, 0, 1, 1], [], []>} : vector<64x16xbf16>, vector<16x64xbf16>, vector<64x64xf32> -> vector<64x64xf32>
      %11 = vector.broadcast %9 : vector<1x64xf32> to vector<64x64xf32>
      %12 = arith.addf %10, %11 : vector<64x64xf32>
      %13 = arith.truncf %12 : vector<64x64xf32> to vector<64x64xbf16>
      %14 = tpu.concatenate %13, %13 in 0 : vector<64x64xbf16>, vector<64x64xbf16> -> vector<128x64xbf16>
      %c2_i32 = arith.constant 2 : i32
      %15 = arith.muli %arg27, %c2_i32 : i32
      %c0_i32_10 = arith.constant 0 : i32
      %16 = arith.addi %15, %c0_i32_10 : i32
      %17 = arith.index_cast %16 : i32 to index
      %c0_11 = arith.constant 0 : index
      %c0_12 = arith.constant 0 : index
      %18 = vector.load %arg3[%17, %c0_11, %c0_12] : memref<56x6x64xf32, #tpu.memory_space<vmem>>, vector<1x6x64xf32>
      %19 = vector.shape_cast %18 : vector<1x6x64xf32> to vector<6x64xf32>
      %c2_i32_13 = arith.constant 2 : i32
      %20 = arith.muli %arg27, %c2_i32_13 : i32
      %c0_i32_14 = arith.constant 0 : i32
      %21 = arith.addi %20, %c0_i32_14 : i32
      %22 = arith.index_cast %21 : i32 to index
      %c0_15 = arith.constant 0 : index
      %c0_16 = arith.constant 0 : index
      %23 = vector.load %arg4[%22, %c0_15, %c0_16] : memref<56x6x64xf32, #tpu.memory_space<vmem>>, vector<1x6x64xf32>
      %24 = vector.shape_cast %23 : vector<1x6x64xf32> to vector<6x64xf32>
      %25 = vector.extract_strided_slice %19 {offsets = [0, 0], sizes = [1, 64], strides = [1, 1]} : vector<6x64xf32> to vector<1x64xf32>
      %26 = vector.extract_strided_slice %19 {offsets = [1, 0], sizes = [1, 64], strides = [1, 1]} : vector<6x64xf32> to vector<1x64xf32>
      %27 = vector.extract_strided_slice %19 {offsets = [2, 0], sizes = [1, 64], strides = [1, 1]} : vector<6x64xf32> to vector<1x64xf32>
      %28 = vector.extract_strided_slice %19 {offsets = [3, 0], sizes = [1, 64], strides = [1, 1]} : vector<6x64xf32> to vector<1x64xf32>
      %29 = vector.extract_strided_slice %19 {offsets = [4, 0], sizes = [1, 64], strides = [1, 1]} : vector<6x64xf32> to vector<1x64xf32>
      %30 = vector.extract_strided_slice %19 {offsets = [5, 0], sizes = [1, 64], strides = [1, 1]} : vector<6x64xf32> to vector<1x64xf32>
      %31 = vector.extract_strided_slice %24 {offsets = [0, 0], sizes = [1, 64], strides = [1, 1]} : vector<6x64xf32> to vector<1x64xf32>
      %32 = vector.extract_strided_slice %24 {offsets = [1, 0], sizes = [1, 64], strides = [1, 1]} : vector<6x64xf32> to vector<1x64xf32>
      %33 = vector.extract_strided_slice %24 {offsets = [2, 0], sizes = [1, 64], strides = [1, 1]} : vector<6x64xf32> to vector<1x64xf32>
      %34 = vector.extract_strided_slice %24 {offsets = [3, 0], sizes = [1, 64], strides = [1, 1]} : vector<6x64xf32> to vector<1x64xf32>
      %35 = vector.extract_strided_slice %24 {offsets = [4, 0], sizes = [1, 64], strides = [1, 1]} : vector<6x64xf32> to vector<1x64xf32>
      %36 = vector.extract_strided_slice %24 {offsets = [5, 0], sizes = [1, 64], strides = [1, 1]} : vector<6x64xf32> to vector<1x64xf32>
      %37 = arith.extf %14 : vector<128x64xbf16> to vector<128x64xf32>
      %cst_17 = arith.constant dense<0.000000e+00> : vector<128xf32>
      %38 = vector.multi_reduction <add>, %37, %cst_17 [1] : vector<128x64xf32> to vector<128xf32>
      %39 = vector.shape_cast %38 : vector<128xf32> to vector<128x1xf32>
      %cst_18 = arith.constant 6.400000e+01 : f32
      %40 = vector.broadcast %cst_18 : f32 to vector<128x1xf32>
      %41 = arith.divf %39, %40 : vector<128x1xf32>
      %42 = vector.broadcast %41 : vector<128x1xf32> to vector<128x64xf32>
      %43 = arith.subf %37, %42 : vector<128x64xf32>
      %44 = arith.mulf %43, %43 : vector<128x64xf32>
      %cst_19 = arith.constant dense<0.000000e+00> : vector<128xf32>
      %45 = vector.multi_reduction <add>, %44, %cst_19 [1] : vector<128x64xf32> to vector<128xf32>
      %46 = vector.shape_cast %45 : vector<128xf32> to vector<128x1xf32>
      %cst_20 = arith.constant 6.400000e+01 : f32
      %47 = vector.broadcast %cst_20 : f32 to vector<128x1xf32>
      %48 = arith.divf %46, %47 : vector<128x1xf32>
      %cst_21 = arith.constant 9.99999997E-7 : f32
      %49 = vector.broadcast %cst_21 : f32 to vector<128x1xf32>
      %50 = arith.addf %48, %49 : vector<128x1xf32>
      %51 = math.rsqrt %50 : vector<128x1xf32>
      %52 = vector.broadcast %51 : vector<128x1xf32> to vector<128x64xf32>
      %53 = arith.mulf %43, %52 : vector<128x64xf32>
      %cst_22 = arith.constant 1.000000e+00 : f32
      %54 = vector.broadcast %cst_22 : f32 to vector<1x64xf32>
      %55 = arith.addf %54, %26 : vector<1x64xf32>
      %56 = vector.broadcast %55 : vector<1x64xf32> to vector<128x64xf32>
      %57 = arith.mulf %53, %56 : vector<128x64xf32>
      %58 = vector.broadcast %25 : vector<1x64xf32> to vector<128x64xf32>
      %59 = arith.addf %57, %58 : vector<128x64xf32>
      %60 = arith.truncf %59 : vector<128x64xf32> to vector<128x64xbf16>
      %61 = arith.extf %0 : vector<16x64xbf16> to vector<16x64xf32>
      %cst_23 = arith.constant dense<0.000000e+00> : vector<16xf32>
      %62 = vector.multi_reduction <add>, %61, %cst_23 [1] : vector<16x64xf32> to vector<16xf32>
      %63 = vector.shape_cast %62 : vector<16xf32> to vector<16x1xf32>
      %cst_24 = arith.constant 6.400000e+01 : f32
      %64 = vector.broadcast %cst_24 : f32 to vector<16x1xf32>
      %65 = arith.divf %63, %64 : vector<16x1xf32>
      %66 = vector.broadcast %65 : vector<16x1xf32> to vector<16x64xf32>
      %67 = arith.subf %61, %66 : vector<16x64xf32>
      %68 = arith.mulf %67, %67 : vector<16x64xf32>
      %cst_25 = arith.constant dense<0.000000e+00> : vector<16xf32>
      %69 = vector.multi_reduction <add>, %68, %cst_25 [1] : vector<16x64xf32> to vector<16xf32>
      %70 = vector.shape_cast %69 : vector<16xf32> to vector<16x1xf32>
      %cst_26 = arith.constant 6.400000e+01 : f32
      %71 = vector.broadcast %cst_26 : f32 to vector<16x1xf32>
      %72 = arith.divf %70, %71 : vector<16x1xf32>
      %cst_27 = arith.constant 9.99999997E-7 : f32
      %73 = vector.broadcast %cst_27 : f32 to vector<16x1xf32>
      %74 = arith.addf %72, %73 : vector<16x1xf32>
      %75 = math.rsqrt %74 : vector<16x1xf32>
      %76 = vector.broadcast %75 : vector<16x1xf32> to vector<16x64xf32>
      %77 = arith.mulf %67, %76 : vector<16x64xf32>
      %cst_28 = arith.constant 1.000000e+00 : f32
      %78 = vector.broadcast %cst_28 : f32 to vector<1x64xf32>
      %79 = arith.addf %78, %32 : vector<1x64xf32>
      %80 = vector.broadcast %79 : vector<1x64xf32> to vector<16x64xf32>
      %81 = arith.mulf %77, %80 : vector<16x64xf32>
      %82 = vector.broadcast %31 : vector<1x64xf32> to vector<16x64xf32>
      %83 = arith.addf %81, %82 : vector<16x64xf32>
      %84 = arith.truncf %83 : vector<16x64xf32> to vector<16x64xbf16>
      %c0_29 = arith.constant 0 : index
      %c0_30 = arith.constant 0 : index
      %c0_31 = arith.constant 0 : index
      %85 = vector.load %arg10[%c0_29, %c0_30, %c0_31] : memref<2x64x192xbf16, #tpu.memory_space<vmem>>, vector<1x64x192xbf16>
      %86 = vector.shape_cast %85 : vector<1x64x192xbf16> to vector<64x192xbf16>
      %c0_32 = arith.constant 0 : index
      %c0_33 = arith.constant 0 : index
      %c0_34 = arith.constant 0 : index
      %87 = vector.load %arg11[%c0_32, %c0_33, %c0_34] : memref<2x1x192xf32, #tpu.memory_space<vmem>>, vector<1x1x192xf32>
      %88 = vector.shape_cast %87 : vector<1x1x192xf32> to vector<1x192xf32>
      %cst_35 = arith.constant dense<0.000000e+00> : vector<128x192xf32>
      %89 = tpu.matmul %60, %86, %cst_35 {dimension_numbers = #tpu.dot_dimension_numbers<[1], [0], [0], [1], [0, 0, 1, 1], [], []>} : vector<128x64xbf16>, vector<64x192xbf16>, vector<128x192xf32> -> vector<128x192xf32>
      %90 = vector.broadcast %88 : vector<1x192xf32> to vector<128x192xf32>
      %91 = arith.addf %89, %90 : vector<128x192xf32>
      %c0_36 = arith.constant 0 : index
      %c0_37 = arith.constant 0 : index
      %c0_38 = arith.constant 0 : index
      %92 = vector.load %arg12[%c0_36, %c0_37, %c0_38] : memref<2x64x192xbf16, #tpu.memory_space<vmem>>, vector<1x64x192xbf16>
      %93 = vector.shape_cast %92 : vector<1x64x192xbf16> to vector<64x192xbf16>
      %c0_39 = arith.constant 0 : index
      %c0_40 = arith.constant 0 : index
      %c0_41 = arith.constant 0 : index
      %94 = vector.load %arg13[%c0_39, %c0_40, %c0_41] : memref<2x1x192xf32, #tpu.memory_space<vmem>>, vector<1x1x192xf32>
      %95 = vector.shape_cast %94 : vector<1x1x192xf32> to vector<1x192xf32>
      %cst_42 = arith.constant dense<0.000000e+00> : vector<16x192xf32>
      %96 = tpu.matmul %84, %93, %cst_42 {dimension_numbers = #tpu.dot_dimension_numbers<[1], [0], [0], [1], [0, 0, 1, 1], [], []>} : vector<16x64xbf16>, vector<64x192xbf16>, vector<16x192xf32> -> vector<16x192xf32>
      %97 = vector.broadcast %95 : vector<1x192xf32> to vector<16x192xf32>
      %98 = arith.addf %96, %97 : vector<16x192xf32>
      %99 = vector.shape_cast %91 : vector<128x192xf32> to vector<2x64x192xf32>
      %100 = vector.shape_cast %98 : vector<16x192xf32> to vector<2x8x192xf32>
      %101 = tpu.concatenate %99, %100 in 1 : vector<2x64x192xf32>, vector<2x8x192xf32> -> vector<2x72x192xf32>
      %102 = vector.extract_strided_slice %101 {offsets = [0, 0, 0], sizes = [2, 72, 32], strides = [1, 1, 1]} : vector<2x72x192xf32> to vector<2x72x32xf32>
      %103 = arith.truncf %102 : vector<2x72x32xf32> to vector<2x72x32xbf16>
      %104 = vector.extract_strided_slice %101 {offsets = [0, 0, 64], sizes = [2, 72, 32], strides = [1, 1, 1]} : vector<2x72x192xf32> to vector<2x72x32xf32>
      %105 = arith.truncf %104 : vector<2x72x32xf32> to vector<2x72x32xbf16>
      %106 = vector.extract_strided_slice %101 {offsets = [0, 0, 128], sizes = [2, 72, 32], strides = [1, 1, 1]} : vector<2x72x192xf32> to vector<2x72x32xf32>
      %107 = arith.truncf %106 : vector<2x72x32xf32> to vector<2x72x32xbf16>
      "tpu.trace_start"() <{level = 10 : i32, message = "bqd,bkd->bqk"}> : () -> ()
      %cst_43 = arith.constant dense<0.000000e+00> : vector<2x72x72xf32>
      %108 = tpu.matmul %103, %105, %cst_43 {dimension_numbers = #tpu.dot_dimension_numbers<[2], [2], [1], [1], [0, 0, 0, 1, 1, 1], [0], [0]>} : vector<2x72x32xbf16>, vector<2x72x32xbf16>, vector<2x72x72xf32> -> vector<2x72x72xf32>
      "tpu.trace_stop"() : () -> ()
      %cst_44 = arith.constant 0.176776692 : f32
      %109 = vector.broadcast %cst_44 : f32 to vector<2x72x72xf32>
      %110 = arith.mulf %108, %109 : vector<2x72x72xf32>
      %cst_45 = arith.constant dense<0xFF800000> : vector<2x72xf32>
      %111 = vector.multi_reduction <maximumf>, %110, %cst_45 [2] : vector<2x72x72xf32> to vector<2x72xf32>
      %112 = vector.shape_cast %111 : vector<2x72xf32> to vector<2x72x1xf32>
      %113 = vector.broadcast %112 : vector<2x72x1xf32> to vector<2x72x72xf32>
      %114 = arith.subf %110, %113 : vector<2x72x72xf32>
      %115 = math.exp %114 : vector<2x72x72xf32>
      %cst_46 = arith.constant dense<0.000000e+00> : vector<2x72xf32>
      %116 = vector.multi_reduction <add>, %115, %cst_46 [2] : vector<2x72x72xf32> to vector<2x72xf32>
      %117 = vector.shape_cast %116 : vector<2x72xf32> to vector<2x72x1xf32>
      %118 = tpu.reciprocal %117 {approx = true} : vector<2x72x1xf32> -> vector<2x72x1xf32>
      %119 = vector.broadcast %118 : vector<2x72x1xf32> to vector<2x72x72xf32>
      %120 = arith.mulf %115, %119 : vector<2x72x72xf32>
      %121 = arith.truncf %120 : vector<2x72x72xf32> to vector<2x72x72xbf16>
      "tpu.trace_start"() <{level = 10 : i32, message = "bqk,bkd->bqd"}> : () -> ()
      %cst_47 = arith.constant dense<0.000000e+00> : vector<2x72x32xf32>
      %122 = tpu.matmul %121, %107, %cst_47 {dimension_numbers = #tpu.dot_dimension_numbers<[2], [1], [1], [2], [0, 0, 0, 1, 1, 2], [0], [0]>} : vector<2x72x72xbf16>, vector<2x72x32xbf16>, vector<2x72x32xf32> -> vector<2x72x32xf32>
      "tpu.trace_stop"() : () -> ()
      %123 = vector.extract_strided_slice %101 {offsets = [0, 0, 32], sizes = [2, 72, 32], strides = [1, 1, 1]} : vector<2x72x192xf32> to vector<2x72x32xf32>
      %124 = arith.truncf %123 : vector<2x72x32xf32> to vector<2x72x32xbf16>
      %125 = vector.extract_strided_slice %101 {offsets = [0, 0, 96], sizes = [2, 72, 32], strides = [1, 1, 1]} : vector<2x72x192xf32> to vector<2x72x32xf32>
      %126 = arith.truncf %125 : vector<2x72x32xf32> to vector<2x72x32xbf16>
      %127 = vector.extract_strided_slice %101 {offsets = [0, 0, 160], sizes = [2, 72, 32], strides = [1, 1, 1]} : vector<2x72x192xf32> to vector<2x72x32xf32>
      %128 = arith.truncf %127 : vector<2x72x32xf32> to vector<2x72x32xbf16>
      "tpu.trace_start"() <{level = 10 : i32, message = "bqd,bkd->bqk"}> : () -> ()
      %cst_48 = arith.constant dense<0.000000e+00> : vector<2x72x72xf32>
      %129 = tpu.matmul %124, %126, %cst_48 {dimension_numbers = #tpu.dot_dimension_numbers<[2], [2], [1], [1], [0, 0, 0, 1, 1, 1], [0], [0]>} : vector<2x72x32xbf16>, vector<2x72x32xbf16>, vector<2x72x72xf32> -> vector<2x72x72xf32>
      "tpu.trace_stop"() : () -> ()
      %cst_49 = arith.constant 0.176776692 : f32
      %130 = vector.broadcast %cst_49 : f32 to vector<2x72x72xf32>
      %131 = arith.mulf %129, %130 : vector<2x72x72xf32>
      %cst_50 = arith.constant dense<0xFF800000> : vector<2x72xf32>
      %132 = vector.multi_reduction <maximumf>, %131, %cst_50 [2] : vector<2x72x72xf32> to vector<2x72xf32>
      %133 = vector.shape_cast %132 : vector<2x72xf32> to vector<2x72x1xf32>
      %134 = vector.broadcast %133 : vector<2x72x1xf32> to vector<2x72x72xf32>
      %135 = arith.subf %131, %134 : vector<2x72x72xf32>
      %136 = math.exp %135 : vector<2x72x72xf32>
      %cst_51 = arith.constant dense<0.000000e+00> : vector<2x72xf32>
      %137 = vector.multi_reduction <add>, %136, %cst_51 [2] : vector<2x72x72xf32> to vector<2x72xf32>
      %138 = vector.shape_cast %137 : vector<2x72xf32> to vector<2x72x1xf32>
      %139 = tpu.reciprocal %138 {approx = true} : vector<2x72x1xf32> -> vector<2x72x1xf32>
      %140 = vector.broadcast %139 : vector<2x72x1xf32> to vector<2x72x72xf32>
      %141 = arith.mulf %136, %140 : vector<2x72x72xf32>
      %142 = arith.truncf %141 : vector<2x72x72xf32> to vector<2x72x72xbf16>
      "tpu.trace_start"() <{level = 10 : i32, message = "bqk,bkd->bqd"}> : () -> ()
      %cst_52 = arith.constant dense<0.000000e+00> : vector<2x72x32xf32>
      %143 = tpu.matmul %142, %128, %cst_52 {dimension_numbers = #tpu.dot_dimension_numbers<[2], [1], [1], [2], [0, 0, 0, 1, 1, 2], [0], [0]>} : vector<2x72x72xbf16>, vector<2x72x32xbf16>, vector<2x72x32xf32> -> vector<2x72x32xf32>
      "tpu.trace_stop"() : () -> ()
      %144 = tpu.concatenate %122, %143 in 2 : vector<2x72x32xf32>, vector<2x72x32xf32> -> vector<2x72x64xf32>
      %145 = vector.extract_strided_slice %144 {offsets = [0, 0, 0], sizes = [2, 64, 64], strides = [1, 1, 1]} : vector<2x72x64xf32> to vector<2x64x64xf32>
      %146 = vector.shape_cast %145 : vector<2x64x64xf32> to vector<128x64xf32>
      %147 = arith.truncf %146 : vector<128x64xf32> to vector<128x64xbf16>
      %148 = vector.extract_strided_slice %144 {offsets = [0, 64, 0], sizes = [2, 8, 64], strides = [1, 1, 1]} : vector<2x72x64xf32> to vector<2x8x64xf32>
      %149 = vector.shape_cast %148 : vector<2x8x64xf32> to vector<16x64xf32>
      %150 = arith.truncf %149 : vector<16x64xf32> to vector<16x64xbf16>
      %c0_53 = arith.constant 0 : index
      %c0_54 = arith.constant 0 : index
      %c0_55 = arith.constant 0 : index
      %151 = vector.load %arg14[%c0_53, %c0_54, %c0_55] : memref<2x64x64xbf16, #tpu.memory_space<vmem>>, vector<1x64x64xbf16>
      %152 = vector.shape_cast %151 : vector<1x64x64xbf16> to vector<64x64xbf16>
      %c0_56 = arith.constant 0 : index
      %c0_57 = arith.constant 0 : index
      %c0_58 = arith.constant 0 : index
      %153 = vector.load %arg15[%c0_56, %c0_57, %c0_58] : memref<2x1x64xf32, #tpu.memory_space<vmem>>, vector<1x1x64xf32>
      %154 = vector.shape_cast %153 : vector<1x1x64xf32> to vector<1x64xf32>
      %cst_59 = arith.constant dense<0.000000e+00> : vector<128x64xf32>
      %155 = tpu.matmul %147, %152, %cst_59 {dimension_numbers = #tpu.dot_dimension_numbers<[1], [0], [0], [1], [0, 0, 1, 1], [], []>} : vector<128x64xbf16>, vector<64x64xbf16>, vector<128x64xf32> -> vector<128x64xf32>
      %156 = vector.broadcast %154 : vector<1x64xf32> to vector<128x64xf32>
      %157 = arith.addf %155, %156 : vector<128x64xf32>
      %c0_60 = arith.constant 0 : index
      %c0_61 = arith.constant 0 : index
      %c0_62 = arith.constant 0 : index
      %158 = vector.load %arg16[%c0_60, %c0_61, %c0_62] : memref<2x64x64xbf16, #tpu.memory_space<vmem>>, vector<1x64x64xbf16>
      %159 = vector.shape_cast %158 : vector<1x64x64xbf16> to vector<64x64xbf16>
      %c0_63 = arith.constant 0 : index
      %c0_64 = arith.constant 0 : index
      %c0_65 = arith.constant 0 : index
      %160 = vector.load %arg17[%c0_63, %c0_64, %c0_65] : memref<2x1x64xf32, #tpu.memory_space<vmem>>, vector<1x1x64xf32>
      %161 = vector.shape_cast %160 : vector<1x1x64xf32> to vector<1x64xf32>
      %cst_66 = arith.constant dense<0.000000e+00> : vector<16x64xf32>
      %162 = tpu.matmul %150, %159, %cst_66 {dimension_numbers = #tpu.dot_dimension_numbers<[1], [0], [0], [1], [0, 0, 1, 1], [], []>} : vector<16x64xbf16>, vector<64x64xbf16>, vector<16x64xf32> -> vector<16x64xf32>
      %163 = vector.broadcast %161 : vector<1x64xf32> to vector<16x64xf32>
      %164 = arith.addf %162, %163 : vector<16x64xf32>
      %165 = vector.broadcast %27 : vector<1x64xf32> to vector<128x64xf32>
      %166 = arith.mulf %165, %157 : vector<128x64xf32>
      %167 = arith.truncf %166 : vector<128x64xf32> to vector<128x64xbf16>
      %168 = arith.addf %14, %167 : vector<128x64xbf16>
      %169 = vector.broadcast %33 : vector<1x64xf32> to vector<16x64xf32>
      %170 = arith.mulf %169, %164 : vector<16x64xf32>
      %171 = arith.truncf %170 : vector<16x64xf32> to vector<16x64xbf16>
      %172 = arith.addf %0, %171 : vector<16x64xbf16>
      %173 = arith.extf %168 : vector<128x64xbf16> to vector<128x64xf32>
      %cst_67 = arith.constant dense<0.000000e+00> : vector<128xf32>
      %174 = vector.multi_reduction <add>, %173, %cst_67 [1] : vector<128x64xf32> to vector<128xf32>
      %175 = vector.shape_cast %174 : vector<128xf32> to vector<128x1xf32>
      %cst_68 = arith.constant 6.400000e+01 : f32
      %176 = vector.broadcast %cst_68 : f32 to vector<128x1xf32>
      %177 = arith.divf %175, %176 : vector<128x1xf32>
      %178 = vector.broadcast %177 : vector<128x1xf32> to vector<128x64xf32>
      %179 = arith.subf %173, %178 : vector<128x64xf32>
      %180 = arith.mulf %179, %179 : vector<128x64xf32>
      %cst_69 = arith.constant dense<0.000000e+00> : vector<128xf32>
      %181 = vector.multi_reduction <add>, %180, %cst_69 [1] : vector<128x64xf32> to vector<128xf32>
      %182 = vector.shape_cast %181 : vector<128xf32> to vector<128x1xf32>
      %cst_70 = arith.constant 6.400000e+01 : f32
      %183 = vector.broadcast %cst_70 : f32 to vector<128x1xf32>
      %184 = arith.divf %182, %183 : vector<128x1xf32>
      %cst_71 = arith.constant 9.99999997E-7 : f32
      %185 = vector.broadcast %cst_71 : f32 to vector<128x1xf32>
      %186 = arith.addf %184, %185 : vector<128x1xf32>
      %187 = math.rsqrt %186 : vector<128x1xf32>
      %188 = vector.broadcast %187 : vector<128x1xf32> to vector<128x64xf32>
      %189 = arith.mulf %179, %188 : vector<128x64xf32>
      %cst_72 = arith.constant 1.000000e+00 : f32
      %190 = vector.broadcast %cst_72 : f32 to vector<1x64xf32>
      %191 = arith.addf %190, %29 : vector<1x64xf32>
      %192 = vector.broadcast %191 : vector<1x64xf32> to vector<128x64xf32>
      %193 = arith.mulf %189, %192 : vector<128x64xf32>
      %194 = vector.broadcast %28 : vector<1x64xf32> to vector<128x64xf32>
      %195 = arith.addf %193, %194 : vector<128x64xf32>
      %196 = arith.truncf %195 : vector<128x64xf32> to vector<128x64xbf16>
      %c0_73 = arith.constant 0 : index
      %c0_74 = arith.constant 0 : index
      %c0_75 = arith.constant 0 : index
      %197 = vector.load %arg18[%c0_73, %c0_74, %c0_75] : memref<2x64x256xbf16, #tpu.memory_space<vmem>>, vector<1x64x256xbf16>
      %198 = vector.shape_cast %197 : vector<1x64x256xbf16> to vector<64x256xbf16>
      %c0_76 = arith.constant 0 : index
      %c0_77 = arith.constant 0 : index
      %c0_78 = arith.constant 0 : index
      %199 = vector.load %arg19[%c0_76, %c0_77, %c0_78] : memref<2x1x256xf32, #tpu.memory_space<vmem>>, vector<1x1x256xf32>
      %200 = vector.shape_cast %199 : vector<1x1x256xf32> to vector<1x256xf32>
      %cst_79 = arith.constant dense<0.000000e+00> : vector<128x256xf32>
      %201 = tpu.matmul %196, %198, %cst_79 {dimension_numbers = #tpu.dot_dimension_numbers<[1], [0], [0], [1], [0, 0, 1, 1], [], []>} : vector<128x64xbf16>, vector<64x256xbf16>, vector<128x256xf32> -> vector<128x256xf32>
      %202 = vector.broadcast %200 : vector<1x256xf32> to vector<128x256xf32>
      %203 = arith.addf %201, %202 : vector<128x256xf32>
      %204 = arith.mulf %203, %203 : vector<128x256xf32>
      %205 = arith.mulf %203, %204 : vector<128x256xf32>
      %cst_80 = arith.constant 4.471500e-02 : f32
      %206 = vector.broadcast %cst_80 : f32 to vector<128x256xf32>
      %207 = arith.mulf %206, %205 : vector<128x256xf32>
      %208 = arith.addf %203, %207 : vector<128x256xf32>
      %cst_81 = arith.constant 0.797884583 : f32
      %209 = vector.broadcast %cst_81 : f32 to vector<128x256xf32>
      %210 = arith.mulf %209, %208 : vector<128x256xf32>
      %211 = math.tanh %210 : vector<128x256xf32>
      %cst_82 = arith.constant 1.000000e+00 : f32
      %212 = vector.broadcast %cst_82 : f32 to vector<128x256xf32>
      %213 = arith.addf %212, %211 : vector<128x256xf32>
      %cst_83 = arith.constant 5.000000e-01 : f32
      %214 = vector.broadcast %cst_83 : f32 to vector<128x256xf32>
      %215 = arith.mulf %214, %213 : vector<128x256xf32>
      %216 = arith.mulf %203, %215 : vector<128x256xf32>
      %217 = arith.truncf %216 : vector<128x256xf32> to vector<128x256xbf16>
      %c0_84 = arith.constant 0 : index
      %c0_85 = arith.constant 0 : index
      %c0_86 = arith.constant 0 : index
      %218 = vector.load %arg20[%c0_84, %c0_85, %c0_86] : memref<2x256x64xbf16, #tpu.memory_space<vmem>>, vector<1x256x64xbf16>
      %219 = vector.shape_cast %218 : vector<1x256x64xbf16> to vector<256x64xbf16>
      %c0_87 = arith.constant 0 : index
      %c0_88 = arith.constant 0 : index
      %c0_89 = arith.constant 0 : index
      %220 = vector.load %arg21[%c0_87, %c0_88, %c0_89] : memref<2x1x64xf32, #tpu.memory_space<vmem>>, vector<1x1x64xf32>
      %221 = vector.shape_cast %220 : vector<1x1x64xf32> to vector<1x64xf32>
      %cst_90 = arith.constant dense<0.000000e+00> : vector<128x64xf32>
      %222 = tpu.matmul %217, %219, %cst_90 {dimension_numbers = #tpu.dot_dimension_numbers<[1], [0], [0], [1], [0, 0, 1, 1], [], []>} : vector<128x256xbf16>, vector<256x64xbf16>, vector<128x64xf32> -> vector<128x64xf32>
      %223 = vector.broadcast %221 : vector<1x64xf32> to vector<128x64xf32>
      %224 = arith.addf %222, %223 : vector<128x64xf32>
      %225 = vector.broadcast %30 : vector<1x64xf32> to vector<128x64xf32>
      %226 = arith.mulf %225, %224 : vector<128x64xf32>
      %227 = arith.truncf %226 : vector<128x64xf32> to vector<128x64xbf16>
      %228 = arith.addf %168, %227 : vector<128x64xbf16>
      %229 = arith.extf %172 : vector<16x64xbf16> to vector<16x64xf32>
      %cst_91 = arith.constant dense<0.000000e+00> : vector<16xf32>
      %230 = vector.multi_reduction <add>, %229, %cst_91 [1] : vector<16x64xf32> to vector<16xf32>
      %231 = vector.shape_cast %230 : vector<16xf32> to vector<16x1xf32>
      %cst_92 = arith.constant 6.400000e+01 : f32
      %232 = vector.broadcast %cst_92 : f32 to vector<16x1xf32>
      %233 = arith.divf %231, %232 : vector<16x1xf32>
      %234 = vector.broadcast %233 : vector<16x1xf32> to vector<16x64xf32>
      %235 = arith.subf %229, %234 : vector<16x64xf32>
      %236 = arith.mulf %235, %235 : vector<16x64xf32>
      %cst_93 = arith.constant dense<0.000000e+00> : vector<16xf32>
      %237 = vector.multi_reduction <add>, %236, %cst_93 [1] : vector<16x64xf32> to vector<16xf32>
      %238 = vector.shape_cast %237 : vector<16xf32> to vector<16x1xf32>
      %cst_94 = arith.constant 6.400000e+01 : f32
      %239 = vector.broadcast %cst_94 : f32 to vector<16x1xf32>
      %240 = arith.divf %238, %239 : vector<16x1xf32>
      %cst_95 = arith.constant 9.99999997E-7 : f32
      %241 = vector.broadcast %cst_95 : f32 to vector<16x1xf32>
      %242 = arith.addf %240, %241 : vector<16x1xf32>
      %243 = math.rsqrt %242 : vector<16x1xf32>
      %244 = vector.broadcast %243 : vector<16x1xf32> to vector<16x64xf32>
      %245 = arith.mulf %235, %244 : vector<16x64xf32>
      %cst_96 = arith.constant 1.000000e+00 : f32
      %246 = vector.broadcast %cst_96 : f32 to vector<1x64xf32>
      %247 = arith.addf %246, %35 : vector<1x64xf32>
      %248 = vector.broadcast %247 : vector<1x64xf32> to vector<16x64xf32>
      %249 = arith.mulf %245, %248 : vector<16x64xf32>
      %250 = vector.broadcast %34 : vector<1x64xf32> to vector<16x64xf32>
      %251 = arith.addf %249, %250 : vector<16x64xf32>
      %252 = arith.truncf %251 : vector<16x64xf32> to vector<16x64xbf16>
      %c0_97 = arith.constant 0 : index
      %c0_98 = arith.constant 0 : index
      %c0_99 = arith.constant 0 : index
      %253 = vector.load %arg22[%c0_97, %c0_98, %c0_99] : memref<2x64x256xbf16, #tpu.memory_space<vmem>>, vector<1x64x256xbf16>
      %254 = vector.shape_cast %253 : vector<1x64x256xbf16> to vector<64x256xbf16>
      %c0_100 = arith.constant 0 : index
      %c0_101 = arith.constant 0 : index
      %c0_102 = arith.constant 0 : index
      %255 = vector.load %arg23[%c0_100, %c0_101, %c0_102] : memref<2x1x256xf32, #tpu.memory_space<vmem>>, vector<1x1x256xf32>
      %256 = vector.shape_cast %255 : vector<1x1x256xf32> to vector<1x256xf32>
      %cst_103 = arith.constant dense<0.000000e+00> : vector<16x256xf32>
      %257 = tpu.matmul %252, %254, %cst_103 {dimension_numbers = #tpu.dot_dimension_numbers<[1], [0], [0], [1], [0, 0, 1, 1], [], []>} : vector<16x64xbf16>, vector<64x256xbf16>, vector<16x256xf32> -> vector<16x256xf32>
      %258 = vector.broadcast %256 : vector<1x256xf32> to vector<16x256xf32>
      %259 = arith.addf %257, %258 : vector<16x256xf32>
      %260 = arith.mulf %259, %259 : vector<16x256xf32>
      %261 = arith.mulf %259, %260 : vector<16x256xf32>
      %cst_104 = arith.constant 4.471500e-02 : f32
      %262 = vector.broadcast %cst_104 : f32 to vector<16x256xf32>
      %263 = arith.mulf %262, %261 : vector<16x256xf32>
      %264 = arith.addf %259, %263 : vector<16x256xf32>
      %cst_105 = arith.constant 0.797884583 : f32
      %265 = vector.broadcast %cst_105 : f32 to vector<16x256xf32>
      %266 = arith.mulf %265, %264 : vector<16x256xf32>
      %267 = math.tanh %266 : vector<16x256xf32>
      %cst_106 = arith.constant 1.000000e+00 : f32
      %268 = vector.broadcast %cst_106 : f32 to vector<16x256xf32>
      %269 = arith.addf %268, %267 : vector<16x256xf32>
      %cst_107 = arith.constant 5.000000e-01 : f32
      %270 = vector.broadcast %cst_107 : f32 to vector<16x256xf32>
      %271 = arith.mulf %270, %269 : vector<16x256xf32>
      %272 = arith.mulf %259, %271 : vector<16x256xf32>
      %273 = arith.truncf %272 : vector<16x256xf32> to vector<16x256xbf16>
      %c0_108 = arith.constant 0 : index
      %c0_109 = arith.constant 0 : index
      %c0_110 = arith.constant 0 : index
      %274 = vector.load %arg24[%c0_108, %c0_109, %c0_110] : memref<2x256x64xbf16, #tpu.memory_space<vmem>>, vector<1x256x64xbf16>
      %275 = vector.shape_cast %274 : vector<1x256x64xbf16> to vector<256x64xbf16>
      %c0_111 = arith.constant 0 : index
      %c0_112 = arith.constant 0 : index
      %c0_113 = arith.constant 0 : index
      %276 = vector.load %arg25[%c0_111, %c0_112, %c0_113] : memref<2x1x64xf32, #tpu.memory_space<vmem>>, vector<1x1x64xf32>
      %277 = vector.shape_cast %276 : vector<1x1x64xf32> to vector<1x64xf32>
      %cst_114 = arith.constant dense<0.000000e+00> : vector<16x64xf32>
      %278 = tpu.matmul %273, %275, %cst_114 {dimension_numbers = #tpu.dot_dimension_numbers<[1], [0], [0], [1], [0, 0, 1, 1], [], []>} : vector<16x256xbf16>, vector<256x64xbf16>, vector<16x64xf32> -> vector<16x64xf32>
      %279 = vector.broadcast %277 : vector<1x64xf32> to vector<16x64xf32>
      %280 = arith.addf %278, %279 : vector<16x64xf32>
      %281 = vector.broadcast %36 : vector<1x64xf32> to vector<16x64xf32>
      %282 = arith.mulf %281, %280 : vector<16x64xf32>
      %283 = arith.truncf %282 : vector<16x64xf32> to vector<16x64xbf16>
      %284 = arith.addf %172, %283 : vector<16x64xbf16>
      %c2_i32_115 = arith.constant 2 : i32
      %285 = arith.muli %arg27, %c2_i32_115 : i32
      %c1_i32_116 = arith.constant 1 : i32
      %286 = arith.addi %285, %c1_i32_116 : i32
      %287 = arith.index_cast %286 : i32 to index
      %c0_117 = arith.constant 0 : index
      %c0_118 = arith.constant 0 : index
      %288 = vector.load %arg3[%287, %c0_117, %c0_118] : memref<56x6x64xf32, #tpu.memory_space<vmem>>, vector<1x6x64xf32>
      %289 = vector.shape_cast %288 : vector<1x6x64xf32> to vector<6x64xf32>
      %c2_i32_119 = arith.constant 2 : i32
      %290 = arith.muli %arg27, %c2_i32_119 : i32
      %c1_i32_120 = arith.constant 1 : i32
      %291 = arith.addi %290, %c1_i32_120 : i32
      %292 = arith.index_cast %291 : i32 to index
      %c0_121 = arith.constant 0 : index
      %c0_122 = arith.constant 0 : index
      %293 = vector.load %arg4[%292, %c0_121, %c0_122] : memref<56x6x64xf32, #tpu.memory_space<vmem>>, vector<1x6x64xf32>
      %294 = vector.shape_cast %293 : vector<1x6x64xf32> to vector<6x64xf32>
      %295 = vector.extract_strided_slice %289 {offsets = [0, 0], sizes = [1, 64], strides = [1, 1]} : vector<6x64xf32> to vector<1x64xf32>
      %296 = vector.extract_strided_slice %289 {offsets = [1, 0], sizes = [1, 64], strides = [1, 1]} : vector<6x64xf32> to vector<1x64xf32>
      %297 = vector.extract_strided_slice %289 {offsets = [2, 0], sizes = [1, 64], strides = [1, 1]} : vector<6x64xf32> to vector<1x64xf32>
      %298 = vector.extract_strided_slice %289 {offsets = [3, 0], sizes = [1, 64], strides = [1, 1]} : vector<6x64xf32> to vector<1x64xf32>
      %299 = vector.extract_strided_slice %289 {offsets = [4, 0], sizes = [1, 64], strides = [1, 1]} : vector<6x64xf32> to vector<1x64xf32>
      %300 = vector.extract_strided_slice %289 {offsets = [5, 0], sizes = [1, 64], strides = [1, 1]} : vector<6x64xf32> to vector<1x64xf32>
      %301 = vector.extract_strided_slice %294 {offsets = [0, 0], sizes = [1, 64], strides = [1, 1]} : vector<6x64xf32> to vector<1x64xf32>
      %302 = vector.extract_strided_slice %294 {offsets = [1, 0], sizes = [1, 64], strides = [1, 1]} : vector<6x64xf32> to vector<1x64xf32>
      %303 = arith.extf %228 : vector<128x64xbf16> to vector<128x64xf32>
      %cst_123 = arith.constant dense<0.000000e+00> : vector<128xf32>
      %304 = vector.multi_reduction <add>, %303, %cst_123 [1] : vector<128x64xf32> to vector<128xf32>
      %305 = vector.shape_cast %304 : vector<128xf32> to vector<128x1xf32>
      %cst_124 = arith.constant 6.400000e+01 : f32
      %306 = vector.broadcast %cst_124 : f32 to vector<128x1xf32>
      %307 = arith.divf %305, %306 : vector<128x1xf32>
      %308 = vector.broadcast %307 : vector<128x1xf32> to vector<128x64xf32>
      %309 = arith.subf %303, %308 : vector<128x64xf32>
      %310 = arith.mulf %309, %309 : vector<128x64xf32>
      %cst_125 = arith.constant dense<0.000000e+00> : vector<128xf32>
      %311 = vector.multi_reduction <add>, %310, %cst_125 [1] : vector<128x64xf32> to vector<128xf32>
      %312 = vector.shape_cast %311 : vector<128xf32> to vector<128x1xf32>
      %cst_126 = arith.constant 6.400000e+01 : f32
      %313 = vector.broadcast %cst_126 : f32 to vector<128x1xf32>
      %314 = arith.divf %312, %313 : vector<128x1xf32>
      %cst_127 = arith.constant 9.99999997E-7 : f32
      %315 = vector.broadcast %cst_127 : f32 to vector<128x1xf32>
      %316 = arith.addf %314, %315 : vector<128x1xf32>
      %317 = math.rsqrt %316 : vector<128x1xf32>
      %318 = vector.broadcast %317 : vector<128x1xf32> to vector<128x64xf32>
      %319 = arith.mulf %309, %318 : vector<128x64xf32>
      %cst_128 = arith.constant 1.000000e+00 : f32
      %320 = vector.broadcast %cst_128 : f32 to vector<1x64xf32>
      %321 = arith.addf %320, %296 : vector<1x64xf32>
      %322 = vector.broadcast %321 : vector<1x64xf32> to vector<128x64xf32>
      %323 = arith.mulf %319, %322 : vector<128x64xf32>
      %324 = vector.broadcast %295 : vector<1x64xf32> to vector<128x64xf32>
      %325 = arith.addf %323, %324 : vector<128x64xf32>
      %326 = arith.truncf %325 : vector<128x64xf32> to vector<128x64xbf16>
      %327 = arith.extf %284 : vector<16x64xbf16> to vector<16x64xf32>
      %cst_129 = arith.constant dense<0.000000e+00> : vector<16xf32>
      %328 = vector.multi_reduction <add>, %327, %cst_129 [1] : vector<16x64xf32> to vector<16xf32>
      %329 = vector.shape_cast %328 : vector<16xf32> to vector<16x1xf32>
      %cst_130 = arith.constant 6.400000e+01 : f32
      %330 = vector.broadcast %cst_130 : f32 to vector<16x1xf32>
      %331 = arith.divf %329, %330 : vector<16x1xf32>
      %332 = vector.broadcast %331 : vector<16x1xf32> to vector<16x64xf32>
      %333 = arith.subf %327, %332 : vector<16x64xf32>
      %334 = arith.mulf %333, %333 : vector<16x64xf32>
      %cst_131 = arith.constant dense<0.000000e+00> : vector<16xf32>
      %335 = vector.multi_reduction <add>, %334, %cst_131 [1] : vector<16x64xf32> to vector<16xf32>
      %336 = vector.shape_cast %335 : vector<16xf32> to vector<16x1xf32>
      %cst_132 = arith.constant 6.400000e+01 : f32
      %337 = vector.broadcast %cst_132 : f32 to vector<16x1xf32>
      %338 = arith.divf %336, %337 : vector<16x1xf32>
      %cst_133 = arith.constant 9.99999997E-7 : f32
      %339 = vector.broadcast %cst_133 : f32 to vector<16x1xf32>
      %340 = arith.addf %338, %339 : vector<16x1xf32>
      %341 = math.rsqrt %340 : vector<16x1xf32>
      %342 = vector.broadcast %341 : vector<16x1xf32> to vector<16x64xf32>
      %343 = arith.mulf %333, %342 : vector<16x64xf32>
      %cst_134 = arith.constant 1.000000e+00 : f32
      %344 = vector.broadcast %cst_134 : f32 to vector<1x64xf32>
      %345 = arith.addf %344, %302 : vector<1x64xf32>
      %346 = vector.broadcast %345 : vector<1x64xf32> to vector<16x64xf32>
      %347 = arith.mulf %343, %346 : vector<16x64xf32>
      %348 = vector.broadcast %301 : vector<1x64xf32> to vector<16x64xf32>
      %349 = arith.addf %347, %348 : vector<16x64xf32>
      %350 = arith.truncf %349 : vector<16x64xf32> to vector<16x64xbf16>
      %c1 = arith.constant 1 : index
      %c0_135 = arith.constant 0 : index
      %c0_136 = arith.constant 0 : index
      %351 = vector.load %arg10[%c1, %c0_135, %c0_136] : memref<2x64x192xbf16, #tpu.memory_space<vmem>>, vector<1x64x192xbf16>
      %352 = vector.shape_cast %351 : vector<1x64x192xbf16> to vector<64x192xbf16>
      %c1_137 = arith.constant 1 : index
      %c0_138 = arith.constant 0 : index
      %c0_139 = arith.constant 0 : index
      %353 = vector.load %arg11[%c1_137, %c0_138, %c0_139] : memref<2x1x192xf32, #tpu.memory_space<vmem>>, vector<1x1x192xf32>
      %354 = vector.shape_cast %353 : vector<1x1x192xf32> to vector<1x192xf32>
      %cst_140 = arith.constant dense<0.000000e+00> : vector<128x192xf32>
      %355 = tpu.matmul %326, %352, %cst_140 {dimension_numbers = #tpu.dot_dimension_numbers<[1], [0], [0], [1], [0, 0, 1, 1], [], []>} : vector<128x64xbf16>, vector<64x192xbf16>, vector<128x192xf32> -> vector<128x192xf32>
      %356 = vector.broadcast %354 : vector<1x192xf32> to vector<128x192xf32>
      %357 = arith.addf %355, %356 : vector<128x192xf32>
      %c1_141 = arith.constant 1 : index
      %c0_142 = arith.constant 0 : index
      %c0_143 = arith.constant 0 : index
      %358 = vector.load %arg12[%c1_141, %c0_142, %c0_143] : memref<2x64x192xbf16, #tpu.memory_space<vmem>>, vector<1x64x192xbf16>
      %359 = vector.shape_cast %358 : vector<1x64x192xbf16> to vector<64x192xbf16>
      %c1_144 = arith.constant 1 : index
      %c0_145 = arith.constant 0 : index
      %c0_146 = arith.constant 0 : index
      %360 = vector.load %arg13[%c1_144, %c0_145, %c0_146] : memref<2x1x192xf32, #tpu.memory_space<vmem>>, vector<1x1x192xf32>
      %361 = vector.shape_cast %360 : vector<1x1x192xf32> to vector<1x192xf32>
      %cst_147 = arith.constant dense<0.000000e+00> : vector<16x192xf32>
      %362 = tpu.matmul %350, %359, %cst_147 {dimension_numbers = #tpu.dot_dimension_numbers<[1], [0], [0], [1], [0, 0, 1, 1], [], []>} : vector<16x64xbf16>, vector<64x192xbf16>, vector<16x192xf32> -> vector<16x192xf32>
      %363 = vector.broadcast %361 : vector<1x192xf32> to vector<16x192xf32>
      %364 = arith.addf %362, %363 : vector<16x192xf32>
      %365 = vector.shape_cast %357 : vector<128x192xf32> to vector<2x64x192xf32>
      %366 = vector.shape_cast %364 : vector<16x192xf32> to vector<2x8x192xf32>
      %367 = tpu.concatenate %365, %366 in 1 : vector<2x64x192xf32>, vector<2x8x192xf32> -> vector<2x72x192xf32>
      %368 = vector.extract_strided_slice %367 {offsets = [0, 0, 0], sizes = [2, 72, 32], strides = [1, 1, 1]} : vector<2x72x192xf32> to vector<2x72x32xf32>
      %369 = arith.truncf %368 : vector<2x72x32xf32> to vector<2x72x32xbf16>
      %370 = vector.extract_strided_slice %367 {offsets = [0, 0, 64], sizes = [2, 72, 32], strides = [1, 1, 1]} : vector<2x72x192xf32> to vector<2x72x32xf32>
      %371 = arith.truncf %370 : vector<2x72x32xf32> to vector<2x72x32xbf16>
      %372 = vector.extract_strided_slice %367 {offsets = [0, 0, 128], sizes = [2, 72, 32], strides = [1, 1, 1]} : vector<2x72x192xf32> to vector<2x72x32xf32>
      %373 = arith.truncf %372 : vector<2x72x32xf32> to vector<2x72x32xbf16>
      "tpu.trace_start"() <{level = 10 : i32, message = "bqd,bkd->bqk"}> : () -> ()
      %cst_148 = arith.constant dense<0.000000e+00> : vector<2x72x72xf32>
      %374 = tpu.matmul %369, %371, %cst_148 {dimension_numbers = #tpu.dot_dimension_numbers<[2], [2], [1], [1], [0, 0, 0, 1, 1, 1], [0], [0]>} : vector<2x72x32xbf16>, vector<2x72x32xbf16>, vector<2x72x72xf32> -> vector<2x72x72xf32>
      "tpu.trace_stop"() : () -> ()
      %cst_149 = arith.constant 0.176776692 : f32
      %375 = vector.broadcast %cst_149 : f32 to vector<2x72x72xf32>
      %376 = arith.mulf %374, %375 : vector<2x72x72xf32>
      %cst_150 = arith.constant dense<0xFF800000> : vector<2x72xf32>
      %377 = vector.multi_reduction <maximumf>, %376, %cst_150 [2] : vector<2x72x72xf32> to vector<2x72xf32>
      %378 = vector.shape_cast %377 : vector<2x72xf32> to vector<2x72x1xf32>
      %379 = vector.broadcast %378 : vector<2x72x1xf32> to vector<2x72x72xf32>
      %380 = arith.subf %376, %379 : vector<2x72x72xf32>
      %381 = math.exp %380 : vector<2x72x72xf32>
      %cst_151 = arith.constant dense<0.000000e+00> : vector<2x72xf32>
      %382 = vector.multi_reduction <add>, %381, %cst_151 [2] : vector<2x72x72xf32> to vector<2x72xf32>
      %383 = vector.shape_cast %382 : vector<2x72xf32> to vector<2x72x1xf32>
      %384 = tpu.reciprocal %383 {approx = true} : vector<2x72x1xf32> -> vector<2x72x1xf32>
      %385 = vector.broadcast %384 : vector<2x72x1xf32> to vector<2x72x72xf32>
      %386 = arith.mulf %381, %385 : vector<2x72x72xf32>
      %387 = arith.truncf %386 : vector<2x72x72xf32> to vector<2x72x72xbf16>
      "tpu.trace_start"() <{level = 10 : i32, message = "bqk,bkd->bqd"}> : () -> ()
      %cst_152 = arith.constant dense<0.000000e+00> : vector<2x72x32xf32>
      %388 = tpu.matmul %387, %373, %cst_152 {dimension_numbers = #tpu.dot_dimension_numbers<[2], [1], [1], [2], [0, 0, 0, 1, 1, 2], [0], [0]>} : vector<2x72x72xbf16>, vector<2x72x32xbf16>, vector<2x72x32xf32> -> vector<2x72x32xf32>
      "tpu.trace_stop"() : () -> ()
      %389 = vector.extract_strided_slice %367 {offsets = [0, 0, 32], sizes = [2, 72, 32], strides = [1, 1, 1]} : vector<2x72x192xf32> to vector<2x72x32xf32>
      %390 = arith.truncf %389 : vector<2x72x32xf32> to vector<2x72x32xbf16>
      %391 = vector.extract_strided_slice %367 {offsets = [0, 0, 96], sizes = [2, 72, 32], strides = [1, 1, 1]} : vector<2x72x192xf32> to vector<2x72x32xf32>
      %392 = arith.truncf %391 : vector<2x72x32xf32> to vector<2x72x32xbf16>
      %393 = vector.extract_strided_slice %367 {offsets = [0, 0, 160], sizes = [2, 72, 32], strides = [1, 1, 1]} : vector<2x72x192xf32> to vector<2x72x32xf32>
      %394 = arith.truncf %393 : vector<2x72x32xf32> to vector<2x72x32xbf16>
      "tpu.trace_start"() <{level = 10 : i32, message = "bqd,bkd->bqk"}> : () -> ()
      %cst_153 = arith.constant dense<0.000000e+00> : vector<2x72x72xf32>
      %395 = tpu.matmul %390, %392, %cst_153 {dimension_numbers = #tpu.dot_dimension_numbers<[2], [2], [1], [1], [0, 0, 0, 1, 1, 1], [0], [0]>} : vector<2x72x32xbf16>, vector<2x72x32xbf16>, vector<2x72x72xf32> -> vector<2x72x72xf32>
      "tpu.trace_stop"() : () -> ()
      %cst_154 = arith.constant 0.176776692 : f32
      %396 = vector.broadcast %cst_154 : f32 to vector<2x72x72xf32>
      %397 = arith.mulf %395, %396 : vector<2x72x72xf32>
      %cst_155 = arith.constant dense<0xFF800000> : vector<2x72xf32>
      %398 = vector.multi_reduction <maximumf>, %397, %cst_155 [2] : vector<2x72x72xf32> to vector<2x72xf32>
      %399 = vector.shape_cast %398 : vector<2x72xf32> to vector<2x72x1xf32>
      %400 = vector.broadcast %399 : vector<2x72x1xf32> to vector<2x72x72xf32>
      %401 = arith.subf %397, %400 : vector<2x72x72xf32>
      %402 = math.exp %401 : vector<2x72x72xf32>
      %cst_156 = arith.constant dense<0.000000e+00> : vector<2x72xf32>
      %403 = vector.multi_reduction <add>, %402, %cst_156 [2] : vector<2x72x72xf32> to vector<2x72xf32>
      %404 = vector.shape_cast %403 : vector<2x72xf32> to vector<2x72x1xf32>
      %405 = tpu.reciprocal %404 {approx = true} : vector<2x72x1xf32> -> vector<2x72x1xf32>
      %406 = vector.broadcast %405 : vector<2x72x1xf32> to vector<2x72x72xf32>
      %407 = arith.mulf %402, %406 : vector<2x72x72xf32>
      %408 = arith.truncf %407 : vector<2x72x72xf32> to vector<2x72x72xbf16>
      "tpu.trace_start"() <{level = 10 : i32, message = "bqk,bkd->bqd"}> : () -> ()
      %cst_157 = arith.constant dense<0.000000e+00> : vector<2x72x32xf32>
      %409 = tpu.matmul %408, %394, %cst_157 {dimension_numbers = #tpu.dot_dimension_numbers<[2], [1], [1], [2], [0, 0, 0, 1, 1, 2], [0], [0]>} : vector<2x72x72xbf16>, vector<2x72x32xbf16>, vector<2x72x32xf32> -> vector<2x72x32xf32>
      "tpu.trace_stop"() : () -> ()
      %410 = tpu.concatenate %388, %409 in 2 : vector<2x72x32xf32>, vector<2x72x32xf32> -> vector<2x72x64xf32>
      %411 = vector.extract_strided_slice %410 {offsets = [0, 0, 0], sizes = [2, 64, 64], strides = [1, 1, 1]} : vector<2x72x64xf32> to vector<2x64x64xf32>
      %412 = vector.shape_cast %411 : vector<2x64x64xf32> to vector<128x64xf32>
      %413 = arith.truncf %412 : vector<128x64xf32> to vector<128x64xbf16>
      %c1_158 = arith.constant 1 : index
      %c0_159 = arith.constant 0 : index
      %c0_160 = arith.constant 0 : index
      %414 = vector.load %arg14[%c1_158, %c0_159, %c0_160] : memref<2x64x64xbf16, #tpu.memory_space<vmem>>, vector<1x64x64xbf16>
      %415 = vector.shape_cast %414 : vector<1x64x64xbf16> to vector<64x64xbf16>
      %c1_161 = arith.constant 1 : index
      %c0_162 = arith.constant 0 : index
      %c0_163 = arith.constant 0 : index
      %416 = vector.load %arg15[%c1_161, %c0_162, %c0_163] : memref<2x1x64xf32, #tpu.memory_space<vmem>>, vector<1x1x64xf32>
      %417 = vector.shape_cast %416 : vector<1x1x64xf32> to vector<1x64xf32>
      %cst_164 = arith.constant dense<0.000000e+00> : vector<128x64xf32>
      %418 = tpu.matmul %413, %415, %cst_164 {dimension_numbers = #tpu.dot_dimension_numbers<[1], [0], [0], [1], [0, 0, 1, 1], [], []>} : vector<128x64xbf16>, vector<64x64xbf16>, vector<128x64xf32> -> vector<128x64xf32>
      %419 = vector.broadcast %417 : vector<1x64xf32> to vector<128x64xf32>
      %420 = arith.addf %418, %419 : vector<128x64xf32>
      %421 = vector.broadcast %297 : vector<1x64xf32> to vector<128x64xf32>
      %422 = arith.mulf %421, %420 : vector<128x64xf32>
      %423 = arith.truncf %422 : vector<128x64xf32> to vector<128x64xbf16>
      %424 = arith.addf %228, %423 : vector<128x64xbf16>
      %425 = arith.extf %424 : vector<128x64xbf16> to vector<128x64xf32>
      %cst_165 = arith.constant dense<0.000000e+00> : vector<128xf32>
      %426 = vector.multi_reduction <add>, %425, %cst_165 [1] : vector<128x64xf32> to vector<128xf32>
      %427 = vector.shape_cast %426 : vector<128xf32> to vector<128x1xf32>
      %cst_166 = arith.constant 6.400000e+01 : f32
      %428 = vector.broadcast %cst_166 : f32 to vector<128x1xf32>
      %429 = arith.divf %427, %428 : vector<128x1xf32>
      %430 = vector.broadcast %429 : vector<128x1xf32> to vector<128x64xf32>
      %431 = arith.subf %425, %430 : vector<128x64xf32>
      %432 = arith.mulf %431, %431 : vector<128x64xf32>
      %cst_167 = arith.constant dense<0.000000e+00> : vector<128xf32>
      %433 = vector.multi_reduction <add>, %432, %cst_167 [1] : vector<128x64xf32> to vector<128xf32>
      %434 = vector.shape_cast %433 : vector<128xf32> to vector<128x1xf32>
      %cst_168 = arith.constant 6.400000e+01 : f32
      %435 = vector.broadcast %cst_168 : f32 to vector<128x1xf32>
      %436 = arith.divf %434, %435 : vector<128x1xf32>
      %cst_169 = arith.constant 9.99999997E-7 : f32
      %437 = vector.broadcast %cst_169 : f32 to vector<128x1xf32>
      %438 = arith.addf %436, %437 : vector<128x1xf32>
      %439 = math.rsqrt %438 : vector<128x1xf32>
      %440 = vector.broadcast %439 : vector<128x1xf32> to vector<128x64xf32>
      %441 = arith.mulf %431, %440 : vector<128x64xf32>
      %cst_170 = arith.constant 1.000000e+00 : f32
      %442 = vector.broadcast %cst_170 : f32 to vector<1x64xf32>
      %443 = arith.addf %442, %299 : vector<1x64xf32>
      %444 = vector.broadcast %443 : vector<1x64xf32> to vector<128x64xf32>
      %445 = arith.mulf %441, %444 : vector<128x64xf32>
      %446 = vector.broadcast %298 : vector<1x64xf32> to vector<128x64xf32>
      %447 = arith.addf %445, %446 : vector<128x64xf32>
      %448 = arith.truncf %447 : vector<128x64xf32> to vector<128x64xbf16>
      %c1_171 = arith.constant 1 : index
      %c0_172 = arith.constant 0 : index
      %c0_173 = arith.constant 0 : index
      %449 = vector.load %arg18[%c1_171, %c0_172, %c0_173] : memref<2x64x256xbf16, #tpu.memory_space<vmem>>, vector<1x64x256xbf16>
      %450 = vector.shape_cast %449 : vector<1x64x256xbf16> to vector<64x256xbf16>
      %c1_174 = arith.constant 1 : index
      %c0_175 = arith.constant 0 : index
      %c0_176 = arith.constant 0 : index
      %451 = vector.load %arg19[%c1_174, %c0_175, %c0_176] : memref<2x1x256xf32, #tpu.memory_space<vmem>>, vector<1x1x256xf32>
      %452 = vector.shape_cast %451 : vector<1x1x256xf32> to vector<1x256xf32>
      %cst_177 = arith.constant dense<0.000000e+00> : vector<128x256xf32>
      %453 = tpu.matmul %448, %450, %cst_177 {dimension_numbers = #tpu.dot_dimension_numbers<[1], [0], [0], [1], [0, 0, 1, 1], [], []>} : vector<128x64xbf16>, vector<64x256xbf16>, vector<128x256xf32> -> vector<128x256xf32>
      %454 = vector.broadcast %452 : vector<1x256xf32> to vector<128x256xf32>
      %455 = arith.addf %453, %454 : vector<128x256xf32>
      %456 = arith.mulf %455, %455 : vector<128x256xf32>
      %457 = arith.mulf %455, %456 : vector<128x256xf32>
      %cst_178 = arith.constant 4.471500e-02 : f32
      %458 = vector.broadcast %cst_178 : f32 to vector<128x256xf32>
      %459 = arith.mulf %458, %457 : vector<128x256xf32>
      %460 = arith.addf %455, %459 : vector<128x256xf32>
      %cst_179 = arith.constant 0.797884583 : f32
      %461 = vector.broadcast %cst_179 : f32 to vector<128x256xf32>
      %462 = arith.mulf %461, %460 : vector<128x256xf32>
      %463 = math.tanh %462 : vector<128x256xf32>
      %cst_180 = arith.constant 1.000000e+00 : f32
      %464 = vector.broadcast %cst_180 : f32 to vector<128x256xf32>
      %465 = arith.addf %464, %463 : vector<128x256xf32>
      %cst_181 = arith.constant 5.000000e-01 : f32
      %466 = vector.broadcast %cst_181 : f32 to vector<128x256xf32>
      %467 = arith.mulf %466, %465 : vector<128x256xf32>
      %468 = arith.mulf %455, %467 : vector<128x256xf32>
      %469 = arith.truncf %468 : vector<128x256xf32> to vector<128x256xbf16>
      %c1_182 = arith.constant 1 : index
      %c0_183 = arith.constant 0 : index
      %c0_184 = arith.constant 0 : index
      %470 = vector.load %arg20[%c1_182, %c0_183, %c0_184] : memref<2x256x64xbf16, #tpu.memory_space<vmem>>, vector<1x256x64xbf16>
      %471 = vector.shape_cast %470 : vector<1x256x64xbf16> to vector<256x64xbf16>
      %c1_185 = arith.constant 1 : index
      %c0_186 = arith.constant 0 : index
      %c0_187 = arith.constant 0 : index
      %472 = vector.load %arg21[%c1_185, %c0_186, %c0_187] : memref<2x1x64xf32, #tpu.memory_space<vmem>>, vector<1x1x64xf32>
      %473 = vector.shape_cast %472 : vector<1x1x64xf32> to vector<1x64xf32>
      %cst_188 = arith.constant dense<0.000000e+00> : vector<128x64xf32>
      %474 = tpu.matmul %469, %471, %cst_188 {dimension_numbers = #tpu.dot_dimension_numbers<[1], [0], [0], [1], [0, 0, 1, 1], [], []>} : vector<128x256xbf16>, vector<256x64xbf16>, vector<128x64xf32> -> vector<128x64xf32>
      %475 = vector.broadcast %473 : vector<1x64xf32> to vector<128x64xf32>
      %476 = arith.addf %474, %475 : vector<128x64xf32>
      %477 = vector.broadcast %300 : vector<1x64xf32> to vector<128x64xf32>
      %478 = arith.mulf %477, %476 : vector<128x64xf32>
      %479 = arith.truncf %478 : vector<128x64xf32> to vector<128x64xbf16>
      %480 = arith.addf %424, %479 : vector<128x64xbf16>
      %481 = arith.index_cast %arg27 : i32 to index
      %c0_189 = arith.constant 0 : index
      %c0_190 = arith.constant 0 : index
      %482 = vector.load %arg5[%481, %c0_189, %c0_190] : memref<28x2x64xf32, #tpu.memory_space<vmem>>, vector<1x2x64xf32>
      %483 = vector.shape_cast %482 : vector<1x2x64xf32> to vector<2x64xf32>
      %484 = vector.extract_strided_slice %483 {offsets = [0, 0], sizes = [1, 64], strides = [1, 1]} : vector<2x64xf32> to vector<1x64xf32>
      %485 = vector.extract_strided_slice %483 {offsets = [1, 0], sizes = [1, 64], strides = [1, 1]} : vector<2x64xf32> to vector<1x64xf32>
      %486 = arith.extf %480 : vector<128x64xbf16> to vector<128x64xf32>
      %cst_191 = arith.constant dense<0.000000e+00> : vector<128xf32>
      %487 = vector.multi_reduction <add>, %486, %cst_191 [1] : vector<128x64xf32> to vector<128xf32>
      %488 = vector.shape_cast %487 : vector<128xf32> to vector<128x1xf32>
      %cst_192 = arith.constant 6.400000e+01 : f32
      %489 = vector.broadcast %cst_192 : f32 to vector<128x1xf32>
      %490 = arith.divf %488, %489 : vector<128x1xf32>
      %491 = vector.broadcast %490 : vector<128x1xf32> to vector<128x64xf32>
      %492 = arith.subf %486, %491 : vector<128x64xf32>
      %493 = arith.mulf %492, %492 : vector<128x64xf32>
      %cst_193 = arith.constant dense<0.000000e+00> : vector<128xf32>
      %494 = vector.multi_reduction <add>, %493, %cst_193 [1] : vector<128x64xf32> to vector<128xf32>
      %495 = vector.shape_cast %494 : vector<128xf32> to vector<128x1xf32>
      %cst_194 = arith.constant 6.400000e+01 : f32
      %496 = vector.broadcast %cst_194 : f32 to vector<128x1xf32>
      %497 = arith.divf %495, %496 : vector<128x1xf32>
      %cst_195 = arith.constant 9.99999997E-7 : f32
      %498 = vector.broadcast %cst_195 : f32 to vector<128x1xf32>
      %499 = arith.addf %497, %498 : vector<128x1xf32>
      %500 = math.rsqrt %499 : vector<128x1xf32>
      %501 = vector.broadcast %500 : vector<128x1xf32> to vector<128x64xf32>
      %502 = arith.mulf %492, %501 : vector<128x64xf32>
      %cst_196 = arith.constant 1.000000e+00 : f32
      %503 = vector.broadcast %cst_196 : f32 to vector<1x64xf32>
      %504 = arith.addf %503, %485 : vector<1x64xf32>
      %505 = vector.broadcast %504 : vector<1x64xf32> to vector<128x64xf32>
      %506 = arith.mulf %502, %505 : vector<128x64xf32>
      %507 = vector.broadcast %484 : vector<1x64xf32> to vector<128x64xf32>
      %508 = arith.addf %506, %507 : vector<128x64xf32>
      %509 = arith.truncf %508 : vector<128x64xf32> to vector<128x64xbf16>
      %c0_197 = arith.constant 0 : index
      %c0_198 = arith.constant 0 : index
      %510 = vector.load %arg8[%c0_197, %c0_198] : memref<64x16xbf16, #tpu.memory_space<vmem>>, vector<64x16xbf16>
      %c0_199 = arith.constant 0 : index
      %c0_200 = arith.constant 0 : index
      %511 = vector.load %arg9[%c0_199, %c0_200] : memref<1x16xf32, #tpu.memory_space<vmem>>, vector<1x16xf32>
      %cst_201 = arith.constant dense<0.000000e+00> : vector<128x16xf32>
      %512 = tpu.matmul %509, %510, %cst_201 {dimension_numbers = #tpu.dot_dimension_numbers<[1], [0], [0], [1], [0, 0, 1, 1], [], []>} : vector<128x64xbf16>, vector<64x16xbf16>, vector<128x16xf32> -> vector<128x16xf32>
      %513 = vector.broadcast %511 : vector<1x16xf32> to vector<128x16xf32>
      %514 = arith.addf %512, %513 : vector<128x16xf32>
      %515 = vector.extract_strided_slice %514 {offsets = [0, 0], sizes = [64, 16], strides = [1, 1]} : vector<128x16xf32> to vector<64x16xf32>
      %516 = vector.extract_strided_slice %514 {offsets = [64, 0], sizes = [64, 16], strides = [1, 1]} : vector<128x16xf32> to vector<64x16xf32>
      %517 = arith.subf %515, %516 : vector<64x16xf32>
      %cst_202 = arith.constant 7.000000e+00 : f32
      %518 = vector.broadcast %cst_202 : f32 to vector<64x16xf32>
      %519 = arith.mulf %518, %517 : vector<64x16xf32>
      %520 = arith.addf %516, %519 : vector<64x16xf32>
      %521 = vector.broadcast %6 : f32 to vector<64x16xf32>
      %522 = arith.mulf %521, %520 : vector<64x16xf32>
      %523 = arith.addf %arg28, %522 : vector<64x16xf32>
      scf.yield %523 : vector<64x16xf32>
    }
    %c28_i32_3 = arith.constant 28 : i32
    %c0_4 = arith.constant 0 : index
    %c0_5 = arith.constant 0 : index
    %4 = vector.load %arg26[%c0_4, %c0_5] : memref<64x16xf32, #tpu.memory_space<vmem>>, vector<64x16xf32>
    tpu.vector_store %arg26[%c0_4, %c0_5], %3 {strides = array<i32>} : memref<64x16xf32, #tpu.memory_space<vmem>>, vector<64x16xf32>,
    return
  }
}

</mosaic_0001>

<bundles_post_ra>
// kernel: sample.1
= control target key start
LH: loop header
LB: loop body
LE: loop exit
PB: predicated region body
PF: predicated region fallthrough
CT: control target
= control target key end

     0   :  { %s14410_s0 = inlined_call_operand.vmem [shape: f32[28], index: 0, kind: input, shape index: {}]   ;;  %s14411_s1 = inlined_call_operand.vmem [shape: f32[64,16], index: 1, kind: input, shape index: {}]   ;;  %s14412_s2 = inlined_call_operand.vmem [shape: bf16[16,64], index: 2, kind: input, shape index: {}]   ;;  %s14413_s3 = inlined_call_operand.vmem [shape: f32[56,6,64], index: 3, kind: input, shape index: {}]   ;;  %s14414_s4 = inlined_call_operand.vmem [shape: f32[56,6,64], index: 4, kind: input, shape index: {}]   ;;  %s14415_s5 = inlined_call_operand.vmem [shape: f32[28,2,64], index: 5, kind: input, shape index: {}]   ;;  %s14416_s6 = inlined_call_operand.vmem [shape: bf16[16,64], index: 6, kind: input, shape index: {}]   ;;  %s14417_s7 = inlined_call_operand.vmem [shape: f32[1,64], index: 7, kind: input, shape index: {}]   ;;  %s14418_s8 = inlined_call_operand.vmem [shape: bf16[64,16], index: 8, kind: input, shape index: {}]   ;;  %s14419_s9 = inlined_call_operand.vmem [shape: f32[1,16], index: 9, kind: input, shape index: {}]   ;;  %s14420_s10 = inlined_call_operand.vmem [shape: bf16[2,64,192], index: 10, kind: input, shape index: {}]   ;;  %s14421_s11 = inlined_call_operand.vmem [shape: f32[2,1,192], index: 11, kind: input, shape index: {}]   ;;  %s14422_s12 = inlined_call_operand.vmem [shape: bf16[2,64,192], index: 12, kind: input, shape index: {}]   ;;  %s14423_s13 = inlined_call_operand.vmem [shape: f32[2,1,192], index: 13, kind: input, shape index: {}]   ;;  %s14424_s14 = inlined_call_operand.vmem [shape: bf16[2,64,64], index: 14, kind: input, shape index: {}]   ;;  %s14425_s15 = inlined_call_operand.vmem [shape: f32[2,1,64], index: 15, kind: input, shape index: {}]   ;;  %s14426_s16 = inlined_call_operand.vmem [shape: bf16[2,64,64], index: 16, kind: input, shape index: {}]   ;;  %s14427_s17 = inlined_call_operand.vmem [shape: f32[2,1,64], index: 17, kind: input, shape index: {}]   ;;  %s14428_s18 = inlined_call_operand.vmem [shape: bf16[2,64,256], index: 18, kind: input, shape index: {}]   ;;  %s14429_s19 = inlined_call_operand.vmem [shape: f32[2,1,256], index: 19, kind: input, shape index: {}]   ;;  %s14430_s20 = inlined_call_operand.vmem [shape: bf16[2,256,64], index: 20, kind: input, shape index: {}]   ;;  %s14431_s21 = inlined_call_operand.vmem [shape: f32[2,1,64], index: 21, kind: input, shape index: {}]   ;;  %s14432_s22 = inlined_call_operand.vmem [shape: bf16[2,64,256], index: 22, kind: input, shape index: {}]   ;;  %s14433_s23 = inlined_call_operand.vmem [shape: f32[2,1,256], index: 23, kind: input, shape index: {}]   ;;  %s14434_s24 = inlined_call_operand.vmem [shape: bf16[2,256,64], index: 24, kind: input, shape index: {}]   ;;  %s14435_s25 = inlined_call_operand.vmem [shape: f32[2,1,64], index: 25, kind: input, shape index: {}]   ;;  %s14436_s26 = inlined_call_operand.vmem [shape: f32[64,16], index: 26, kind: output, shape index: {}]  }
   0x1   :  { %14470 = sst [smem:[#allocation21_spill]] %s14410_s0 }
   0x2   :  { %14471 = sst [smem:[#allocation22_spill]] %s14411_s1 }
   0x3   :  { %14472 = sst [smem:[#allocation23_spill]] %s14412_s2 }
   0x4   :  { %14473 = sst [smem:[#allocation24_spill]] %s14413_s3 }
   0x5   :  { %14474 = sst [smem:[#allocation25_spill]] %s14414_s4 }
   0x6   :  { %14475 = sst [smem:[#allocation26_spill]] %s14415_s5 }
   0x7   :  { %14476 = sst [smem:[#allocation27_spill]] %s14416_s6 }
   0x8   :  { %14477 = sst [smem:[#allocation28_spill]] %s14417_s7 }
   0x9   :  { %14478 = sst [smem:[#allocation29_spill]] %s14418_s8 }
   0xa   :  { %14479 = sst [smem:[#allocation30_spill]] %s14419_s9 }
   0xb   :  { %14480 = sst [smem:[#allocation31_spill]] %s14420_s10 }
   0xc   :  { %31 = vsyncpa [#allocation3], 0  ;;  %s14481_s7 = sld [smem:[#allocation21_spill]] }
  0x12   :  { %s38_s28 = sshll.u32 %s14481_s7, 4  ;;  %s39_s28 = int_to_ptr.vmem [resolvable:$true] %s38_s28 }
  0x13   :  { %s9894_s8 = scalar_lea.vmem %s39_s28, 16  ;;  %p9899_p1 = scmp.lt.s32.totalorder %s39_s28, %s39_s28 }
  0x14   :  { %p9895_p0 = scmp.ne.s32.totalorder %s39_s28, %s9894_s8  ;;  %p9900_p2 = scmp.lt.s32.totalorder %s9894_s8, %s9894_s8 }
  0x16   :  { %p9901_p3 = por %p9900_p2, %p9899_p1 }
  0x18   :  { %p9902_p4 = pnand %p9901_p3, %p9895_p0 }
  0x1a   :  { %9905 = shalt.err (!%p9902_p4)
}
  0x1b   :  { %s9980_s4 = smov [#allocation2]  }
  0x1c   :  { %41 = dma.vmem_to_smem %s39_s28, 16, %s9980_s4, [#allocation3]  }
  0x1d   :  { %9942 = dma.done.wait [#allocation3], 16  }
  0x1e   :  { %9943 = vsyncadd [#allocation3], 4294967280 }
  0x1f   :  { %95 = sfence }
  0x20   :  { %s14482_s9 = sld [smem:[#allocation23_spill]]  ;;  %s14485_s6 = sld [smem:[#allocation22_spill]] }
  0x21   :  { %s10175_s1 = smov 0  }
  0x26   :  { %v10128_v0 = vld [vmem:[%s14482_s9] sm:$0xf]  ;;  %v10133_v1 = vld [vmem:[%s14482_s9 + $0x4] sm:$0xf]  ;;  %v100_v3 = vld [vmem:[%s14485_s6 + $0x8] sm:$0xff]  }
  0x27   :  { %14483 = vst [vmem:[#allocation5_spill] sm:$0xff] %v10128_v0  ;;  %14484 = vst [vmem:[#allocation6_spill] sm:$0xff] %v10133_v1  ;;  %v99_v2 = vld [vmem:[%s14485_s6] sm:$0xff]   ;;  %v101_v4 = vld [vmem:[%s14485_s6 + $0x10] sm:$0xff]  }
  0x28   :  { %v102_v5 = vld [vmem:[%s14485_s6 + $0x18] sm:$0xff]   ;;  %v103_v6 = vld [vmem:[%s14485_s6 + $0x20] sm:$0xff]   ;;  %v104_v7 = vld [vmem:[%s14485_s6 + $0x28] sm:$0xff]  }
  0x29   :  { %v105_v8 = vld [vmem:[%s14485_s6 + $0x30] sm:$0xff]   ;;  %v106_v9 = vld [vmem:[%s14485_s6 + $0x38] sm:$0xff]  }
  0x2a LB: > { %14488 = vst [vmem:[#allocation7_spill] sm:$0xff] %v9946_v9  ;;  %14489 = vst [vmem:[#allocation8_spill] sm:$0xff] %v9950_v8  ;;  %s14496_s3 = sld [smem:[#allocation27_spill]]  ;;  %vm141_vm0 = vcmask 130048   ;;  %v122_v11 = vpack.c.bf16 %v9970_v3, %v9974_v2  ;;  %v123_v12 = vpack.c.bf16 %v9962_v5, %v9966_v4  ;;  %v124_v13 = vpack.c.bf16 %v9954_v7, %v9958_v6  ;;  %s14497_s8 = sld [smem:[#allocation28_spill]]  ;;  %v9950_v8 = vphi %v105_v8, %v14532_v8   ;;  %v9946_v9 = vphi %v106_v9, %v14531_v9   ;;  %s9978_s1 = sphi %s10175_s1, %s112_s1   ;;  %v9974_v2 = vphi %v99_v2, %v14538_v2   ;;  %v9970_v3 = vphi %v100_v3, %v14537_v3   ;;  %v9966_v4 = vphi %v101_v4, %v14536_v4   ;;  %v9962_v5 = vphi %v102_v5, %v14535_v5   ;;  %v9958_v6 = vphi %v103_v6, %v14534_v6   ;;  %v9954_v7 = vphi %v104_v7, %v14533_v7  }
  0x2b   : > { %14490 = vst [vmem:[#allocation9_spill] sm:$0xff] %v9954_v7  ;;  %14491 = vst [vmem:[#allocation10_spill] sm:$0xff] %v9958_v6  ;;  %v125_v14 = vpack.c.bf16 %v9946_v9, %v9950_v8  ;;  %vm237_vm1 = vcmask 523264   ;;  %s14498_s0 = sld [smem:[#allocation31_spill]]  ;;  %s8058_s10 = sshll.u32 %s9978_s1, 4  ;;  %vm9984_vm2 = vmmov 0  }
  0x2c   : > { %14492 = vst [vmem:[#allocation11_spill] sm:$0xff] %v9962_v5  ;;  %14493 = vst [vmem:[#allocation12_spill] sm:$0xff] %v9966_v4  ;;  %8423 = vmatprep.mubr.msk.bf16.mxu0 %vm141_vm0, %v122_v11  ;;  %s14502_s4 = sld [smem:[#allocation25_spill]]  ;;  %s9983_s2 = smov 64   ;;  %vm740_vm3 = vcmask 261120   ;;  %vm1202_vm4 = vcmask 1043456  }
  0x2d   : > { %14494 = vst [vmem:[#allocation13_spill] sm:$0xff] %v9970_v3  ;;  %14495 = vst [vmem:[#allocation14_spill] sm:$0xff] %v9974_v2  ;;  %s14459_s6 = smov 32   ;;  %vm978_vm5 = vcmask 588800   ;;  %s14457_s27 = smov 96  }
  0x2e   : > { %v14486_v1 = vld [vmem:[#allocation6_spill] sm:$0xff]  ;;  %v14487_v0 = vld [vmem:[#allocation5_spill] sm:$0xff]  ;;  %s14521_s30 = sld [smem:[#allocation26_spill]]  ;;  %s14522_s28 = sld [smem:[#allocation30_spill]] }
  0x2f   : > { %v372_v52 = vunpack.c.l.bf16 %v14487_v0  ;;  %v373_v53 = vunpack.c.l.bf16 %v14486_v1 }
  0x30   : > { %v9159_v10 = vld [vmem:[%s14496_s3] sm:$0xff]   ;;  %s14499_s3 = sld [smem:[#allocation24_spill]] }
  0x31   : > { %8421 = vmatprep.subr.bf16.mxu0 %v9159_v10  ;;  %v7704_v16 = vld [vmem:[%s14497_s8] ss:$0 sm:$0xff]  ;;  %v374_v54 = vsel %vm237_vm1, %v372_v52, 0.0  ;;  %v377_v55 = vsel %vm237_vm1, %v373_v53, 0.0 }
  0x32   : > { %8422 = vmatpush3.bf16.msra.mxu0 %v9159_v10  ;;  %s10384_s29 = scalar_lea.vmem %s14502_s4, %s8058_s10  ;;  %s14511_s4 = smov 32  }
  0x35   : > { %8424 = vmatmul.mubr.msk.bf16.vlgmr.msra.gmra.mrb[0].mxu0 %vm141_vm0, %v123_v12 }
  0x36   : > { %8427 = vmatprep.mubr.msk.bf16.mxu0 %vm141_vm0, %v124_v13  ;;  %s10356_s7 = scalar_lea.vmem %s14499_s3, %s8058_s10  ;;  %s14520_s10 = sld [smem:[#allocation29_spill]] }
  0x3d   : > { %8428 = vmatmul.mubr.msk.bf16.gmra.mrb[4].mxu0 %vm141_vm0, %v125_v14 }
 0x108   : > { %v8425_v15 = vpop.f32.mrb[0].mxu0 }
 0x109   : > { %v188_v17 = vpop.f32.mrb[1].mxu0  ;;  %v197_v19 = vadd.f32 %v8425_v15, %v7704_v16 }
 0x10a   : > { %v8426_v18 = vpop.f32.mrb[2].mxu0  ;;  %v189_v22 = vadd.f32 %v7704_v16, %v188_v17 }
 0x10b   : > { %v200_v20 = vadd.f32 %v8426_v18, %v7704_v16  ;;  %v191_v21 = vpop.f32.mrb[3].mxu0 }
 0x10c   : > { %v192_v23 = vadd.f32 %v7704_v16, %v191_v21 }
 0x10d   : > { %v10222_v24 = vpack.c.bf16 %v200_v20, %v197_v19 }
 0x10e   : > { %v10224_v25 = vpack.c.bf16 %v192_v23, %v189_v22 }
 0x10f   : > { %v231_v26 = vunpack.c.l.bf16 %v10222_v24  ;;  %v232_v32 = vunpack.c.h.bf16 %v10222_v24 }
 0x110   : > { %v8429_v27 = vpop.f32.mrb[4].mxu0  ;;  %v229_v28 = vunpack.c.l.bf16 %v10224_v25  ;;  %v230_v36 = vunpack.c.h.bf16 %v10224_v25 }
 0x111   : > { %v213_v29 = vadd.f32 %v8429_v27, %v7704_v16  ;;  %v204_v30 = vpop.f32.mrb[5].mxu0  ;;  %v244_v31 = vsel %vm237_vm1, %v231_v26, 0.0  ;;  %v247_v41 = vsel %vm237_vm1, %v232_v32, 0.0 }
 0x112   : > { %v205_v33 = vadd.f32 %v7704_v16, %v204_v30  ;;  %245 = vadd.xlane.f32.xlu1 %v244_v31  ;;  %v8430_v34 = vpop.f32.mrb[6].mxu0  ;;  %v238_v35 = vsel %vm237_vm1, %v229_v28, 0.0  ;;  %v241_v43 = vsel %vm237_vm1, %v230_v36, 0.0 }
 0x113   : > { %v216_v37 = vadd.f32 %v8430_v34, %v7704_v16  ;;  %239 = vadd.xlane.f32.xlu0 %v238_v35  ;;  %v207_v38 = vpop.f32.mrb[7].mxu0 }
 0x114   : > { %v208_v39 = vadd.f32 %v7704_v16, %v207_v38 }
 0x115   : > { %v10232_v40 = vpack.c.bf16 %v216_v37, %v213_v29 }
 0x116   : > { %v10235_v42 = vpack.c.bf16 %v208_v39, %v205_v33  ;;  %248 = vadd.xlane.f32.xlu1 %v247_v41 }
 0x117   : > { %242 = vadd.xlane.f32.xlu0 %v241_v43  ;;  %v236_v46 = vunpack.c.h.bf16 %v10232_v40  ;;  %v235_v47 = vunpack.c.l.bf16 %v10232_v40 }
 0x118   : > { %v234_v44 = vunpack.c.h.bf16 %v10235_v42  ;;  %v233_v45 = vunpack.c.l.bf16 %v10235_v42 }
 0x119   : > { %v259_v50 = vsel %vm237_vm1, %v236_v46, 0.0  ;;  %v256_v51 = vsel %vm237_vm1, %v235_v47, 0.0 }
 0x11a   : > { %v253_v48 = vsel %vm237_vm1, %v234_v44, 0.0  ;;  %v250_v49 = vsel %vm237_vm1, %v233_v45, 0.0 }
 0x11b   : > { %254 = vadd.xlane.f32.xlu1 %v253_v48  ;;  %251 = vadd.xlane.f32.xlu0 %v250_v49 }
 0x11f   : > { %260 = vadd.xlane.f32.xlu1 %v259_v50  ;;  %257 = vadd.xlane.f32.xlu0 %v256_v51 }
 0x123   : > { %375 = vadd.xlane.f32.xlu0 %v374_v54  ;;  %378 = vadd.xlane.f32.xlu1 %v377_v55 }
 0x19f   : > { %v246_v56 = vpop.xlane.xlu1 %245 }
 0x1a0   : > { %v265_v57 = vmul.f32 0.015625, %v246_v56  ;;  %v240_v58 = vpop.xlane.xlu0 %239  ;;  %v9160_v56 = vld [vmem:[%s14498_s0 + $0x4] ss:$8 sps:$4 sm:$0xff]  }
 0x1a1   : > { %v263_v59 = vmul.f32 0.015625, %v240_v58  ;;  %486 = vmatprep.subr.bf16.mxu1 %v9160_v56  ;;  %v9163_v58 = vld [vmem:[%s14498_s0 + $0x14] ss:$8 sps:$4 sm:$0xff]  }
 0x1a2   : > { %v10250_v60 = vsub.f32 %v231_v26, %v265_v57  ;;  %v9162_v57 = vld [vmem:[%s14498_s0] ss:$8 sps:$4 sm:$0xff]  }
 0x1a3   : > { %v10252_v61 = vsub.f32 %v229_v28, %v263_v59  ;;  %v249_v62 = vpop.xlane.xlu1 %248  ;;  %487 = vmatpush1.bf16.msra.mxu1 %v9162_v57  ;;  %v9165_v59 = vld [vmem:[%s14498_s0 + $0x10] ss:$8 sps:$4 sm:$0xff]  }
 0x1a4   : > { %v266_v63 = vmul.f32 0.015625, %v249_v62  ;;  %v243_v10 = vpop.xlane.xlu0 %242  ;;  %v281_v13 = vmul.f32 %v10250_v60, %v10250_v60  ;;  %488 = vmatprep.subr.bf16.mxu1 %v9163_v58  ;;  %v9166_v62 = vld [vmem:[%s14498_s0 + $0x24] ss:$8 sps:$4 sm:$0xff]  }
 0x1a5   : > { %v264_v11 = vmul.f32 0.015625, %v243_v10  ;;  %v279_v12 = vmul.f32 %v10252_v61, %v10252_v61  ;;  %v9169_v10 = vld [vmem:[%s14498_s0 + $0x34] ss:$8 sps:$4 sm:$0xff]  }
 0x1a6   : > { %v10258_v14 = vsub.f32 %v232_v32, %v266_v63  ;;  %v293_v22 = vsel %vm237_vm1, %v281_v13, 0.0  ;;  %v9168_v63 = vld [vmem:[%s14498_s0 + $0x20] ss:$8 sps:$4 sm:$0xff]   ;;  %v14441_v13 = vmov 0  }
 0x1a7   : > { %v10260_v15 = vsub.f32 %v230_v36, %v264_v11  ;;  %v287_v16 = vsel %vm237_vm1, %v279_v12, 0.0  ;;  %489 = vmatpush1.bf16.msra.mxu1 %v9165_v59  ;;  %v9171_v11 = vld [vmem:[%s14498_s0 + $0x30] ss:$8 sps:$4 sm:$0xff]   ;;  %v9174_v12 = vld [vmem:[%s14422_s12 + $0x4] ss:$8 sps:$4 sm:$0xff]   ;;  %518 = vmatprep.mubr.bf16.mxu1 %v14441_v13 }
 0x1a8   : > { %v255_v17 = vpop.xlane.xlu1 %254  ;;  %288 = vadd.xlane.f32.xlu0 %v287_v16  ;;  %v252_v18 = vpop.xlane.xlu0 %251  ;;  %v282_v28 = vmul.f32 %v10258_v14, %v10258_v14  ;;  %490 = vmatprep.subr.bf16.mxu1 %v9166_v62  ;;  %v9172_v16 = vld [vmem:[%s14422_s12] ss:$8 sps:$4 sm:$0xff]  }
 0x1a9   : > { %v268_v19 = vmul.f32 0.015625, %v255_v17  ;;  %v267_v20 = vmul.f32 0.015625, %v252_v18  ;;  %v280_v21 = vmul.f32 %v10260_v15, %v10260_v15  ;;  %694 = vmatprep.mubr.bf16.mxu0 %v14441_v13  ;;  %662 = vmatprep.subr.bf16.mxu0 %v9174_v12  ;;  %v9177_v17 = vld [vmem:[%s14422_s12 + $0x14] ss:$8 sps:$4 sm:$0xff]   ;;  %v9175_v18 = vld [vmem:[%s14422_s12 + $0x10] ss:$8 sps:$4 sm:$0xff]  }
 0x1aa   : > { %v296_v37 = vsel %vm237_vm1, %v282_v28, 0.0  ;;  %663 = vmatpush1.bf16.msra.mxu0 %v9172_v16 }
 0x1ab   : > { %v10266_v23 = vsub.f32 %v234_v44, %v268_v19  ;;  %v10268_v26 = vsub.f32 %v233_v45, %v267_v20  ;;  %v290_v27 = vsel %vm237_vm1, %v280_v21, 0.0  ;;  %491 = vmatpush1.bf16.msra.mxu1 %v9168_v63  ;;  %664 = vmatprep.subr.bf16.mxu0 %v9177_v17  ;;  %v9180_v19 = vld [vmem:[%s14422_s12 + $0x24] ss:$8 sps:$4 sm:$0xff]   ;;  %v9178_v20 = vld [vmem:[%s14422_s12 + $0x20] ss:$8 sps:$4 sm:$0xff]  }
 0x1ac   : > { %291 = vadd.xlane.f32.xlu1 %v290_v27  ;;  %v261_v29 = vpop.xlane.xlu1 %260  ;;  %294 = vadd.xlane.f32.xlu0 %v293_v22  ;;  %v258_v30 = vpop.xlane.xlu0 %257  ;;  %v9183_v21 = vld [vmem:[%s14422_s12 + $0x34] ss:$8 sps:$4 sm:$0xff]   ;;  %v9181_v22 = vld [vmem:[%s14422_s12 + $0x30] ss:$8 sps:$4 sm:$0xff]  }
 0x1ad   : > { %v270_v31 = vmul.f32 0.015625, %v261_v29  ;;  %v269_v32 = vmul.f32 0.015625, %v258_v30  ;;  %v283_v33 = vmul.f32 %v10268_v26, %v10268_v26  ;;  %v284_v34 = vmul.f32 %v10266_v23, %v10266_v23  ;;  %492 = vmatprep.subr.bf16.mxu1 %v9169_v10 }
 0x1ae   : > { %665 = vmatpush1.bf16.msra.mxu0 %v9175_v18  ;;  %v344_v29 = vlaneseq }
 0x1af   : > { %v10277_v35 = vsub.f32 %v236_v46, %v270_v31  ;;  %v10279_v36 = vsub.f32 %v235_v47, %v269_v32  ;;  %v299_v38 = vsel %vm237_vm1, %v283_v33, 0.0  ;;  %v302_v48 = vsel %vm237_vm1, %v284_v34, 0.0  ;;  %493 = vmatpush1.bf16.msra.mxu1 %v9171_v11  ;;  %666 = vmatprep.subr.bf16.mxu0 %v9180_v19 }
 0x1b0   : > { %297 = vadd.xlane.f32.xlu1 %v296_v37  ;;  %300 = vadd.xlane.f32.xlu0 %v299_v38  ;;  %v376_v39 = vpop.xlane.xlu0 %375  ;;  %v379_v41 = vpop.xlane.xlu1 %378  ;;  %v10358_v37 = vshrl.u32 %v344_v29, 7 }
 0x1b1   : > { %v380_v43 = vmul.f32 0.015625, %v376_v39  ;;  %v381_v44 = vmul.f32 0.015625, %v379_v41  ;;  %v285_v45 = vmul.f32 %v10279_v36, %v10279_v36  ;;  %v286_v50 = vmul.f32 %v10277_v35, %v10277_v35  ;;  %v226_v41 = vld [vmem:[%s10356_s7] sm:$0x3f] }
 0x1b2   : > { %667 = vmatpush1.bf16.msra.mxu0 %v9178_v20 }
 0x1b3   : > { %v10286_v49 = vsub.f32 %v372_v52, %v380_v43  ;;  %v10288_v46 = vsub.f32 %v373_v53, %v381_v44  ;;  %v305_v47 = vsel %vm237_vm1, %v285_v45, 0.0  ;;  %v308_v55 = vsel %vm237_vm1, %v286_v50, 0.0  ;;  %668 = vmatprep.subr.bf16.mxu0 %v9183_v21 }
 0x1b4   : > { %303 = vadd.xlane.f32.xlu1 %v302_v48  ;;  %306 = vadd.xlane.f32.xlu0 %v305_v47  ;;  %v10361_v48 = vadd.f32 1.0, %v226_v41 }
 0x1b5   : > { %v384_v51 = vmul.f32 %v10286_v49, %v10286_v49  ;;  %v385_v54 = vmul.f32 %v10288_v46, %v10288_v46 }
 0x1b6   : > { %669 = vmatpush1.bf16.msra.mxu0 %v9181_v22 }
 0x1b7   : > { %v386_v52 = vsel %vm237_vm1, %v384_v51, 0.0  ;;  %v389_v53 = vsel %vm237_vm1, %v385_v54, 0.0  ;;  %v10364_v51 = vsub.s32 1, %v10358_v37 }
 0x1b8   : > { %309 = vadd.xlane.f32.xlu1 %v308_v55  ;;  %387 = vadd.xlane.f32.xlu0 %v386_v52 }
 0x1b9   : > { %14500 = vst [vmem:[#allocation15_spill] sm:$0xff] %v10364_v51  ;;  %v10371_v59 = vrot.slane %v10361_v48, %v10364_v51 }
 0x1bc   : > { %390 = vadd.xlane.f32.xlu1 %v389_v53  ;;  %v10367_v53 = vsub.s32 0, %v10358_v37 }
 0x1be   : > { %14501 = vst [vmem:[#allocation16_spill] sm:$0xff] %v10367_v53  ;;  %v10375_v16 = vrot.slane %v226_v41, %v10367_v53 }
 0x235   : > { %v289_v27 = vpop.xlane.xlu0 %288 }
 0x236   : > { %v311_v28 = vmul.f32 0.015625, %v289_v27 }
 0x238   : > { %v319_v30 = vadd.f32 1e-06, %v311_v28 }
 0x239   : > { %v292_v31 = vpop.xlane.xlu1 %291  ;;  %v295_v32 = vpop.xlane.xlu0 %294 }
 0x23a   : > { %9308 = vrsqrt.f32 %v319_v30  ;;  %v312_v33 = vmul.f32 0.015625, %v292_v31  ;;  %v313_v34 = vmul.f32 0.015625, %v295_v32 }
 0x23c   : > { %v320_v38 = vadd.f32 1e-06, %v312_v33  ;;  %v321_v39 = vadd.f32 1e-06, %v313_v34 }
 0x23d   : > { %v298_v43 = vpop.xlane.xlu1 %297  ;;  %v301_v44 = vpop.xlane.xlu0 %300 }
 0x23e   : > { %9310 = vrsqrt.f32 %v320_v38  ;;  %v314_v45 = vmul.f32 0.015625, %v298_v43  ;;  %v315_v50 = vmul.f32 0.015625, %v301_v44 }
 0x23f   : > { %9312 = vrsqrt.f32 %v321_v39  ;;  %v228_v39 = vld [vmem:[%s10384_s29] sm:$0x3f] }
 0x240   : > { %v322_v47 = vadd.f32 1e-06, %v314_v45  ;;  %v323_v57 = vadd.f32 1e-06, %v315_v50  ;;  %v10393_v45 = vadd.f32 1.0, %v228_v39 }
 0x241   : > { %v304_v54 = vpop.xlane.xlu1 %303  ;;  %v307_v55 = vpop.xlane.xlu0 %306 }
 0x242   : > { %9314 = vrsqrt.f32 %v322_v47  ;;  %v316_v52 = vmul.f32 0.015625, %v304_v54  ;;  %v317_v18 = vmul.f32 0.015625, %v307_v55  ;;  %v404_v55 = vrot.slane %v10393_v45, %v10364_v51 }
 0x244   : > { %v9309_v56 = vpop.eup %9308  ;;  %v324_v58 = vadd.f32 1e-06, %v316_v52  ;;  %v325_v31 = vadd.f32 1e-06, %v317_v18 }
 0x245   : > { %v310_v62 = vpop.xlane.xlu1 %309  ;;  %v388_v63 = vpop.xlane.xlu0 %387  ;;  %v335_v10 = vmul.f32 %v9309_v56, %v10252_v61 }
 0x246   : > { %9316 = vrsqrt.f32 %v324_v58  ;;  %v318_v11 = vmul.f32 0.015625, %v310_v62  ;;  %v392_v12 = vmul.f32 0.015625, %v388_v63 }
 0x247   : > { %9318 = vrsqrt.f32 %v323_v57  ;;  %v348_v20 = vmul.f32 %v10371_v59, %v335_v10 }
 0x248   : > { %v9311_v17 = vpop.eup %9310  ;;  %v394_v19 = vadd.f32 1e-06, %v392_v12  ;;  %v326_v21 = vadd.f32 1e-06, %v318_v11  ;;  %v410_v11 = vrot.slane %v228_v39, %v10367_v53 }
 0x249   : > { %v391_v22 = vpop.xlane.xlu1 %390  ;;  %v336_v27 = vmul.f32 %v9311_v17, %v10260_v15  ;;  %v9313_v28 = vpop.eup %9312  ;;  %v360_v33 = vadd.f32 %v10375_v16, %v348_v20 }
 0x24a   : > { %v393_v29 = vmul.f32 0.015625, %v391_v22  ;;  %9320 = vrsqrt.f32 %v394_v19  ;;  %v337_v34 = vmul.f32 %v9313_v28, %v10250_v60 }
 0x24b   : > { %v349_v61 = vmul.f32 %v10371_v59, %v336_v27  ;;  %9322 = vrsqrt.f32 %v326_v21 }
 0x24c   : > { %v9315_v30 = vpop.eup %9314  ;;  %v395_v32 = vadd.f32 1e-06, %v393_v29  ;;  %v350_v47 = vmul.f32 %v10371_v59, %v337_v34 }
 0x24d   : > { %v361_v15 = vadd.f32 %v10375_v16, %v349_v61  ;;  %v338_v38 = vmul.f32 %v9315_v30, %v10258_v14 }
 0x24e   : > { %9324 = vrsqrt.f32 %v395_v32  ;;  %v362_v52 = vadd.f32 %v10375_v16, %v350_v47 }
 0x24f   : > { %v368_v41 = vpack.c.bf16 %v361_v15, %v360_v33  ;;  %v351_v43 = vmul.f32 %v10371_v59, %v338_v38  ;;  %9326 = vrsqrt.f32 %v325_v31 }
 0x250   : > { %v9317_v44 = vpop.eup %9316 }
 0x251   : > { %7720 = vmatmul.mubr.msk.bf16.vlgmr.msra.gmra.mrb[0].mxu1 %vm237_vm1, %v368_v41  ;;  %v9319_v50 = vpop.eup %9318  ;;  %v363_v60 = vadd.f32 %v10375_v16, %v351_v43  ;;  %v340_v14 = vmul.f32 %v9317_v44, %v10266_v23 }
 0x252   : > { %528 = vmatprep.mubr.bf16.mxu1 %v14441_v13  ;;  %v339_v56 = vmul.f32 %v9319_v50, %v10268_v26 }
 0x253   : > { %v369_v62 = vpack.c.bf16 %v363_v60, %v362_v52  ;;  %v353_v63 = vmul.f32 %v10371_v59, %v340_v14 }
 0x254   : > { %v9321_v54 = vpop.eup %9320  ;;  %v352_v17 = vmul.f32 %v10371_v59, %v339_v56 }
 0x255   : > { %v398_v57 = vmul.f32 %v9321_v54, %v10286_v49  ;;  %v9323_v58 = vpop.eup %9322  ;;  %v365_v49 = vadd.f32 %v10375_v16, %v353_v63 }
 0x256   : > { %v342_v19 = vmul.f32 %v9323_v58, %v10277_v35  ;;  %v364_v22 = vadd.f32 %v10375_v16, %v352_v17 }
 0x257   : > { %v405_v12 = vmul.f32 %v404_v55, %v398_v57 }
 0x258   : > { %v9325_v10 = vpop.eup %9324  ;;  %v370_v28 = vpack.c.bf16 %v365_v49, %v364_v22  ;;  %v355_v29 = vmul.f32 %v10371_v59, %v342_v19 }
 0x259   : > { %v399_v23 = vmul.f32 %v9325_v10, %v10288_v46  ;;  %7721 = vmatmul.mubr.msk.bf16.gmra.mrb[4].mxu1 %vm237_vm1, %v369_v62  ;;  %v9327_v18 = vpop.eup %9326  ;;  %v411_v20 = vadd.f32 %v410_v11, %v405_v12 }
 0x25a   : > { %538 = vmatprep.mubr.bf16.mxu1 %v14441_v13  ;;  %v341_v27 = vmul.f32 %v9327_v18, %v10279_v36  ;;  %v367_v35 = vadd.f32 %v10375_v16, %v355_v29  ;;  %v14443_v36 = vmov 0.0  }
 0x25b   : > { %v406_v26 = vmul.f32 %v404_v55, %v399_v23  ;;  %8431 = vmatprep.subr.bf16.mxu0 %v14443_v36  ;;  %8461 = vmatprep.subr.bf16.mxu1 %v14443_v36  ;;  %v607_v55 = vld [vmem:[%s14423_s13] sm:$0x3] }
 0x25c   : > { %v354_v61 = vmul.f32 %v10371_v59, %v341_v27  ;;  %v422_v59 = vld [vmem:[%s14421_s11] sm:$0x3]  ;;  %v10462_v10 = vrot.slane %v607_v55, %v10367_v53  ;;  %v616_v12 = vrot.slane %v607_v55, %v10364_v51 }
 0x25d   : > { %v412_v21 = vadd.f32 %v410_v11, %v406_v26  ;;  %v10440_v33 = vrot.slane %v422_v59, %v10364_v51 }
 0x25e   : > { %v366_v30 = vadd.f32 %v10375_v16, %v354_v61  ;;  %v10437_v16 = vrot.slane %v422_v59, %v10367_v53 }
 0x25f   : > { %v413_v46 = vpack.c.bf16 %v412_v21, %v411_v20 }
 0x260   : > { %v371_v31 = vpack.c.bf16 %v367_v35, %v366_v30 }
 0x261   : > { %7722 = vmatmul.mubr.msk.bf16.gmra.mrb[8].mxu1 %vm237_vm1, %v370_v28  ;;  %7736 = vmatmul.mubr.msk.bf16.vlgmr.msra.gmra.mrb[8].mxu0 %vm237_vm1, %v413_v46 }
 0x262   : > { %548 = vmatprep.mubr.bf16.mxu1 %v14441_v13  ;;  %8441 = vmatprep.mubr.msk.bf16.mxu0 %vm9984_vm2, %v14443_v36 }
 0x269   : > { %7723 = vmatmul.mubr.msk.bf16.gmra.mrb[12].mxu1 %vm237_vm1, %v371_v31 }
 0x26a   : > { %558 = vmatprep.mubr.bf16.mxu1 %v14441_v13 }
 0x271   : > { %7724 = vmatmul.mubr.msk.bf16.gmra.mrb[16].mxu1 %vm237_vm1, %v368_v41 }
 0x272   : > { %568 = vmatprep.mubr.bf16.mxu1 %v14441_v13 }
 0x279   : > { %7725 = vmatmul.mubr.msk.bf16.gmra.mrb[20].mxu1 %vm237_vm1, %v369_v62 }
 0x27a   : > { %578 = vmatprep.mubr.bf16.mxu1 %v14441_v13 }
 0x281   : > { %7726 = vmatmul.mubr.msk.bf16.gmra.mrb[24].mxu1 %vm237_vm1, %v370_v28 }
 0x282   : > { %588 = vmatprep.mubr.bf16.mxu1 %v14441_v13 }
 0x289   : > { %7727 = vmatmul.mubr.msk.bf16.gmra.mrb[28].mxu1 %vm237_vm1, %v371_v31 }
 0x28a   : > { %8471 = vmatprep.mubr.msk.bf16.mxu1 %vm9984_vm2, %v14443_v36 }
 0x324   : > { %v520_v32 = vpop.f32.mrb[0].mxu1 }
 0x325   : > { %v522_v15 = vpop.f32.mrb[1].mxu1  ;;  %v521_v38 = vadd.f32 %v520_v32, %v10437_v16 }
 0x326   : > { %v524_v34 = vpop.f32.mrb[2].mxu1  ;;  %v523_v43 = vadd.f32 %v522_v15, %v10440_v33 }
 0x327   : > { %v525_v39 = vadd.f32 %v524_v34, %v10437_v16  ;;  %v526_v41 = vpop.f32.mrb[3].mxu1 }
 0x328   : > { %v527_v44 = vadd.f32 %v526_v41, %v10440_v33 }
 0x329   : > { %v10446_v47 = vpack.c.bf16 %v525_v39, %v521_v38 }
 0x32a   : > { %v10448_v50 = vpack.c.bf16 %v527_v44, %v523_v43 }
 0x32b   : > { %730 = vrot.lane.b32.xlu0 %v10446_v47, %s9983_s2 }
 0x32c   : > { %v530_v60 = vpop.f32.mrb[4].mxu1 }
 0x32d   : > { %v532_v14 = vpop.f32.mrb[5].mxu1  ;;  %v531_v52 = vadd.f32 %v530_v60, %v10437_v16 }
 0x32e   : > { %v534_v54 = vpop.f32.mrb[6].mxu1  ;;  %v533_v58 = vadd.f32 %v532_v14, %v10440_v33 }
 0x32f   : > { %v535_v56 = vadd.f32 %v534_v54, %v10437_v16  ;;  %v536_v57 = vpop.f32.mrb[7].mxu1 }
 0x330   : > { %v537_v62 = vadd.f32 %v536_v57, %v10440_v33 }
 0x331   : > { %v10459_v63 = vpack.c.bf16 %v535_v56, %v531_v52 }
 0x332   : > { %v10464_v11 = vpack.c.bf16 %v537_v62, %v533_v58 }
 0x333   : > { %732 = vrot.lane.b32.xlu1 %v10459_v63, %s9983_s2 }
 0x334   : > { %v540_v23 = vpop.f32.mrb[8].mxu1  ;;  %v696_v17 = vpop.f32.mrb[8].mxu0 }
 0x335   : > { %v697_v18 = vadd.f32 %v696_v17, %v10462_v10  ;;  %v542_v26 = vpop.f32.mrb[9].mxu1  ;;  %v698_v49 = vpop.f32.mrb[9].mxu0  ;;  %v541_v22 = vadd.f32 %v540_v23, %v10437_v16 }
 0x336   : > { %v10470_v19 = vadd.f32 %v698_v49, %v616_v12  ;;  %v544_v20 = vpop.f32.mrb[10].mxu1  ;;  %v700_v21 = vpop.f32.mrb[10].mxu0  ;;  %v543_v61 = vadd.f32 %v542_v26, %v10440_v33 }
 0x337   : > { %v10473_v27 = vpack.c.bf16 %v697_v18, %v697_v18  ;;  %v545_v28 = vadd.f32 %v544_v20, %v10437_v16  ;;  %v546_v46 = vpop.f32.mrb[11].mxu1  ;;  %v702_v29 = vpop.f32.mrb[11].mxu0 }
 0x338   : > { %v547_v35 = vadd.f32 %v546_v46, %v10440_v33  ;;  %v10478_v30 = vadd.f32 %v702_v29, %v616_v12 }
 0x339   : > { %v10480_v31 = vpack.c.bf16 %v545_v28, %v541_v22  ;;  %738 = vrot.lane.b32.xlu0 %v10473_v27, %s9983_s2 }
 0x33a   : > { %v10484_v59 = vpack.c.bf16 %v547_v35, %v543_v61 }
 0x33b   : > { %734 = vrot.lane.b32.xlu1 %v10480_v31, %s9983_s2 }
 0x33c   : > { %v550_v32 = vpop.f32.mrb[12].mxu1 }
 0x33d   : > { %v552_v15 = vpop.f32.mrb[13].mxu1  ;;  %v551_v38 = vadd.f32 %v550_v32, %v10437_v16 }
 0x33e   : > { %v554_v34 = vpop.f32.mrb[14].mxu1  ;;  %v553_v43 = vadd.f32 %v552_v15, %v10440_v33 }
 0x33f   : > { %v555_v39 = vadd.f32 %v554_v34, %v10437_v16  ;;  %v556_v41 = vpop.f32.mrb[15].mxu1 }
 0x340   : > { %v557_v44 = vadd.f32 %v556_v41, %v10440_v33 }
 0x341   : > { %v10496_v60 = vpack.c.bf16 %v555_v39, %v551_v38 }
 0x342   : > { %v10498_v14 = vpack.c.bf16 %v557_v44, %v553_v43 }
 0x343   : > { %736 = vrot.lane.b32.xlu1 %v10496_v60, %s9983_s2 }
 0x344   : > { %v560_v54 = vpop.f32.mrb[16].mxu1 }
 0x345   : > { %v562_v55 = vpop.f32.mrb[17].mxu1  ;;  %v561_v56 = vadd.f32 %v560_v54, %v10437_v16  ;;  %v701_v54 = vadd.f32 %v700_v21, %v10462_v10 }
 0x346   : > { %v564_v52 = vpop.f32.mrb[18].mxu1  ;;  %v563_v62 = vadd.f32 %v562_v55, %v10440_v33 }
 0x347   : > { %v565_v57 = vadd.f32 %v564_v52, %v10437_v16  ;;  %v566_v58 = vpop.f32.mrb[19].mxu1 }
 0x348   : > { %v567_v12 = vadd.f32 %v566_v58, %v10440_v33 }
 0x349   : > { %v10506_v23 = vpack.c.bf16 %v565_v57, %v561_v56  ;;  %v10533_v57 = vpack.c.bf16 %v701_v54, %v701_v54 }
 0x34a   : > { %v10508_v17 = vpack.c.bf16 %v567_v12, %v563_v62 }
 0x34b   : > { %848 = vrot.lane.b32.xlu1 %v10506_v23, %s9983_s2 }
 0x34c   : > { %v570_v18 = vpop.f32.mrb[20].mxu1 }
 0x34d   : > { %v572_v26 = vpop.f32.mrb[21].mxu1  ;;  %v571_v20 = vadd.f32 %v570_v18, %v10437_v16 }
 0x34e   : > { %v574_v49 = vpop.f32.mrb[22].mxu1  ;;  %v573_v46 = vadd.f32 %v572_v26, %v10440_v33 }
 0x34f   : > { %v575_v22 = vadd.f32 %v574_v49, %v10437_v16  ;;  %v576_v28 = vpop.f32.mrb[23].mxu1 }
 0x350   : > { %v577_v29 = vadd.f32 %v576_v28, %v10440_v33 }
 0x351   : > { %v10516_v61 = vpack.c.bf16 %v575_v22, %v571_v20 }
 0x352   : > { %v10518_v35 = vpack.c.bf16 %v577_v29, %v573_v46 }
 0x353   : > { %850 = vrot.lane.b32.xlu0 %v10516_v61, %s9983_s2 }
 0x354   : > { %v580_v32 = vpop.f32.mrb[24].mxu1 }
 0x355   : > { %v582_v15 = vpop.f32.mrb[25].mxu1  ;;  %v581_v38 = vadd.f32 %v580_v32, %v10437_v16 }
 0x356   : > { %v584_v34 = vpop.f32.mrb[26].mxu1  ;;  %v583_v43 = vadd.f32 %v582_v15, %v10440_v33 }
 0x357   : > { %v585_v39 = vadd.f32 %v584_v34, %v10437_v16  ;;  %v586_v41 = vpop.f32.mrb[27].mxu1 }
 0x358   : > { %v587_v44 = vadd.f32 %v586_v41, %v10440_v33 }
 0x359   : > { %v10527_v55 = vpack.c.bf16 %v585_v39, %v581_v38 }
 0x35a   : > { %v10529_v52 = vpack.c.bf16 %v587_v44, %v583_v43 }
 0x35b   : > { %852 = vrot.lane.b32.xlu1 %v10527_v55, %s9983_s2 }
 0x35c   : > { %v590_v56 = vpop.f32.mrb[28].mxu1 }
 0x35d   : > { %v592_v58 = vpop.f32.mrb[29].mxu1  ;;  %v591_v12 = vadd.f32 %v590_v56, %v10437_v16 }
 0x35e   : > { %v594_v62 = vpop.f32.mrb[30].mxu1  ;;  %v593_v10 = vadd.f32 %v592_v58, %v10440_v33  ;;  %v10583_v58 = vpack.c.bf16 %v10470_v19, %v10470_v19 }
 0x35f   : > { %v595_v18 = vadd.f32 %v594_v62, %v10437_v16  ;;  %v596_v26 = vpop.f32.mrb[31].mxu1  ;;  %856 = vrot.lane.b32.xlu1 %v10533_v57, %s9983_s2 }
 0x360   : > { %v597_v21 = vadd.f32 %v596_v26, %v10440_v33 }
 0x361   : > { %v10541_v49 = vpack.c.bf16 %v595_v18, %v591_v12  ;;  %v1204_v18 = vsel %vm1202_vm4, %v10583_v58, 0 }
 0x362   : > { %v10543_v20 = vpack.c.bf16 %v597_v21, %v593_v10  ;;  %v10622_v10 = vpack.c.bf16 %v10478_v30, %v10478_v30 }
 0x363   : > { %1380 = vrot.lane.b32.xlu1 %v10459_v63, %s14459_s6  ;;  %854 = vrot.lane.b32.xlu0 %v10541_v49, %s9983_s2 }
 0x364   : > { %v1294_v21 = vsel %vm1202_vm4, %v10622_v10, 0 }
 0x367   : > { %1378 = vrot.lane.b32.xlu0 %v10446_v47, %s14459_s6 }
 0x39d   : > { %v731_v16 = vpop.permute.xlu0 %730 }
 0x39e   : > { %v757_v22 = vsel %vm740_vm3, %v731_v16, 0 }
 0x39f   : > { %8432 = vmatpush3.bf16.xpose.msra.mxu0 %v757_v22 }
 0x3a0   : > { %8433 = vmatprep.subr.bf16.mxu0 %v14443_v36 }
 0x3a5   : > { %v733_v33 = vpop.permute.xlu1 %732 }
 0x3a6   : > { %v760_v28 = vsel %vm740_vm3, %v733_v33, 0 }
 0x3a7   : > { %8434 = vmatpush3.bf16.xpose.msra.mxu0 %v760_v28 }
 0x3a8   : > { %8435 = vmatprep.subr.bf16.mxu0 %v14443_v36 }
 0x3ab   : > { %v739_v34 = vpop.permute.xlu0 %738 }
 0x3ac   : > { %v769_v39 = vsel %vm740_vm3, %v739_v34, 0 }
 0x3ad   : > { %v735_v46 = vpop.permute.xlu1 %734 }
 0x3ae   : > { %v763_v29 = vsel %vm740_vm3, %v735_v46, 0 }
 0x3af   : > { %8436 = vmatpush3.bf16.xpose.msra.mxu0 %v763_v29 }
 0x3b0   : > { %8437 = vmatprep.subr.bf16.mxu0 %v14443_v36 }
 0x3b5   : > { %v737_v32 = vpop.permute.xlu1 %736 }
 0x3b6   : > { %v766_v15 = vsel %vm740_vm3, %v737_v32, 0 }
 0x3b7   : > { %8438 = vmatpush3.bf16.xpose.msra.mxu0 %v766_v15 }
 0x3b8   : > { %8439 = vmatprep.subr.bf16.mxu0 %v14443_v36 }
 0x3bd   : > { %v849_v38 = vpop.permute.xlu1 %848 }
 0x3be   : > { %v874_v41 = vsel %vm740_vm3, %v849_v38, 0 }
 0x3bf   : > { %8440 = vmatpush3.bf16.xpose.msra.mxu0 %v769_v39  ;;  %8462 = vmatpush3.bf16.xpose.msra.mxu1 %v874_v41 }
 0x3c0   : > { %8463 = vmatprep.subr.bf16.mxu1 %v14443_v36  ;;  %8491 = vmatprep.subr.bf16.mxu0 %v14443_v36 }
 0x3c5   : > { %v851_v43 = vpop.permute.xlu0 %850 }
 0x3c6   : > { %v877_v44 = vsel %vm740_vm3, %v851_v43, 0  ;;  %8442 = vmatmul.mubr.msk.bf16.vlgmr.msra.gmra.mrb[12].mxu0 %vm740_vm3, %v10446_v47 }
 0x3c7   : > { %8464 = vmatpush3.bf16.xpose.msra.mxu1 %v877_v44  ;;  %8492 = vmatpush3.bf16.msra.mxu0 %v10448_v50 }
 0x3c8   : > { %8493 = vmatprep.subr.bf16.mxu0 %v14443_v36  ;;  %8445 = vmatprep.mubr.msk.bf16.mxu0 %vm9984_vm2, %v14443_v36 }
 0x3c9   : > { %8465 = vmatprep.subr.bf16.mxu1 %v14443_v36 }
 0x3cb   : > { %8494 = vmatpush3.bf16.msra.mxu0 %v10464_v11 }
 0x3cc   : > { %8495 = vmatprep.subr.bf16.mxu0 %v14443_v36 }
 0x3cd   : > { %v853_v54 = vpop.permute.xlu1 %852 }
 0x3ce   : > { %v880_v56 = vsel %vm740_vm3, %v853_v54, 0  ;;  %8446 = vmatmul.mubr.msk.bf16.gmra.mrb[16].mxu0 %vm740_vm3, %v10459_v63 }
 0x3cf   : > { %8466 = vmatpush3.bf16.xpose.msra.mxu1 %v880_v56  ;;  %8496 = vmatpush3.bf16.msra.mxu0 %v10484_v59 }
 0x3d0   : > { %8497 = vmatprep.subr.bf16.mxu0 %v14443_v36  ;;  %8449 = vmatprep.mubr.msk.bf16.mxu0 %vm9984_vm2, %v14443_v36 }
 0x3d1   : > { %8467 = vmatprep.subr.bf16.mxu1 %v14443_v36  ;;  %v857_v19 = vpop.permute.xlu1 %856 }
 0x3d2   : > { %v886_v26 = vsel %vm740_vm3, %v857_v19, 0 }
 0x3d3   : > { %8498 = vmatpush3.bf16.msra.mxu0 %v10498_v14 }
 0x3d4   : > { %8499 = vmatprep.subr.bf16.mxu0 %v14443_v36 }
 0x3d5   : > { %v855_v62 = vpop.permute.xlu0 %854 }
 0x3d6   : > { %v883_v12 = vsel %vm740_vm3, %v855_v62, 0  ;;  %8450 = vmatmul.mubr.msk.bf16.gmra.mrb[20].mxu0 %vm740_vm3, %v10480_v31 }
 0x3d7   : > { %8468 = vmatpush3.bf16.xpose.msra.mxu1 %v883_v12  ;;  %8500 = vmatpush3.bf16.msra.mxu0 %v1204_v18 }
 0x3d8   : > { %8453 = vmatprep.mubr.msk.bf16.mxu0 %vm9984_vm2, %v14443_v36  ;;  %8469 = vmatprep.subr.bf16.mxu1 %v14443_v36 }
 0x3d9   : > { %8551 = vmatprep.subr.bf16.mxu0 %v14443_v36 }
 0x3de   : > { %8454 = vmatmul.mubr.msk.bf16.gmra.mrb[24].mxu0 %vm740_vm3, %v10496_v60 }
 0x3df   : > { %8470 = vmatpush3.bf16.xpose.msra.mxu1 %v886_v26  ;;  %8457 = vmatprep.mubr.msk.bf16.mxu0 %vm9984_vm2, %v14443_v36 }
 0x3e0   : > { %8521 = vmatprep.subr.bf16.mxu1 %v14443_v36 }
 0x3e6   : > { %8458 = vmatmul.mubr.msk.bf16.gmra.mrb[28].mxu0 %vm740_vm3, %v10473_v27  ;;  %8472 = vmatmul.mubr.msk.bf16.vlgmr.msra.gmra.mrb[32].mxu1 %vm740_vm3, %v10506_v23 }
 0x3e7   : > { %8522 = vmatpush3.bf16.msra.mxu1 %v10508_v17  ;;  %8475 = vmatprep.mubr.msk.bf16.mxu1 %vm9984_vm2, %v14443_v36 }
 0x3e8   : > { %8523 = vmatprep.subr.bf16.mxu1 %v14443_v36  ;;  %8501 = vmatprep.mubr.msk.bf16.mxu0 %vm9984_vm2, %v14443_v36 }
 0x3eb   : > { %8524 = vmatpush3.bf16.msra.mxu1 %v10518_v35 }
 0x3ec   : > { %8525 = vmatprep.subr.bf16.mxu1 %v14443_v36 }
 0x3ee   : > { %8476 = vmatmul.mubr.msk.bf16.gmra.mrb[36].mxu1 %vm740_vm3, %v10516_v61 }
 0x3ef   : > { %8526 = vmatpush3.bf16.msra.mxu1 %v10529_v52  ;;  %8479 = vmatprep.mubr.msk.bf16.mxu1 %vm9984_vm2, %v14443_v36 }
 0x3f0   : > { %8527 = vmatprep.subr.bf16.mxu1 %v14443_v36 }
 0x3f3   : > { %8528 = vmatpush3.bf16.msra.mxu1 %v10543_v20 }
 0x3f4   : > { %8529 = vmatprep.subr.bf16.mxu1 %v14443_v36 }
 0x3f6   : > { %8480 = vmatmul.mubr.msk.bf16.gmra.mrb[40].mxu1 %vm740_vm3, %v10527_v55 }
 0x3f7   : > { %8530 = vmatpush3.bf16.msra.mxu1 %v1294_v21  ;;  %8483 = vmatprep.mubr.msk.bf16.mxu1 %vm9984_vm2, %v14443_v36 }
 0x3f8   : > { %8581 = vmatprep.subr.bf16.mxu1 %v14443_v36 }
 0x3fe   : > { %8484 = vmatmul.mubr.msk.bf16.gmra.mrb[44].mxu1 %vm740_vm3, %v10541_v49 }
 0x3ff   : > { %8487 = vmatprep.mubr.msk.bf16.mxu1 %vm9984_vm2, %v14443_v36 }
 0x406   : > { %8488 = vmatmul.mubr.msk.bf16.gmra.mrb[48].mxu1 %vm740_vm3, %v10533_v57 }
 0x407   : > { %8531 = vmatprep.mubr.msk.bf16.mxu1 %vm9984_vm2, %v14443_v36 }
 0x499   : > { %v805_v30 = vpop.f32.mrb[12].mxu0 }
 0x49a   : > { %v8443_v16 = vpop.f32.mrb[13].mxu0  ;;  %v10641_v22 = vmul.f32 0.17677669, %v805_v30 }
 0x49b   : > { %v808_v33 = vpop.f32.mrb[14].mxu0 }
 0x49c   : > { %v8444_v28 = vpop.f32.mrb[15].mxu0  ;;  %v979_v46 = vsel %vm978_vm5, %v10641_v22, -inf  ;;  %v10645_v29 = vmul.f32 0.17677669, %v808_v33 }
 0x49d   : > { %980 = vmax.xlane.f32.xlu0 %v979_v46 }
 0x49e   : > { %v982_v32 = vsel %vm978_vm5, %v10645_v29, -inf }
 0x49f   : > { %983 = vmax.xlane.f32.xlu1 %v982_v32 }
 0x4a1   : > { %v813_v15 = vpop.f32.mrb[16].mxu0 }
 0x4a2   : > { %v8447_v34 = vpop.f32.mrb[17].mxu0  ;;  %v10649_v38 = vmul.f32 0.17677669, %v813_v15 }
 0x4a3   : > { %v816_v39 = vpop.f32.mrb[18].mxu0 }
 0x4a4   : > { %v8448_v41 = vpop.f32.mrb[19].mxu0  ;;  %v985_v43 = vsel %vm978_vm5, %v10649_v38, -inf  ;;  %v10653_v44 = vmul.f32 0.17677669, %v816_v39 }
 0x4a5   : > { %986 = vmax.xlane.f32.xlu0 %v985_v43 }
 0x4a6   : > { %v988_v54 = vsel %vm978_vm5, %v10653_v44, -inf }
 0x4a9   : > { %989 = vmax.xlane.f32.xlu0 %v988_v54  ;;  %v821_v56 = vpop.f32.mrb[20].mxu0 }
 0x4aa   : > { %v8451_v62 = vpop.f32.mrb[21].mxu0  ;;  %v10657_v12 = vmul.f32 0.17677669, %v821_v56 }
 0x4ab   : > { %v824_v18 = vpop.f32.mrb[22].mxu0 }
 0x4ac   : > { %v8452_v19 = vpop.f32.mrb[23].mxu0  ;;  %v991_v26 = vsel %vm978_vm5, %v10657_v12, -inf  ;;  %v10661_v21 = vmul.f32 0.17677669, %v824_v18 }
 0x4ad   : > { %992 = vmax.xlane.f32.xlu0 %v991_v26 }
 0x4ae   : > { %v994_v30 = vsel %vm978_vm5, %v10661_v21, -inf }
 0x4af   : > { %995 = vmax.xlane.f32.xlu1 %v994_v30 }
 0x4b1   : > { %v829_v16 = vpop.f32.mrb[24].mxu0 }
 0x4b2   : > { %v8455_v33 = vpop.f32.mrb[25].mxu0  ;;  %v10665_v28 = vmul.f32 0.17677669, %v829_v16 }
 0x4b3   : > { %v832_v46 = vpop.f32.mrb[26].mxu0 }
 0x4b4   : > { %v8456_v32 = vpop.f32.mrb[27].mxu0  ;;  %v997_v15 = vsel %vm978_vm5, %v10665_v28, -inf  ;;  %v10669_v34 = vmul.f32 0.17677669, %v832_v46 }
 0x4b5   : > { %998 = vmax.xlane.f32.xlu0 %v997_v15 }
 0x4b6   : > { %v1000_v39 = vsel %vm978_vm5, %v10669_v34, -inf }
 0x4b7   : > { %1001 = vmax.xlane.f32.xlu1 %v1000_v39 }
 0x4b9   : > { %v837_v41 = vpop.f32.mrb[28].mxu0  ;;  %v922_v43 = vpop.f32.mrb[32].mxu1 }
 0x4ba   : > { %v10673_v54 = vmul.f32 0.17677669, %v922_v43  ;;  %v8459_v56 = vpop.f32.mrb[29].mxu0  ;;  %v8473_v62 = vpop.f32.mrb[33].mxu1  ;;  %v10675_v18 = vmul.f32 0.17677669, %v837_v41 }
 0x4bb   : > { %v840_v19 = vpop.f32.mrb[30].mxu0  ;;  %v925_v26 = vpop.f32.mrb[34].mxu1 }
 0x4bc   : > { %v10677_v30 = vmul.f32 0.17677669, %v925_v26  ;;  %v8460_v16 = vpop.f32.mrb[31].mxu0  ;;  %v8474_v33 = vpop.f32.mrb[35].mxu1  ;;  %v1003_v46 = vsel %vm978_vm5, %v10675_v18, -inf  ;;  %v1006_v32 = vsel %vm978_vm5, %v10673_v54, -inf }
 0x4bd   : > { %1004 = vmax.xlane.f32.xlu0 %v1003_v46  ;;  %1007 = vmax.xlane.f32.xlu1 %v1006_v32 }
 0x4be   : > { %v1009_v15 = vsel %vm978_vm5, %v10677_v30, -inf }
 0x4c1   : > { %1010 = vmax.xlane.f32.xlu0 %v1009_v15  ;;  %v930_v39 = vpop.f32.mrb[36].mxu1 }
 0x4c2   : > { %v10685_v41 = vmul.f32 0.17677669, %v930_v39  ;;  %v8477_v43 = vpop.f32.mrb[37].mxu1 }
 0x4c3   : > { %v933_v56 = vpop.f32.mrb[38].mxu1 }
 0x4c4   : > { %v10687_v62 = vmul.f32 0.17677669, %v933_v56  ;;  %v8478_v19 = vpop.f32.mrb[39].mxu1  ;;  %v1012_v26 = vsel %vm978_vm5, %v10685_v41, -inf }
 0x4c5   : > { %1013 = vmax.xlane.f32.xlu1 %v1012_v26 }
 0x4c6   : > { %v1015_v16 = vsel %vm978_vm5, %v10687_v62, -inf }
 0x4c7   : > { %1016 = vmax.xlane.f32.xlu0 %v1015_v16 }
 0x4c9   : > { %v938_v33 = vpop.f32.mrb[40].mxu1 }
 0x4ca   : > { %v10693_v46 = vmul.f32 0.17677669, %v938_v33  ;;  %v8481_v32 = vpop.f32.mrb[41].mxu1 }
 0x4cb   : > { %v941_v15 = vpop.f32.mrb[42].mxu1 }
 0x4cc   : > { %v10695_v39 = vmul.f32 0.17677669, %v941_v15  ;;  %v8482_v43 = vpop.f32.mrb[43].mxu1  ;;  %v1018_v56 = vsel %vm978_vm5, %v10693_v46, -inf }
 0x4cd   : > { %1019 = vmax.xlane.f32.xlu1 %v1018_v56 }
 0x4ce   : > { %v1021_v19 = vsel %vm978_vm5, %v10695_v39, -inf }
 0x4cf   : > { %1022 = vmax.xlane.f32.xlu0 %v1021_v19 }
 0x4d1   : > { %v946_v26 = vpop.f32.mrb[44].mxu1 }
 0x4d2   : > { %v10701_v13 = vmul.f32 0.17677669, %v946_v26  ;;  %v8485_v16 = vpop.f32.mrb[45].mxu1 }
 0x4d3   : > { %v949_v36 = vpop.f32.mrb[46].mxu1  ;;  %v10717_v16 = vpop.permute.xlu0 %1378 }
 0x4d4   : > { %v10703_v33 = vmul.f32 0.17677669, %v949_v36  ;;  %v8486_v32 = vpop.f32.mrb[47].mxu1  ;;  %v1024_v15 = vsel %vm978_vm5, %v10701_v13, -inf }
 0x4d5   : > { %1025 = vmax.xlane.f32.xlu1 %v1024_v15  ;;  %v10719_v32 = vpop.permute.xlu1 %1380 }
 0x4d6   : > { %v1027_v43 = vsel %vm978_vm5, %v10703_v33, -inf }
 0x4d7   : > { %1028 = vmax.xlane.f32.xlu0 %v1027_v43 }
 0x4d9   : > { %v954_v56 = vpop.f32.mrb[48].mxu1 }
 0x4da   : > { %v8489_v7 = vpop.f32.mrb[49].mxu1  ;;  %v10713_v36 = vmul.f32 0.17677669, %v954_v56 }
 0x4db   : > { %v957_v9 = vpop.f32.mrb[50].mxu1 }
 0x4dc   : > { %v8490_v19 = vpop.f32.mrb[51].mxu1  ;;  %v1030_v26 = vsel %vm978_vm5, %v10713_v36, -inf }
 0x4e6   : > { %1384 = vrot.lane.b32.xlu1 %v10496_v60, %s14459_s6 }
 0x4ed   : > { %1382 = vrot.lane.b32.xlu0 %v10480_v31, %s14459_s6 }
 0x50a   : > { %1031 = vmax.xlane.f32.xlu1 %v1030_v26 }
 0x52a   : > { %v981_v15 = vpop.xlane.xlu0 %980 }
 0x52b   : > { %v1033_v7 = vsub.f32 %v10641_v22, %v981_v15 }
 0x52c   : > { %v984_v9 = vpop.xlane.xlu1 %983 }
 0x52d   : > { %v1051_v43 = vmul.f32 1.442695, %v1033_v7  ;;  %v1034_v19 = vsub.f32 %v10645_v29, %v984_v9 }
 0x52f   : > { %9328 = vpow2.f32 %v1051_v43  ;;  %v1053_v6 = vmul.f32 1.442695, %v1034_v19 }
 0x531   : > { %9330 = vpow2.f32 %v1053_v6 }
 0x532   : > { %v987_v56 = vpop.xlane.xlu0 %986 }
 0x533   : > { %v1035_v8 = vsub.f32 %v10649_v38, %v987_v56 }
 0x535   : > { %v1055_v3 = vmul.f32 1.442695, %v1035_v8 }
 0x536   : > { %v990_v5 = vpop.xlane.xlu0 %989 }
 0x537   : > { %9332 = vpow2.f32 %v1055_v3  ;;  %v1036_v26 = vsub.f32 %v10653_v44, %v990_v5 }
 0x539   : > { %v10725_v2 = vpop.eup %9328  ;;  %v1057_v4 = vmul.f32 1.442695, %v1036_v26 }
 0x53a   : > { %v993_v51 = vpop.xlane.xlu0 %992  ;;  %v1087_v22 = vsel %vm978_vm5, %v10725_v2, 0.0 }
 0x53b   : > { %v10729_v15 = vpop.eup %9330  ;;  %9334 = vpow2.f32 %v1057_v4  ;;  %v1037_v6 = vsub.f32 %v10657_v12, %v993_v51  ;;  %1088 = vadd.xlane.f32.xlu0 %v1087_v22 }
 0x53c   : > { %v996_v29 = vpop.xlane.xlu1 %995  ;;  %v1090_v8 = vsel %vm978_vm5, %v10729_v15, 0.0 }
 0x53d   : > { %v1059_v3 = vmul.f32 1.442695, %v1037_v6  ;;  %v1038_v5 = vsub.f32 %v10661_v21, %v996_v29  ;;  %1091 = vadd.xlane.f32.xlu1 %v1090_v8 }
 0x53f   : > { %9336 = vpow2.f32 %v1059_v3  ;;  %v1061_v38 = vmul.f32 1.442695, %v1038_v5 }
 0x541   : > { %v10735_v44 = vpop.eup %9332  ;;  %9338 = vpow2.f32 %v1061_v38 }
 0x542   : > { %v999_v7 = vpop.xlane.xlu0 %998  ;;  %v1093_v4 = vsel %vm978_vm5, %v10735_v44, 0.0 }
 0x543   : > { %v1039_v51 = vsub.f32 %v10665_v28, %v999_v7  ;;  %1094 = vadd.xlane.f32.xlu0 %v1093_v4 }
 0x544   : > { %v1002_v12 = vpop.xlane.xlu1 %1001 }
 0x545   : > { %v10740_v9 = vpop.eup %9334  ;;  %v1063_v43 = vmul.f32 1.442695, %v1039_v51  ;;  %v1040_v19 = vsub.f32 %v10669_v34, %v1002_v12 }
 0x546   : > { %v1096_v21 = vsel %vm978_vm5, %v10740_v9, 0.0 }
 0x547   : > { %9340 = vpow2.f32 %v1063_v43  ;;  %v1065_v56 = vmul.f32 1.442695, %v1040_v19  ;;  %1097 = vadd.xlane.f32.xlu1 %v1096_v21 }
 0x549   : > { %v10745_v26 = vpop.eup %9336  ;;  %9342 = vpow2.f32 %v1065_v56 }
 0x54a   : > { %v1008_v22 = vpop.xlane.xlu1 %1007  ;;  %v1005_v6 = vpop.xlane.xlu0 %1004  ;;  %v1099_v28 = vsel %vm978_vm5, %v10745_v26, 0.0 }
 0x54b   : > { %v10749_v29 = vpop.eup %9338  ;;  %v1042_v8 = vsub.f32 %v10673_v54, %v1008_v22  ;;  %v1041_v34 = vsub.f32 %v10675_v18, %v1005_v6  ;;  %1100 = vadd.xlane.f32.xlu0 %v1099_v28 }
 0x54c   : > { %v1102_v3 = vsel %vm978_vm5, %v10749_v29, 0.0 }
 0x54d   : > { %v1067_v5 = vmul.f32 1.442695, %v1041_v34  ;;  %1103 = vadd.xlane.f32.xlu1 %v1102_v3  ;;  %v1069_v38 = vmul.f32 1.442695, %v1042_v8 }
 0x54e   : > { %v1011_v7 = vpop.xlane.xlu0 %1010 }
 0x54f   : > { %v1043_v4 = vsub.f32 %v10677_v30, %v1011_v7  ;;  %9344 = vpow2.f32 %v1067_v5 }
 0x550   : > { %9346 = vpow2.f32 %v1069_v38 }
 0x551   : > { %v10756_v51 = vpop.eup %9340  ;;  %v1071_v12 = vmul.f32 1.442695, %v1043_v4 }
 0x552   : > { %v1014_v43 = vpop.xlane.xlu1 %1013  ;;  %v1105_v54 = vsel %vm978_vm5, %v10756_v51, 0.0 }
 0x553   : > { %v10760_v18 = vpop.eup %9342  ;;  %v1044_v19 = vsub.f32 %v10685_v41, %v1014_v43  ;;  %1106 = vadd.xlane.f32.xlu0 %v1105_v54  ;;  %9348 = vpow2.f32 %v1071_v12 }
 0x554   : > { %v1108_v21 = vsel %vm978_vm5, %v10760_v18, 0.0  ;;  %v1017_v12 = vpop.xlane.xlu0 %1016 }
 0x555   : > { %v1073_v56 = vmul.f32 1.442695, %v1044_v19  ;;  %1109 = vadd.xlane.f32.xlu1 %v1108_v21 }
 0x557   : > { %9350 = vpow2.f32 %v1073_v56 }
 0x559   : > { %v10765_v30 = vpop.eup %9344 }
 0x55a   : > { %v1111_v22 = vsel %vm978_vm5, %v10765_v30, 0.0  ;;  %v10769_v6 = vpop.eup %9346  ;;  %v1020_v5 = vpop.xlane.xlu1 %1019 }
 0x55b   : > { %1112 = vadd.xlane.f32.xlu1 %v1111_v22  ;;  %v1114_v28 = vsel %vm978_vm5, %v10769_v6, 0.0  ;;  %v1046_v21 = vsub.f32 %v10693_v46, %v1020_v5 }
 0x55d   : > { %v10773_v41 = vpop.eup %9348 }
 0x55e   : > { %v1117_v3 = vsel %vm978_vm5, %v10773_v41, 0.0 }
 0x55f   : > { %1115 = vadd.xlane.f32.xlu1 %v1114_v28 }
 0x561   : > { %v10775_v8 = vpop.eup %9350 }
 0x562   : > { %v1120_v34 = vsel %vm978_vm5, %v10775_v8, 0.0  ;;  %v1026_v38 = vpop.xlane.xlu1 %1025 }
 0x563   : > { %1121 = vadd.xlane.f32.xlu0 %v1120_v34  ;;  %1118 = vadd.xlane.f32.xlu1 %v1117_v3  ;;  %v1048_v7 = vsub.f32 %v10701_v13, %v1026_v38  ;;  %v1023_v13 = vpop.xlane.xlu0 %1022  ;;  %v1077_v34 = vmul.f32 1.442695, %v1046_v21 }
 0x565   : > { %v1081_v4 = vmul.f32 1.442695, %v1048_v7 }
 0x566   : > { %v10795_v43 = vpop.permute.xlu1 %1384 }
 0x567   : > { %9352 = vpow2.f32 %v1081_v4  ;;  %v1029_v3 = vpop.xlane.xlu0 %1028 }
 0x568   : > { %v1049_v7 = vsub.f32 %v10703_v33, %v1029_v3  ;;  %v1407_v3 = vsel %vm740_vm3, %v10719_v32, 0 }
 0x56a   : > { %v1083_v46 = vmul.f32 1.442695, %v1049_v7 }
 0x571   : > { %v10797_v54 = vpop.eup %9352 }
 0x574   : > { %1500 = vrot.lane.b32.xlu1 %v10506_v23, %s14459_s6 }
 0x578   : > { %1368 = vrot.lane.b32.xlu1 %v10446_v47, %s14457_s27  ;;  %v1045_v47 = vsub.f32 %v10687_v62, %v1017_v12  ;;  %v1047_v62 = vsub.f32 %v10695_v39, %v1023_v13 }
 0x579   : > { %1386 = vrot.lane.b32.xlu0 %v10473_v27, %s14459_s6 }
 0x57a   : > { %v1075_v19 = vmul.f32 1.442695, %v1045_v47  ;;  %v1079_v38 = vmul.f32 1.442695, %v1047_v62 }
 0x57c   : > { %1502 = vrot.lane.b32.xlu1 %v10516_v61, %s14459_s6  ;;  %9354 = vpow2.f32 %v1075_v19 }
 0x580   : > { %1370 = vrot.lane.b32.xlu1 %v10459_v63, %s14457_s27  ;;  %v1132_v63 = vsel %vm978_vm5, %v10797_v54, 0.0 }
 0x584   : > { %1504 = vrot.lane.b32.xlu1 %v10527_v55, %s14459_s6 }
 0x586   : > { %v10805_v5 = vpop.eup %9354 }
 0x587   : > { %v1123_v39 = vsel %vm978_vm5, %v10805_v5, 0.0 }
 0x597   : > { %v1032_v56 = vpop.xlane.xlu1 %1031 }
 0x598   : > { %v1050_v22 = vsub.f32 %v10713_v36, %v1032_v56  ;;  %1133 = vadd.xlane.f32.xlu0 %v1132_v63  ;;  %v1383_v63 = vpop.permute.xlu0 %1382 }
 0x59a   : > { %v1085_v28 = vmul.f32 1.442695, %v1050_v22 }
 0x59c   : > { %9356 = vpow2.f32 %v1085_v28 }
 0x59d   : > { %9358 = vpow2.f32 %v1077_v34 }
 0x59e   : > { %9360 = vpow2.f32 %v1079_v38 }
 0x59f   : > { %9362 = vpow2.f32 %v1083_v46 }
 0x5a6   : > { %v10807_v4 = vpop.eup %9356 }
 0x5a7   : > { %v1138_v36 = vsel %vm978_vm5, %v10807_v4, 0.0  ;;  %v10813_v12 = vpop.eup %9358 }
 0x5a8   : > { %1139 = vadd.xlane.f32.xlu0 %v1138_v36  ;;  %1124 = vadd.xlane.f32.xlu1 %v1123_v39  ;;  %v1126_v33 = vsel %vm978_vm5, %v10813_v12, 0.0  ;;  %v10817_v47 = vpop.eup %9360 }
 0x5a9   : > { %v1129_v19 = vsel %vm978_vm5, %v10817_v47, 0.0  ;;  %v10821_v21 = vpop.eup %9362 }
 0x5aa   : > { %v1135_v56 = vsel %vm978_vm5, %v10821_v21, 0.0 }
 0x5ac   : > { %1127 = vadd.xlane.f32.xlu1 %v1126_v33 }
 0x5b0   : > { %1130 = vadd.xlane.f32.xlu1 %v1129_v19 }
 0x5b4   : > { %1136 = vadd.xlane.f32.xlu1 %v1135_v56 }
 0x5be   : > { %1372 = vrot.lane.b32.xlu0 %v10480_v31, %s14457_s27 }
 0x5c2   : > { %1496 = vrot.lane.b32.xlu0 %v10541_v49, %s14457_s27 }
 0x5c5   : > { %1506 = vrot.lane.b32.xlu1 %v10541_v49, %s14459_s6 }
 0x5c6   : > { %1498 = vrot.lane.b32.xlu0 %v10533_v57, %s14457_s27 }
 0x5c8   : > { %v1089_v13 = vpop.xlane.xlu0 %1088 }
 0x5c9   : > { %9364 = vrcp.f32 %v1089_v13  ;;  %1374 = vrot.lane.b32.xlu1 %v10496_v60, %s14457_s27 }
 0x5ca   : > { %v1092_v22 = vpop.xlane.xlu1 %1091  ;;  %1843 = vrot.lane.b32.xlu0 %v10448_v50, %s14457_s27 }
 0x5cb   : > { %9366 = vrcp.f32 %v1092_v22 }
 0x5cd   : > { %1508 = vrot.lane.b32.xlu1 %v10533_v57, %s14459_s6 }
 0x5ce   : > { %1847 = vrot.lane.b32.xlu0 %v10484_v59, %s14457_s27 }
 0x5d0   : > { %v1095_v31 = vpop.xlane.xlu0 %1094 }
 0x5d1   : > { %1490 = vrot.lane.b32.xlu1 %v10506_v23, %s14457_s27  ;;  %9368 = vrcp.f32 %v1095_v31  ;;  %v1404_v23 = vsel %vm740_vm3, %v10717_v16, 0 }
 0x5d2   : > { %1851 = vrot.lane.b32.xlu0 %v10583_v58, %s14457_s27 }
 0x5d3   : > { %v9365_v49 = vpop.eup %9364 }
 0x5d4   : > { %v1098_v60 = vpop.xlane.xlu1 %1097  ;;  %v1159_v50 = vmul.f32 %v9365_v49, %v10725_v2  ;;  %v14503_v2 = vmov 0.0  }
 0x5d5   : > { %v9367_v28 = vpop.eup %9366  ;;  %9370 = vrcp.f32 %v1098_v60  ;;  %1492 = vrot.lane.b32.xlu1 %v10516_v61, %s14457_s27 }
 0x5d6   : > { %v1160_v34 = vmul.f32 %v9367_v28, %v10729_v15 }
 0x5d8   : > { %v1177_v59 = vpack.c.bf16 %v1160_v34, %v1159_v50  ;;  %v1101_v57 = vpop.xlane.xlu0 %1100 }
 0x5d9   : > { %9372 = vrcp.f32 %v1101_v57  ;;  %1494 = vrot.lane.b32.xlu1 %v10527_v55, %s14457_s27 }
 0x5da   : > { %v1104_v58 = vpop.xlane.xlu1 %1103  ;;  %8502 = vmatmul.mubr.msk.bf16.vlgmr.msra.gmra.mrb[32].mxu0 %vm978_vm5, %v1177_v59 }
 0x5db   : > { %9374 = vrcp.f32 %v1104_v58  ;;  %8552 = vmatpush3.bf16.xpose.msra.mxu0 %v1404_v23  ;;  %8505 = vmatprep.mubr.msk.bf16.mxu0 %vm9984_vm2, %v14503_v2  ;;  %v9369_v61 = vpop.eup %9368 }
 0x5dc   : > { %8553 = vmatprep.subr.bf16.mxu0 %v14503_v2  ;;  %v1161_v62 = vmul.f32 %v9369_v61, %v10735_v44 }
 0x5dd   : > { %1376 = vrot.lane.b32.xlu1 %v10473_v27, %s14457_s27 }
 0x5df   : > { %v9371_v15 = vpop.eup %9370 }
 0x5e0   : > { %v1107_v16 = vpop.xlane.xlu0 %1106  ;;  %v1162_v55 = vmul.f32 %v9371_v15, %v10740_v9  ;;  %v1410_v9 = vsel %vm740_vm3, %v1383_v63, 0  ;;  %v1413_v63 = vsel %vm740_vm3, %v10795_v43, 0 }
 0x5e1   : > { %9376 = vrcp.f32 %v1107_v16  ;;  %1845 = vrot.lane.b32.xlu1 %v10464_v11, %s14457_s27 }
 0x5e2   : > { %v1110_v38 = vpop.xlane.xlu1 %1109  ;;  %v1178_v7 = vpack.c.bf16 %v1162_v55, %v1161_v62 }
 0x5e3   : > { %9378 = vrcp.f32 %v1110_v38  ;;  %8554 = vmatpush3.bf16.xpose.msra.mxu0 %v1407_v3  ;;  %v9373_v46 = vpop.eup %9372 }
 0x5e4   : > { %8506 = vmatmul.mubr.msk.bf16.gmra.mrb[36].mxu0 %vm978_vm5, %v1178_v7  ;;  %8555 = vmatprep.subr.bf16.mxu0 %v14503_v2  ;;  %v1163_v11 = vmul.f32 %v9373_v46, %v10745_v26 }
 0x5e5   : > { %v9375_v27 = vpop.eup %9374  ;;  %8509 = vmatprep.mubr.msk.bf16.mxu0 %vm9984_vm2, %v14503_v2  ;;  %1849 = vrot.lane.b32.xlu1 %v10498_v14, %s14457_s27 }
 0x5e6   : > { %v1164_v32 = vmul.f32 %v9375_v27, %v10749_v29 }
 0x5e8   : > { %v1113_v44 = vpop.xlane.xlu1 %1112  ;;  %v1179_v36 = vpack.c.bf16 %v1164_v32, %v1163_v11 }
 0x5e9   : > { %9380 = vrcp.f32 %v1113_v44 }
 0x5eb   : > { %8556 = vmatpush3.bf16.xpose.msra.mxu0 %v1410_v9  ;;  %v9377_v39 = vpop.eup %9376 }
 0x5ec   : > { %8510 = vmatmul.mubr.msk.bf16.gmra.mrb[40].mxu0 %vm978_vm5, %v1179_v36  ;;  %8557 = vmatprep.subr.bf16.mxu0 %v14503_v2  ;;  %v1116_v19 = vpop.xlane.xlu1 %1115  ;;  %v1165_v26 = vmul.f32 %v9377_v39, %v10756_v51 }
 0x5ed   : > { %v9379_v33 = vpop.eup %9378  ;;  %8513 = vmatprep.mubr.msk.bf16.mxu0 %vm9984_vm2, %v14503_v2  ;;  %9382 = vrcp.f32 %v1116_v19 }
 0x5ee   : > { %v1166_v14 = vmul.f32 %v9379_v33, %v10760_v18 }
 0x5f0   : > { %v1119_v29 = vpop.xlane.xlu1 %1118  ;;  %v1122_v56 = vpop.xlane.xlu0 %1121  ;;  %v1180_v13 = vpack.c.bf16 %v1166_v14, %v1165_v26 }
 0x5f1   : > { %9384 = vrcp.f32 %v1119_v29 }
 0x5f2   : > { %9386 = vrcp.f32 %v1122_v56 }
 0x5f3   : > { %8558 = vmatpush3.bf16.xpose.msra.mxu0 %v1413_v63  ;;  %v9381_v22 = vpop.eup %9380 }
 0x5f4   : > { %8514 = vmatmul.mubr.msk.bf16.gmra.mrb[44].mxu0 %vm978_vm5, %v1180_v13  ;;  %8559 = vmatprep.subr.bf16.mxu0 %v14503_v2  ;;  %v1501_v18 = vpop.permute.xlu1 %1500  ;;  %v1167_v31 = vmul.f32 %v9381_v22, %v10765_v30  ;;  %v1387_v51 = vpop.permute.xlu0 %1386 }
 0x5f5   : > { %8517 = vmatprep.mubr.msk.bf16.mxu0 %vm9984_vm2, %v14503_v2  ;;  %v1416_v60 = vsel %vm740_vm3, %v1387_v51, 0  ;;  %v1526_v57 = vsel %vm740_vm3, %v1501_v18, 0 }
 0x5f6   : > { %v1181_v28 = vpack.c.bf16 %v1167_v31, %v1167_v31 }
 0x5f7   : > { %v9383_v49 = vpop.eup %9382 }
 0x5f8   : > { %v1369_v50 = vpop.permute.xlu1 %1368  ;;  %v1168_v34 = vmul.f32 %v9383_v49, %v10769_v6 }
 0x5fb   : > { %8560 = vmatpush3.bf16.xpose.msra.mxu0 %v1416_v60  ;;  %v9385_v43 = vpop.eup %9384 }
 0x5fc   : > { %8518 = vmatmul.mubr.msk.bf16.gmra.mrb[48].mxu0 %vm978_vm5, %v1181_v28  ;;  %8611 = vmatprep.subr.bf16.mxu0 %v14503_v2  ;;  %v1169_v59 = vmul.f32 %v9385_v43, %v10773_v41  ;;  %v1503_v23 = vpop.permute.xlu1 %1502  ;;  %v9387_v46 = vpop.eup %9386 }
 0x5fd   : > { %8561 = vmatprep.mubr.msk.bf16.mxu0 %vm9984_vm2, %v14503_v2  ;;  %v1529_v41 = vsel %vm740_vm3, %v1503_v23, 0  ;;  %v1170_v44 = vmul.f32 %v9387_v46, %v10775_v8 }
 0x5fe   : > { %v1182_v30 = vpack.c.bf16 %v1169_v59, %v1168_v34 }
 0x600   : > { %8532 = vmatmul.mubr.msk.bf16.vlgmr.msra.gmra.mrb[52].mxu1 %vm978_vm5, %v1182_v30  ;;  %v1371_v6 = vpop.permute.xlu1 %1370 }
 0x601   : > { %8582 = vmatpush3.bf16.xpose.msra.mxu1 %v1526_v57  ;;  %8535 = vmatprep.mubr.msk.bf16.mxu1 %vm9984_vm2, %v14503_v2 }
 0x602   : > { %8583 = vmatprep.subr.bf16.mxu1 %v14503_v2 }
 0x604   : > { %8562 = vmatmul.mubr.msk.bf16.vlgmr.msra.gmra.mrb[52].mxu0 %vm740_vm3, %v1369_v50  ;;  %v1505_v58 = vpop.permute.xlu1 %1504 }
 0x605   : > { %8565 = vmatprep.mubr.msk.bf16.mxu0 %vm9984_vm2, %v14503_v2  ;;  %v1532_v61 = vsel %vm740_vm3, %v1505_v58, 0 }
 0x609   : > { %8584 = vmatpush3.bf16.xpose.msra.mxu1 %v1529_v41 }
 0x60a   : > { %8585 = vmatprep.subr.bf16.mxu1 %v14503_v2 }
 0x60c   : > { %8566 = vmatmul.mubr.msk.bf16.gmra.mrb[56].mxu0 %vm740_vm3, %v1371_v6 }
 0x60d   : > { %8569 = vmatprep.mubr.msk.bf16.mxu0 %vm9984_vm2, %v14503_v2 }
 0x611   : > { %8586 = vmatpush3.bf16.xpose.msra.mxu1 %v1532_v61 }
 0x612   : > { %8587 = vmatprep.subr.bf16.mxu1 %v14503_v2 }
 0x625   : > { %v1134_v15 = vpop.xlane.xlu0 %1133 }
 0x635   : > { %v1140_v16 = vpop.xlane.xlu0 %1139  ;;  %v1125_v62 = vpop.xlane.xlu1 %1124 }
 0x636   : > { %9388 = vrcp.f32 %v1125_v62 }
 0x639   : > { %v1373_v55 = vpop.permute.xlu0 %1372  ;;  %v1128_v3 = vpop.xlane.xlu1 %1127 }
 0x63a   : > { %8570 = vmatmul.mubr.msk.bf16.gmra.mrb[60].mxu0 %vm740_vm3, %v1373_v55  ;;  %9390 = vrcp.f32 %v1128_v3 }
 0x63b   : > { %8573 = vmatprep.mubr.msk.bf16.mxu0 %vm9984_vm2, %v14503_v2 }
 0x63d   : > { %v10912_v38 = vpop.permute.xlu0 %1496  ;;  %v1131_v7 = vpop.xlane.xlu1 %1130 }
 0x63e   : > { %9392 = vrcp.f32 %v1131_v7 }
 0x640   : > { %v9389_v27 = vpop.eup %9388 }
 0x641   : > { %v10914_v32 = vpop.permute.xlu0 %1498  ;;  %v1137_v11 = vpop.xlane.xlu1 %1136  ;;  %v1171_v9 = vmul.f32 %v9389_v27, %v10805_v5 }
 0x642   : > { %9394 = vrcp.f32 %v1137_v11 }
 0x643   : > { %v1183_v36 = vpack.c.bf16 %v1171_v9, %v1170_v44  ;;  %9396 = vrcp.f32 %v1134_v15 }
 0x644   : > { %v9391_v19 = vpop.eup %9390  ;;  %9398 = vrcp.f32 %v1140_v16 }
 0x645   : > { %v1844_v39 = vpop.permute.xlu0 %1843  ;;  %v1507_v33 = vpop.permute.xlu1 %1506  ;;  %8536 = vmatmul.mubr.msk.bf16.gmra.mrb[56].mxu1 %vm978_vm5, %v1183_v36  ;;  %v1172_v26 = vmul.f32 %v9391_v19, %v10813_v12 }
 0x646   : > { %8612 = vmatpush3.bf16.msra.mxu0 %v1844_v39  ;;  %v1535_v14 = vsel %vm740_vm3, %v1507_v33, 0  ;;  %8539 = vmatprep.mubr.msk.bf16.mxu1 %vm9984_vm2, %v14503_v2 }
 0x647   : > { %8613 = vmatprep.subr.bf16.mxu0 %v14503_v2  ;;  %8588 = vmatpush3.bf16.xpose.msra.mxu1 %v1535_v14 }
 0x648   : > { %v9393_v8 = vpop.eup %9392  ;;  %8589 = vmatprep.subr.bf16.mxu1 %v14503_v2 }
 0x649   : > { %v1375_v5 = vpop.permute.xlu1 %1374  ;;  %v1173_v29 = vmul.f32 %v9393_v8, %v10817_v47 }
 0x64a   : > { %8574 = vmatmul.mubr.msk.bf16.gmra.mrb[64].mxu0 %vm740_vm3, %v1375_v5 }
 0x64b   : > { %v1184_v56 = vpack.c.bf16 %v1173_v29, %v1172_v26  ;;  %8577 = vmatprep.mubr.msk.bf16.mxu0 %vm9984_vm2, %v14503_v2 }
 0x64c   : > { %v9395_v63 = vpop.eup %9394 }
 0x64d   : > { %v1509_v13 = vpop.permute.xlu1 %1508  ;;  %8540 = vmatmul.mubr.msk.bf16.gmra.mrb[60].mxu1 %vm978_vm5, %v1184_v56  ;;  %v9397_v22 = vpop.eup %9396  ;;  %v1175_v12 = vmul.f32 %v9395_v63, %v10821_v21 }
 0x64e   : > { %v1538_v18 = vsel %vm740_vm3, %v1509_v13, 0  ;;  %8543 = vmatprep.mubr.msk.bf16.mxu1 %vm9984_vm2, %v14503_v2  ;;  %v1174_v31 = vmul.f32 %v9397_v22, %v10797_v54  ;;  %v9399_v49 = vpop.eup %9398  ;;  %v1848_v21 = vpop.permute.xlu0 %1847 }
 0x64f   : > { %8590 = vmatpush3.bf16.xpose.msra.mxu1 %v1538_v18  ;;  %v1176_v28 = vmul.f32 %v9399_v49, %v10807_v4 }
 0x650   : > { %8641 = vmatprep.subr.bf16.mxu1 %v14503_v2  ;;  %v1185_v51 = vpack.c.bf16 %v1175_v12, %v1174_v31 }
 0x651   : > { %v1491_v47 = vpop.permute.xlu1 %1490  ;;  %v1186_v50 = vpack.c.bf16 %v1176_v28, %v1176_v28 }
 0x652   : > { %v1852_v59 = vpop.permute.xlu0 %1851 }
 0x653   : > { %v1873_v30 = vsel %vm1202_vm4, %v1852_v59, 0 }
 0x655   : > { %v1493_v60 = vpop.permute.xlu1 %1492  ;;  %8544 = vmatmul.mubr.msk.bf16.gmra.mrb[64].mxu1 %vm978_vm5, %v1185_v51 }
 0x656   : > { %8547 = vmatprep.mubr.msk.bf16.mxu1 %vm9984_vm2, %v14503_v2 }
 0x659   : > { %v1495_v43 = vpop.permute.xlu1 %1494 }
 0x65d   : > { %v1377_v34 = vpop.permute.xlu1 %1376  ;;  %8548 = vmatmul.mubr.msk.bf16.gmra.mrb[68].mxu1 %vm978_vm5, %v1186_v50 }
 0x65e   : > { %8578 = vmatmul.mubr.msk.bf16.gmra.mrb[68].mxu0 %vm740_vm3, %v1377_v34  ;;  %8591 = vmatprep.mubr.msk.bf16.mxu1 %vm9984_vm2, %v14503_v2 }
 0x65f   : > { %8621 = vmatprep.mubr.msk.bf16.mxu0 %vm9984_vm2, %v14503_v2 }
 0x661   : > { %v1846_v54 = vpop.permute.xlu1 %1845 }
 0x662   : > { %8614 = vmatpush3.bf16.msra.mxu0 %v1846_v54 }
 0x663   : > { %8615 = vmatprep.subr.bf16.mxu0 %v14503_v2 }
 0x665   : > { %8592 = vmatmul.mubr.msk.bf16.vlgmr.msra.gmra.mrb[72].mxu1 %vm740_vm3, %v1491_v47  ;;  %v1850_v4 = vpop.permute.xlu1 %1849 }
 0x666   : > { %8616 = vmatpush3.bf16.msra.mxu0 %v1848_v21  ;;  %8595 = vmatprep.mubr.msk.bf16.mxu1 %vm9984_vm2, %v14503_v2 }
 0x667   : > { %8617 = vmatprep.subr.bf16.mxu0 %v14503_v2 }
 0x66a   : > { %8618 = vmatpush3.bf16.msra.mxu0 %v1850_v4 }
 0x66b   : > { %8619 = vmatprep.subr.bf16.mxu0 %v14503_v2 }
 0x66d   : > { %8596 = vmatmul.mubr.msk.bf16.gmra.mrb[76].mxu1 %vm740_vm3, %v1493_v60 }
 0x66e   : > { %8620 = vmatpush3.bf16.msra.mxu0 %v1873_v30  ;;  %8599 = vmatprep.mubr.msk.bf16.mxu1 %vm9984_vm2, %v14503_v2 }
 0x675   : > { %8600 = vmatmul.mubr.msk.bf16.gmra.mrb[80].mxu1 %vm740_vm3, %v1495_v43 }
 0x676   : > { %8603 = vmatprep.mubr.msk.bf16.mxu1 %vm9984_vm2, %v14503_v2 }
 0x67d   : > { %8604 = vmatmul.mubr.msk.bf16.gmra.mrb[84].mxu1 %vm740_vm3, %v10912_v38 }
 0x67e   : > { %8607 = vmatprep.mubr.msk.bf16.mxu1 %vm9984_vm2, %v14503_v2 }
 0x685   : > { %8608 = vmatmul.mubr.msk.bf16.gmra.mrb[88].mxu1 %vm740_vm3, %v10914_v32 }
 0x686   : > { %8651 = vmatprep.mubr.msk.bf16.mxu1 %vm9984_vm2, %v14503_v2 }
 0x6ad   : > { %v10967_v57 = vpop.f32.mrb[32].mxu0 }
 0x6ae   : > { %v8503_v23 = vpop.f32.mrb[33].mxu0 }
 0x6af   : > { %v10969_v6 = vpop.f32.mrb[34].mxu0 }
 0x6b0   : > { %v8504_v41 = vpop.f32.mrb[35].mxu0 }
 0x6b7   : > { %v10971_v58 = vpop.f32.mrb[36].mxu0 }
 0x6b8   : > { %v8507_v61 = vpop.f32.mrb[37].mxu0 }
 0x6b9   : > { %v10973_v15 = vpop.f32.mrb[38].mxu0 }
 0x6ba   : > { %v8508_v16 = vpop.f32.mrb[39].mxu0 }
 0x6bf   : > { %v10975_v62 = vpop.f32.mrb[40].mxu0 }
 0x6c0   : > { %v8511_v55 = vpop.f32.mrb[41].mxu0 }
 0x6c1   : > { %v10977_v3 = vpop.f32.mrb[42].mxu0 }
 0x6c2   : > { %v8512_v38 = vpop.f32.mrb[43].mxu0 }
 0x6c7   : > { %v10979_v7 = vpop.f32.mrb[44].mxu0 }
 0x6c8   : > { %v8515_v46 = vpop.f32.mrb[45].mxu0 }
 0x6c9   : > { %v10981_v27 = vpop.f32.mrb[46].mxu0 }
 0x6ca   : > { %v8516_v32 = vpop.f32.mrb[47].mxu0 }
 0x6cf   : > { %v10983_v11 = vpop.f32.mrb[48].mxu0 }
 0x6d0   : > { %v8519_v44 = vpop.f32.mrb[49].mxu0 }
 0x6d1   : > { %v1275_v9 = vpop.f32.mrb[50].mxu0 }
 0x6d2   : > { %v8520_v36 = vpop.f32.mrb[51].mxu0 }
 0x6d3   : > { %v10985_v39 = vpop.f32.mrb[52].mxu1 }
 0x6d4   : > { %v8533_v33 = vpop.f32.mrb[53].mxu1 }
 0x6d5   : > { %v10987_v19 = vpop.f32.mrb[54].mxu1 }
 0x6d6   : > { %v8534_v14 = vpop.f32.mrb[55].mxu1 }
 0x6d7   : > { %v1452_v8 = vpop.f32.mrb[52].mxu0 }
 0x6d8   : > { %v10989_v5 = vmul.f32 0.17677669, %v1452_v8  ;;  %v8563_v26 = vpop.f32.mrb[53].mxu0 }
 0x6d9   : > { %v1455_v29 = vpop.f32.mrb[54].mxu0 }
 0x6da   : > { %v10991_v56 = vmul.f32 0.17677669, %v1455_v29  ;;  %v8564_v63 = vpop.f32.mrb[55].mxu0  ;;  %v1630_v13 = vsel %vm978_vm5, %v10989_v5, -inf }
 0x6db   : > { %1631 = vmax.xlane.f32.xlu1 %v1630_v13 }
 0x6dc   : > { %v1633_v22 = vsel %vm978_vm5, %v10991_v56, -inf }
 0x6dd   : > { %1634 = vmax.xlane.f32.xlu0 %v1633_v22 }
 0x6df   : > { %v1460_v18 = vpop.f32.mrb[56].mxu0 }
 0x6e0   : > { %v10997_v12 = vmul.f32 0.17677669, %v1460_v18  ;;  %v8567_v47 = vpop.f32.mrb[57].mxu0 }
 0x6e1   : > { %v1463_v31 = vpop.f32.mrb[58].mxu0 }
 0x6e2   : > { %v10999_v51 = vmul.f32 0.17677669, %v1463_v31  ;;  %v8568_v49 = vpop.f32.mrb[59].mxu0  ;;  %v1636_v60 = vsel %vm978_vm5, %v10997_v12, -inf }
 0x6e3   : > { %1637 = vmax.xlane.f32.xlu0 %v1636_v60 }
 0x6e4   : > { %v1639_v28 = vsel %vm978_vm5, %v10999_v51, -inf }
 0x6e5   : > { %1640 = vmax.xlane.f32.xlu1 %v1639_v28 }
 0x70d   : > { %v1468_v43 = vpop.f32.mrb[60].mxu0 }
 0x70e   : > { %v11005_v50 = vmul.f32 0.17677669, %v1468_v43  ;;  %v8571_v34 = vpop.f32.mrb[61].mxu0 }
 0x70f   : > { %v1471_v54 = vpop.f32.mrb[62].mxu0 }
 0x710   : > { %v11007_v21 = vmul.f32 0.17677669, %v1471_v54  ;;  %v8572_v4 = vpop.f32.mrb[63].mxu0  ;;  %v1642_v59 = vsel %vm978_vm5, %v11005_v50, -inf }
 0x711   : > { %1643 = vmax.xlane.f32.xlu0 %v1642_v59 }
 0x712   : > { %v1645_v30 = vsel %vm978_vm5, %v11007_v21, -inf }
 0x713   : > { %1646 = vmax.xlane.f32.xlu1 %v1645_v30 }
 0x718   : > { %v11013_v23 = vpop.f32.mrb[56].mxu1 }
 0x719   : > { %v8537_v41 = vpop.f32.mrb[57].mxu1 }
 0x71a   : > { %v11015_v61 = vpop.f32.mrb[58].mxu1 }
 0x71b   : > { %v8538_v16 = vpop.f32.mrb[59].mxu1 }
 0x71d   : > { %v1476_v55 = vpop.f32.mrb[64].mxu0 }
 0x71e   : > { %v11017_v38 = vmul.f32 0.17677669, %v1476_v55  ;;  %v8575_v46 = vpop.f32.mrb[65].mxu0 }
 0x71f   : > { %v1479_v32 = vpop.f32.mrb[66].mxu0 }
 0x720   : > { %v11019_v44 = vmul.f32 0.17677669, %v1479_v32  ;;  %v11021_v9 = vpop.f32.mrb[60].mxu1  ;;  %v8576_v36 = vpop.f32.mrb[67].mxu0  ;;  %v1648_v33 = vsel %vm978_vm5, %v11017_v38, -inf }
 0x721   : > { %v8541_v14 = vpop.f32.mrb[61].mxu1  ;;  %1649 = vmax.xlane.f32.xlu0 %v1648_v33 }
 0x722   : > { %v11025_v8 = vpop.f32.mrb[62].mxu1  ;;  %v1651_v26 = vsel %vm978_vm5, %v11019_v44, -inf }
 0x723   : > { %v8542_v29 = vpop.f32.mrb[63].mxu1  ;;  %1652 = vmax.xlane.f32.xlu1 %v1651_v26 }
 0x728   : > { %v11029_v63 = vpop.f32.mrb[64].mxu1 }
 0x729   : > { %v8545_v13 = vpop.f32.mrb[65].mxu1 }
 0x72a   : > { %v11031_v22 = vpop.f32.mrb[66].mxu1 }
 0x72b   : > { %v8546_v18 = vpop.f32.mrb[67].mxu1 }
 0x730   : > { %v11033_v47 = vpop.f32.mrb[68].mxu1 }
 0x731   : > { %v8549_v31 = vpop.f32.mrb[69].mxu1  ;;  %v1484_v49 = vpop.f32.mrb[68].mxu0 }
 0x732   : > { %v1365_v60 = vpop.f32.mrb[70].mxu1  ;;  %v8579_v28 = vpop.f32.mrb[69].mxu0  ;;  %v11037_v16 = vmul.f32 0.17677669, %v1484_v49 }
 0x733   : > { %v8550_v43 = vpop.f32.mrb[71].mxu1  ;;  %v1487_v34 = vpop.f32.mrb[70].mxu0 }
 0x734   : > { %v8580_v54 = vpop.f32.mrb[71].mxu0  ;;  %v1654_v33 = vsel %vm978_vm5, %v11037_v16, -inf }
 0x738   : > { %v1574_v4 = vpop.f32.mrb[72].mxu1 }
 0x739   : > { %v11035_v59 = vmul.f32 0.17677669, %v1574_v4  ;;  %v8593_v30 = vpop.f32.mrb[73].mxu1 }
 0x73a   : > { %v1577_v41 = vpop.f32.mrb[74].mxu1 }
 0x73b   : > { %v11039_v55 = vmul.f32 0.17677669, %v1577_v41  ;;  %v8594_v46 = vpop.f32.mrb[75].mxu1  ;;  %v1657_v32 = vsel %vm978_vm5, %v11035_v59, -inf }
 0x73c   : > { %1658 = vmax.xlane.f32.xlu0 %v1657_v32 }
 0x73d   : > { %v1660_v36 = vsel %vm978_vm5, %v11039_v55, -inf }
 0x73e   : > { %1661 = vmax.xlane.f32.xlu1 %v1660_v36 }
 0x740   : > { %v1582_v14 = vpop.f32.mrb[76].mxu1  ;;  %1655 = vmax.xlane.f32.xlu0 %v1654_v33 }
 0x741   : > { %v11047_v26 = vmul.f32 0.17677669, %v1582_v14  ;;  %v8597_v29 = vpop.f32.mrb[77].mxu1 }
 0x742   : > { %v1585_v13 = vpop.f32.mrb[78].mxu1 }
 0x743   : > { %v11049_v18 = vmul.f32 0.17677669, %v1585_v13  ;;  %v8598_v31 = vpop.f32.mrb[79].mxu1  ;;  %v1663_v49 = vsel %vm978_vm5, %v11047_v26, -inf }
 0x744   : > { %1664 = vmax.xlane.f32.xlu0 %v1663_v49 }
 0x745   : > { %v1666_v60 = vsel %vm978_vm5, %v11049_v18, -inf }
 0x746   : > { %1667 = vmax.xlane.f32.xlu1 %v1666_v60 }
 0x748   : > { %v1590_v28 = vpop.f32.mrb[80].mxu1 }
 0x749   : > { %v8601_v43 = vpop.f32.mrb[81].mxu1 }
 0x74a   : > { %v1593_v34 = vpop.f32.mrb[82].mxu1 }
 0x74b   : > { %v8602_v54 = vpop.f32.mrb[83].mxu1 }
 0x750   : > { %v1598_v4 = vpop.f32.mrb[84].mxu1 }
 0x751   : > { %v8605_v30 = vpop.f32.mrb[85].mxu1 }
 0x752   : > { %v1601_v41 = vpop.f32.mrb[86].mxu1 }
 0x753   : > { %v8606_v46 = vpop.f32.mrb[87].mxu1 }
 0x754   : > { %v11062_v46 = vmul.f32 0.17677669, %v1590_v28 }
 0x757   : > { %1952 = vrot.lane.b32.xlu1 %v10508_v17, %s14457_s27 }
 0x758   : > { %v1606_v32 = vpop.f32.mrb[88].mxu1 }
 0x759   : > { %v8609_v36 = vpop.f32.mrb[89].mxu1 }
 0x75a   : > { %1954 = vrot.lane.b32.xlu0 %v10518_v35, %s14457_s27  ;;  %v1609_v33 = vpop.f32.mrb[90].mxu1 }
 0x75b   : > { %v8610_v14 = vpop.f32.mrb[91].mxu1  ;;  %v11065_v33 = vmul.f32 0.17677669, %v1593_v34 }
 0x75c   : > { %v11067_v14 = vmul.f32 0.17677669, %v1598_v4  ;;  %v11079_v4 = vmul.f32 0.17677669, %v1606_v32 }
 0x75d   : > { %v1672_v28 = vsel %vm978_vm5, %v11065_v33, -inf }
 0x768   : > { %v1632_v29 = vpop.xlane.xlu1 %1631 }
 0x769   : > { %v1684_v13 = vsub.f32 %v10989_v5, %v1632_v29  ;;  %v1669_v5 = vsel %vm978_vm5, %v11062_v46, -inf }
 0x76a   : > { %v1635_v31 = vpop.xlane.xlu0 %1634 }
 0x76b   : > { %v1702_v49 = vmul.f32 1.442695, %v1684_v13  ;;  %v1685_v54 = vsub.f32 %v10991_v56, %v1635_v31  ;;  %v11071_v56 = vmul.f32 0.17677669, %v1601_v41  ;;  %v1681_v31 = vsel %vm978_vm5, %v11079_v4, -inf }
 0x76d   : > { %9400 = vpow2.f32 %v1702_v49  ;;  %v1704_v36 = vmul.f32 1.442695, %v1685_v54  ;;  %v1678_v29 = vsel %vm978_vm5, %v11071_v56, -inf }
 0x770   : > { %v1638_v60 = vpop.xlane.xlu0 %1637 }
 0x771   : > { %v1686_v43 = vsub.f32 %v10997_v12, %v1638_v60 }
 0x772   : > { %v1641_v30 = vpop.xlane.xlu1 %1640 }
 0x773   : > { %v1706_v17 = vmul.f32 1.442695, %v1686_v43  ;;  %v1687_v35 = vsub.f32 %v10999_v51, %v1641_v30  ;;  %v1675_v51 = vsel %vm978_vm5, %v11067_v14, -inf }
 0x775   : > { %9402 = vpow2.f32 %v1706_v17  ;;  %v1708_v12 = vmul.f32 1.442695, %v1687_v35 }
 0x776   : > { %9404 = vpow2.f32 %v1704_v36 }
 0x777   : > { %v11077_v34 = vpop.eup %9400  ;;  %9406 = vpow2.f32 %v1708_v12 }
 0x778   : > { %v1738_v41 = vsel %vm978_vm5, %v11077_v34, 0.0 }
 0x779   : > { %1670 = vmax.xlane.f32.xlu0 %v1669_v5 }
 0x77b   : > { %1673 = vmax.xlane.f32.xlu1 %v1672_v28 }
 0x77d   : > { %1676 = vmax.xlane.f32.xlu0 %v1675_v51 }
 0x77f   : > { %1679 = vmax.xlane.f32.xlu1 %v1678_v29  ;;  %v11085_v13 = vpop.eup %9402 }
 0x780   : > { %v11089_v49 = vpop.eup %9404  ;;  %v1744_v32 = vsel %vm978_vm5, %v11085_v13, 0.0 }
 0x781   : > { %1739 = vadd.xlane.f32.xlu0 %v1738_v41  ;;  %v1741_v60 = vsel %vm978_vm5, %v11089_v49, 0.0  ;;  %v11095_v43 = vpop.eup %9406 }
 0x782   : > { %v1747_v54 = vsel %vm978_vm5, %v11095_v43, 0.0 }
 0x783   : > { %1682 = vmax.xlane.f32.xlu1 %v1681_v31 }
 0x785   : > { %1745 = vadd.xlane.f32.xlu0 %v1744_v32 }
 0x787   : > { %1742 = vadd.xlane.f32.xlu1 %v1741_v60 }
 0x78b   : > { %1748 = vadd.xlane.f32.xlu1 %v1747_v54 }
 0x79b   : > { %1956 = vrot.lane.b32.xlu0 %v10529_v52, %s14457_s27 }
 0x79e   : > { %v1644_v30 = vpop.xlane.xlu0 %1643 }
 0x79f   : > { %v1688_v17 = vsub.f32 %v11005_v50, %v1644_v30 }
 0x7a0   : > { %v1647_v35 = vpop.xlane.xlu1 %1646 }
 0x7a1   : > { %v1710_v36 = vmul.f32 1.442695, %v1688_v17  ;;  %v1689_v5 = vsub.f32 %v11007_v21, %v1647_v35 }
 0x7a3   : > { %9408 = vpow2.f32 %v1710_v36  ;;  %v1712_v12 = vmul.f32 1.442695, %v1689_v5 }
 0x7a5   : > { %9410 = vpow2.f32 %v1712_v12 }
 0x7ad   : > { %v11103_v28 = vpop.eup %9408 }
 0x7ae   : > { %v1750_v51 = vsel %vm978_vm5, %v11103_v28, 0.0  ;;  %v1650_v29 = vpop.xlane.xlu0 %1649 }
 0x7af   : > { %1751 = vadd.xlane.f32.xlu1 %v1750_v51  ;;  %v1690_v41 = vsub.f32 %v11017_v38, %v1650_v29  ;;  %v11109_v60 = vpop.eup %9410 }
 0x7b0   : > { %v1653_v52 = vpop.xlane.xlu1 %1652  ;;  %v1753_v21 = vsel %vm978_vm5, %v11109_v60, 0.0 }
 0x7b1   : > { %v1714_v31 = vmul.f32 1.442695, %v1690_v41  ;;  %v1691_v50 = vsub.f32 %v11019_v44, %v1653_v52 }
 0x7b3   : > { %9412 = vpow2.f32 %v1714_v31  ;;  %v1716_v32 = vmul.f32 1.442695, %v1691_v50 }
 0x7b5   : > { %9414 = vpow2.f32 %v1716_v32 }
 0x7ba   : > { %1754 = vadd.xlane.f32.xlu0 %v1753_v21 }
 0x7bd   : > { %v11113_v54 = vpop.eup %9412 }
 0x7be   : > { %v1756_v30 = vsel %vm978_vm5, %v11113_v54, 0.0 }
 0x7bf   : > { %v11117_v17 = vpop.eup %9414  ;;  %1757 = vadd.xlane.f32.xlu1 %v1756_v30 }
 0x7c0   : > { %v1759_v38 = vsel %vm978_vm5, %v11117_v17, 0.0 }
 0x7c1   : > { %1760 = vadd.xlane.f32.xlu0 %v1759_v38 }
 0x7c9   : > { %v1659_v44 = vpop.xlane.xlu0 %1658 }
 0x7ca   : > { %v1693_v36 = vsub.f32 %v11035_v59, %v1659_v44 }
 0x7cb   : > { %v1662_v35 = vpop.xlane.xlu1 %1661 }
 0x7cc   : > { %v1720_v5 = vmul.f32 1.442695, %v1693_v36  ;;  %v1694_v12 = vsub.f32 %v11039_v55, %v1662_v35 }
 0x7cd   : > { %v11123_v51 = vpop.xlane.xlu0 %1655 }
 0x7ce   : > { %9416 = vpow2.f32 %v1720_v5  ;;  %v1722_v29 = vmul.f32 1.442695, %v1694_v12 }
 0x7d0   : > { %9418 = vpow2.f32 %v1722_v29 }
 0x7d1   : > { %v1665_v41 = vpop.xlane.xlu0 %1664 }
 0x7d2   : > { %v1695_v52 = vsub.f32 %v11047_v26, %v1665_v41 }
 0x7d3   : > { %v1668_v31 = vpop.xlane.xlu1 %1667 }
 0x7d4   : > { %v1724_v50 = vmul.f32 1.442695, %v1695_v52  ;;  %v1696_v32 = vsub.f32 %v11049_v18, %v1668_v31 }
 0x7d5   : > { %v1955_v26 = vpop.permute.xlu0 %1954 }
 0x7d6   : > { %9420 = vpow2.f32 %v1724_v50  ;;  %v1726_v21 = vmul.f32 1.442695, %v1696_v32 }
 0x7d7   : > { %v1953_v30 = vpop.permute.xlu1 %1952 }
 0x7d8   : > { %v11127_v59 = vpop.eup %9416  ;;  %9422 = vpow2.f32 %v1726_v21  ;;  %8642 = vmatpush3.bf16.msra.mxu1 %v1953_v30 }
 0x7d9   : > { %v1765_v55 = vsel %vm978_vm5, %v11127_v59, 0.0  ;;  %8643 = vmatprep.subr.bf16.mxu1 %v14503_v2 }
 0x7da   : > { %v11132_v38 = vpop.eup %9418  ;;  %1766 = vadd.xlane.f32.xlu1 %v1765_v55 }
 0x7db   : > { %v1768_v18 = vsel %vm978_vm5, %v11132_v38, 0.0 }
 0x7dc   : > { %8644 = vmatpush3.bf16.msra.mxu1 %v1955_v26 }
 0x7dd   : > { %8645 = vmatprep.subr.bf16.mxu1 %v14503_v2 }
 0x7de   : > { %1769 = vadd.xlane.f32.xlu1 %v1768_v18 }
 0x7e0   : > { %v11137_v44 = vpop.eup %9420 }
 0x7e1   : > { %v1771_v36 = vsel %vm978_vm5, %v11137_v44, 0.0 }
 0x7e2   : > { %v11141_v35 = vpop.eup %9422  ;;  %1772 = vadd.xlane.f32.xlu1 %v1771_v36 }
 0x7e3   : > { %v1774_v5 = vsel %vm978_vm5, %v11141_v35, 0.0 }
 0x7e6   : > { %1775 = vadd.xlane.f32.xlu1 %v1774_v5 }
 0x806   : > { %v1671_v12 = vpop.xlane.xlu0 %1670 }
 0x807   : > { %v1697_v29 = vsub.f32 %v11062_v46, %v1671_v12 }
 0x808   : > { %v1674_v41 = vpop.xlane.xlu1 %1673 }
 0x809   : > { %v1728_v52 = vmul.f32 1.442695, %v1697_v29  ;;  %v1698_v31 = vsub.f32 %v11065_v33, %v1674_v41 }
 0x80a   : > { %v1677_v50 = vpop.xlane.xlu0 %1676 }
 0x80b   : > { %9424 = vpow2.f32 %v1728_v52  ;;  %v1730_v32 = vmul.f32 1.442695, %v1698_v31  ;;  %v1699_v21 = vsub.f32 %v11067_v14, %v1677_v50 }
 0x80c   : > { %v1680_v30 = vpop.xlane.xlu1 %1679 }
 0x80d   : > { %9426 = vpow2.f32 %v1730_v32  ;;  %v1732_v55 = vmul.f32 1.442695, %v1699_v21 }
 0x80e   : > { %v1740_v26 = vpop.xlane.xlu0 %1739 }
 0x80f   : > { %9428 = vpow2.f32 %v1732_v55 }
 0x810   : > { %v1683_v18 = vpop.xlane.xlu1 %1682  ;;  %9430 = vrcp.f32 %v1740_v26 }
 0x812   : > { %v1746_v36 = vpop.xlane.xlu0 %1745 }
 0x814   : > { %v1743_v5 = vpop.xlane.xlu1 %1742 }
 0x815   : > { %v11148_v53 = vpop.eup %9424  ;;  %9432 = vrcp.f32 %v1743_v5 }
 0x816   : > { %v1957_v46 = vpop.permute.xlu0 %1956  ;;  %v1777_v33 = vsel %vm978_vm5, %v11148_v53, 0.0 }
 0x817   : > { %v11152_v12 = vpop.eup %9426  ;;  %1778 = vadd.xlane.f32.xlu0 %v1777_v33  ;;  %8646 = vmatpush3.bf16.msra.mxu1 %v1957_v46 }
 0x818   : > { %v1749_v14 = vpop.xlane.xlu1 %1748  ;;  %v1780_v29 = vsel %vm978_vm5, %v11152_v12, 0.0  ;;  %8647 = vmatprep.subr.bf16.mxu1 %v14503_v2 }
 0x819   : > { %v11157_v41 = vpop.eup %9428  ;;  %1781 = vadd.xlane.f32.xlu1 %v1780_v29  ;;  %9434 = vrcp.f32 %v1749_v14 }
 0x81a   : > { %v1783_v52 = vsel %vm978_vm5, %v11157_v41, 0.0  ;;  %9436 = vrcp.f32 %v1746_v36  ;;  %v9431_v31 = vpop.eup %9430 }
 0x81b   : > { %1784 = vadd.xlane.f32.xlu0 %v1783_v52  ;;  %v1810_v32 = vmul.f32 %v9431_v31, %v11077_v34  ;;  %v1700_v34 = vsub.f32 %v11071_v56, %v1680_v30 }
 0x81f   : > { %v9433_v50 = vpop.eup %9432 }
 0x820   : > { %v1811_v21 = vmul.f32 %v9433_v50, %v11089_v49  ;;  %v1692_v49 = vsub.f32 %v11037_v16, %v11123_v51 }
 0x822   : > { %v1828_v55 = vpack.c.bf16 %v1811_v21, %v1810_v32  ;;  %v1718_v14 = vmul.f32 1.442695, %v1692_v49 }
 0x823   : > { %v9435_v26 = vpop.eup %9434 }
 0x824   : > { %8622 = vmatmul.mubr.msk.bf16.vlgmr.msra.gmra.mrb[72].mxu0 %vm978_vm5, %v1828_v55  ;;  %v9437_v5 = vpop.eup %9436  ;;  %v1813_v46 = vmul.f32 %v9435_v26, %v11095_v43  ;;  %v1734_v43 = vmul.f32 1.442695, %v1700_v34 }
 0x825   : > { %8625 = vmatprep.mubr.msk.bf16.mxu0 %vm9984_vm2, %v14503_v2  ;;  %v1812_v33 = vmul.f32 %v9437_v5, %v11085_v13  ;;  %v1701_v13 = vsub.f32 %v11079_v4, %v1683_v18 }
 0x826   : > { %9438 = vpow2.f32 %v1734_v43 }
 0x827   : > { %v1829_v36 = vpack.c.bf16 %v1813_v46, %v1812_v33  ;;  %9440 = vpow2.f32 %v1718_v14 }
 0x82a   : > { %1958 = vrot.lane.b32.xlu1 %v10543_v20, %s14457_s27  ;;  %v1736_v20 = vmul.f32 1.442695, %v1701_v13 }
 0x82c   : > { %8626 = vmatmul.mubr.msk.bf16.gmra.mrb[76].mxu0 %vm978_vm5, %v1829_v36 }
 0x82d   : > { %8629 = vmatprep.mubr.msk.bf16.mxu0 %vm9984_vm2, %v14503_v2 }
 0x830   : > { %v11179_v31 = vpop.eup %9438 }
 0x831   : > { %1960 = vrot.lane.b32.xlu0 %v10622_v10, %s14457_s27  ;;  %v1786_v56 = vsel %vm978_vm5, %v11179_v31, 0.0  ;;  %v11183_v16 = vpop.eup %9440 }
 0x832   : > { %v1762_v18 = vsel %vm978_vm5, %v11183_v16, 0.0 }
 0x83c   : > { %v1752_v29 = vpop.xlane.xlu1 %1751 }
 0x83d   : > { %9442 = vrcp.f32 %v1752_v29 }
 0x83e   : > { %9444 = vpow2.f32 %v1736_v20 }
 0x847   : > { %v1755_v52 = vpop.xlane.xlu0 %1754  ;;  %v9443_v51 = vpop.eup %9442 }
 0x848   : > { %9446 = vrcp.f32 %v1755_v52  ;;  %v11185_v30 = vpop.eup %9444  ;;  %v1814_v32 = vmul.f32 %v9443_v51, %v11103_v28 }
 0x849   : > { %v1789_v55 = vsel %vm978_vm5, %v11185_v30, 0.0 }
 0x84c   : > { %v1758_v10 = vpop.xlane.xlu1 %1757 }
 0x84d   : > { %9448 = vrcp.f32 %v1758_v10 }
 0x84e   : > { %1787 = vadd.xlane.f32.xlu1 %v1786_v56  ;;  %v1761_v4 = vpop.xlane.xlu0 %1760 }
 0x84f   : > { %9450 = vrcp.f32 %v1761_v4 }
 0x852   : > { %v9447_v50 = vpop.eup %9446  ;;  %1763 = vadd.xlane.f32.xlu1 %v1762_v18 }
 0x853   : > { %v1815_v21 = vmul.f32 %v9447_v50, %v11109_v60 }
 0x855   : > { %v1830_v26 = vpack.c.bf16 %v1815_v21, %v1814_v32 }
 0x856   : > { %1790 = vadd.xlane.f32.xlu1 %v1789_v55 }
 0x857   : > { %v9449_v5 = vpop.eup %9448  ;;  %8630 = vmatmul.mubr.msk.bf16.gmra.mrb[80].mxu0 %vm978_vm5, %v1830_v26 }
 0x858   : > { %8633 = vmatprep.mubr.msk.bf16.mxu0 %vm9984_vm2, %v14503_v2  ;;  %v1816_v33 = vmul.f32 %v9449_v5, %v11113_v54 }
 0x859   : > { %v9451_v46 = vpop.eup %9450 }
 0x85a   : > { %v1817_v36 = vmul.f32 %v9451_v46, %v11117_v17 }
 0x85c   : > { %v1831_v34 = vpack.c.bf16 %v1817_v36, %v1816_v33 }
 0x85f   : > { %8634 = vmatmul.mubr.msk.bf16.gmra.mrb[84].mxu0 %vm978_vm5, %v1831_v34 }
 0x860   : > { %8637 = vmatprep.mubr.msk.bf16.mxu0 %vm9984_vm2, %v14503_v2 }
 0x867   : > { %v1767_v28 = vpop.xlane.xlu1 %1766 }
 0x86b   : > { %v1770_v60 = vpop.xlane.xlu1 %1769 }
 0x86c   : > { %9452 = vrcp.f32 %v1770_v60 }
 0x86d   : > { %9454 = vrcp.f32 %v1767_v28 }
 0x86f   : > { %v1773_v49 = vpop.xlane.xlu1 %1772 }
 0x873   : > { %v1776_v43 = vpop.xlane.xlu1 %1775 }
 0x874   : > { %9456 = vrcp.f32 %v1776_v43 }
 0x875   : > { %9458 = vrcp.f32 %v1773_v49 }
 0x876   : > { %v9453_v29 = vpop.eup %9452 }
 0x877   : > { %v9455_v17 = vpop.eup %9454  ;;  %v1820_v52 = vmul.f32 %v9453_v29, %v11132_v38 }
 0x878   : > { %v1819_v4 = vmul.f32 %v9455_v17, %v11127_v59  ;;  %v9184_v59 = vld [vmem:[%s14424_s14] sm:$0xff]  }
 0x879   : > { %8671 = vmatprep.subr.bf16.mxu0 %v9184_v59 }
 0x87a   : > { %v1833_v51 = vpack.c.bf16 %v1820_v52, %v1819_v4  ;;  %8672 = vmatpush3.bf16.msra.mxu0 %v9184_v59 }
 0x87e   : > { %v9457_v18 = vpop.eup %9456 }
 0x87f   : > { %v9459_v50 = vpop.eup %9458  ;;  %v1822_v38 = vmul.f32 %v9457_v18, %v11141_v35 }
 0x880   : > { %v1821_v32 = vmul.f32 %v9459_v50, %v11137_v44 }
 0x882   : > { %v1834_v21 = vpack.c.bf16 %v1822_v38, %v1821_v32 }
 0x8a4   : > { %v1779_v13 = vpop.xlane.xlu0 %1778 }
 0x8a6   : > { %v1782_v14 = vpop.xlane.xlu1 %1781 }
 0x8a7   : > { %9460 = vrcp.f32 %v1782_v14 }
 0x8a8   : > { %v1785_v20 = vpop.xlane.xlu0 %1784  ;;  %9462 = vrcp.f32 %v1779_v13 }
 0x8a9   : > { %9464 = vrcp.f32 %v1785_v20 }
 0x8aa   : > { %v1959_v54 = vpop.permute.xlu1 %1958 }
 0x8ab   : > { %8648 = vmatpush3.bf16.msra.mxu1 %v1959_v54 }
 0x8ac   : > { %v1961_v10 = vpop.permute.xlu0 %1960  ;;  %8649 = vmatprep.subr.bf16.mxu1 %v14503_v2 }
 0x8ad   : > { %v1982_v56 = vsel %vm1202_vm4, %v1961_v10, 0 }
 0x8af   : > { %8650 = vmatpush3.bf16.msra.mxu1 %v1982_v56 }
 0x8b0   : > { %8695 = vmatprep.subr.bf16.mxu1 %v14503_v2 }
 0x8b1   : > { %v9461_v55 = vpop.eup %9460 }
 0x8b2   : > { %8652 = vmatmul.mubr.msk.bf16.vlgmr.msra.gmra.mrb[92].mxu1 %vm978_vm5, %v1833_v51  ;;  %v9463_v26 = vpop.eup %9462  ;;  %v1824_v5 = vmul.f32 %v9461_v55, %v11152_v12 }
 0x8b3   : > { %8655 = vmatprep.mubr.msk.bf16.mxu1 %vm9984_vm2, %v14503_v2  ;;  %v1823_v35 = vmul.f32 %v9463_v26, %v11148_v53  ;;  %v9465_v34 = vpop.eup %9464 }
 0x8b4   : > { %v1825_v60 = vmul.f32 %v9465_v34, %v11157_v41  ;;  %v9185_v41 = vld [vmem:[%s14424_s14 + $0x8] sm:$0xff]  }
 0x8b5   : > { %v1835_v46 = vpack.c.bf16 %v1824_v5, %v1823_v35  ;;  %8673 = vmatprep.subr.bf16.mxu0 %v9185_v41 }
 0x8b6   : > { %8674 = vmatpush3.bf16.msra.mxu0 %v9185_v41 }
 0x8ba   : > { %8656 = vmatmul.mubr.msk.bf16.gmra.mrb[96].mxu1 %vm978_vm5, %v1834_v21 }
 0x8bb   : > { %8659 = vmatprep.mubr.msk.bf16.mxu1 %vm9984_vm2, %v14503_v2 }
 0x8c2   : > { %8660 = vmatmul.mubr.msk.bf16.gmra.mrb[100].mxu1 %vm978_vm5, %v1835_v46 }
 0x8c3   : > { %8663 = vmatprep.mubr.msk.bf16.mxu1 %vm9984_vm2, %v14503_v2 }
 0x8db   : > { %v1788_v44 = vpop.xlane.xlu1 %1787 }
 0x8dc   : > { %9466 = vrcp.f32 %v1788_v44 }
 0x8df   : > { %v1764_v33 = vpop.xlane.xlu1 %1763 }
 0x8e0   : > { %9468 = vrcp.f32 %v1764_v33 }
 0x8e3   : > { %v1791_v36 = vpop.xlane.xlu1 %1790 }
 0x8e4   : > { %9470 = vrcp.f32 %v1791_v36 }
 0x8e6   : > { %v9467_v28 = vpop.eup %9466 }
 0x8e7   : > { %v1826_v12 = vmul.f32 %v9467_v28, %v11179_v31 }
 0x8e9   : > { %v1836_v53 = vpack.c.bf16 %v1826_v12, %v1825_v60 }
 0x8ea   : > { %v9469_v49 = vpop.eup %9468 }
 0x8eb   : > { %8664 = vmatmul.mubr.msk.bf16.gmra.mrb[104].mxu1 %vm978_vm5, %v1836_v53  ;;  %v1818_v43 = vmul.f32 %v9469_v49, %v11183_v16  ;;  %v9186_v16 = vld [vmem:[%s14424_s14 + $0x10] sm:$0xff]  }
 0x8ec   : > { %8667 = vmatprep.mubr.msk.bf16.mxu1 %vm9984_vm2, %v14503_v2  ;;  %8675 = vmatprep.subr.bf16.mxu0 %v9186_v16 }
 0x8ed   : > { %v1832_v13 = vpack.c.bf16 %v1818_v43, %v1818_v43  ;;  %8676 = vmatpush3.bf16.msra.mxu0 %v9186_v16 }
 0x8ee   : > { %v9471_v14 = vpop.eup %9470 }
 0x8ef   : > { %8638 = vmatmul.mubr.msk.bf16.gmra.mrb[88].mxu0 %vm978_vm5, %v1832_v13  ;;  %v1827_v20 = vmul.f32 %v9471_v14, %v11185_v30  ;;  %v9187_v30 = vld [vmem:[%s14424_s14 + $0x18] sm:$0xff]  }
 0x8f0   : > { %8677 = vmatprep.subr.bf16.mxu0 %v9187_v30 }
 0x8f1   : > { %v1837_v31 = vpack.c.bf16 %v1827_v20, %v1827_v20  ;;  %8678 = vmatpush3.bf16.msra.mxu0 %v9187_v30 }
 0x8f3   : > { %8668 = vmatmul.mubr.msk.bf16.gmra.mrb[108].mxu1 %vm978_vm5, %v1837_v31 }
 0x8f4   : > { %8703 = vmatprep.mubr.msk.bf16.mxu1 %vm9984_vm2, %v14503_v2 }
 0x8f7   : > { %v1909_v29 = vpop.f32.mrb[72].mxu0 }
 0x8f8   : > { %v8623_v54 = vpop.f32.mrb[73].mxu0 }
 0x8f9   : > { %v1912_v17 = vpop.f32.mrb[74].mxu0 }
 0x8fa   : > { %v9074_v52 = vpack.i.bf16 %v1912_v17, %v1909_v29  ;;  %v8624_v10 = vpop.f32.mrb[75].mxu0 }
 0x8fc   : > { %9075 = vrot.lane.b32.xlu0 %v9074_v52, %s14459_s6 }
 0x8ff   : > { %v1917_v56 = vpop.f32.mrb[76].mxu0 }
 0x900   : > { %v8627_v4 = vpop.f32.mrb[77].mxu0 }
 0x901   : > { %v1920_v51 = vpop.f32.mrb[78].mxu0 }
 0x902   : > { %v9079_v18 = vpack.i.bf16 %v1920_v51, %v1917_v56  ;;  %v8628_v50 = vpop.f32.mrb[79].mxu0 }
 0x904   : > { %9080 = vrot.lane.b32.xlu1 %v9079_v18, %s14459_s6 }
 0x92a   : > { %v1925_v38 = vpop.f32.mrb[80].mxu0 }
 0x92b   : > { %v8631_v32 = vpop.f32.mrb[81].mxu0 }
 0x92c   : > { %v1928_v59 = vpop.f32.mrb[82].mxu0 }
 0x92d   : > { %v9084_v21 = vpack.i.bf16 %v1928_v59, %v1925_v38  ;;  %v8632_v55 = vpop.f32.mrb[83].mxu0 }
 0x92f   : > { %9085 = vrot.lane.b32.xlu0 %v9084_v21, %s14459_s6 }
 0x932   : > { %v1933_v26 = vpop.f32.mrb[84].mxu0 }
 0x933   : > { %v8635_v5 = vpop.f32.mrb[85].mxu0 }
 0x934   : > { %v1936_v35 = vpop.f32.mrb[86].mxu0 }
 0x935   : > { %v9089_v46 = vpack.i.bf16 %v1936_v35, %v1933_v26  ;;  %v8636_v44 = vpop.f32.mrb[87].mxu0 }
 0x937   : > { %9090 = vrot.lane.b32.xlu0 %v9089_v46, %s14459_s6 }
 0x96e   : > { %v9076_v33 = vpop.permute.xlu0 %9075 }
 0x96f   : > { %v9078_v36 = vunpack.i.h.bf16 %v9076_v33  ;;  %v9077_v34 = vunpack.i.l.bf16 %v9076_v33 }
 0x971   : > { %v2129_v28 = vsel %vm740_vm3, %v10969_v6, %v9078_v36  ;;  %v2128_v60 = vsel %vm740_vm3, %v10967_v57, %v9077_v34 }
 0x972   : > { %v2146_v12 = vpack.c.bf16 %v2129_v28, %v2128_v60 }
 0x974   : > { %8679 = vmatprep.mubr.msk.bf16.mxu0 %vm237_vm1, %v2146_v12 }
 0x976   : > { %v9081_v53 = vpop.permute.xlu1 %9080 }
 0x977   : > { %v9083_v49 = vunpack.i.h.bf16 %v9081_v53  ;;  %v9082_v43 = vunpack.i.l.bf16 %v9081_v53 }
 0x979   : > { %v2131_v13 = vsel %vm740_vm3, %v10973_v15, %v9083_v49  ;;  %v2130_v14 = vsel %vm740_vm3, %v10971_v58, %v9082_v43  ;;  %v9188_v58 = vld [vmem:[%s14426_s16] sm:$0xff]  }
 0x97a   : > { %v2147_v20 = vpack.c.bf16 %v2131_v13, %v2130_v14  ;;  %8696 = vmatpush3.bf16.msra.mxu1 %v9188_v58 }
 0x97b   : > { %8697 = vmatprep.subr.bf16.mxu1 %v14503_v2 }
 0x97c   : > { %8680 = vmatmul.mubr.msk.bf16.vlgmr.msra.gmra.mrb[92].mxu0 %vm237_vm1, %v2147_v20 }
 0x985   : > { %v2018_v41 = vpop.f32.mrb[92].mxu1 }
 0x986   : > { %v8653_v6 = vpop.f32.mrb[93].mxu1 }
 0x987   : > { %v2021_v31 = vpop.f32.mrb[94].mxu1 }
 0x988   : > { %v9094_v16 = vpack.i.bf16 %v2021_v31, %v2018_v41  ;;  %v8654_v57 = vpop.f32.mrb[95].mxu1 }
 0x98a   : > { %9095 = vrot.lane.b32.xlu0 %v9094_v16, %s14459_s6 }
 0x98d   : > { %v2026_v30 = vpop.f32.mrb[96].mxu1 }
 0x98e   : > { %v8657_v29 = vpop.f32.mrb[97].mxu1 }
 0x98f   : > { %v2029_v54 = vpop.f32.mrb[98].mxu1 }
 0x990   : > { %v9099_v17 = vpack.i.bf16 %v2029_v54, %v2026_v30  ;;  %v8658_v52 = vpop.f32.mrb[99].mxu1 }
 0x992   : > { %9100 = vrot.lane.b32.xlu0 %v9099_v17, %s14459_s6 }
 0x995   : > { %v2034_v15 = vpop.f32.mrb[100].mxu1 }
 0x996   : > { %v8661_v10 = vpop.f32.mrb[101].mxu1 }
 0x997   : > { %v2037_v56 = vpop.f32.mrb[102].mxu1 }
 0x998   : > { %v9104_v4 = vpack.i.bf16 %v2037_v56, %v2034_v15  ;;  %v8662_v51 = vpop.f32.mrb[103].mxu1 }
 0x99a   : > { %9105 = vrot.lane.b32.xlu1 %v9104_v4, %s14459_s6 }
 0x9a1   : > { %v9086_v18 = vpop.permute.xlu0 %9085 }
 0x9a2   : > { %v9088_v50 = vunpack.i.h.bf16 %v9086_v18  ;;  %v9087_v38 = vunpack.i.l.bf16 %v9086_v18 }
 0x9a4   : > { %v2133_v32 = vsel %vm740_vm3, %v10977_v3, %v9088_v50  ;;  %v2132_v59 = vsel %vm740_vm3, %v10975_v62, %v9087_v38  ;;  %v9189_v3 = vld [vmem:[%s14426_s16 + $0x8] sm:$0xff]   ;;  %v9190_v62 = vld [vmem:[%s14426_s16 + $0x10] sm:$0xff]  }
 0x9a5   : > { %v2148_v21 = vpack.c.bf16 %v2133_v32, %v2132_v59  ;;  %8698 = vmatpush3.bf16.msra.mxu1 %v9189_v3 }
 0x9a6   : > { %8699 = vmatprep.subr.bf16.mxu1 %v14503_v2 }
 0x9a7   : > { %8683 = vmatprep.mubr.msk.bf16.mxu0 %vm237_vm1, %v2148_v21 }
 0x9a9   : > { %v9091_v55 = vpop.permute.xlu0 %9090  ;;  %8700 = vmatpush3.bf16.msra.mxu1 %v9190_v62 }
 0x9aa   : > { %v9093_v26 = vunpack.i.h.bf16 %v9091_v55  ;;  %v9092_v5 = vunpack.i.l.bf16 %v9091_v55  ;;  %8701 = vmatprep.subr.bf16.mxu1 %v14503_v2 }
 0x9ac   : > { %v2135_v35 = vsel %vm740_vm3, %v10981_v27, %v9093_v26  ;;  %v2134_v46 = vsel %vm740_vm3, %v10979_v7, %v9092_v5  ;;  %v9191_v7 = vld [vmem:[%s14426_s16 + $0x18] sm:$0xff]  }
 0x9ad   : > { %v2149_v44 = vpack.c.bf16 %v2135_v35, %v2134_v46  ;;  %8702 = vmatpush3.bf16.msra.mxu1 %v9191_v7 }
 0x9af   : > { %8684 = vmatmul.mubr.msk.bf16.gmra.mrb[96].mxu0 %vm237_vm1, %v2149_v44  ;;  %v11321_v44 = vld [vmem:[%s10356_s7] sm:$0x3f] }
 0x9be   : > { %v2042_v27 = vpop.f32.mrb[104].mxu1 }
 0x9bf   : > { %v8665_v33 = vpop.f32.mrb[105].mxu1 }
 0x9c0   : > { %v2045_v36 = vpop.f32.mrb[106].mxu1 }
 0x9c1   : > { %v9109_v34 = vpack.i.bf16 %v2045_v36, %v2042_v27  ;;  %v8666_v28 = vpop.f32.mrb[107].mxu1 }
 0x9c2   : > { %v1941_v60 = vpop.f32.mrb[88].mxu0 }
 0x9c3   : > { %v8639_v12 = vpop.f32.mrb[89].mxu0  ;;  %9110 = vrot.lane.b32.xlu0 %v9109_v34, %s14459_s6 }
 0x9c4   : > { %v1944_v53 = vpop.f32.mrb[90].mxu0 }
 0x9c5   : > { %v8640_v49 = vpop.f32.mrb[91].mxu0 }
 0x9c6   : > { %v2050_v43 = vpop.f32.mrb[108].mxu1 }
 0x9c7   : > { %v9114_v13 = vpack.i.bf16 %v2050_v43, %v1941_v60  ;;  %v8669_v14 = vpop.f32.mrb[109].mxu1 }
 0x9c8   : > { %v2053_v20 = vpop.f32.mrb[110].mxu1 }
 0x9c9   : > { %9115 = vrot.lane.b32.xlu1 %v9114_v13, %s14459_s6  ;;  %v8670_v41 = vpop.f32.mrb[111].mxu1 }
 0x9fc   : > { %v9096_v6 = vpop.permute.xlu0 %9095 }
 0x9fd   : > { %v9098_v31 = vunpack.i.h.bf16 %v9096_v6  ;;  %v9097_v16 = vunpack.i.l.bf16 %v9096_v6 }
 0x9ff   : > { %v2138_v57 = vsel %vm740_vm3, %v10987_v19, %v9098_v31  ;;  %v2137_v30 = vsel %vm740_vm3, %v10985_v39, %v9097_v16 }
 0xa00   : > { %v2150_v29 = vpack.c.bf16 %v2138_v57, %v2137_v30 }
 0xa02   : > { %8687 = vmatprep.mubr.msk.bf16.mxu0 %vm237_vm1, %v2150_v29 }
 0xa04   : > { %v9101_v54 = vpop.permute.xlu0 %9100 }
 0xa05   : > { %v9103_v17 = vunpack.i.h.bf16 %v9101_v54  ;;  %v9102_v52 = vunpack.i.l.bf16 %v9101_v54 }
 0xa07   : > { %v2140_v58 = vsel %vm740_vm3, %v11015_v61, %v9103_v17  ;;  %v2139_v15 = vsel %vm740_vm3, %v11013_v23, %v9102_v52 }
 0xa08   : > { %v2151_v10 = vpack.c.bf16 %v2140_v58, %v2139_v15 }
 0xa0a   : > { %8688 = vmatmul.mubr.msk.bf16.gmra.mrb[100].mxu0 %vm237_vm1, %v2151_v10 }
 0xa0c   : > { %v9106_v56 = vpop.permute.xlu1 %9105 }
 0xa0d   : > { %v9108_v19 = vunpack.i.h.bf16 %v9106_v56  ;;  %v9107_v4 = vunpack.i.l.bf16 %v9106_v56 }
 0xa0f   : > { %v2142_v39 = vsel %vm740_vm3, %v11025_v8, %v9108_v19  ;;  %v2141_v51 = vsel %vm740_vm3, %v11021_v9, %v9107_v4  ;;  %v14504_v9 = vmov 0  }
 0xa10   : > { %v2152_v18 = vpack.c.bf16 %v2142_v39, %v2141_v51 }
 0xa12   : > { %8691 = vmatprep.mubr.msk.bf16.mxu0 %vm237_vm1, %v2152_v18 }
 0xa35   : > { %v9111_v50 = vpop.permute.xlu0 %9110 }
 0xa36   : > { %v9113_v61 = vunpack.i.h.bf16 %v9111_v50  ;;  %v9112_v38 = vunpack.i.l.bf16 %v9111_v50 }
 0xa38   : > { %v2144_v23 = vsel %vm740_vm3, %v11031_v22, %v9113_v61  ;;  %v2143_v32 = vsel %vm740_vm3, %v11029_v63, %v9112_v38  ;;  %v11313_v22 = vsub.s32 2, %v10358_v37  ;;  %v11318_v63 = vld [vmem:[%s14425_s15] ss:$0 sm:$0xff] }
 0xa39   : > { %v2153_v59 = vpack.c.bf16 %v2144_v23, %v2143_v32 }
 0xa3b   : > { %v9116_v21 = vpop.permute.xlu1 %9115  ;;  %8692 = vmatmul.mubr.msk.bf16.gmra.mrb[104].mxu0 %vm237_vm1, %v2153_v59 }
 0xa3c   : > { %v9118_v8 = vunpack.i.h.bf16 %v9116_v21  ;;  %v9117_v55 = vunpack.i.l.bf16 %v9116_v21  ;;  %2838 = vmatprep.mubr.bf16.mxu0 %v14504_v9 }
 0xa3e   : > { %v2145_v26 = vsel %vm740_vm3, %v11033_v47, %v9118_v8  ;;  %v2136_v5 = vsel %vm740_vm3, %v10983_v11, %v9117_v55  ;;  %v11325_v47 = vrot.slane %v11321_v44, %v11313_v22 }
 0xa3f   : > { %v2154_v35 = vpack.c.bf16 %v2145_v26, %v2136_v5 }
 0xa41   : > { %8704 = vmatmul.mubr.msk.bf16.vlgmr.msra.gmra.mrb[112].mxu1 %vm237_vm1, %v2154_v35 }
 0xa4f   : > { %v8681_v46 = vpop.f32.mrb[92].mxu0 }
 0xa50   : > { %v2261_v11 = vadd.f32 %v8681_v46, %v11318_v63  ;;  %v2252_v3 = vpop.f32.mrb[93].mxu0 }
 0xa51   : > { %v2253_v62 = vadd.f32 %v11318_v63, %v2252_v3  ;;  %v8682_v7 = vpop.f32.mrb[94].mxu0 }
 0xa52   : > { %v2264_v27 = vadd.f32 %v8682_v7, %v11318_v63  ;;  %v2255_v33 = vpop.f32.mrb[95].mxu0  ;;  %v2404_v34 = vmul.f32 %v11325_v47, %v2261_v11 }
 0xa53   : > { %v2256_v36 = vadd.f32 %v11318_v63, %v2255_v33  ;;  %v2402_v60 = vmul.f32 %v11325_v47, %v2253_v62 }
 0xa54   : > { %v2405_v28 = vmul.f32 %v11325_v47, %v2264_v27 }
 0xa55   : > { %v2403_v12 = vmul.f32 %v11325_v47, %v2256_v36 }
 0xa56   : > { %v2419_v53 = vpack.c.bf16 %v2405_v28, %v2404_v34 }
 0xa57   : > { %v2418_v49 = vpack.c.bf16 %v2403_v12, %v2402_v60 }
 0xa58   : > { %v11336_v43 = vadd.bf16 %v2419_v53, %v10222_v24 }
 0xa59   : > { %v11339_v13 = vadd.bf16 %v2418_v49, %v10224_v25 }
 0xa5a   : > { %v2452_v31 = vunpack.c.l.bf16 %v11336_v43  ;;  %v2453_v57 = vunpack.c.h.bf16 %v11336_v43 }
 0xa5b   : > { %v2451_v14 = vunpack.c.h.bf16 %v11339_v13  ;;  %v2450_v20 = vunpack.c.l.bf16 %v11339_v13 }
 0xa5c   : > { %v2472_v16 = vsel %vm237_vm1, %v2452_v31, 0.0  ;;  %v2475_v30 = vsel %vm237_vm1, %v2453_v57, 0.0 }
 0xa5d   : > { %v2469_v41 = vsel %vm237_vm1, %v2451_v14, 0.0  ;;  %v2466_v6 = vsel %vm237_vm1, %v2450_v20, 0.0 }
 0xa5e   : > { %2470 = vadd.xlane.f32.xlu1 %v2469_v41  ;;  %2467 = vadd.xlane.f32.xlu0 %v2466_v6 }
 0xa62   : > { %2473 = vadd.xlane.f32.xlu0 %v2472_v16 }
 0xa66   : > { %2476 = vadd.xlane.f32.xlu0 %v2475_v30 }
 0xa82   : > { %v8685_v29 = vpop.f32.mrb[96].mxu0 }
 0xa83   : > { %v2277_v54 = vadd.f32 %v8685_v29, %v11318_v63  ;;  %v2268_v17 = vpop.f32.mrb[97].mxu0 }
 0xa84   : > { %v2269_v52 = vadd.f32 %v11318_v63, %v2268_v17  ;;  %v8686_v58 = vpop.f32.mrb[98].mxu0 }
 0xa85   : > { %v2280_v15 = vadd.f32 %v8686_v58, %v11318_v63  ;;  %v2271_v10 = vpop.f32.mrb[99].mxu0  ;;  %v2408_v19 = vmul.f32 %v11325_v47, %v2277_v54 }
 0xa86   : > { %v2272_v56 = vadd.f32 %v11318_v63, %v2271_v10  ;;  %v2406_v39 = vmul.f32 %v11325_v47, %v2269_v52 }
 0xa87   : > { %v2409_v4 = vmul.f32 %v11325_v47, %v2280_v15 }
 0xa88   : > { %v2407_v51 = vmul.f32 %v11325_v47, %v2272_v56 }
 0xa89   : > { %v2421_v18 = vpack.c.bf16 %v2409_v4, %v2408_v19 }
 0xa8a   : > { %v2420_v50 = vpack.c.bf16 %v2407_v51, %v2406_v39 }
 0xa8b   : > { %v11366_v61 = vadd.bf16 %v2421_v18, %v10232_v40  ;;  %v7790_v18 = vld [vmem:[%s14427_s17] ss:$0 sm:$0xff] }
 0xa8c   : > { %v11369_v38 = vadd.bf16 %v2420_v50, %v10235_v42 }
 0xa8d   : > { %v2456_v8 = vunpack.c.l.bf16 %v11366_v61  ;;  %v2457_v55 = vunpack.c.h.bf16 %v11366_v61 }
 0xa8e   : > { %v2454_v23 = vunpack.c.l.bf16 %v11369_v38  ;;  %v2455_v32 = vunpack.c.h.bf16 %v11369_v38 }
 0xa8f   : > { %v2484_v26 = vsel %vm237_vm1, %v2456_v8, 0.0  ;;  %v2487_v5 = vsel %vm237_vm1, %v2457_v55, 0.0 }
 0xa90   : > { %v2478_v59 = vsel %vm237_vm1, %v2454_v23, 0.0  ;;  %v2481_v21 = vsel %vm237_vm1, %v2455_v32, 0.0 }
 0xa91   : > { %2479 = vadd.xlane.f32.xlu1 %v2478_v59  ;;  %2482 = vadd.xlane.f32.xlu0 %v2481_v21  ;;  %v11427_v21 = vld [vmem:[%s10384_s29] sm:$0x3f] }
 0xa95   : > { %2485 = vadd.xlane.f32.xlu1 %v2484_v26  ;;  %2488 = vadd.xlane.f32.xlu0 %v2487_v5  ;;  %v2437_v26 = vrot.slane %v11427_v21, %v11313_v22 }
 0xadd   : > { %v8689_v35 = vpop.f32.mrb[100].mxu0 }
 0xade   : > { %v2293_v46 = vadd.f32 %v8689_v35, %v11318_v63  ;;  %v2284_v11 = vpop.f32.mrb[101].mxu0 }
 0xadf   : > { %v2285_v3 = vadd.f32 %v11318_v63, %v2284_v11  ;;  %v8690_v62 = vpop.f32.mrb[102].mxu0 }
 0xae0   : > { %v2296_v7 = vadd.f32 %v8690_v62, %v11318_v63  ;;  %v2287_v27 = vpop.f32.mrb[103].mxu0  ;;  %v2412_v36 = vmul.f32 %v11325_v47, %v2293_v46 }
 0xae1   : > { %v2288_v33 = vadd.f32 %v11318_v63, %v2287_v27  ;;  %v2410_v28 = vmul.f32 %v11325_v47, %v2285_v3 }
 0xae2   : > { %v2413_v34 = vmul.f32 %v11325_v47, %v2296_v7 }
 0xae3   : > { %v2411_v60 = vmul.f32 %v11325_v47, %v2288_v33 }
 0xae4   : > { %v2423_v12 = vpack.c.bf16 %v2413_v34, %v2412_v36 }
 0xae5   : > { %v2422_v53 = vpack.c.bf16 %v2411_v60, %v2410_v28 }
 0xae6   : > { %v11396_v49 = vadd.bf16 %v2423_v12, %v10222_v24 }
 0xae7   : > { %v11399_v41 = vadd.bf16 %v2422_v53, %v10224_v25 }
 0xae8   : > { %v2460_v54 = vunpack.c.l.bf16 %v11396_v49  ;;  %v2461_v24 = vunpack.c.h.bf16 %v11396_v49 }
 0xae9   : > { %v2458_v6 = vunpack.c.l.bf16 %v11399_v41  ;;  %v2459_v16 = vunpack.c.h.bf16 %v11399_v41 }
 0xaea   : > { %v2496_v25 = vsel %vm237_vm1, %v2460_v54, 0.0  ;;  %v2499_v17 = vsel %vm237_vm1, %v2461_v24, 0.0 }
 0xaeb   : > { %v2490_v30 = vsel %vm237_vm1, %v2458_v6, 0.0  ;;  %v2493_v29 = vsel %vm237_vm1, %v2459_v16, 0.0  ;;  %v2468_v58 = vpop.xlane.xlu0 %2467  ;;  %v2471_v60 = vpop.xlane.xlu1 %2470 }
 0xaec   : > { %2491 = vadd.xlane.f32.xlu1 %v2490_v30  ;;  %2494 = vadd.xlane.f32.xlu0 %v2493_v29 }
 0xaef   : > { %v2474_v11 = vpop.xlane.xlu0 %2473 }
 0xaf0   : > { %2497 = vadd.xlane.f32.xlu1 %v2496_v25  ;;  %2500 = vadd.xlane.f32.xlu0 %v2499_v17  ;;  %v2515_v25 = vmul.f32 0.015625, %v2471_v60  ;;  %v2514_v17 = vmul.f32 0.015625, %v2468_v58 }
 0xaf2   : > { %v11457_v58 = vsub.f32 %v2451_v14, %v2515_v25 }
 0xb0e   : > { %v8693_v52 = vpop.f32.mrb[104].mxu0 }
 0xb0f   : > { %v2309_v15 = vadd.f32 %v8693_v52, %v11318_v63  ;;  %v2300_v10 = vpop.f32.mrb[105].mxu0  ;;  %v2477_v52 = vpop.xlane.xlu0 %2476 }
 0xb10   : > { %v2301_v56 = vadd.f32 %v11318_v63, %v2300_v10  ;;  %v8694_v19 = vpop.f32.mrb[106].mxu0 }
 0xb11   : > { %v2312_v4 = vadd.f32 %v8694_v19, %v11318_v63  ;;  %v2303_v39 = vpop.f32.mrb[107].mxu0  ;;  %v2416_v50 = vmul.f32 %v11325_v47, %v2309_v15 }
 0xb12   : > { %v2304_v51 = vadd.f32 %v11318_v63, %v2303_v39  ;;  %v2414_v5 = vmul.f32 %v11325_v47, %v2301_v56  ;;  %v11461_v39 = vsub.f32 %v2450_v20, %v2514_v17 }
 0xb13   : > { %v2417_v59 = vmul.f32 %v11325_v47, %v2312_v4 }
 0xb14   : > { %v2415_v35 = vmul.f32 %v11325_v47, %v2304_v51  ;;  %v2391_v46 = vpop.f32.mrb[112].mxu1  ;;  %v2516_v51 = vmul.f32 0.015625, %v2474_v11  ;;  %v2547_v11 = vmul.f32 %v11457_v58, %v11457_v58 }
 0xb15   : > { %v2425_v63 = vpack.c.bf16 %v2417_v59, %v2416_v50  ;;  %v2392_v3 = vadd.f32 %v7790_v18, %v2391_v46  ;;  %v8705_v62 = vpop.f32.mrb[113].mxu1 }
 0xb16   : > { %v2424_v7 = vpack.c.bf16 %v2415_v35, %v2414_v5  ;;  %v2394_v27 = vpop.f32.mrb[114].mxu1  ;;  %v11473_v20 = vsub.f32 %v2452_v31, %v2516_v51 }
 0xb17   : > { %v11434_v33 = vadd.bf16 %v2425_v63, %v10232_v40  ;;  %v2438_v36 = vmul.f32 %v2437_v26, %v2392_v3  ;;  %v2395_v34 = vadd.f32 %v7790_v18, %v2394_v27  ;;  %v8706_v28 = vpop.f32.mrb[115].mxu1  ;;  %v2517_v18 = vmul.f32 0.015625, %v2477_v52 }
 0xb18   : > { %v11437_v12 = vadd.bf16 %v2424_v7, %v10235_v42  ;;  %v2546_v63 = vmul.f32 %v11461_v39, %v11461_v39  ;;  %v2548_v28 = vmul.f32 %v11473_v20, %v11473_v20 }
 0xb19   : > { %v8059_v53 = vpack.c.bf16 %v2438_v36, %v2438_v36  ;;  %v2439_v30 = vmul.f32 %v2437_v26, %v2395_v34  ;;  %v2464_v40 = vunpack.c.l.bf16 %v11434_v33  ;;  %v2465_v19 = vunpack.c.h.bf16 %v11434_v33 }
 0xb1a   : > { %v2462_v47 = vunpack.c.l.bf16 %v11437_v12  ;;  %v2463_v29 = vunpack.c.h.bf16 %v11437_v12  ;;  %v11477_v46 = vsub.f32 %v2453_v57, %v2517_v18  ;;  %v2565_v57 = vsel %vm237_vm1, %v2547_v11, 0.0  ;;  %v9197_v11 = vld [vmem:[%s14428_s18 + $0x14] ss:$8 sps:$4 sm:$0xff]  }
 0xb1b   : > { %v8060_v15 = vpack.c.bf16 %v2439_v30, %v2439_v30  ;;  %v11443_v10 = vadd.bf16 %v8059_v53, %v14487_v0  ;;  %v2508_v26 = vsel %vm237_vm1, %v2464_v40, 0.0  ;;  %v2511_v5 = vsel %vm237_vm1, %v2465_v19, 0.0 }
 0xb1c   : > { %v2502_v42 = vsel %vm237_vm1, %v2462_v47, 0.0  ;;  %v2505_v56 = vsel %vm237_vm1, %v2463_v29, 0.0  ;;  %v2562_v34 = vsel %vm237_vm1, %v2546_v63, 0.0  ;;  %v2549_v60 = vmul.f32 %v11477_v46, %v11477_v46  ;;  %v9195_v63 = vld [vmem:[%s14428_s18 + $0x10] ss:$8 sps:$4 sm:$0xff]  }
 0xb1d   : > { %v11453_v4 = vadd.bf16 %v8060_v15, %v14486_v1  ;;  %2503 = vadd.xlane.f32.xlu1 %v2502_v42  ;;  %2506 = vadd.xlane.f32.xlu0 %v2505_v56  ;;  %v3491_v35 = vunpack.c.l.bf16 %v11443_v10  ;;  %v2568_v52 = vsel %vm237_vm1, %v2548_v28, 0.0 }
 0xb1e   : > { %v2480_v50 = vpop.xlane.xlu1 %2479  ;;  %v2483_v59 = vpop.xlane.xlu0 %2482  ;;  %v2571_v15 = vsel %vm237_vm1, %v2549_v60, 0.0 }
 0xb1f   : > { %v3492_v14 = vunpack.c.l.bf16 %v11453_v4  ;;  %v2518_v3 = vmul.f32 0.015625, %v2480_v50  ;;  %v2519_v62 = vmul.f32 0.015625, %v2483_v59  ;;  %v3493_v7 = vsel %vm237_vm1, %v3491_v35, 0.0 }
 0xb21   : > { %2509 = vadd.xlane.f32.xlu1 %v2508_v26  ;;  %2512 = vadd.xlane.f32.xlu0 %v2511_v5  ;;  %v3496_v31 = vsel %vm237_vm1, %v3492_v14, 0.0  ;;  %v11497_v53 = vsub.f32 %v2454_v23, %v2518_v3  ;;  %v11501_v30 = vsub.f32 %v2455_v32, %v2519_v62  ;;  %v9194_v26 = vld [vmem:[%s14428_s18 + $0x4] ss:$8 sps:$4 sm:$0xff]   ;;  %v9192_v5 = vld [vmem:[%s14428_s18] ss:$8 sps:$4 sm:$0xff]  }
 0xb22   : > { %v2486_v27 = vpop.xlane.xlu1 %2485  ;;  %v2489_v36 = vpop.xlane.xlu0 %2488  ;;  %2806 = vmatprep.subr.bf16.mxu0 %v9194_v26  ;;  %v9200_v3 = vld [vmem:[%s14428_s18 + $0x24] ss:$8 sps:$4 sm:$0xff]   ;;  %v9198_v62 = vld [vmem:[%s14428_s18 + $0x20] ss:$8 sps:$4 sm:$0xff]  }
 0xb23   : > { %v2520_v25 = vmul.f32 0.015625, %v2486_v27  ;;  %v2521_v17 = vmul.f32 0.015625, %v2489_v36  ;;  %v2550_v32 = vmul.f32 %v11497_v53, %v11497_v53  ;;  %v2551_v56 = vmul.f32 %v11501_v30, %v11501_v30  ;;  %2807 = vmatpush1.bf16.msra.mxu0 %v9192_v5 }
 0xb24   : > { %2808 = vmatprep.subr.bf16.mxu0 %v9197_v11 }
 0xb25   : > { %3494 = vadd.xlane.f32.xlu1 %v3493_v7  ;;  %3497 = vadd.xlane.f32.xlu0 %v3496_v31  ;;  %v11507_v42 = vsub.f32 %v2456_v8, %v2520_v25  ;;  %v11511_v23 = vsub.f32 %v2457_v55, %v2521_v17  ;;  %v2574_v51 = vsel %vm237_vm1, %v2550_v32, 0.0  ;;  %v2577_v18 = vsel %vm237_vm1, %v2551_v56, 0.0  ;;  %v9203_v7 = vld [vmem:[%s14428_s18 + $0x34] ss:$8 sps:$4 sm:$0xff]   ;;  %v9201_v31 = vld [vmem:[%s14428_s18 + $0x30] ss:$8 sps:$4 sm:$0xff]  }
 0xb27   : > { %v2552_v8 = vmul.f32 %v11507_v42, %v11507_v42  ;;  %v2553_v50 = vmul.f32 %v11511_v23, %v11511_v23  ;;  %2809 = vmatpush1.bf16.msra.mxu0 %v9195_v63 }
 0xb28   : > { %2810 = vmatprep.subr.bf16.mxu0 %v9200_v3 }
 0xb29   : > { %2566 = vadd.xlane.f32.xlu0 %v2565_v57  ;;  %2563 = vadd.xlane.f32.xlu1 %v2562_v34  ;;  %v2580_v55 = vsel %vm237_vm1, %v2552_v8, 0.0  ;;  %v2583_v59 = vsel %vm237_vm1, %v2553_v50, 0.0 }
 0xb2b   : > { %2811 = vmatpush1.bf16.msra.mxu0 %v9198_v62 }
 0xb2c   : > { %2812 = vmatprep.subr.bf16.mxu0 %v9203_v7 }
 0xb2d   : > { %2569 = vadd.xlane.f32.xlu1 %v2568_v52  ;;  %2572 = vadd.xlane.f32.xlu0 %v2571_v15 }
 0xb2f   : > { %2813 = vmatpush1.bf16.msra.mxu0 %v9201_v31 }
 0xb31   : > { %2575 = vadd.xlane.f32.xlu1 %v2574_v51  ;;  %2578 = vadd.xlane.f32.xlu0 %v2577_v18 }
 0xb35   : > { %2581 = vadd.xlane.f32.xlu1 %v2580_v55  ;;  %2584 = vadd.xlane.f32.xlu0 %v2583_v59 }
 0xb79   : > { %v2492_v27 = vpop.xlane.xlu1 %2491  ;;  %v2495_v36 = vpop.xlane.xlu0 %2494 }
 0xb7a   : > { %v2522_v57 = vmul.f32 0.015625, %v2492_v27  ;;  %v2523_v34 = vmul.f32 0.015625, %v2495_v36 }
 0xb7c   : > { %v11551_v28 = vsub.f32 %v2458_v6, %v2522_v57  ;;  %v11555_v60 = vsub.f32 %v2459_v16, %v2523_v34  ;;  %v9206_v57 = vld [vmem:[%s14432_s22 + $0x4] ss:$8 sps:$4 sm:$0xff]  }
 0xb7d   : > { %v2498_v25 = vpop.xlane.xlu1 %2497  ;;  %v2501_v17 = vpop.xlane.xlu0 %2500  ;;  %3595 = vmatprep.subr.bf16.mxu0 %v9206_v57 }
 0xb7e   : > { %v2524_v52 = vmul.f32 0.015625, %v2498_v25  ;;  %v2525_v15 = vmul.f32 0.015625, %v2501_v17  ;;  %v2554_v32 = vmul.f32 %v11551_v28, %v11551_v28  ;;  %v2555_v56 = vmul.f32 %v11555_v60, %v11555_v60 }
 0xb80   : > { %v11563_v51 = vsub.f32 %v2460_v54, %v2524_v52  ;;  %v11567_v6 = vsub.f32 %v2461_v24, %v2525_v15  ;;  %v2586_v16 = vsel %vm237_vm1, %v2554_v32, 0.0  ;;  %v2589_v18 = vsel %vm237_vm1, %v2555_v56, 0.0 }
 0xb81   : > { %2587 = vadd.xlane.f32.xlu1 %v2586_v16  ;;  %2590 = vadd.xlane.f32.xlu0 %v2589_v18 }
 0xb82   : > { %v2556_v8 = vmul.f32 %v11563_v51, %v11563_v51  ;;  %v2557_v50 = vmul.f32 %v11567_v6, %v11567_v6 }
 0xb84   : > { %v2592_v55 = vsel %vm237_vm1, %v2556_v8, 0.0  ;;  %v2595_v54 = vsel %vm237_vm1, %v2557_v50, 0.0 }
 0xb85   : > { %2593 = vadd.xlane.f32.xlu1 %v2592_v55  ;;  %2596 = vadd.xlane.f32.xlu0 %v2595_v54 }
 0xbaa   : > { %v2504_v24 = vpop.xlane.xlu1 %2503  ;;  %v2507_v59 = vpop.xlane.xlu0 %2506 }
 0xbab   : > { %v2526_v26 = vmul.f32 0.015625, %v2504_v24  ;;  %v2527_v5 = vmul.f32 0.015625, %v2507_v59 }
 0xbad   : > { %v11579_v11 = vsub.f32 %v2462_v47, %v2526_v26  ;;  %v11583_v63 = vsub.f32 %v2463_v29, %v2527_v5 }
 0xbae   : > { %v2510_v3 = vpop.xlane.xlu1 %2509  ;;  %v2513_v62 = vpop.xlane.xlu0 %2512 }
 0xbaf   : > { %v2528_v7 = vmul.f32 0.015625, %v2510_v3  ;;  %v2529_v31 = vmul.f32 0.015625, %v2513_v62  ;;  %v2558_v27 = vmul.f32 %v11579_v11, %v11579_v11  ;;  %v2559_v36 = vmul.f32 %v11583_v63, %v11583_v63 }
 0xbb1   : > { %v11594_v47 = vsub.f32 %v2464_v40, %v2528_v7  ;;  %v11598_v29 = vsub.f32 %v2465_v19, %v2529_v31  ;;  %v2598_v34 = vsel %vm237_vm1, %v2558_v27, 0.0  ;;  %v2601_v25 = vsel %vm237_vm1, %v2559_v36, 0.0 }
 0xbb2   : > { %v3495_v17 = vpop.xlane.xlu1 %3494  ;;  %2599 = vadd.xlane.f32.xlu1 %v2598_v34  ;;  %2602 = vadd.xlane.f32.xlu0 %v2601_v25  ;;  %v3498_v52 = vpop.xlane.xlu0 %3497 }
 0xbb3   : > { %v3499_v15 = vmul.f32 0.015625, %v3495_v17  ;;  %v3500_v32 = vmul.f32 0.015625, %v3498_v52  ;;  %v2560_v56 = vmul.f32 %v11594_v47, %v11594_v47  ;;  %v2561_v40 = vmul.f32 %v11598_v29, %v11598_v29 }
 0xbb5   : > { %v11608_v19 = vsub.f32 %v3491_v35, %v3499_v15  ;;  %v11612_v16 = vsub.f32 %v3492_v14, %v3500_v32  ;;  %v2604_v18 = vsel %vm237_vm1, %v2560_v56, 0.0  ;;  %v2607_v8 = vsel %vm237_vm1, %v2561_v40, 0.0 }
 0xbb6   : > { %v2564_v50 = vpop.xlane.xlu1 %2563  ;;  %2605 = vadd.xlane.f32.xlu1 %v2604_v18  ;;  %2608 = vadd.xlane.f32.xlu0 %v2607_v8  ;;  %v2567_v55 = vpop.xlane.xlu0 %2566  ;;  %v11623_v15 = vsub.s32 4, %v10358_v37  ;;  %v11626_v40 = vsub.s32 3, %v10358_v37 }
 0xbb7   : > { %v2610_v54 = vmul.f32 0.015625, %v2564_v50  ;;  %v2611_v24 = vmul.f32 0.015625, %v2567_v55  ;;  %v3503_v59 = vmul.f32 %v11608_v19, %v11608_v19  ;;  %v3504_v35 = vmul.f32 %v11612_v16, %v11612_v16 }
 0xbb8   : > { %14505 = vst [vmem:[#allocation17_spill] sm:$0xff] %v11623_v15  ;;  %14506 = vst [vmem:[#allocation18_spill] sm:$0xff] %v11626_v40  ;;  %v11630_v55 = vrot.slane %v10361_v48, %v11623_v15 }
 0xbb9   : > { %v2626_v26 = vadd.f32 1e-06, %v2610_v54  ;;  %v2627_v5 = vadd.f32 1e-06, %v2611_v24  ;;  %v3505_v14 = vsel %vm237_vm1, %v3503_v59, 0.0  ;;  %v3508_v3 = vsel %vm237_vm1, %v3504_v35, 0.0 }
 0xbba   : > { %3506 = vadd.xlane.f32.xlu1 %v3505_v14  ;;  %v2570_v62 = vpop.xlane.xlu1 %2569  ;;  %3509 = vadd.xlane.f32.xlu0 %v3508_v3  ;;  %v2573_v7 = vpop.xlane.xlu0 %2572  ;;  %v11634_v35 = vrot.slane %v11321_v44, %v11626_v40 }
 0xbbb   : > { %9472 = vrsqrt.f32 %v2626_v26  ;;  %v2612_v31 = vmul.f32 0.015625, %v2570_v62  ;;  %v2613_v27 = vmul.f32 0.015625, %v2573_v7 }
 0xbbc   : > { %9474 = vrsqrt.f32 %v2627_v5 }
 0xbbd   : > { %v2628_v36 = vadd.f32 1e-06, %v2612_v31  ;;  %v2629_v57 = vadd.f32 1e-06, %v2613_v27 }
 0xbbe   : > { %v2576_v34 = vpop.xlane.xlu1 %2575  ;;  %v2579_v25 = vpop.xlane.xlu0 %2578 }
 0xbbf   : > { %9476 = vrsqrt.f32 %v2628_v36  ;;  %v2614_v17 = vmul.f32 0.015625, %v2576_v34  ;;  %v2615_v52 = vmul.f32 0.015625, %v2579_v25 }
 0xbc0   : > { %9478 = vrsqrt.f32 %v2629_v57 }
 0xbc1   : > { %v2630_v32 = vadd.f32 1e-06, %v2614_v17  ;;  %v2631_v56 = vadd.f32 1e-06, %v2615_v52 }
 0xbc2   : > { %v2582_v18 = vpop.xlane.xlu1 %2581  ;;  %v2585_v8 = vpop.xlane.xlu0 %2584 }
 0xbc3   : > { %9480 = vrsqrt.f32 %v2630_v32  ;;  %v2616_v50 = vmul.f32 0.015625, %v2582_v18  ;;  %v2617_v54 = vmul.f32 0.015625, %v2585_v8 }
 0xbc4   : > { %9482 = vrsqrt.f32 %v2631_v56 }
 0xbc5   : > { %v9473_v24 = vpop.eup %9472  ;;  %v2632_v14 = vadd.f32 1e-06, %v2616_v50  ;;  %v2633_v62 = vadd.f32 1e-06, %v2617_v54 }
 0xbc6   : > { %v9475_v59 = vpop.eup %9474  ;;  %v2658_v26 = vmul.f32 %v9473_v24, %v11461_v39 }
 0xbc7   : > { %v2659_v5 = vmul.f32 %v9475_v59, %v11457_v58  ;;  %9484 = vrsqrt.f32 %v2632_v14  ;;  %v9204_v58 = vld [vmem:[%s14432_s22] ss:$8 sps:$4 sm:$0xff]   ;;  %v9207_v14 = vld [vmem:[%s14432_s22 + $0x10] ss:$8 sps:$4 sm:$0xff]  }
 0xbc8   : > { %v2678_v3 = vmul.f32 %v11630_v55, %v2658_v26  ;;  %9486 = vrsqrt.f32 %v2633_v62 }
 0xbc9   : > { %v9477_v7 = vpop.eup %9476  ;;  %v2679_v48 = vmul.f32 %v11630_v55, %v2659_v5 }
 0xbca   : > { %v9479_v31 = vpop.eup %9478  ;;  %v2698_v27 = vadd.f32 %v11634_v35, %v2678_v3  ;;  %v2660_v36 = vmul.f32 %v9477_v7, %v11473_v20  ;;  %v9212_v3 = vld [vmem:[%s14432_s22 + $0x24] ss:$8 sps:$4 sm:$0xff]  }
 0xbcb   : > { %v2699_v57 = vadd.f32 %v11634_v35, %v2679_v48  ;;  %v2661_v44 = vmul.f32 %v9479_v31, %v11477_v46  ;;  %v9215_v48 = vld [vmem:[%s14432_s22 + $0x34] ss:$8 sps:$4 sm:$0xff]  }
 0xbcc   : > { %v2680_v25 = vmul.f32 %v11630_v55, %v2660_v36  ;;  %v9213_v36 = vld [vmem:[%s14432_s22 + $0x30] ss:$8 sps:$4 sm:$0xff]  }
 0xbcd   : > { %v9481_v39 = vpop.eup %9480  ;;  %v2714_v34 = vpack.c.bf16 %v2699_v57, %v2698_v27  ;;  %v2681_v17 = vmul.f32 %v11630_v55, %v2661_v44 }
 0xbce   : > { %v9483_v52 = vpop.eup %9482  ;;  %v2700_v20 = vadd.f32 %v11634_v35, %v2680_v25  ;;  %v2662_v32 = vmul.f32 %v9481_v39, %v11497_v53 }
 0xbcf   : > { %7806 = vmatmul.mubr.msk.bf16.vlgmr.msra.gmra.mrb[108].mxu0 %vm237_vm1, %v2714_v34  ;;  %v2701_v46 = vadd.f32 %v11634_v35, %v2681_v17  ;;  %v2663_v56 = vmul.f32 %v9483_v52, %v11501_v30  ;;  %v9209_v30 = vld [vmem:[%s14432_s22 + $0x14] ss:$8 sps:$4 sm:$0xff]  }
 0xbd0   : > { %2848 = vmatprep.mubr.bf16.mxu0 %v14504_v9  ;;  %3596 = vmatpush1.bf16.msra.mxu0 %v9204_v58  ;;  %v2682_v50 = vmul.f32 %v11630_v55, %v2662_v32 }
 0xbd1   : > { %v9485_v18 = vpop.eup %9484  ;;  %v2715_v8 = vpack.c.bf16 %v2701_v46, %v2700_v20  ;;  %v2683_v54 = vmul.f32 %v11630_v55, %v2663_v56  ;;  %3597 = vmatprep.subr.bf16.mxu0 %v9209_v30 }
 0xbd2   : > { %v9487_v24 = vpop.eup %9486  ;;  %v2702_v59 = vadd.f32 %v11634_v35, %v2682_v50  ;;  %v2664_v5 = vmul.f32 %v9485_v18, %v11507_v42 }
 0xbd3   : > { %v2703_v26 = vadd.f32 %v11634_v35, %v2683_v54  ;;  %v2665_v53 = vmul.f32 %v9487_v24, %v11511_v23  ;;  %v9210_v23 = vld [vmem:[%s14432_s22 + $0x20] ss:$8 sps:$4 sm:$0xff]  }
 0xbd4   : > { %v2684_v7 = vmul.f32 %v11630_v55, %v2664_v5  ;;  %3598 = vmatpush1.bf16.msra.mxu0 %v9207_v14 }
 0xbd5   : > { %v2716_v62 = vpack.c.bf16 %v2703_v26, %v2702_v59  ;;  %v2685_v42 = vmul.f32 %v11630_v55, %v2665_v53  ;;  %3599 = vmatprep.subr.bf16.mxu0 %v9212_v3 }
 0xbd6   : > { %v2704_v31 = vadd.f32 %v11634_v35, %v2684_v7 }
 0xbd7   : > { %7807 = vmatmul.mubr.msk.bf16.gmra.mrb[112].mxu0 %vm237_vm1, %v2715_v8  ;;  %v2705_v27 = vadd.f32 %v11634_v35, %v2685_v42 }
 0xbd8   : > { %2858 = vmatprep.mubr.bf16.mxu0 %v14504_v9  ;;  %3600 = vmatpush1.bf16.msra.mxu0 %v9210_v23  ;;  %v9217_v23 = vld [vmem:[%s14430_s20] sm:$0xff]  }
 0xbd9   : > { %3601 = vmatprep.subr.bf16.mxu0 %v9215_v48  ;;  %v2717_v57 = vpack.c.bf16 %v2705_v27, %v2704_v31  ;;  %v9219_v31 = vld [vmem:[%s14430_s20 + $0x8] sm:$0xff]   ;;  %v9220_v27 = vld [vmem:[%s14430_s20 + $0x50] sm:$0xff]  }
 0xbdc   : > { %3602 = vmatpush1.bf16.msra.mxu0 %v9213_v36 }
 0xbdf   : > { %7808 = vmatmul.mubr.msk.bf16.gmra.mrb[116].mxu0 %vm237_vm1, %v2716_v62 }
 0xbe0   : > { %2868 = vmatprep.mubr.bf16.mxu0 %v14504_v9 }
 0xbe7   : > { %7809 = vmatmul.mubr.msk.bf16.gmra.mrb[120].mxu0 %vm237_vm1, %v2717_v57  ;;  %v9221_v57 = vld [vmem:[%s14430_s20 + $0x10] sm:$0xff]  }
 0xbe8   : > { %2878 = vmatprep.mubr.bf16.mxu0 %v14504_v9 }
 0xc0e   : > { %v2588_v44 = vpop.xlane.xlu1 %2587  ;;  %v2591_v58 = vpop.xlane.xlu0 %2590 }
 0xc0f   : > { %v2618_v39 = vmul.f32 0.015625, %v2588_v44  ;;  %v2619_v34 = vmul.f32 0.015625, %v2591_v58  ;;  %v9222_v44 = vld [vmem:[%s14430_s20 + $0x58] sm:$0xff]  }
 0xc10   : > { %v9223_v58 = vld [vmem:[%s14430_s20 + $0x18] sm:$0xff]  }
 0xc11   : > { %v2634_v25 = vadd.f32 1e-06, %v2618_v39  ;;  %v2635_v17 = vadd.f32 1e-06, %v2619_v34  ;;  %v9224_v39 = vld [vmem:[%s14430_s20 + $0x60] sm:$0xff]  }
 0xc12   : > { %v2594_v52 = vpop.xlane.xlu1 %2593  ;;  %v2597_v20 = vpop.xlane.xlu0 %2596  ;;  %v9225_v34 = vld [vmem:[%s14430_s20 + $0x20] sm:$0xff]  }
 0xc13   : > { %9488 = vrsqrt.f32 %v2634_v25  ;;  %v2620_v46 = vmul.f32 0.015625, %v2594_v52  ;;  %v2621_v32 = vmul.f32 0.015625, %v2597_v20  ;;  %v9226_v25 = vld [vmem:[%s14430_s20 + $0x68] sm:$0xff]  }
 0xc14   : > { %9490 = vrsqrt.f32 %v2635_v17  ;;  %v9227_v17 = vld [vmem:[%s14430_s20 + $0x28] sm:$0xff]  }
 0xc15   : > { %v2636_v56 = vadd.f32 1e-06, %v2620_v46  ;;  %v2637_v18 = vadd.f32 1e-06, %v2621_v32  ;;  %v9228_v46 = vld [vmem:[%s14430_s20 + $0x70] sm:$0xff]  }
 0xc17   : > { %9492 = vrsqrt.f32 %v2636_v56 }
 0xc18   : > { %9494 = vrsqrt.f32 %v2637_v18  ;;  %v9229_v18 = vld [vmem:[%s14430_s20 + $0x30] sm:$0xff]  }
 0xc1d   : > { %v9489_v8 = vpop.eup %9488 }
 0xc1e   : > { %v9491_v50 = vpop.eup %9490  ;;  %v2666_v54 = vmul.f32 %v9489_v8, %v11551_v28  ;;  %v9216_v28 = vld [vmem:[%s14430_s20 + $0x40] sm:$0xff]  }
 0xc1f   : > { %v2667_v24 = vmul.f32 %v9491_v50, %v11555_v60  ;;  %8167 = vmatprep.subr.bf16.mxu1 %v9216_v28 }
 0xc20   : > { %v2686_v59 = vmul.f32 %v11630_v55, %v2666_v54  ;;  %8168 = vmatpush3.bf16.msra.mxu1 %v9217_v23 }
 0xc21   : > { %v9493_v26 = vpop.eup %9492  ;;  %v2687_v5 = vmul.f32 %v11630_v55, %v2667_v24 }
 0xc22   : > { %v9495_v53 = vpop.eup %9494  ;;  %v2706_v30 = vadd.f32 %v11634_v35, %v2686_v59  ;;  %v2668_v14 = vmul.f32 %v9493_v26, %v11563_v51  ;;  %v9218_v51 = vld [vmem:[%s14430_s20 + $0x48] sm:$0xff]   ;;  %v9230_v59 = vld [vmem:[%s14430_s20 + $0x78] sm:$0xff]  }
 0xc23   : > { %v2707_v3 = vadd.f32 %v11634_v35, %v2687_v5  ;;  %v2669_v62 = vmul.f32 %v9495_v53, %v11567_v6  ;;  %8169 = vmatprep.subr.bf16.mxu1 %v9218_v51  ;;  %v9231_v53 = vld [vmem:[%s14430_s20 + $0x38] sm:$0xff]  }
 0xc24   : > { %v2688_v60 = vmul.f32 %v11630_v55, %v2668_v14  ;;  %8170 = vmatpush3.bf16.msra.mxu1 %v9219_v31 }
 0xc25   : > { %v2718_v7 = vpack.c.bf16 %v2707_v3, %v2706_v30  ;;  %v2689_v42 = vmul.f32 %v11630_v55, %v2669_v62  ;;  %8171 = vmatprep.subr.bf16.mxu1 %v9220_v27 }
 0xc26   : > { %v2708_v6 = vadd.f32 %v11634_v35, %v2688_v60 }
 0xc27   : > { %7810 = vmatmul.mubr.msk.bf16.gmra.mrb[124].mxu0 %vm237_vm1, %v2718_v7  ;;  %v2709_v48 = vadd.f32 %v11634_v35, %v2689_v42 }
 0xc28   : > { %2888 = vmatprep.mubr.bf16.mxu0 %v14504_v9  ;;  %8172 = vmatpush3.bf16.msra.mxu1 %v9221_v57 }
 0xc29   : > { %v2719_v36 = vpack.c.bf16 %v2709_v48, %v2708_v6  ;;  %8173 = vmatprep.subr.bf16.mxu1 %v9222_v44 }
 0xc2c   : > { %8174 = vmatpush3.bf16.msra.mxu1 %v9223_v58 }
 0xc2d   : > { %8175 = vmatprep.subr.bf16.mxu1 %v9224_v39 }
 0xc2f   : > { %7811 = vmatmul.mubr.msk.bf16.gmra.mrb[128].mxu0 %vm237_vm1, %v2719_v36 }
 0xc30   : > { %2898 = vmatprep.mubr.bf16.mxu0 %v14504_v9  ;;  %8176 = vmatpush3.bf16.msra.mxu1 %v9225_v34 }
 0xc31   : > { %8177 = vmatprep.subr.bf16.mxu1 %v9226_v25 }
 0xc34   : > { %8178 = vmatpush3.bf16.msra.mxu1 %v9227_v17 }
 0xc35   : > { %8179 = vmatprep.subr.bf16.mxu1 %v9228_v46 }
 0xc38   : > { %8180 = vmatpush3.bf16.msra.mxu1 %v9229_v18 }
 0xc39   : > { %8181 = vmatprep.subr.bf16.mxu1 %v9230_v59 }
 0xc3c   : > { %8182 = vmatpush3.bf16.msra.mxu1 %v9231_v53 }
 0xc3f   : > { %v2600_v52 = vpop.xlane.xlu1 %2599  ;;  %v2603_v20 = vpop.xlane.xlu0 %2602 }
 0xc40   : > { %v2622_v32 = vmul.f32 0.015625, %v2600_v52  ;;  %v2623_v56 = vmul.f32 0.015625, %v2603_v20  ;;  %v3522_v20 = vrot.slane %v10393_v45, %v11623_v15 }
 0xc42   : > { %v2638_v8 = vadd.f32 1e-06, %v2622_v32  ;;  %v2639_v50 = vadd.f32 1e-06, %v2623_v56  ;;  %v3528_v56 = vrot.slane %v11427_v21, %v11626_v40 }
 0xc43   : > { %v2606_v54 = vpop.xlane.xlu1 %2605  ;;  %v2609_v24 = vpop.xlane.xlu0 %2608 }
 0xc44   : > { %9496 = vrsqrt.f32 %v2638_v8  ;;  %v2624_v26 = vmul.f32 0.015625, %v2606_v54  ;;  %v2625_v5 = vmul.f32 0.015625, %v2609_v24 }
 0xc45   : > { %9498 = vrsqrt.f32 %v2639_v50 }
 0xc46   : > { %v2640_v30 = vadd.f32 1e-06, %v2624_v26  ;;  %v2641_v14 = vadd.f32 1e-06, %v2625_v5 }
 0xc47   : > { %v3507_v3 = vpop.xlane.xlu1 %3506  ;;  %v3510_v62 = vpop.xlane.xlu0 %3509 }
 0xc48   : > { %9500 = vrsqrt.f32 %v2640_v30  ;;  %v3511_v28 = vmul.f32 0.015625, %v3507_v3  ;;  %v3512_v7 = vmul.f32 0.015625, %v3510_v62 }
 0xc49   : > { %9502 = vrsqrt.f32 %v2641_v14 }
 0xc4a   : > { %v3513_v60 = vadd.f32 1e-06, %v3511_v28  ;;  %v3514_v42 = vadd.f32 1e-06, %v3512_v7 }
 0xc4c   : > { %9504 = vrsqrt.f32 %v3513_v60 }
 0xc4d   : > { %9506 = vrsqrt.f32 %v3514_v42 }
 0xc4e   : > { %v9497_v23 = vpop.eup %9496 }
 0xc4f   : > { %v9499_v51 = vpop.eup %9498  ;;  %v2670_v6 = vmul.f32 %v9497_v23, %v11579_v11 }
 0xc50   : > { %v2671_v48 = vmul.f32 %v9499_v51, %v11583_v63 }
 0xc51   : > { %v2690_v31 = vmul.f32 %v11630_v55, %v2670_v6 }
 0xc52   : > { %v9501_v27 = vpop.eup %9500  ;;  %v2691_v36 = vmul.f32 %v11630_v55, %v2671_v48 }
 0xc53   : > { %v9503_v57 = vpop.eup %9502  ;;  %v2710_v44 = vadd.f32 %v11634_v35, %v2690_v31  ;;  %v2672_v58 = vmul.f32 %v9501_v27, %v11594_v47 }
 0xc54   : > { %v2711_v39 = vadd.f32 %v11634_v35, %v2691_v36  ;;  %v2673_v34 = vmul.f32 %v9503_v57, %v11598_v29 }
 0xc55   : > { %v2692_v11 = vmul.f32 %v11630_v55, %v2672_v58 }
 0xc56   : > { %v9505_v25 = vpop.eup %9504  ;;  %v2720_v17 = vpack.c.bf16 %v2711_v39, %v2710_v44  ;;  %v2693_v63 = vmul.f32 %v11630_v55, %v2673_v34 }
 0xc57   : > { %v9507_v52 = vpop.eup %9506  ;;  %v3517_v47 = vmul.f32 %v9505_v25, %v11608_v19  ;;  %v2712_v29 = vadd.f32 %v11634_v35, %v2692_v11  ;;  %v2730_v19 = vld [vmem:[%s14429_s19] sm:$0x3] }
 0xc58   : > { %7812 = vmatmul.mubr.msk.bf16.gmra.mrb[132].mxu0 %vm237_vm1, %v2720_v17  ;;  %v3518_v46 = vmul.f32 %v9507_v52, %v11612_v16  ;;  %v2713_v32 = vadd.f32 %v11634_v35, %v2693_v63  ;;  %v14507_v16 = vld [vmem:[#allocation16_spill] sm:$0xff]  ;;  %v14508_v35 = vld [vmem:[#allocation15_spill] sm:$0xff] }
 0xc59   : > { %2908 = vmatprep.mubr.bf16.mxu0 %v14504_v9  ;;  %v3523_v55 = vmul.f32 %v3522_v20, %v3517_v47  ;;  %v11781_v21 = vrot.slane %v2730_v19, %v14507_v16  ;;  %v11784_v24 = vrot.slane %v2730_v19, %v14508_v35 }
 0xc5a   : > { %v3524_v18 = vmul.f32 %v3522_v20, %v3518_v46  ;;  %v2721_v8 = vpack.c.bf16 %v2713_v32, %v2712_v29 }
 0xc5b   : > { %v3529_v45 = vadd.f32 %v3528_v56, %v3523_v55 }
 0xc5c   : > { %v3530_v50 = vadd.f32 %v3528_v56, %v3524_v18 }
 0xc5e   : > { %v3531_v54 = vpack.c.bf16 %v3530_v50, %v3529_v45 }
 0xc60   : > { %7813 = vmatmul.mubr.msk.bf16.gmra.mrb[136].mxu0 %vm237_vm1, %v2721_v8 }
 0xc61   : > { %3627 = vmatprep.mubr.bf16.mxu0 %v14504_v9 }
 0xc68   : > { %7839 = vmatmul.mubr.msk.bf16.vlgmr.msra.gmra.mrb[140].mxu0 %vm237_vm1, %v3531_v54 }
 0xc69   : > { %4307 = vmatprep.mubr.bf16.mxu0 %v14504_v9 }
 0xca2   : > { %v2840_v59 = vpop.f32.mrb[108].mxu0 }
 0xca3   : > { %v11787_v26 = vadd.f32 %v2840_v59, %v11781_v21  ;;  %v2842_v5 = vpop.f32.mrb[109].mxu0 }
 0xca4   : > { %v11790_v53 = vadd.f32 %v2842_v5, %v11784_v24  ;;  %v2844_v30 = vpop.f32.mrb[110].mxu0 }
 0xca5   : > { %v2919_v14 = vmul.f32 %v11787_v26, %v11787_v26  ;;  %v11795_v3 = vadd.f32 %v2844_v30, %v11781_v21  ;;  %v2846_v62 = vpop.f32.mrb[111].mxu0 }
 0xca6   : > { %v2920_v28 = vmul.f32 %v11790_v53, %v11790_v53  ;;  %v11800_v7 = vadd.f32 %v2846_v62, %v11784_v24 }
 0xca7   : > { %v2951_v60 = vmul.f32 %v2919_v14, %v11787_v26  ;;  %v2921_v42 = vmul.f32 %v11795_v3, %v11795_v3 }
 0xca8   : > { %v2952_v23 = vmul.f32 %v2920_v28, %v11790_v53  ;;  %v2922_v51 = vmul.f32 %v11800_v7, %v11800_v7 }
 0xca9   : > { %v2983_v6 = vmul.f32 0.044715, %v2951_v60  ;;  %v2953_v48 = vmul.f32 %v2921_v42, %v11795_v3 }
 0xcaa   : > { %v2984_v31 = vmul.f32 0.044715, %v2952_v23  ;;  %v2954_v27 = vmul.f32 %v2922_v51, %v11800_v7  ;;  %v2850_v36 = vpop.f32.mrb[112].mxu0 }
 0xcab   : > { %v3015_v57 = vadd.f32 %v2983_v6, %v11787_v26  ;;  %v2985_v44 = vmul.f32 0.044715, %v2953_v48  ;;  %v11812_v58 = vadd.f32 %v2850_v36, %v11781_v21  ;;  %v2852_v39 = vpop.f32.mrb[113].mxu0 }
 0xcac   : > { %v3016_v34 = vadd.f32 %v2984_v31, %v11790_v53  ;;  %v2986_v25 = vmul.f32 0.044715, %v2954_v27  ;;  %v11816_v17 = vadd.f32 %v2852_v39, %v11784_v24  ;;  %v2854_v11 = vpop.f32.mrb[114].mxu0 }
 0xcad   : > { %v3047_v63 = vmul.f32 0.7978846, %v3015_v57  ;;  %v3017_v52 = vadd.f32 %v2985_v44, %v11795_v3  ;;  %v2923_v20 = vmul.f32 %v11812_v58, %v11812_v58  ;;  %v11822_v47 = vadd.f32 %v2854_v11, %v11781_v21  ;;  %v2856_v46 = vpop.f32.mrb[115].mxu0 }
 0xcae   : > { %v3048_v29 = vmul.f32 0.7978846, %v3016_v34  ;;  %v3018_v32 = vadd.f32 %v2986_v25, %v11800_v7  ;;  %v2924_v56 = vmul.f32 %v11816_v17, %v11816_v17  ;;  %v11828_v55 = vadd.f32 %v2856_v46, %v11784_v24 }
 0xcaf   : > { %9508 = vtanh.f32 %v3047_v63  ;;  %v3049_v18 = vmul.f32 0.7978846, %v3017_v52  ;;  %v2955_v8 = vmul.f32 %v2923_v20, %v11812_v58  ;;  %v2925_v45 = vmul.f32 %v11822_v47, %v11822_v47 }
 0xcb0   : > { %9510 = vtanh.f32 %v3048_v29  ;;  %v3050_v50 = vmul.f32 0.7978846, %v3018_v32  ;;  %v2956_v54 = vmul.f32 %v2924_v56, %v11816_v17  ;;  %v2926_v19 = vmul.f32 %v11828_v55, %v11828_v55 }
 0xcb1   : > { %9512 = vtanh.f32 %v3049_v18  ;;  %v2987_v59 = vmul.f32 0.044715, %v2955_v8  ;;  %v2957_v5 = vmul.f32 %v2925_v45, %v11822_v47 }
 0xcb2   : > { %v2988_v30 = vmul.f32 0.044715, %v2956_v54  ;;  %v2958_v14 = vmul.f32 %v2926_v19, %v11828_v55  ;;  %v2860_v62 = vpop.f32.mrb[116].mxu0  ;;  %9514 = vtanh.f32 %v3050_v50 }
 0xcb3   : > { %v3019_v28 = vadd.f32 %v2987_v59, %v11812_v58  ;;  %v2989_v60 = vmul.f32 0.044715, %v2957_v5  ;;  %v11840_v42 = vadd.f32 %v2860_v62, %v11781_v21  ;;  %v2862_v23 = vpop.f32.mrb[117].mxu0 }
 0xcb4   : > { %v3020_v51 = vadd.f32 %v2988_v30, %v11816_v17  ;;  %v2990_v6 = vmul.f32 0.044715, %v2958_v14  ;;  %v11844_v48 = vadd.f32 %v2862_v23, %v11784_v24  ;;  %v2864_v31 = vpop.f32.mrb[118].mxu0 }
 0xcb5   : > { %v3051_v27 = vmul.f32 0.7978846, %v3019_v28  ;;  %v3021_v36 = vadd.f32 %v2989_v60, %v11822_v47  ;;  %v2927_v57 = vmul.f32 %v11840_v42, %v11840_v42  ;;  %v11850_v44 = vadd.f32 %v2864_v31, %v11781_v21  ;;  %v2866_v39 = vpop.f32.mrb[119].mxu0 }
 0xcb6   : > { %v3052_v34 = vmul.f32 0.7978846, %v3020_v51  ;;  %v3022_v25 = vadd.f32 %v2990_v6, %v11828_v55  ;;  %v2928_v11 = vmul.f32 %v11844_v48, %v11844_v48  ;;  %v11856_v63 = vadd.f32 %v2866_v39, %v11784_v24 }
 0xcb7   : > { %9516 = vtanh.f32 %v3051_v27  ;;  %v3053_v52 = vmul.f32 0.7978846, %v3021_v36  ;;  %v2959_v20 = vmul.f32 %v2927_v57, %v11840_v42  ;;  %v2929_v46 = vmul.f32 %v11850_v44, %v11850_v44 }
 0xcb8   : > { %9518 = vtanh.f32 %v3052_v34  ;;  %v3054_v29 = vmul.f32 0.7978846, %v3022_v25  ;;  %v2960_v32 = vmul.f32 %v2928_v11, %v11844_v48  ;;  %v2930_v56 = vmul.f32 %v11856_v63, %v11856_v63 }
 0xcb9   : > { %v9509_v18 = vpop.eup %9508  ;;  %9520 = vtanh.f32 %v3053_v52  ;;  %v2991_v8 = vmul.f32 0.044715, %v2959_v20  ;;  %v2961_v45 = vmul.f32 %v2929_v46, %v11850_v44 }
 0xcba   : > { %v9511_v50 = vpop.eup %9510  ;;  %v3111_v54 = vadd.f32 1.0, %v9509_v18  ;;  %9522 = vtanh.f32 %v3054_v29  ;;  %v2992_v19 = vmul.f32 0.044715, %v2960_v32  ;;  %v2962_v59 = vmul.f32 %v2930_v56, %v11856_v63  ;;  %v2870_v5 = vpop.f32.mrb[120].mxu0 }
 0xcbb   : > { %v9513_v30 = vpop.eup %9512  ;;  %v3023_v14 = vadd.f32 %v2991_v8, %v11840_v42  ;;  %v2993_v62 = vmul.f32 0.044715, %v2961_v45  ;;  %v11868_v28 = vadd.f32 %v2870_v5, %v11781_v21  ;;  %v2872_v60 = vpop.f32.mrb[121].mxu0  ;;  %v3112_v23 = vadd.f32 1.0, %v9511_v50 }
 0xcbc   : > { %v3143_v51 = vmul.f32 0.5, %v3111_v54  ;;  %v3113_v6 = vadd.f32 1.0, %v9513_v30  ;;  %v3024_v31 = vadd.f32 %v2992_v19, %v11844_v48  ;;  %v2994_v27 = vmul.f32 0.044715, %v2962_v59  ;;  %v2874_v36 = vpop.f32.mrb[122].mxu0  ;;  %v9515_v52 = vpop.eup %9514 }
 0xcbd   : > { %v3055_v57 = vmul.f32 0.7978846, %v3023_v14  ;;  %v3025_v39 = vadd.f32 %v2993_v62, %v11850_v44  ;;  %v2931_v34 = vmul.f32 %v11868_v28, %v11868_v28  ;;  %v11875_v25 = vadd.f32 %v2872_v60, %v11784_v24  ;;  %v2876_v11 = vpop.f32.mrb[123].mxu0 }
 0xcbe   : > { %v11878_v20 = vmul.f32 %v3143_v51, %v11787_v26  ;;  %v3145_v46 = vmul.f32 0.5, %v3113_v6  ;;  %v3056_v29 = vmul.f32 0.7978846, %v3024_v31  ;;  %v3026_v32 = vadd.f32 %v2994_v27, %v11856_v63  ;;  %v9232_v26 = vld [vmem:[%s14434_s24 + $0x40] sm:$0xff]  }
 0xcbf   : > { %9524 = vtanh.f32 %v3055_v57  ;;  %v3057_v56 = vmul.f32 0.7978846, %v3025_v39  ;;  %v2963_v18 = vmul.f32 %v2931_v34, %v11868_v28  ;;  %v2932_v8 = vmul.f32 %v11875_v25, %v11875_v25  ;;  %8231 = vmatprep.subr.bf16.mxu1 %v9232_v26 }
 0xcc0   : > { %v3177_v45 = vmul.f32 %v3145_v46, %v11795_v3  ;;  %9526 = vtanh.f32 %v3056_v29  ;;  %v3058_v50 = vmul.f32 0.7978846, %v3026_v32  ;;  %v11886_v54 = vadd.f32 %v2874_v36, %v11781_v21 }
 0xcc1   : > { %v9517_v19 = vpop.eup %9516  ;;  %9528 = vtanh.f32 %v3057_v56  ;;  %v2995_v59 = vmul.f32 0.044715, %v2963_v18  ;;  %v2964_v5 = vmul.f32 %v2932_v8, %v11875_v25  ;;  %v11893_v30 = vadd.f32 %v2876_v11, %v11784_v24 }
 0xcc2   : > { %v9519_v14 = vpop.eup %9518  ;;  %9530 = vtanh.f32 %v3058_v50  ;;  %v2933_v3 = vmul.f32 %v11886_v54, %v11886_v54  ;;  %v3114_v62 = vadd.f32 1.0, %v9515_v52  ;;  %v3144_v60 = vmul.f32 0.5, %v3112_v23 }
 0xcc3   : > { %v9521_v51 = vpop.eup %9520  ;;  %v3027_v6 = vadd.f32 %v2995_v59, %v11868_v28  ;;  %v2996_v31 = vmul.f32 0.044715, %v2964_v5  ;;  %v2934_v27 = vmul.f32 %v11893_v30, %v11893_v30  ;;  %v3207_v36 = vpack.c.bf16 %v3177_v45, %v11878_v20 }
 0xcc4   : > { %v9523_v57 = vpop.eup %9522  ;;  %v2965_v39 = vmul.f32 %v2933_v3, %v11886_v54  ;;  %v3146_v34 = vmul.f32 0.5, %v3114_v62  ;;  %v3176_v11 = vmul.f32 %v3144_v60, %v11790_v53  ;;  %v3116_v46 = vadd.f32 1.0, %v9519_v14  ;;  %v9233_v3 = vld [vmem:[%s14434_s24] sm:$0xff]  }
 0xcc5   : > { %v3059_v29 = vmul.f32 0.7978846, %v3027_v6  ;;  %v3028_v23 = vadd.f32 %v2996_v31, %v11875_v25  ;;  %v2966_v52 = vmul.f32 %v2934_v27, %v11893_v30  ;;  %v3118_v32 = vadd.f32 1.0, %v9523_v57  ;;  %v9234_v6 = vld [vmem:[%s14434_s24 + $0x48] sm:$0xff]  }
 0xcc6   : > { %v2997_v56 = vmul.f32 0.044715, %v2965_v39  ;;  %v3178_v18 = vmul.f32 %v3146_v34, %v11800_v7  ;;  %v3148_v8 = vmul.f32 0.5, %v3116_v46  ;;  %v3115_v50 = vadd.f32 1.0, %v9517_v19 }
 0xcc7   : > { %9532 = vtanh.f32 %v3059_v29  ;;  %v3060_v20 = vmul.f32 0.7978846, %v3028_v23  ;;  %v2998_v45 = vmul.f32 0.044715, %v2966_v52  ;;  %v3150_v26 = vmul.f32 0.5, %v3118_v32  ;;  %v9235_v32 = vld [vmem:[%s14434_s24 + $0x8] sm:$0xff]  }
 0xcc8   : > { %v3029_v59 = vadd.f32 %v2997_v56, %v11886_v54  ;;  %v3208_v5 = vpack.c.bf16 %v3178_v18, %v3176_v11  ;;  %v3180_v53 = vmul.f32 %v3148_v8, %v11816_v17  ;;  %v3117_v14 = vadd.f32 1.0, %v9521_v51 }
 0xcc9   : > { %v9525_v62 = vpop.eup %9524  ;;  %9534 = vtanh.f32 %v3060_v20  ;;  %v3030_v7 = vadd.f32 %v2998_v45, %v11893_v30  ;;  %v3182_v19 = vmul.f32 %v3150_v26, %v11828_v55  ;;  %v3147_v60 = vmul.f32 0.5, %v3115_v50  ;;  %v9237_v45 = vld [vmem:[%s14434_s24 + $0x10] sm:$0xff]  }
 0xcca   : > { %v9527_v31 = vpop.eup %9526  ;;  %v3061_v27 = vmul.f32 0.7978846, %v3029_v59  ;;  %3390 = vmatprep.mubr.bf16.mxu1 %v3208_v5  ;;  %v3149_v17 = vmul.f32 0.5, %v3117_v14  ;;  %v3119_v51 = vadd.f32 1.0, %v9525_v62 }
 0xccb   : > { %v9529_v57 = vpop.eup %9528  ;;  %v3062_v39 = vmul.f32 0.7978846, %v3030_v7  ;;  %3391 = vmatmul.mubr.bf16.vlgmr.msra.gmra.mrb[116].mxu1 %v3207_v36  ;;  %v3210_v34 = vpack.c.bf16 %v3182_v19, %v3180_v53  ;;  %v3179_v11 = vmul.f32 %v3147_v60, %v11812_v58  ;;  %v3120_v46 = vadd.f32 1.0, %v9527_v31  ;;  %v9236_v58 = vld [vmem:[%s14434_s24 + $0x50] sm:$0xff]   ;;  %v9238_v53 = vld [vmem:[%s14434_s24 + $0x58] sm:$0xff]  }
 0xccc   : > { %v9531_v29 = vpop.eup %9530  ;;  %9536 = vtanh.f32 %v3061_v27  ;;  %v3181_v55 = vmul.f32 %v3149_v17, %v11822_v47  ;;  %v3121_v23 = vadd.f32 1.0, %v9529_v57  ;;  %v3151_v52 = vmul.f32 0.5, %v3119_v51  ;;  %8232 = vmatpush3.bf16.msra.mxu1 %v9233_v3  ;;  %v9239_v7 = vld [vmem:[%s14434_s24 + $0x18] sm:$0xff]   ;;  %v9241_v17 = vld [vmem:[%s14434_s24 + $0x20] sm:$0xff]   ;;  %v9242_v57 = vld [vmem:[%s14434_s24 + $0x68] sm:$0xff]  }
 0xccd   : > { %9538 = vtanh.f32 %v3062_v39  ;;  %3398 = vmatprep.mubr.bf16.mxu1 %v3210_v34  ;;  %v3122_v56 = vadd.f32 1.0, %v9531_v29  ;;  %v3152_v18 = vmul.f32 0.5, %v3120_v46  ;;  %8233 = vmatprep.subr.bf16.mxu1 %v9234_v6 }
 0xcce   : > { %v3209_v36 = vpack.c.bf16 %v3181_v55, %v3179_v11  ;;  %v3153_v8 = vmul.f32 0.5, %v3121_v23  ;;  %v3183_v47 = vmul.f32 %v3151_v52, %v11840_v42  ;;  %v9243_v55 = vld [vmem:[%s14434_s24 + $0x28] sm:$0xff]   ;;  %v9244_v52 = vld [vmem:[%s14434_s24 + $0x70] sm:$0xff]  }
 0xccf   : > { %v3154_v50 = vmul.f32 0.5, %v3122_v56  ;;  %v3184_v59 = vmul.f32 %v3152_v18, %v11844_v48  ;;  %v9240_v48 = vld [vmem:[%s14434_s24 + $0x60] sm:$0xff]  }
 0xcd0   : > { %v3185_v20 = vmul.f32 %v3153_v8, %v11850_v44  ;;  %8234 = vmatpush3.bf16.msra.mxu1 %v9235_v32 }
 0xcd1   : > { %v9533_v26 = vpop.eup %9532  ;;  %v3186_v5 = vmul.f32 %v3154_v50, %v11856_v63  ;;  %8235 = vmatprep.subr.bf16.mxu1 %v9236_v58 }
 0xcd2   : > { %v3211_v14 = vpack.c.bf16 %v3185_v20, %v3183_v47  ;;  %v3123_v44 = vadd.f32 1.0, %v9533_v26 }
 0xcd3   : > { %v9535_v3 = vpop.eup %9534  ;;  %3399 = vmatmul.mubr.bf16.gmra.mrb[120].mxu1 %v3209_v36  ;;  %v3212_v42 = vpack.c.bf16 %v3186_v5, %v3184_v59 }
 0xcd4   : > { %v3124_v62 = vadd.f32 1.0, %v9535_v3  ;;  %8236 = vmatpush3.bf16.msra.mxu1 %v9237_v45  ;;  %v3155_v6 = vmul.f32 0.5, %v3123_v44 }
 0xcd5   : > { %3406 = vmatprep.mubr.bf16.mxu1 %v3212_v42  ;;  %8237 = vmatprep.subr.bf16.mxu1 %v9238_v53 }
 0xcd6   : > { %v9537_v63 = vpop.eup %9536  ;;  %v3156_v27 = vmul.f32 0.5, %v3124_v62  ;;  %v3187_v34 = vmul.f32 %v3155_v6, %v11868_v28  ;;  %v9245_v28 = vld [vmem:[%s14434_s24 + $0x30] sm:$0xff]  }
 0xcd7   : > { %v9539_v19 = vpop.eup %9538  ;;  %v3125_v60 = vadd.f32 1.0, %v9537_v63 }
 0xcd8   : > { %v3126_v31 = vadd.f32 1.0, %v9539_v19  ;;  %8238 = vmatpush3.bf16.msra.mxu1 %v9239_v7  ;;  %v3188_v46 = vmul.f32 %v3156_v27, %v11875_v25  ;;  %v9246_v25 = vld [vmem:[%s14434_s24 + $0x78] sm:$0xff]  }
 0xcd9   : > { %v3157_v51 = vmul.f32 0.5, %v3125_v60  ;;  %8239 = vmatprep.subr.bf16.mxu1 %v9240_v48 }
 0xcda   : > { %v3158_v39 = vmul.f32 0.5, %v3126_v31 }
 0xcdb   : > { %3407 = vmatmul.mubr.bf16.gmra.mrb[124].mxu1 %v3211_v14  ;;  %v3189_v11 = vmul.f32 %v3157_v51, %v11886_v54  ;;  %v9247_v54 = vld [vmem:[%s14434_s24 + $0x38] sm:$0xff]  }
 0xcdc   : > { %v3190_v29 = vmul.f32 %v3158_v39, %v11893_v30  ;;  %8240 = vmatpush3.bf16.msra.mxu1 %v9241_v17 }
 0xcdd   : > { %v3213_v23 = vpack.c.bf16 %v3189_v11, %v3187_v34  ;;  %8241 = vmatprep.subr.bf16.mxu1 %v9242_v57 }
 0xcde   : > { %v3214_v32 = vpack.c.bf16 %v3190_v29, %v3188_v46 }
 0xce0   : > { %3414 = vmatprep.mubr.bf16.mxu1 %v3214_v32  ;;  %8242 = vmatpush3.bf16.msra.mxu1 %v9243_v55 }
 0xce1   : > { %8243 = vmatprep.subr.bf16.mxu1 %v9244_v52 }
 0xce3   : > { %3415 = vmatmul.mubr.bf16.gmra.mrb[128].mxu1 %v3213_v23 }
 0xce4   : > { %8244 = vmatpush3.bf16.msra.mxu1 %v9245_v28 }
 0xce5   : > { %8245 = vmatprep.subr.bf16.mxu1 %v9246_v25 }
 0xce8   : > { %8246 = vmatpush3.bf16.msra.mxu1 %v9247_v54 }
 0xcfa   : > { %v2880_v30 = vpop.f32.mrb[124].mxu0 }
 0xcfb   : > { %v11966_v56 = vadd.f32 %v2880_v30, %v11781_v21  ;;  %v2882_v18 = vpop.f32.mrb[125].mxu0 }
 0xcfc   : > { %v11969_v58 = vadd.f32 %v2882_v18, %v11784_v24  ;;  %v2884_v36 = vpop.f32.mrb[126].mxu0 }
 0xcfd   : > { %v2935_v8 = vmul.f32 %v11966_v56, %v11966_v56  ;;  %v11974_v50 = vadd.f32 %v2884_v36, %v11781_v21  ;;  %v2886_v47 = vpop.f32.mrb[127].mxu0 }
 0xcfe   : > { %v2936_v20 = vmul.f32 %v11969_v58, %v11969_v58  ;;  %v11979_v45 = vadd.f32 %v2886_v47, %v11784_v24 }
 0xcff   : > { %v2967_v26 = vmul.f32 %v2935_v8, %v11966_v56  ;;  %v2937_v59 = vmul.f32 %v11974_v50, %v11974_v50 }
 0xd00   : > { %v2968_v5 = vmul.f32 %v2936_v20, %v11969_v58  ;;  %v2938_v53 = vmul.f32 %v11979_v45, %v11979_v45 }
 0xd01   : > { %v2999_v14 = vmul.f32 0.044715, %v2967_v26  ;;  %v2969_v3 = vmul.f32 %v2937_v59, %v11974_v50 }
 0xd02   : > { %v3000_v42 = vmul.f32 0.044715, %v2968_v5  ;;  %v2970_v44 = vmul.f32 %v2938_v53, %v11979_v45  ;;  %v2890_v62 = vpop.f32.mrb[128].mxu0 }
 0xd03   : > { %v3031_v7 = vadd.f32 %v2999_v14, %v11966_v56  ;;  %v3001_v48 = vmul.f32 0.044715, %v2969_v3  ;;  %v11991_v63 = vadd.f32 %v2890_v62, %v11781_v21  ;;  %v2892_v19 = vpop.f32.mrb[129].mxu0 }
 0xd04   : > { %v3032_v60 = vadd.f32 %v3000_v42, %v11969_v58  ;;  %v3002_v6 = vmul.f32 0.044715, %v2970_v44  ;;  %v11995_v31 = vadd.f32 %v2892_v19, %v11784_v24  ;;  %v2894_v27 = vpop.f32.mrb[130].mxu0 }
 0xd05   : > { %v3063_v17 = vmul.f32 0.7978846, %v3031_v7  ;;  %v3033_v51 = vadd.f32 %v3001_v48, %v11974_v50  ;;  %v2939_v57 = vmul.f32 %v11991_v63, %v11991_v63  ;;  %v12001_v39 = vadd.f32 %v2894_v27, %v11781_v21  ;;  %v2896_v34 = vpop.f32.mrb[131].mxu0 }
 0xd06   : > { %v3064_v11 = vmul.f32 0.7978846, %v3032_v60  ;;  %v3034_v46 = vadd.f32 %v3002_v6, %v11979_v45  ;;  %v2940_v29 = vmul.f32 %v11995_v31, %v11995_v31  ;;  %v12007_v55 = vadd.f32 %v2896_v34, %v11784_v24 }
 0xd07   : > { %9540 = vtanh.f32 %v3063_v17  ;;  %v3065_v23 = vmul.f32 0.7978846, %v3033_v51  ;;  %v2971_v52 = vmul.f32 %v2939_v57, %v11991_v63  ;;  %v2941_v32 = vmul.f32 %v12001_v39, %v12001_v39 }
 0xd08   : > { %9542 = vtanh.f32 %v3064_v11  ;;  %v3066_v28 = vmul.f32 0.7978846, %v3034_v46  ;;  %v2972_v25 = vmul.f32 %v2940_v29, %v11995_v31  ;;  %v2942_v54 = vmul.f32 %v12007_v55, %v12007_v55 }
 0xd09   : > { %9544 = vtanh.f32 %v3065_v23  ;;  %v3003_v30 = vmul.f32 0.044715, %v2971_v52  ;;  %v2973_v18 = vmul.f32 %v2941_v32, %v12001_v39 }
 0xd0a   : > { %9546 = vtanh.f32 %v3066_v28  ;;  %v3004_v36 = vmul.f32 0.044715, %v2972_v25  ;;  %v2974_v8 = vmul.f32 %v2942_v54, %v12007_v55 }
 0xd0b   : > { %v3035_v47 = vadd.f32 %v3003_v30, %v11991_v63  ;;  %v3005_v20 = vmul.f32 0.044715, %v2973_v18 }
 0xd0c   : > { %v3036_v26 = vadd.f32 %v3004_v36, %v11995_v31  ;;  %v3006_v59 = vmul.f32 0.044715, %v2974_v8 }
 0xd0d   : > { %v3067_v5 = vmul.f32 0.7978846, %v3035_v47  ;;  %v3037_v53 = vadd.f32 %v3005_v20, %v12001_v39 }
 0xd0e   : > { %v3068_v14 = vmul.f32 0.7978846, %v3036_v26  ;;  %v3038_v3 = vadd.f32 %v3006_v59, %v12007_v55 }
 0xd0f   : > { %9548 = vtanh.f32 %v3067_v5  ;;  %v3069_v42 = vmul.f32 0.7978846, %v3037_v53 }
 0xd10   : > { %9550 = vtanh.f32 %v3068_v14  ;;  %v3070_v44 = vmul.f32 0.7978846, %v3038_v3 }
 0xd11   : > { %v9541_v62 = vpop.eup %9540  ;;  %9552 = vtanh.f32 %v3069_v42 }
 0xd12   : > { %v9543_v7 = vpop.eup %9542  ;;  %9554 = vtanh.f32 %v3070_v44  ;;  %v3127_v48 = vadd.f32 1.0, %v9541_v62 }
 0xd13   : > { %v9545_v19 = vpop.eup %9544  ;;  %v3128_v60 = vadd.f32 1.0, %v9543_v7 }
 0xd14   : > { %v9547_v6 = vpop.eup %9546  ;;  %v3129_v27 = vadd.f32 1.0, %v9545_v19  ;;  %v3159_v17 = vmul.f32 0.5, %v3127_v48 }
 0xd15   : > { %v3130_v51 = vadd.f32 1.0, %v9547_v6  ;;  %v3160_v57 = vmul.f32 0.5, %v3128_v60 }
 0xd16   : > { %v3161_v34 = vmul.f32 0.5, %v3129_v27  ;;  %v3191_v46 = vmul.f32 %v3159_v17, %v11966_v56 }
 0xd17   : > { %v3162_v11 = vmul.f32 0.5, %v3130_v51  ;;  %v3192_v52 = vmul.f32 %v3160_v57, %v11969_v58  ;;  %v3540_v51 = vld [vmem:[%s14433_s23] sm:$0x3] }
 0xd18   : > { %v3193_v29 = vmul.f32 %v3161_v34, %v11974_v50 }
 0xd19   : > { %v9549_v23 = vpop.eup %9548  ;;  %v3194_v32 = vmul.f32 %v3162_v11, %v11979_v45 }
 0xd1a   : > { %v9551_v28 = vpop.eup %9550  ;;  %v3215_v25 = vpack.c.bf16 %v3193_v29, %v3191_v46  ;;  %v3131_v54 = vadd.f32 1.0, %v9549_v23 }
 0xd1b   : > { %v9553_v30 = vpop.eup %9552  ;;  %v3216_v18 = vpack.c.bf16 %v3194_v32, %v3192_v52  ;;  %v3132_v36 = vadd.f32 1.0, %v9551_v28 }
 0xd1c   : > { %v9555_v8 = vpop.eup %9554  ;;  %v3133_v47 = vadd.f32 1.0, %v9553_v30  ;;  %v3163_v20 = vmul.f32 0.5, %v3131_v54 }
 0xd1d   : > { %3422 = vmatprep.mubr.bf16.mxu1 %v3216_v18  ;;  %v3134_v26 = vadd.f32 1.0, %v9555_v8  ;;  %v3164_v59 = vmul.f32 0.5, %v3132_v36  ;;  %v3549_v8 = vrot.slane %v3540_v51, %v14508_v35 }
 0xd1e   : > { %3423 = vmatmul.mubr.bf16.gmra.mrb[132].mxu1 %v3215_v25  ;;  %v3165_v56 = vmul.f32 0.5, %v3133_v47  ;;  %v3195_v5 = vmul.f32 %v3163_v20, %v11991_v63  ;;  %v3545_v25 = vrot.slane %v3540_v51, %v14507_v16 }
 0xd1f   : > { %v3166_v50 = vmul.f32 0.5, %v3134_v26  ;;  %v3196_v45 = vmul.f32 %v3164_v59, %v11995_v31 }
 0xd20   : > { %v3197_v58 = vmul.f32 %v3165_v56, %v12001_v39 }
 0xd21   : > { %v3198_v53 = vmul.f32 %v3166_v50, %v12007_v55 }
 0xd22   : > { %v3217_v14 = vpack.c.bf16 %v3197_v58, %v3195_v5 }
 0xd23   : > { %v3218_v3 = vpack.c.bf16 %v3198_v53, %v3196_v45 }
 0xd25   : > { %3430 = vmatprep.mubr.bf16.mxu1 %v3218_v3 }
 0xd26   : > { %3431 = vmatmul.mubr.bf16.gmra.mrb[136].mxu1 %v3217_v14 }
 0xd2b   : > { %v2900_v42 = vpop.f32.mrb[132].mxu0 }
 0xd2c   : > { %v12030_v44 = vadd.f32 %v2900_v42, %v11781_v21  ;;  %v2902_v62 = vpop.f32.mrb[133].mxu0 }
 0xd2d   : > { %v12033_v7 = vadd.f32 %v2902_v62, %v11784_v24  ;;  %v2904_v48 = vpop.f32.mrb[134].mxu0 }
 0xd2e   : > { %v2943_v63 = vmul.f32 %v12030_v44, %v12030_v44  ;;  %v12038_v31 = vadd.f32 %v2904_v48, %v11781_v21  ;;  %v2906_v39 = vpop.f32.mrb[135].mxu0 }
 0xd2f   : > { %v2944_v55 = vmul.f32 %v12033_v7, %v12033_v7  ;;  %v12043_v19 = vadd.f32 %v2906_v39, %v11784_v24 }
 0xd30   : > { %v2975_v60 = vmul.f32 %v2943_v63, %v12030_v44  ;;  %v2945_v6 = vmul.f32 %v12038_v31, %v12038_v31 }
 0xd31   : > { %v2976_v27 = vmul.f32 %v2944_v55, %v12033_v7  ;;  %v2946_v17 = vmul.f32 %v12043_v19, %v12043_v19 }
 0xd32   : > { %v3007_v57 = vmul.f32 0.044715, %v2975_v60  ;;  %v2977_v34 = vmul.f32 %v2945_v6, %v12038_v31 }
 0xd33   : > { %v3008_v11 = vmul.f32 0.044715, %v2976_v27  ;;  %v2978_v46 = vmul.f32 %v2946_v17, %v12043_v19  ;;  %v2910_v29 = vpop.f32.mrb[136].mxu0 }
 0xd34   : > { %v3039_v23 = vadd.f32 %v3007_v57, %v12030_v44  ;;  %v3009_v52 = vmul.f32 0.044715, %v2977_v34  ;;  %v12058_v32 = vadd.f32 %v2910_v29, %v11781_v21  ;;  %v2912_v28 = vpop.f32.mrb[137].mxu0 }
 0xd35   : > { %v3040_v54 = vadd.f32 %v3008_v11, %v12033_v7  ;;  %v3010_v30 = vmul.f32 0.044715, %v2978_v46  ;;  %v12063_v18 = vadd.f32 %v2912_v28, %v11784_v24  ;;  %v2914_v36 = vpop.f32.mrb[138].mxu0 }
 0xd36   : > { %v3071_v47 = vmul.f32 0.7978846, %v3039_v23  ;;  %v3041_v20 = vadd.f32 %v3009_v52, %v12038_v31  ;;  %v2947_v26 = vmul.f32 %v12058_v32, %v12058_v32  ;;  %v12070_v59 = vadd.f32 %v2914_v36, %v11781_v21  ;;  %v2916_v56 = vpop.f32.mrb[139].mxu0 }
 0xd37   : > { %v3072_v50 = vmul.f32 0.7978846, %v3040_v54  ;;  %v3042_v5 = vadd.f32 %v3010_v30, %v12043_v19  ;;  %v2948_v58 = vmul.f32 %v12063_v18, %v12063_v18  ;;  %v12076_v45 = vadd.f32 %v2916_v56, %v11784_v24 }
 0xd38   : > { %9556 = vtanh.f32 %v3071_v47  ;;  %v3073_v53 = vmul.f32 0.7978846, %v3041_v20  ;;  %v2979_v14 = vmul.f32 %v2947_v26, %v12058_v32  ;;  %v2949_v3 = vmul.f32 %v12070_v59, %v12070_v59 }
 0xd39   : > { %9558 = vtanh.f32 %v3072_v50  ;;  %v3074_v21 = vmul.f32 0.7978846, %v3042_v5  ;;  %v2980_v42 = vmul.f32 %v2948_v58, %v12063_v18  ;;  %v2950_v62 = vmul.f32 %v12076_v45, %v12076_v45 }
 0xd3a   : > { %9560 = vtanh.f32 %v3073_v53  ;;  %v3011_v48 = vmul.f32 0.044715, %v2979_v14  ;;  %v2981_v63 = vmul.f32 %v2949_v3, %v12070_v59 }
 0xd3b   : > { %9562 = vtanh.f32 %v3074_v21  ;;  %v3012_v24 = vmul.f32 0.044715, %v2980_v42  ;;  %v2982_v39 = vmul.f32 %v2950_v62, %v12076_v45  ;;  %v3629_v55 = vpop.f32.mrb[140].mxu0 }
 0xd3c   : > { %v3043_v60 = vadd.f32 %v3011_v48, %v12058_v32  ;;  %v3013_v6 = vmul.f32 0.044715, %v2981_v63  ;;  %v12087_v27 = vadd.f32 %v3629_v55, %v3545_v25  ;;  %v3631_v17 = vpop.f32.mrb[141].mxu0 }
 0xd3d   : > { %v3044_v51 = vadd.f32 %v3012_v24, %v12063_v18  ;;  %v3014_v57 = vmul.f32 0.044715, %v2982_v39  ;;  %v12090_v34 = vadd.f32 %v3631_v17, %v3549_v8  ;;  %v3633_v11 = vpop.f32.mrb[142].mxu0 }
 0xd3e   : > { %v3075_v46 = vmul.f32 0.7978846, %v3043_v60  ;;  %v3045_v29 = vadd.f32 %v3013_v6, %v12070_v59  ;;  %v3638_v23 = vmul.f32 %v12087_v27, %v12087_v27  ;;  %v12095_v52 = vadd.f32 %v3633_v11, %v3545_v25  ;;  %v3635_v28 = vpop.f32.mrb[143].mxu0 }
 0xd3f   : > { %v3076_v54 = vmul.f32 0.7978846, %v3044_v51  ;;  %v3046_v30 = vadd.f32 %v3014_v57, %v12076_v45  ;;  %v3639_v36 = vmul.f32 %v12090_v34, %v12090_v34  ;;  %v12100_v47 = vadd.f32 %v3635_v28, %v3549_v8 }
 0xd40   : > { %9564 = vtanh.f32 %v3075_v46  ;;  %v3077_v20 = vmul.f32 0.7978846, %v3045_v29  ;;  %v3642_v26 = vmul.f32 %v3638_v23, %v12087_v27  ;;  %v3640_v56 = vmul.f32 %v12095_v52, %v12095_v52 }
 0xd41   : > { %9566 = vtanh.f32 %v3076_v54  ;;  %v3078_v50 = vmul.f32 0.7978846, %v3046_v30  ;;  %v3643_v25 = vmul.f32 %v3639_v36, %v12090_v34  ;;  %v3641_v5 = vmul.f32 %v12100_v47, %v12100_v47 }
 0xd42   : > { %v9557_v58 = vpop.eup %9556  ;;  %9568 = vtanh.f32 %v3077_v20  ;;  %v3646_v53 = vmul.f32 0.044715, %v3642_v26  ;;  %v3644_v8 = vmul.f32 %v3640_v56, %v12095_v52 }
 0xd43   : > { %v9559_v14 = vpop.eup %9558  ;;  %9570 = vtanh.f32 %v3078_v50  ;;  %v3647_v3 = vmul.f32 0.044715, %v3643_v25  ;;  %v3645_v21 = vmul.f32 %v3641_v5, %v12100_v47  ;;  %v3135_v42 = vadd.f32 1.0, %v9557_v58 }
 0xd44   : > { %v9561_v62 = vpop.eup %9560  ;;  %v3650_v48 = vadd.f32 %v3646_v53, %v12087_v27  ;;  %v3648_v63 = vmul.f32 0.044715, %v3644_v8  ;;  %v3136_v24 = vadd.f32 1.0, %v9559_v14 }
 0xd45   : > { %v9563_v39 = vpop.eup %9562  ;;  %v3651_v55 = vadd.f32 %v3647_v3, %v12090_v34  ;;  %v3649_v60 = vmul.f32 0.044715, %v3645_v21  ;;  %v3137_v6 = vadd.f32 1.0, %v9561_v62  ;;  %v3167_v17 = vmul.f32 0.5, %v3135_v42 }
 0xd46   : > { %v3654_v51 = vmul.f32 0.7978846, %v3650_v48  ;;  %v3652_v57 = vadd.f32 %v3648_v63, %v12095_v52  ;;  %v3138_v11 = vadd.f32 1.0, %v9563_v39  ;;  %v3168_v46 = vmul.f32 0.5, %v3136_v24 }
 0xd47   : > { %v3655_v29 = vmul.f32 0.7978846, %v3651_v55  ;;  %v3653_v23 = vadd.f32 %v3649_v60, %v12100_v47  ;;  %v3169_v28 = vmul.f32 0.5, %v3137_v6  ;;  %v3199_v20 = vmul.f32 %v3167_v17, %v12030_v44 }
 0xd48   : > { %9572 = vtanh.f32 %v3654_v51  ;;  %v3656_v54 = vmul.f32 0.7978846, %v3652_v57  ;;  %v3170_v30 = vmul.f32 0.5, %v3138_v11  ;;  %v3200_v50 = vmul.f32 %v3168_v46, %v12033_v7 }
 0xd49   : > { %9574 = vtanh.f32 %v3655_v29  ;;  %v3657_v36 = vmul.f32 0.7978846, %v3653_v23  ;;  %v3201_v26 = vmul.f32 %v3169_v28, %v12038_v31 }
 0xd4a   : > { %v9565_v56 = vpop.eup %9564  ;;  %9576 = vtanh.f32 %v3656_v54  ;;  %v3202_v25 = vmul.f32 %v3170_v30, %v12043_v19 }
 0xd4b   : > { %v9567_v5 = vpop.eup %9566  ;;  %9578 = vtanh.f32 %v3657_v36  ;;  %v3219_v58 = vpack.c.bf16 %v3201_v26, %v3199_v20  ;;  %v3139_v53 = vadd.f32 1.0, %v9565_v56  ;;  %v12128_v56 = vsub.s32 5, %v10358_v37 }
 0xd4c   : > { %v9569_v8 = vpop.eup %9568  ;;  %v3220_v14 = vpack.c.bf16 %v3202_v25, %v3200_v50  ;;  %v3140_v3 = vadd.f32 1.0, %v9567_v5 }
 0xd4d   : > { %v9571_v21 = vpop.eup %9570  ;;  %v3141_v42 = vadd.f32 1.0, %v9569_v8  ;;  %v3171_v62 = vmul.f32 0.5, %v3139_v53  ;;  %14509 = vst [vmem:[#allocation19_spill] sm:$0xff] %v12128_v56 }
 0xd4e   : > { %3438 = vmatprep.mubr.bf16.mxu1 %v3220_v14  ;;  %v3142_v44 = vadd.f32 1.0, %v9571_v21  ;;  %v3172_v48 = vmul.f32 0.5, %v3140_v3 }
 0xd4f   : > { %3439 = vmatmul.mubr.bf16.gmra.mrb[140].mxu1 %v3219_v58  ;;  %v3173_v31 = vmul.f32 0.5, %v3141_v42  ;;  %v3203_v7 = vmul.f32 %v3171_v62, %v12058_v32 }
 0xd50   : > { %v3174_v63 = vmul.f32 0.5, %v3142_v44  ;;  %v3204_v39 = vmul.f32 %v3172_v48, %v12063_v18 }
 0xd51   : > { %v3205_v19 = vmul.f32 %v3173_v31, %v12070_v59 }
 0xd52   : > { %v9573_v24 = vpop.eup %9572  ;;  %v3206_v55 = vmul.f32 %v3174_v63, %v12076_v45 }
 0xd53   : > { %v9575_v60 = vpop.eup %9574  ;;  %v3662_v6 = vadd.f32 1.0, %v9573_v24  ;;  %v3221_v17 = vpack.c.bf16 %v3205_v19, %v3203_v7 }
 0xd54   : > { %v9577_v51 = vpop.eup %9576  ;;  %v3222_v57 = vpack.c.bf16 %v3206_v55, %v3204_v39  ;;  %v3663_v11 = vadd.f32 1.0, %v9575_v60 }
 0xd55   : > { %v9579_v46 = vpop.eup %9578  ;;  %v3666_v29 = vmul.f32 0.5, %v3662_v6  ;;  %v3664_v23 = vadd.f32 1.0, %v9577_v51 }
 0xd56   : > { %3446 = vmatprep.mubr.bf16.mxu1 %v3222_v57  ;;  %v3665_v28 = vadd.f32 1.0, %v9579_v46  ;;  %v3667_v54 = vmul.f32 0.5, %v3663_v11 }
 0xd57   : > { %v3668_v32 = vmul.f32 0.5, %v3664_v23  ;;  %3447 = vmatmul.mubr.bf16.gmra.mrb[144].mxu1 %v3221_v17  ;;  %v3670_v30 = vmul.f32 %v3666_v29, %v12087_v27  ;;  %v12133_v27 = vld [vmem:[%s14431_s21] ss:$0 sm:$0xff] }
 0xd58   : > { %v3669_v59 = vmul.f32 0.5, %v3665_v28  ;;  %v3671_v45 = vmul.f32 %v3667_v54, %v12090_v34 }
 0xd59   : > { %v3672_v18 = vmul.f32 %v3668_v32, %v12095_v52 }
 0xd5a   : > { %v3673_v36 = vmul.f32 %v3669_v59, %v12100_v47  ;;  %v9890_v47 = vld [vmem:[%s10356_s7] sm:$0x3f] }
 0xd5b   : > { %v3674_v20 = vpack.c.bf16 %v3672_v18, %v3670_v30  ;;  %v12137_v58 = vrot.slane %v9890_v47, %v12128_v56 }
 0xd5c   : > { %v3675_v26 = vpack.c.bf16 %v3673_v36, %v3671_v45 }
 0xd5e   : > { %3843 = vmatprep.mubr.bf16.mxu1 %v3675_v26 }
 0xd5f   : > { %3844 = vmatmul.mubr.bf16.vlgmr.msra.gmra.mrb[148].mxu1 %v3674_v20 }
 0xd60   : > { %4485 = vmatprep.mubr.bf16.mxu1 %v14504_v9 }
 0xd9e   : > { %v8183_v50 = vpop.f32.mrb[116].mxu1 }
 0xd9f   : > { %v8184_v52 = vpop.f32.mrb[117].mxu1 }
 0xda0   : > { %v8185_v25 = vadd.f32 %v8184_v52, %v8183_v50  ;;  %v8186_v34 = vpop.f32.mrb[118].mxu1 }
 0xda1   : > { %v8187_v5 = vpop.f32.mrb[119].mxu1 }
 0xda2   : > { %v3393_v53 = vadd.f32 %v8185_v25, %v12133_v27  ;;  %v8188_v8 = vadd.f32 %v8187_v5, %v8186_v34 }
 0xda4   : > { %v3396_v37 = vadd.f32 %v8188_v8, %v12133_v27  ;;  %v3459_v14 = vmul.f32 %v12137_v58, %v3393_v53 }
 0xda6   : > { %v3460_v3 = vmul.f32 %v12137_v58, %v3396_v37  ;;  %v8189_v21 = vpop.f32.mrb[120].mxu1 }
 0xda7   : > { %v8190_v42 = vpop.f32.mrb[121].mxu1 }
 0xda8   : > { %v3475_v62 = vpack.c.bf16 %v3460_v3, %v3459_v14  ;;  %v8191_v44 = vadd.f32 %v8190_v42, %v8189_v21  ;;  %v8192_v48 = vpop.f32.mrb[122].mxu1 }
 0xda9   : > { %v8193_v31 = vpop.f32.mrb[123].mxu1 }
 0xdaa   : > { %v3401_v63 = vadd.f32 %v8191_v44, %v12133_v27  ;;  %v8194_v7 = vadd.f32 %v8193_v31, %v8192_v48  ;;  %v12145_v19 = vadd.bf16 %v3475_v62, %v11339_v13 }
 0xdac   : > { %v3404_v24 = vadd.f32 %v8194_v7, %v12133_v27  ;;  %v3875_v39 = vunpack.c.h.bf16 %v12145_v19  ;;  %v3874_v55 = vunpack.c.l.bf16 %v12145_v19  ;;  %v3461_v60 = vmul.f32 %v12137_v58, %v3401_v63 }
 0xdae   : > { %v3462_v6 = vmul.f32 %v12137_v58, %v3404_v24  ;;  %v8195_v17 = vpop.f32.mrb[124].mxu1  ;;  %v3893_v51 = vsel %vm237_vm1, %v3875_v39, 0.0  ;;  %v3890_v13 = vsel %vm237_vm1, %v3874_v55, 0.0 }
 0xdaf   : > { %3894 = vadd.xlane.f32.xlu0 %v3893_v51  ;;  %3891 = vadd.xlane.f32.xlu1 %v3890_v13  ;;  %v8196_v57 = vpop.f32.mrb[125].mxu1 }
 0xdb0   : > { %v3476_v11 = vpack.c.bf16 %v3462_v6, %v3461_v60  ;;  %v8197_v46 = vadd.f32 %v8196_v57, %v8195_v17  ;;  %v8198_v29 = vpop.f32.mrb[126].mxu1 }
 0xdb1   : > { %v8199_v23 = vpop.f32.mrb[127].mxu1 }
 0xdb2   : > { %v3409_v28 = vadd.f32 %v8197_v46, %v12133_v27  ;;  %v8200_v54 = vadd.f32 %v8199_v23, %v8198_v29  ;;  %v12160_v32 = vadd.bf16 %v3476_v11, %v11336_v43 }
 0xdb4   : > { %v3412_v59 = vadd.f32 %v8200_v54, %v12133_v27  ;;  %v3877_v30 = vunpack.c.h.bf16 %v12160_v32  ;;  %v3876_v18 = vunpack.c.l.bf16 %v12160_v32  ;;  %v3463_v45 = vmul.f32 %v12137_v58, %v3409_v28 }
 0xdb6   : > { %v3464_v36 = vmul.f32 %v12137_v58, %v3412_v59  ;;  %v8201_v20 = vpop.f32.mrb[128].mxu1  ;;  %v3899_v26 = vsel %vm237_vm1, %v3877_v30, 0.0  ;;  %v3896_v43 = vsel %vm237_vm1, %v3876_v18, 0.0 }
 0xdb7   : > { %3900 = vadd.xlane.f32.xlu0 %v3899_v26  ;;  %3897 = vadd.xlane.f32.xlu1 %v3896_v43  ;;  %v8202_v50 = vpop.f32.mrb[129].mxu1 }
 0xdb8   : > { %v3477_v52 = vpack.c.bf16 %v3464_v36, %v3463_v45  ;;  %v8203_v25 = vadd.f32 %v8202_v50, %v8201_v20  ;;  %v8204_v34 = vpop.f32.mrb[130].mxu1 }
 0xdb9   : > { %v8205_v5 = vpop.f32.mrb[131].mxu1 }
 0xdba   : > { %v3417_v47 = vadd.f32 %v8203_v25, %v12133_v27  ;;  %v8206_v53 = vadd.f32 %v8205_v5, %v8204_v34  ;;  %v12175_v8 = vadd.bf16 %v3477_v52, %v11369_v38 }
 0xdbc   : > { %v3420_v37 = vadd.f32 %v8206_v53, %v12133_v27  ;;  %v3879_v14 = vunpack.c.h.bf16 %v12175_v8  ;;  %v3878_v3 = vunpack.c.l.bf16 %v12175_v8  ;;  %v3465_v21 = vmul.f32 %v12137_v58, %v3417_v47 }
 0xdbe   : > { %v3466_v42 = vmul.f32 %v12137_v58, %v3420_v37  ;;  %v3905_v62 = vsel %vm237_vm1, %v3879_v14, 0.0  ;;  %v3902_v44 = vsel %vm237_vm1, %v3878_v3, 0.0 }
 0xdbf   : > { %3906 = vadd.xlane.f32.xlu0 %v3905_v62  ;;  %3903 = vadd.xlane.f32.xlu1 %v3902_v44 }
 0xdc0   : > { %v3478_v38 = vpack.c.bf16 %v3466_v42, %v3465_v21 }
 0xdc2   : > { %v12189_v48 = vadd.bf16 %v3478_v38, %v11366_v61 }
 0xdc4   : > { %v3881_v31 = vunpack.c.h.bf16 %v12189_v48  ;;  %v3880_v63 = vunpack.c.l.bf16 %v12189_v48 }
 0xdc6   : > { %v3911_v7 = vsel %vm237_vm1, %v3881_v31, 0.0  ;;  %v3908_v24 = vsel %vm237_vm1, %v3880_v63, 0.0 }
 0xdc7   : > { %3912 = vadd.xlane.f32.xlu0 %v3911_v7  ;;  %3909 = vadd.xlane.f32.xlu1 %v3908_v24 }
 0xdf1   : > { %v8207_v60 = vpop.f32.mrb[132].mxu1 }
 0xdf2   : > { %v8208_v6 = vpop.f32.mrb[133].mxu1 }
 0xdf3   : > { %v8209_v17 = vadd.f32 %v8208_v6, %v8207_v60  ;;  %v8210_v51 = vpop.f32.mrb[134].mxu1 }
 0xdf4   : > { %v8211_v61 = vpop.f32.mrb[135].mxu1 }
 0xdf5   : > { %v3425_v13 = vadd.f32 %v8209_v17, %v12133_v27  ;;  %v8212_v57 = vadd.f32 %v8211_v61, %v8210_v51 }
 0xdf7   : > { %v3428_v11 = vadd.f32 %v8212_v57, %v12133_v27  ;;  %v3467_v46 = vmul.f32 %v12137_v58, %v3425_v13 }
 0xdf9   : > { %v3468_v29 = vmul.f32 %v12137_v58, %v3428_v11  ;;  %v8213_v23 = vpop.f32.mrb[136].mxu1 }
 0xdfa   : > { %v8214_v28 = vpop.f32.mrb[137].mxu1 }
 0xdfb   : > { %v3479_v54 = vpack.c.bf16 %v3468_v29, %v3467_v46  ;;  %v8215_v59 = vadd.f32 %v8214_v28, %v8213_v23  ;;  %v8216_v45 = vpop.f32.mrb[138].mxu1 }
 0xdfc   : > { %v8217_v36 = vpop.f32.mrb[139].mxu1 }
 0xdfd   : > { %v3433_v20 = vadd.f32 %v8215_v59, %v12133_v27  ;;  %v8218_v26 = vadd.f32 %v8217_v36, %v8216_v45  ;;  %v12205_v43 = vadd.bf16 %v3479_v54, %v11399_v41  ;;  %v7840_v45 = vld [vmem:[%s14435_s25] ss:$0 sm:$0xff] }
 0xdff   : > { %v3436_v50 = vadd.f32 %v8218_v26, %v12133_v27  ;;  %v3883_v52 = vunpack.c.h.bf16 %v12205_v43  ;;  %v3882_v25 = vunpack.c.l.bf16 %v12205_v43  ;;  %v3469_v34 = vmul.f32 %v12137_v58, %v3433_v20 }
 0xe01   : > { %v3470_v5 = vmul.f32 %v12137_v58, %v3436_v50  ;;  %v3917_v47 = vsel %vm237_vm1, %v3883_v52, 0.0  ;;  %v3914_v53 = vsel %vm237_vm1, %v3882_v25, 0.0  ;;  %v9891_v50 = vld [vmem:[%s10384_s29] sm:$0x3f] }
 0xe02   : > { %3918 = vadd.xlane.f32.xlu0 %v3917_v47  ;;  %3915 = vadd.xlane.f32.xlu1 %v3914_v53 }
 0xe03   : > { %v3480_v41 = vpack.c.bf16 %v3470_v5, %v3469_v34  ;;  %v3855_v34 = vrot.slane %v9891_v50, %v12128_v56 }
 0xe22   : > { %v8219_v37 = vpop.f32.mrb[140].mxu1 }
 0xe23   : > { %v8220_v21 = vpop.f32.mrb[141].mxu1 }
 0xe24   : > { %v8221_v42 = vadd.f32 %v8220_v21, %v8219_v37  ;;  %v8222_v62 = vpop.f32.mrb[142].mxu1 }
 0xe25   : > { %v8223_v44 = vpop.f32.mrb[143].mxu1 }
 0xe26   : > { %v3441_v38 = vadd.f32 %v8221_v42, %v12133_v27  ;;  %v8224_v7 = vadd.f32 %v8223_v44, %v8222_v62 }
 0xe28   : > { %v3444_v24 = vadd.f32 %v8224_v7, %v12133_v27  ;;  %v3471_v60 = vmul.f32 %v12137_v58, %v3441_v38  ;;  %v12235_v38 = vadd.bf16 %v3480_v41, %v11396_v49 }
 0xe2a   : > { %v3472_v6 = vmul.f32 %v12137_v58, %v3444_v24  ;;  %v8225_v17 = vpop.f32.mrb[144].mxu1 }
 0xe2b   : > { %v8226_v51 = vpop.f32.mrb[145].mxu1 }
 0xe2c   : > { %v3481_v61 = vpack.c.bf16 %v3472_v6, %v3471_v60  ;;  %v8227_v13 = vadd.f32 %v8226_v51, %v8225_v17  ;;  %v8228_v57 = vpop.f32.mrb[146].mxu1  ;;  %v3884_v17 = vunpack.c.l.bf16 %v12235_v38 }
 0xe2d   : > { %v8229_v11 = vpop.f32.mrb[147].mxu1 }
 0xe2e   : > { %v3449_v46 = vadd.f32 %v8227_v13, %v12133_v27  ;;  %v8230_v29 = vadd.f32 %v8229_v11, %v8228_v57  ;;  %v12247_v51 = vadd.bf16 %v3481_v61, %v11437_v12  ;;  %v3920_v57 = vsel %vm237_vm1, %v3884_v17, 0.0 }
 0xe30   : > { %v3452_v23 = vadd.f32 %v8230_v29, %v12133_v27  ;;  %v3473_v28 = vmul.f32 %v12137_v58, %v3449_v46  ;;  %v3886_v11 = vunpack.c.l.bf16 %v12247_v51 }
 0xe32   : > { %v3474_v54 = vmul.f32 %v12137_v58, %v3452_v23  ;;  %v8247_v59 = vpop.f32.mrb[148].mxu1  ;;  %v3887_v23 = vunpack.c.h.bf16 %v12247_v51 }
 0xe33   : > { %v8248_v36 = vpop.f32.mrb[149].mxu1 }
 0xe34   : > { %v3482_v20 = vpack.c.bf16 %v3474_v54, %v3473_v28  ;;  %v8249_v26 = vadd.f32 %v8248_v36, %v8247_v59  ;;  %v8250_v5 = vpop.f32.mrb[150].mxu1 }
 0xe35   : > { %v8251_v47 = vpop.f32.mrb[151].mxu1 }
 0xe36   : > { %v3846_v53 = vadd.f32 %v8249_v26, %v7840_v45  ;;  %v8252_v37 = vadd.f32 %v8251_v47, %v8250_v5  ;;  %v12258_v12 = vadd.bf16 %v3482_v20, %v11434_v33  ;;  %v3926_v33 = vsel %vm237_vm1, %v3886_v11, 0.0 }
 0xe37   : > { %v3929_v26 = vsel %vm237_vm1, %v3887_v23, 0.0 }
 0xe38   : > { %v3856_v27 = vmul.f32 %v3855_v34, %v3846_v53  ;;  %v3849_v21 = vadd.f32 %v8252_v37, %v7840_v45  ;;  %v3888_v45 = vunpack.c.l.bf16 %v12258_v12 }
 0xe3a   : > { %v8061_v42 = vpack.c.bf16 %v3856_v27, %v3856_v27  ;;  %v3857_v62 = vmul.f32 %v3855_v34, %v3849_v21  ;;  %v3932_v47 = vsel %vm237_vm1, %v3888_v45, 0.0 }
 0xe3c   : > { %v8062_v58 = vpack.c.bf16 %v3857_v62, %v3857_v62  ;;  %v12232_v44 = vadd.bf16 %v8061_v42, %v11443_v10  ;;  %v3892_v10 = vpop.xlane.xlu1 %3891  ;;  %v3895_v41 = vpop.xlane.xlu0 %3894 }
 0xe3d   : > { %v3938_v13 = vmul.f32 0.015625, %v3892_v10  ;;  %v3939_v46 = vmul.f32 0.015625, %v3895_v41 }
 0xe3e   : > { %v4147_v7 = vunpack.c.l.bf16 %v12232_v44  ;;  %v12239_v24 = vadd.bf16 %v8062_v58, %v11453_v4  ;;  %v3885_v4 = vunpack.c.h.bf16 %v12235_v38 }
 0xe3f   : > { %v12266_v54 = vsub.f32 %v3874_v55, %v3938_v13  ;;  %v12274_v36 = vsub.f32 %v3875_v39, %v3939_v46  ;;  %v3889_v55 = vunpack.c.h.bf16 %v12258_v12 }
 0xe40   : > { %v4149_v60 = vsel %vm237_vm1, %v4147_v7, 0.0  ;;  %v4148_v6 = vunpack.c.l.bf16 %v12239_v24  ;;  %v3923_v29 = vsel %vm237_vm1, %v3885_v4, 0.0 }
 0xe41   : > { %4150 = vadd.xlane.f32.xlu1 %v4149_v60  ;;  %v3970_v39 = vmul.f32 %v12266_v54, %v12266_v54  ;;  %v3971_v21 = vmul.f32 %v12274_v36, %v12274_v36 }
 0xe42   : > { %v4152_v49 = vsel %vm237_vm1, %v4148_v6, 0.0 }
 0xe43   : > { %4153 = vadd.xlane.f32.xlu0 %v4152_v49  ;;  %v3986_v62 = vsel %vm237_vm1, %v3970_v39, 0.0  ;;  %v3989_v60 = vsel %vm237_vm1, %v3971_v21, 0.0  ;;  %v9251_v39 = vld [vmem:[%s14498_s0 + $0x50] ss:$8 sps:$4 sm:$0xff]  }
 0xe44   : > { %v3898_v61 = vpop.xlane.xlu1 %3897  ;;  %v3901_v28 = vpop.xlane.xlu0 %3900  ;;  %v9257_v21 = vld [vmem:[%s14498_s0 + $0x70] ss:$8 sps:$4 sm:$0xff]  }
 0xe45   : > { %3921 = vadd.xlane.f32.xlu1 %v3920_v57  ;;  %v3940_v59 = vmul.f32 0.015625, %v3898_v61  ;;  %v3941_v20 = vmul.f32 0.015625, %v3901_v28 }
 0xe47   : > { %3924 = vadd.xlane.f32.xlu0 %v3923_v29  ;;  %v12282_v50 = vsub.f32 %v3876_v18, %v3940_v59  ;;  %v12291_v37 = vsub.f32 %v3877_v30, %v3941_v20  ;;  %v3935_v18 = vsel %vm237_vm1, %v3889_v55, 0.0 }
 0xe49   : > { %3927 = vadd.xlane.f32.xlu1 %v3926_v33  ;;  %v3972_v58 = vmul.f32 %v12282_v50, %v12282_v50  ;;  %v3973_v10 = vmul.f32 %v12291_v37, %v12291_v37 }
 0xe4b   : > { %3930 = vadd.xlane.f32.xlu0 %v3929_v26  ;;  %v3995_v46 = vsel %vm237_vm1, %v3973_v10, 0.0 }
 0xe4c   : > { %v3904_v34 = vpop.xlane.xlu1 %3903  ;;  %v3907_v5 = vpop.xlane.xlu0 %3906 }
 0xe4d   : > { %v3942_v53 = vmul.f32 0.015625, %v3904_v34  ;;  %3933 = vadd.xlane.f32.xlu1 %v3932_v47  ;;  %v3943_v27 = vmul.f32 0.015625, %v3907_v5  ;;  %v9248_v5 = vld [vmem:[%s14498_s0 + $0x40] ss:$8 sps:$4 sm:$0xff]   ;;  %v9253_v47 = vld [vmem:[%s14498_s0 + $0x54] ss:$8 sps:$4 sm:$0xff]  }
 0xe4f   : > { %3936 = vadd.xlane.f32.xlu0 %v3935_v18  ;;  %v12300_v42 = vsub.f32 %v3878_v3, %v3942_v53  ;;  %v12307_v30 = vsub.f32 %v3879_v14, %v3943_v27  ;;  %v3992_v3 = vsel %vm237_vm1, %v3972_v58, 0.0  ;;  %v9254_v53 = vld [vmem:[%s14498_s0 + $0x60] ss:$8 sps:$4 sm:$0xff]   ;;  %v9256_v27 = vld [vmem:[%s14498_s0 + $0x64] ss:$8 sps:$4 sm:$0xff]  }
 0xe50   : > { %v9259_v18 = vld [vmem:[%s14498_s0 + $0x74] ss:$8 sps:$4 sm:$0xff]  }
 0xe51   : > { %3987 = vadd.xlane.f32.xlu1 %v3986_v62  ;;  %v3974_v13 = vmul.f32 %v12300_v42, %v12300_v42  ;;  %v3975_v14 = vmul.f32 %v12307_v30, %v12307_v30 }
 0xe53   : > { %3990 = vadd.xlane.f32.xlu0 %v3989_v60  ;;  %v3998_v59 = vsel %vm237_vm1, %v3974_v13, 0.0  ;;  %v4001_v20 = vsel %vm237_vm1, %v3975_v14, 0.0 }
 0xe54   : > { %v3910_v49 = vpop.xlane.xlu1 %3909  ;;  %v3913_v41 = vpop.xlane.xlu0 %3912 }
 0xe55   : > { %v3944_v57 = vmul.f32 0.015625, %v3910_v49  ;;  %v3945_v61 = vmul.f32 0.015625, %v3913_v41  ;;  %3993 = vadd.xlane.f32.xlu1 %v3992_v3 }
 0xe57   : > { %v12320_v29 = vsub.f32 %v3880_v63, %v3944_v57  ;;  %v12324_v28 = vsub.f32 %v3881_v31, %v3945_v61  ;;  %3996 = vadd.xlane.f32.xlu0 %v3995_v46  ;;  %v9250_v31 = vld [vmem:[%s14498_s0 + $0x44] ss:$8 sps:$4 sm:$0xff]  }
 0xe58   : > { %4275 = vmatprep.subr.bf16.mxu0 %v9250_v31 }
 0xe59   : > { %3999 = vadd.xlane.f32.xlu1 %v3998_v59  ;;  %v3976_v33 = vmul.f32 %v12320_v29, %v12320_v29  ;;  %v3977_v26 = vmul.f32 %v12324_v28, %v12324_v28  ;;  %4276 = vmatpush1.bf16.msra.mxu0 %v9248_v5 }
 0xe5a   : > { %4277 = vmatprep.subr.bf16.mxu0 %v9253_v47 }
 0xe5b   : > { %4002 = vadd.xlane.f32.xlu0 %v4001_v20  ;;  %v4004_v63 = vsel %vm237_vm1, %v3976_v33, 0.0  ;;  %v4007_v34 = vsel %vm237_vm1, %v3977_v26, 0.0 }
 0xe5d   : > { %4005 = vadd.xlane.f32.xlu1 %v4004_v63  ;;  %4278 = vmatpush1.bf16.msra.mxu0 %v9251_v39 }
 0xe5e   : > { %4279 = vmatprep.subr.bf16.mxu0 %v9256_v27 }
 0xe5f   : > { %4008 = vadd.xlane.f32.xlu0 %v4007_v34 }
 0xe61   : > { %4280 = vmatpush1.bf16.msra.mxu0 %v9254_v53 }
 0xe62   : > { %4281 = vmatprep.subr.bf16.mxu0 %v9259_v18 }
 0xe65   : > { %4282 = vmatpush1.bf16.msra.mxu0 %v9257_v21 }
 0xe66   : > { %8737 = vmatprep.subr.bf16.mxu0 %v14503_v2 }
 0xe8f   : > { %v3916_v62 = vpop.xlane.xlu1 %3915  ;;  %v3919_v58 = vpop.xlane.xlu0 %3918 }
 0xe90   : > { %v3946_v60 = vmul.f32 0.015625, %v3916_v62  ;;  %v3947_v10 = vmul.f32 0.015625, %v3919_v58 }
 0xe92   : > { %v12361_v49 = vsub.f32 %v3882_v25, %v3946_v60  ;;  %v12365_v41 = vsub.f32 %v3883_v52, %v3947_v10 }
 0xe94   : > { %v3978_v3 = vmul.f32 %v12361_v49, %v12361_v49  ;;  %v3979_v13 = vmul.f32 %v12365_v41, %v12365_v41 }
 0xe96   : > { %v4010_v57 = vsel %vm237_vm1, %v3978_v3, 0.0  ;;  %v4013_v61 = vsel %vm237_vm1, %v3979_v13, 0.0 }
 0xe97   : > { %4011 = vadd.xlane.f32.xlu1 %v4010_v57  ;;  %4014 = vadd.xlane.f32.xlu0 %v4013_v61 }
 0xece   : > { %v4151_v46 = vpop.xlane.xlu1 %4150 }
 0xecf   : > { %v4155_v14 = vmul.f32 0.015625, %v4151_v46 }
 0xed0   : > { %v4154_v25 = vpop.xlane.xlu0 %4153 }
 0xed1   : > { %v12375_v59 = vsub.f32 %v4147_v7, %v4155_v14  ;;  %v4156_v52 = vmul.f32 0.015625, %v4154_v25 }
 0xed2   : > { %v3922_v33 = vpop.xlane.xlu1 %3921 }
 0xed3   : > { %v12379_v20 = vsub.f32 %v4148_v6, %v4156_v52  ;;  %v3948_v26 = vmul.f32 0.015625, %v3922_v33  ;;  %v4159_v63 = vmul.f32 %v12375_v59, %v12375_v59 }
 0xed4   : > { %v3925_v34 = vpop.xlane.xlu0 %3924 }
 0xed5   : > { %v12385_v31 = vsub.f32 %v3884_v17, %v3948_v26  ;;  %v3949_v5 = vmul.f32 0.015625, %v3925_v34  ;;  %v4161_v44 = vsel %vm237_vm1, %v4159_v63, 0.0  ;;  %v4160_v7 = vmul.f32 %v12379_v20, %v12379_v20 }
 0xed6   : > { %4162 = vadd.xlane.f32.xlu1 %v4161_v44  ;;  %v3928_v47 = vpop.xlane.xlu1 %3927 }
 0xed7   : > { %v12392_v24 = vsub.f32 %v3885_v4, %v3949_v5  ;;  %v3950_v6 = vmul.f32 0.015625, %v3928_v47  ;;  %v4164_v39 = vsel %vm237_vm1, %v4160_v7, 0.0  ;;  %v3980_v53 = vmul.f32 %v12385_v31, %v12385_v31 }
 0xed8   : > { %4165 = vadd.xlane.f32.xlu0 %v4164_v39  ;;  %v3931_v17 = vpop.xlane.xlu0 %3930  ;;  %v7861_v39 = vld [vmem:[%s10356_s7 + $0x8] sm:$0x3f] }
 0xed9   : > { %v12399_v27 = vsub.f32 %v3886_v11, %v3950_v6  ;;  %v3951_v18 = vmul.f32 0.015625, %v3931_v17  ;;  %v4016_v21 = vsel %vm237_vm1, %v3980_v53, 0.0  ;;  %v3981_v62 = vmul.f32 %v12392_v24, %v12392_v24 }
 0xeda   : > { %4017 = vadd.xlane.f32.xlu1 %v4016_v21  ;;  %v3934_v4 = vpop.xlane.xlu1 %3933 }
 0xedb   : > { %v12406_v58 = vsub.f32 %v3887_v23, %v3951_v18  ;;  %v3952_v60 = vmul.f32 0.015625, %v3934_v4  ;;  %v4019_v10 = vsel %vm237_vm1, %v3981_v62, 0.0  ;;  %v3982_v3 = vmul.f32 %v12399_v27, %v12399_v27 }
 0xedc   : > { %4020 = vadd.xlane.f32.xlu0 %v4019_v10  ;;  %v3937_v11 = vpop.xlane.xlu0 %3936  ;;  %v12430_v4 = vadd.f32 1.0, %v7861_v39 }
 0xedd   : > { %v12413_v13 = vsub.f32 %v3888_v45, %v3952_v60  ;;  %v3953_v57 = vmul.f32 0.015625, %v3937_v11  ;;  %v4022_v61 = vsel %vm237_vm1, %v3982_v3, 0.0  ;;  %v3983_v46 = vmul.f32 %v12406_v58, %v12406_v58 }
 0xede   : > { %4023 = vadd.xlane.f32.xlu1 %v4022_v61  ;;  %v3988_v23 = vpop.xlane.xlu1 %3987  ;;  %14510 = vst [vmem:[#allocation20_spill] sm:$0xff] %v12430_v4 }
 0xedf   : > { %v12420_v14 = vsub.f32 %v3889_v55, %v3953_v57  ;;  %v4034_v25 = vmul.f32 0.015625, %v3988_v23  ;;  %v4025_v52 = vsel %vm237_vm1, %v3983_v46, 0.0  ;;  %v3984_v45 = vmul.f32 %v12413_v13, %v12413_v13 }
 0xee0   : > { %4026 = vadd.xlane.f32.xlu0 %v4025_v52  ;;  %v3991_v33 = vpop.xlane.xlu0 %3990  ;;  %v12434_v57 = vrot.slane %v12430_v4, %v14508_v35 }
 0xee1   : > { %v4050_v26 = vadd.f32 1e-06, %v4034_v25  ;;  %v4035_v63 = vmul.f32 0.015625, %v3991_v33  ;;  %v4028_v34 = vsel %vm237_vm1, %v3984_v45, 0.0  ;;  %v3985_v5 = vmul.f32 %v12420_v14, %v12420_v14 }
 0xee2   : > { %4029 = vadd.xlane.f32.xlu1 %v4028_v34  ;;  %v3994_v44 = vpop.xlane.xlu1 %3993 }
 0xee3   : > { %9580 = vrsqrt.f32 %v4050_v26  ;;  %v4051_v55 = vadd.f32 1e-06, %v4035_v63  ;;  %v4036_v7 = vmul.f32 0.015625, %v3994_v44  ;;  %v4031_v47 = vsel %vm237_vm1, %v3985_v5, 0.0  ;;  %v9262_v5 = vld [vmem:[%s14422_s12 + $0x44] ss:$8 sps:$4 sm:$0xff]  }
 0xee4   : > { %4032 = vadd.xlane.f32.xlu0 %v4031_v47  ;;  %v3997_v6 = vpop.xlane.xlu0 %3996  ;;  %v12438_v26 = vrot.slane %v7861_v39, %v14507_v16  ;;  %4453 = vmatprep.subr.bf16.mxu1 %v9262_v5 }
 0xee5   : > { %9582 = vrsqrt.f32 %v4051_v55  ;;  %v4052_v53 = vadd.f32 1e-06, %v4036_v7  ;;  %v4037_v17 = vmul.f32 0.015625, %v3997_v6 }
 0xee6   : > { %v4000_v18 = vpop.xlane.xlu1 %3999 }
 0xee7   : > { %9584 = vrsqrt.f32 %v4052_v53  ;;  %v4053_v21 = vadd.f32 1e-06, %v4037_v17  ;;  %v4038_v62 = vmul.f32 0.015625, %v4000_v18  ;;  %v9265_v18 = vld [vmem:[%s14422_s12 + $0x54] ss:$8 sps:$4 sm:$0xff]  }
 0xee8   : > { %v4003_v60 = vpop.xlane.xlu0 %4002 }
 0xee9   : > { %9586 = vrsqrt.f32 %v4053_v21  ;;  %v4039_v10 = vmul.f32 0.015625, %v4003_v60  ;;  %v4054_v3 = vadd.f32 1e-06, %v4038_v62  ;;  %v9263_v21 = vld [vmem:[%s14422_s12 + $0x50] ss:$8 sps:$4 sm:$0xff]  }
 0xeea   : > { %v4006_v61 = vpop.xlane.xlu1 %4005 }
 0xeeb   : > { %v4055_v11 = vadd.f32 1e-06, %v4039_v10  ;;  %v4040_v33 = vmul.f32 0.015625, %v4006_v61 }
 0xeec   : > { %v4009_v46 = vpop.xlane.xlu0 %4008 }
 0xeed   : > { %v9581_v23 = vpop.eup %9580  ;;  %9588 = vrsqrt.f32 %v4055_v11  ;;  %v4041_v25 = vmul.f32 0.015625, %v4009_v46  ;;  %v4056_v6 = vadd.f32 1e-06, %v4040_v33  ;;  %v9271_v11 = vld [vmem:[%s14422_s12 + $0x74] ss:$8 sps:$4 sm:$0xff]  }
 0xeee   : > { %v4082_v52 = vmul.f32 %v9581_v23, %v12266_v54  ;;  %9590 = vrsqrt.f32 %v4054_v3  ;;  %v9260_v54 = vld [vmem:[%s14422_s12 + $0x40] ss:$8 sps:$4 sm:$0xff]  }
 0xeef   : > { %v9583_v45 = vpop.eup %9582  ;;  %v4057_v55 = vadd.f32 1e-06, %v4041_v25  ;;  %4454 = vmatpush1.bf16.msra.mxu1 %v9260_v54  ;;  %v9269_v25 = vld [vmem:[%s14422_s12 + $0x70] ss:$8 sps:$4 sm:$0xff]  }
 0xef0   : > { %v4103_v63 = vmul.f32 %v12434_v57, %v4082_v52  ;;  %v4083_v34 = vmul.f32 %v9583_v45, %v12274_v36  ;;  %4455 = vmatprep.subr.bf16.mxu1 %v9265_v18 }
 0xef1   : > { %v9585_v44 = vpop.eup %9584  ;;  %9592 = vrsqrt.f32 %v4057_v55 }
 0xef2   : > { %v4104_v7 = vmul.f32 %v12434_v57, %v4083_v34  ;;  %v4123_v39 = vadd.f32 %v12438_v26, %v4103_v63  ;;  %v4084_v53 = vmul.f32 %v9585_v44, %v12282_v50  ;;  %9594 = vrsqrt.f32 %v4056_v6  ;;  %v9266_v50 = vld [vmem:[%s14422_s12 + $0x60] ss:$8 sps:$4 sm:$0xff]  }
 0xef3   : > { %v9587_v47 = vpop.eup %9586  ;;  %4456 = vmatpush1.bf16.msra.mxu1 %v9263_v21 }
 0xef4   : > { %v4124_v36 = vadd.f32 %v12438_v26, %v4104_v7  ;;  %v4085_v17 = vmul.f32 %v9587_v47, %v12291_v37  ;;  %v9268_v37 = vld [vmem:[%s14422_s12 + $0x64] ss:$8 sps:$4 sm:$0xff]   ;;  %v4105_v3 = vmul.f32 %v12434_v57, %v4084_v53 }
 0xef5   : > { %4457 = vmatprep.subr.bf16.mxu1 %v9268_v37 }
 0xef6   : > { %v4139_v62 = vpack.c.bf16 %v4124_v36, %v4123_v39  ;;  %v4106_v60 = vmul.f32 %v12434_v57, %v4085_v17  ;;  %v4125_v52 = vadd.f32 %v12438_v26, %v4105_v3 }
 0xef7   : > { %v9589_v10 = vpop.eup %9588  ;;  %4458 = vmatpush1.bf16.msra.mxu1 %v9266_v50 }
 0xef8   : > { %7882 = vmatmul.mubr.msk.bf16.vlgmr.msra.gmra.mrb[144].mxu0 %vm237_vm1, %v4139_v62  ;;  %v9591_v61 = vpop.eup %9590  ;;  %v4126_v46 = vadd.f32 %v12438_v26, %v4106_v60  ;;  %v4087_v23 = vmul.f32 %v9589_v10, %v12307_v30  ;;  %4459 = vmatprep.subr.bf16.mxu1 %v9271_v11 }
 0xef9   : > { %4317 = vmatprep.mubr.bf16.mxu0 %v14504_v9  ;;  %v4086_v45 = vmul.f32 %v9591_v61, %v12300_v42 }
 0xefa   : > { %v4140_v33 = vpack.c.bf16 %v4126_v46, %v4125_v52  ;;  %v4108_v63 = vmul.f32 %v12434_v57, %v4087_v23 }
 0xefb   : > { %v9593_v34 = vpop.eup %9592  ;;  %4460 = vmatpush1.bf16.msra.mxu1 %v9269_v25  ;;  %v4107_v5 = vmul.f32 %v12434_v57, %v4086_v45 }
 0xefc   : > { %8707 = vmatprep.subr.bf16.mxu1 %v14503_v2  ;;  %v9595_v30 = vpop.eup %9594  ;;  %v4128_v44 = vadd.f32 %v12438_v26, %v4108_v63  ;;  %v4089_v55 = vmul.f32 %v9593_v34, %v12324_v28 }
 0xefd   : > { %v4127_v42 = vadd.f32 %v12438_v26, %v4107_v5  ;;  %v4088_v54 = vmul.f32 %v9595_v30, %v12320_v29  ;;  %v7864_v30 = vld [vmem:[%s10384_s29 + $0x8] sm:$0x3f]  ;;  %s121_s29 = sld [smem:[#allocation2 + %s9978_s1]] }
 0xefe   : > { %v4110_v47 = vmul.f32 %v12434_v57, %v4089_v55 }
 0xeff   : > { %v4141_v7 = vpack.c.bf16 %v4128_v44, %v4127_v42  ;;  %v4109_v6 = vmul.f32 %v12434_v57, %v4088_v54 }
 0xf00   : > { %7883 = vmatmul.mubr.msk.bf16.gmra.mrb[148].mxu0 %vm237_vm1, %v4140_v33  ;;  %v4130_v39 = vadd.f32 %v12438_v26, %v4110_v47  ;;  %v4175_v47 = vadd.f32 1.0, %v7864_v30 }
 0xf01   : > { %4327 = vmatprep.mubr.bf16.mxu0 %v14504_v9  ;;  %v4129_v36 = vadd.f32 %v12438_v26, %v4109_v6 }
 0xf03   : > { %v4142_v53 = vpack.c.bf16 %v4130_v39, %v4129_v36 }
 0xf08   : > { %7884 = vmatmul.mubr.msk.bf16.gmra.mrb[152].mxu0 %vm237_vm1, %v4141_v7 }
 0xf09   : > { %4337 = vmatprep.mubr.bf16.mxu0 %v14504_v9 }
 0xf10   : > { %7885 = vmatmul.mubr.msk.bf16.gmra.mrb[156].mxu0 %vm237_vm1, %v4142_v53 }
 0xf11   : > { %4347 = vmatprep.mubr.bf16.mxu0 %v14504_v9 }
 0xf24   : > { %v4012_v28 = vpop.xlane.xlu1 %4011  ;;  %v4015_v29 = vpop.xlane.xlu0 %4014 }
 0xf25   : > { %v4042_v17 = vmul.f32 0.015625, %v4012_v28  ;;  %v4043_v18 = vmul.f32 0.015625, %v4015_v29 }
 0xf27   : > { %v4058_v21 = vadd.f32 1e-06, %v4042_v17  ;;  %v4059_v62 = vadd.f32 1e-06, %v4043_v18  ;;  %v4179_v17 = vrot.slane %v4175_v47, %v14508_v35 }
 0xf29   : > { %9596 = vrsqrt.f32 %v4058_v21 }
 0xf2a   : > { %9598 = vrsqrt.f32 %v4059_v62 }
 0xf33   : > { %v9597_v60 = vpop.eup %9596 }
 0xf34   : > { %v9599_v10 = vpop.eup %9598  ;;  %v4090_v50 = vmul.f32 %v9597_v60, %v12361_v49 }
 0xf35   : > { %v4091_v37 = vmul.f32 %v9599_v10, %v12365_v41 }
 0xf36   : > { %v4111_v3 = vmul.f32 %v12434_v57, %v4090_v50 }
 0xf37   : > { %v4112_v11 = vmul.f32 %v12434_v57, %v4091_v37 }
 0xf38   : > { %v4131_v61 = vadd.f32 %v12438_v26, %v4111_v3 }
 0xf39   : > { %v4132_v46 = vadd.f32 %v12438_v26, %v4112_v11 }
 0xf3b   : > { %v4143_v23 = vpack.c.bf16 %v4132_v46, %v4131_v61  ;;  %v4185_v61 = vrot.slane %v7864_v30, %v14507_v16 }
 0xf3d   : > { %7886 = vmatmul.mubr.msk.bf16.gmra.mrb[160].mxu0 %vm237_vm1, %v4143_v23 }
 0xf3e   : > { %4357 = vmatprep.mubr.bf16.mxu0 %v14504_v9 }
 0xf63   : > { %v4163_v25 = vpop.xlane.xlu1 %4162 }
 0xf64   : > { %v4167_v52 = vmul.f32 0.015625, %v4163_v25 }
 0xf65   : > { %v4166_v45 = vpop.xlane.xlu0 %4165 }
 0xf66   : > { %v4169_v49 = vadd.f32 1e-06, %v4167_v52  ;;  %v4168_v33 = vmul.f32 0.015625, %v4166_v45 }
 0xf67   : > { %v4018_v41 = vpop.xlane.xlu1 %4017 }
 0xf68   : > { %9600 = vrsqrt.f32 %v4169_v49  ;;  %v4170_v63 = vadd.f32 1e-06, %v4168_v33  ;;  %v4044_v34 = vmul.f32 0.015625, %v4018_v41 }
 0xf69   : > { %v4021_v5 = vpop.xlane.xlu0 %4020 }
 0xf6a   : > { %9602 = vrsqrt.f32 %v4170_v63  ;;  %v4060_v44 = vadd.f32 1e-06, %v4044_v34  ;;  %v4045_v55 = vmul.f32 0.015625, %v4021_v5 }
 0xf6b   : > { %v4024_v42 = vpop.xlane.xlu1 %4023 }
 0xf6c   : > { %9604 = vrsqrt.f32 %v4060_v44  ;;  %v4061_v54 = vadd.f32 1e-06, %v4045_v55  ;;  %v4046_v7 = vmul.f32 0.015625, %v4024_v42 }
 0xf6d   : > { %v4027_v6 = vpop.xlane.xlu0 %4026 }
 0xf6e   : > { %9606 = vrsqrt.f32 %v4061_v54  ;;  %v4062_v39 = vadd.f32 1e-06, %v4046_v7  ;;  %v4047_v36 = vmul.f32 0.015625, %v4027_v6 }
 0xf6f   : > { %v4030_v53 = vpop.xlane.xlu1 %4029 }
 0xf70   : > { %9608 = vrsqrt.f32 %v4062_v39  ;;  %v4063_v28 = vadd.f32 1e-06, %v4047_v36  ;;  %v4048_v29 = vmul.f32 0.015625, %v4030_v53 }
 0xf71   : > { %v4033_v18 = vpop.xlane.xlu0 %4032 }
 0xf72   : > { %v9601_v21 = vpop.eup %9600  ;;  %9610 = vrsqrt.f32 %v4063_v28  ;;  %v4049_v62 = vmul.f32 0.015625, %v4033_v18  ;;  %v4064_v50 = vadd.f32 1e-06, %v4048_v29 }
 0xf73   : > { %v4173_v60 = vmul.f32 %v9601_v21, %v12375_v59 }
 0xf74   : > { %v9603_v10 = vpop.eup %9602  ;;  %v4065_v37 = vadd.f32 1e-06, %v4049_v62 }
 0xf75   : > { %v4180_v3 = vmul.f32 %v4179_v17, %v4173_v60  ;;  %v4174_v11 = vmul.f32 %v9603_v10, %v12379_v20 }
 0xf76   : > { %v9605_v46 = vpop.eup %9604  ;;  %9612 = vrsqrt.f32 %v4065_v37 }
 0xf77   : > { %v4181_v23 = vmul.f32 %v4179_v17, %v4174_v11  ;;  %v4092_v25 = vmul.f32 %v9605_v46, %v12385_v31  ;;  %9614 = vrsqrt.f32 %v4064_v50  ;;  %v4186_v45 = vadd.f32 %v4185_v61, %v4180_v3 }
 0xf78   : > { %v9607_v52 = vpop.eup %9606 }
 0xf79   : > { %v4187_v49 = vadd.f32 %v4185_v61, %v4181_v23  ;;  %v4093_v33 = vmul.f32 %v9607_v52, %v12392_v24  ;;  %v4113_v59 = vmul.f32 %v12434_v57, %v4092_v25 }
 0xf7a   : > { %v9609_v41 = vpop.eup %9608 }
 0xf7b   : > { %v4188_v63 = vpack.c.bf16 %v4187_v49, %v4186_v45  ;;  %v4114_v34 = vmul.f32 %v12434_v57, %v4093_v33  ;;  %v4133_v5 = vadd.f32 %v12438_v26, %v4113_v59  ;;  %v4094_v31 = vmul.f32 %v9609_v41, %v12399_v27 }
 0xf7c   : > { %v9611_v20 = vpop.eup %9610 }
 0xf7d   : > { %7907 = vmatmul.mubr.msk.bf16.vlgmr.msra.gmra.mrb[152].mxu1 %vm237_vm1, %v4188_v63  ;;  %v4134_v30 = vadd.f32 %v12438_v26, %v4114_v34  ;;  %v4095_v44 = vmul.f32 %v9611_v20, %v12406_v58  ;;  %v4115_v54 = vmul.f32 %v12434_v57, %v4094_v31 }
 0xf7e   : > { %8717 = vmatprep.mubr.msk.bf16.mxu1 %vm9984_vm2, %v14503_v2 }
 0xf7f   : > { %v4144_v24 = vpack.c.bf16 %v4134_v30, %v4133_v5  ;;  %v4116_v55 = vmul.f32 %v12434_v57, %v4095_v44  ;;  %v4135_v58 = vadd.f32 %v12438_v26, %v4115_v54 }
 0xf80   : > { %v9613_v42 = vpop.eup %9612 }
 0xf81   : > { %7887 = vmatmul.mubr.msk.bf16.gmra.mrb[164].mxu0 %vm237_vm1, %v4144_v24  ;;  %v9615_v7 = vpop.eup %9614  ;;  %v4136_v47 = vadd.f32 %v12438_v26, %v4116_v55  ;;  %v4097_v27 = vmul.f32 %v9613_v42, %v12420_v14 }
 0xf82   : > { %4367 = vmatprep.mubr.bf16.mxu0 %v14504_v9  ;;  %v4096_v6 = vmul.f32 %v9615_v7, %v12413_v13  ;;  %v7873_v13 = vld [vmem:[%s14421_s11 + $0x2] sm:$0x3] }
 0xf83   : > { %v4145_v39 = vpack.c.bf16 %v4136_v47, %v4135_v58  ;;  %v4118_v36 = vmul.f32 %v12434_v57, %v4097_v27  ;;  %v12541_v14 = vrot.slane %v7873_v13, %v14508_v35 }
 0xf84   : > { %v4117_v53 = vmul.f32 %v12434_v57, %v4096_v6  ;;  %v12544_v57 = vrot.slane %v7873_v13, %v14507_v16 }
 0xf85   : > { %v4138_v28 = vadd.f32 %v12438_v26, %v4118_v36 }
 0xf86   : > { %v4137_v29 = vadd.f32 %v12438_v26, %v4117_v53 }
 0xf88   : > { %v4146_v17 = vpack.c.bf16 %v4138_v28, %v4137_v29 }
 0xf89   : > { %7888 = vmatmul.mubr.msk.bf16.gmra.mrb[168].mxu0 %vm237_vm1, %v4145_v39 }
 0xf8a   : > { %4377 = vmatprep.mubr.bf16.mxu0 %v14504_v9 }
 0xf91   : > { %7889 = vmatmul.mubr.msk.bf16.gmra.mrb[172].mxu0 %vm237_vm1, %v4146_v17 }
 0xf92   : > { %8747 = vmatprep.mubr.msk.bf16.mxu0 %vm9984_vm2, %v14503_v2 }
 0xfcb   : > { %v4309_v18 = vpop.f32.mrb[144].mxu0 }
 0xfcc   : > { %v4311_v21 = vpop.f32.mrb[145].mxu0  ;;  %v4310_v60 = vadd.f32 %v4309_v18, %v12544_v57 }
 0xfcd   : > { %v4312_v26 = vadd.f32 %v4311_v21, %v12541_v14  ;;  %v4313_v62 = vpop.f32.mrb[146].mxu0 }
 0xfce   : > { %v4314_v10 = vadd.f32 %v4313_v62, %v12544_v57  ;;  %v4315_v50 = vpop.f32.mrb[147].mxu0 }
 0xfcf   : > { %v4316_v37 = vadd.f32 %v4315_v50, %v12541_v14 }
 0xfd0   : > { %v12550_v3 = vpack.c.bf16 %v4314_v10, %v4310_v60 }
 0xfd1   : > { %v12552_v11 = vpack.c.bf16 %v4316_v37, %v4312_v26 }
 0xfd2   : > { %4521 = vrot.lane.b32.xlu1 %v12550_v3, %s9983_s2 }
 0xfd3   : > { %v4319_v61 = vpop.f32.mrb[148].mxu0 }
 0xfd4   : > { %v4321_v46 = vpop.f32.mrb[149].mxu0  ;;  %v4320_v52 = vadd.f32 %v4319_v61, %v12544_v57 }
 0xfd5   : > { %v4322_v23 = vadd.f32 %v4321_v46, %v12541_v14  ;;  %v4323_v25 = vpop.f32.mrb[150].mxu0  ;;  %v7898_v46 = vld [vmem:[%s14423_s13 + $0x2] sm:$0x3] }
 0xfd6   : > { %v4324_v45 = vadd.f32 %v4323_v25, %v12544_v57  ;;  %v4325_v49 = vpop.f32.mrb[151].mxu0 }
 0xfd7   : > { %v4326_v33 = vadd.f32 %v4325_v49, %v12541_v14 }
 0xfd8   : > { %v12560_v59 = vpack.c.bf16 %v4324_v45, %v4320_v52  ;;  %v4403_v52 = vrot.slane %v7898_v46, %v14507_v16  ;;  %v4407_v45 = vrot.slane %v7898_v46, %v14508_v35 }
 0xfd9   : > { %v12562_v41 = vpack.c.bf16 %v4326_v33, %v4322_v23 }
 0xfda   : > { %4523 = vrot.lane.b32.xlu0 %v12560_v59, %s9983_s2 }
 0xfdb   : > { %v4329_v63 = vpop.f32.mrb[152].mxu0 }
 0xfdc   : > { %v4331_v34 = vpop.f32.mrb[153].mxu0  ;;  %v4330_v30 = vadd.f32 %v4329_v63, %v12544_v57 }
 0xfdd   : > { %v4332_v20 = vadd.f32 %v4331_v34, %v12541_v14  ;;  %v4333_v5 = vpop.f32.mrb[154].mxu0 }
 0xfde   : > { %v4334_v31 = vadd.f32 %v4333_v5, %v12544_v57  ;;  %v4335_v44 = vpop.f32.mrb[155].mxu0 }
 0xfdf   : > { %v4336_v24 = vadd.f32 %v4335_v44, %v12541_v14 }
 0xfe0   : > { %v12570_v55 = vpack.c.bf16 %v4334_v31, %v4330_v30 }
 0xfe1   : > { %v12572_v42 = vpack.c.bf16 %v4336_v24, %v4332_v20 }
 0xfe2   : > { %4525 = vrot.lane.b32.xlu1 %v12570_v55, %s9983_s2 }
 0xfe3   : > { %v4339_v54 = vpop.f32.mrb[156].mxu0 }
 0xfe4   : > { %v4341_v7 = vpop.f32.mrb[157].mxu0  ;;  %v4340_v58 = vadd.f32 %v4339_v54, %v12544_v57 }
 0xfe5   : > { %v4342_v47 = vadd.f32 %v4341_v7, %v12541_v14  ;;  %v4343_v27 = vpop.f32.mrb[158].mxu0 }
 0xfe6   : > { %v4344_v6 = vadd.f32 %v4343_v27, %v12544_v57  ;;  %v4345_v39 = vpop.f32.mrb[159].mxu0 }
 0xfe7   : > { %v4346_v36 = vadd.f32 %v4345_v39, %v12541_v14 }
 0xfe8   : > { %v12580_v53 = vpack.c.bf16 %v4344_v6, %v4340_v58 }
 0xfe9   : > { %v12582_v28 = vpack.c.bf16 %v4346_v36, %v4342_v47 }
 0xfea   : > { %4527 = vrot.lane.b32.xlu1 %v12580_v53, %s9983_s2 }
0x1010   : > { %v4349_v29 = vpop.f32.mrb[160].mxu0 }
0x1011   : > { %v4351_v17 = vpop.f32.mrb[161].mxu0  ;;  %v4350_v21 = vadd.f32 %v4349_v29, %v12544_v57 }
0x1012   : > { %v4352_v13 = vadd.f32 %v4351_v17, %v12541_v14  ;;  %v4353_v18 = vpop.f32.mrb[162].mxu0 }
0x1013   : > { %v4354_v26 = vadd.f32 %v4353_v18, %v12544_v57  ;;  %v4355_v62 = vpop.f32.mrb[163].mxu0 }
0x1014   : > { %v4356_v60 = vadd.f32 %v4355_v62, %v12541_v14 }
0x1015   : > { %v12590_v10 = vpack.c.bf16 %v4354_v26, %v4350_v21 }
0x1016   : > { %v12592_v50 = vpack.c.bf16 %v4356_v60, %v4352_v13 }
0x1017   : > { %4638 = vrot.lane.b32.xlu1 %v12590_v10, %s9983_s2 }
0x1044   : > { %v4522_v37 = vpop.permute.xlu1 %4521 }
0x1045   : > { %v4547_v61 = vsel %vm740_vm3, %v4522_v37, 0 }
0x1046   : > { %8708 = vmatpush3.bf16.xpose.msra.mxu1 %v4547_v61 }
0x1047   : > { %8709 = vmatprep.subr.bf16.mxu1 %v14503_v2 }
0x104c   : > { %v4524_v23 = vpop.permute.xlu0 %4523 }
0x104d   : > { %v4550_v25 = vsel %vm740_vm3, %v4524_v23, 0 }
0x104e   : > { %8710 = vmatpush3.bf16.xpose.msra.mxu1 %v4550_v25 }
0x104f   : > { %8711 = vmatprep.subr.bf16.mxu1 %v14503_v2 }
0x1050   : > { %v4487_v49 = vpop.f32.mrb[152].mxu1 }
0x1051   : > { %v4488_v33 = vadd.f32 %v4487_v49, %v4403_v52  ;;  %v4489_v63 = vpop.f32.mrb[153].mxu1 }
0x1052   : > { %v12605_v34 = vadd.f32 %v4489_v63, %v4407_v45  ;;  %v4491_v20 = vpop.f32.mrb[154].mxu1 }
0x1053   : > { %v12607_v5 = vpack.c.bf16 %v4488_v33, %v4488_v33  ;;  %v4493_v30 = vpop.f32.mrb[155].mxu1  ;;  %v4492_v25 = vadd.f32 %v4491_v20, %v4403_v52 }
0x1054   : > { %v12609_v31 = vadd.f32 %v4493_v30, %v4407_v45  ;;  %v4526_v44 = vpop.permute.xlu1 %4525  ;;  %v4359_v24 = vpop.f32.mrb[164].mxu0 }
0x1055   : > { %v4553_v54 = vsel %vm740_vm3, %v4526_v44, 0  ;;  %4529 = vrot.lane.b32.xlu0 %v12607_v5, %s9983_s2  ;;  %v4361_v7 = vpop.f32.mrb[165].mxu0  ;;  %v4360_v58 = vadd.f32 %v4359_v24, %v12544_v57  ;;  %v12637_v63 = vpack.c.bf16 %v4492_v25, %v4492_v25 }
0x1056   : > { %v4362_v47 = vadd.f32 %v4361_v7, %v12541_v14  ;;  %v4363_v27 = vpop.f32.mrb[166].mxu0  ;;  %8712 = vmatpush3.bf16.xpose.msra.mxu1 %v4553_v54 }
0x1057   : > { %v4364_v6 = vadd.f32 %v4363_v27, %v12544_v57  ;;  %v4365_v39 = vpop.f32.mrb[167].mxu0  ;;  %8713 = vmatprep.subr.bf16.mxu1 %v14503_v2 }
0x1058   : > { %v4366_v36 = vadd.f32 %v4365_v39, %v12541_v14 }
0x1059   : > { %v12619_v29 = vpack.c.bf16 %v4364_v6, %v4360_v58 }
0x105a   : > { %v12621_v17 = vpack.c.bf16 %v4366_v36, %v4362_v47 }
0x105b   : > { %4640 = vrot.lane.b32.xlu0 %v12619_v29, %s9983_s2 }
0x105c   : > { %v4528_v13 = vpop.permute.xlu1 %4527  ;;  %v4369_v18 = vpop.f32.mrb[168].mxu0 }
0x105d   : > { %v4556_v21 = vsel %vm740_vm3, %v4528_v13, 0  ;;  %v4371_v26 = vpop.f32.mrb[169].mxu0  ;;  %v4370_v37 = vadd.f32 %v4369_v18, %v12544_v57 }
0x105e   : > { %v4372_v62 = vadd.f32 %v4371_v26, %v12541_v14  ;;  %v4373_v60 = vpop.f32.mrb[170].mxu0  ;;  %8714 = vmatpush3.bf16.xpose.msra.mxu1 %v4556_v21  ;;  %v12679_v21 = vpack.c.bf16 %v12605_v34, %v12605_v34 }
0x105f   : > { %v4374_v61 = vadd.f32 %v4373_v60, %v12544_v57  ;;  %v4375_v46 = vpop.f32.mrb[171].mxu0  ;;  %8715 = vmatprep.subr.bf16.mxu1 %v14503_v2 }
0x1060   : > { %v4376_v23 = vadd.f32 %v4375_v46, %v12541_v14  ;;  %v4992_v60 = vsel %vm1202_vm4, %v12679_v21, 0 }
0x1061   : > { %v12631_v45 = vpack.c.bf16 %v4374_v61, %v4370_v37  ;;  %v12718_v61 = vpack.c.bf16 %v12609_v31, %v12609_v31 }
0x1062   : > { %v12633_v49 = vpack.c.bf16 %v4376_v23, %v4372_v62 }
0x1063   : > { %4642 = vrot.lane.b32.xlu1 %v12631_v45, %s9983_s2  ;;  %v5081_v46 = vsel %vm1202_vm4, %v12718_v61, 0 }
0x1064   : > { %v4379_v33 = vpop.f32.mrb[172].mxu0 }
0x1065   : > { %v4381_v30 = vpop.f32.mrb[173].mxu0  ;;  %v4380_v54 = vadd.f32 %v4379_v33, %v12544_v57 }
0x1066   : > { %v4382_v44 = vadd.f32 %v4381_v30, %v12541_v14  ;;  %v4383_v24 = vpop.f32.mrb[174].mxu0 }
0x1067   : > { %v4384_v7 = vadd.f32 %v4383_v24, %v12544_v57  ;;  %4646 = vrot.lane.b32.xlu1 %v12637_v63, %s9983_s2  ;;  %v4385_v52 = vpop.f32.mrb[175].mxu0 }
0x1068   : > { %v4386_v20 = vadd.f32 %v4385_v52, %v12541_v14 }
0x1069   : > { %v12645_v47 = vpack.c.bf16 %v4384_v7, %v4380_v54 }
0x106a   : > { %v12647_v27 = vpack.c.bf16 %v4386_v20, %v4382_v44 }
0x106b   : > { %5164 = vrot.lane.b32.xlu1 %v12550_v3, %s14511_s4  ;;  %4644 = vrot.lane.b32.xlu0 %v12645_v47, %s9983_s2  ;;  %s14512_s2 = smov 96  }
0x106f   : > { %5166 = vrot.lane.b32.xlu0 %v12560_v59, %s14511_s4 }
0x1089   : > { %v4639_v57 = vpop.permute.xlu1 %4638 }
0x108a   : > { %v4664_v58 = vsel %vm740_vm3, %v4639_v57, 0 }
0x108b   : > { %8738 = vmatpush3.bf16.xpose.msra.mxu0 %v4664_v58 }
0x108c   : > { %8739 = vmatprep.subr.bf16.mxu0 %v14503_v2 }
0x10c7   : > { %v4530_v14 = vpop.permute.xlu0 %4529 }
0x10c8   : > { %v4559_v6 = vsel %vm740_vm3, %v4530_v14, 0 }
0x10c9   : > { %8716 = vmatpush3.bf16.xpose.msra.mxu1 %v4559_v6 }
0x10ca   : > { %8767 = vmatprep.subr.bf16.mxu1 %v14503_v2 }
0x10cd   : > { %v4641_v39 = vpop.permute.xlu0 %4640 }
0x10ce   : > { %v4667_v36 = vsel %vm740_vm3, %v4641_v39, 0 }
0x10cf   : > { %8740 = vmatpush3.bf16.xpose.msra.mxu0 %v4667_v36 }
0x10d0   : > { %8718 = vmatmul.mubr.msk.bf16.vlgmr.msra.gmra.mrb[156].mxu1 %vm740_vm3, %v12550_v3  ;;  %8741 = vmatprep.subr.bf16.mxu0 %v14503_v2 }
0x10d1   : > { %8768 = vmatpush3.bf16.msra.mxu1 %v12552_v11  ;;  %8721 = vmatprep.mubr.msk.bf16.mxu1 %vm9984_vm2, %v14503_v2 }
0x10d2   : > { %8769 = vmatprep.subr.bf16.mxu1 %v14503_v2 }
0x10d5   : > { %v4643_v13 = vpop.permute.xlu1 %4642  ;;  %8770 = vmatpush3.bf16.msra.mxu1 %v12562_v41 }
0x10d6   : > { %v4670_v18 = vsel %vm740_vm3, %v4643_v13, 0  ;;  %8771 = vmatprep.subr.bf16.mxu1 %v14503_v2 }
0x10d7   : > { %8742 = vmatpush3.bf16.xpose.msra.mxu0 %v4670_v18 }
0x10d8   : > { %8722 = vmatmul.mubr.msk.bf16.gmra.mrb[160].mxu1 %vm740_vm3, %v12560_v59  ;;  %8743 = vmatprep.subr.bf16.mxu0 %v14503_v2 }
0x10d9   : > { %8772 = vmatpush3.bf16.msra.mxu1 %v12572_v42  ;;  %8725 = vmatprep.mubr.msk.bf16.mxu1 %vm9984_vm2, %v14503_v2  ;;  %v4647_v34 = vpop.permute.xlu1 %4646 }
0x10da   : > { %8773 = vmatprep.subr.bf16.mxu1 %v14503_v2  ;;  %v4676_v37 = vsel %vm740_vm3, %v4647_v34, 0 }
0x10dd   : > { %8774 = vmatpush3.bf16.msra.mxu1 %v12582_v28  ;;  %v4645_v26 = vpop.permute.xlu0 %4644  ;;  %v12813_v1 = vpop.permute.xlu1 %5164 }
0x10de   : > { %v4673_v62 = vsel %vm740_vm3, %v4645_v26, 0  ;;  %8775 = vmatprep.subr.bf16.mxu1 %v14503_v2 }
0x10df   : > { %8744 = vmatpush3.bf16.xpose.msra.mxu0 %v4673_v62 }
0x10e0   : > { %8726 = vmatmul.mubr.msk.bf16.gmra.mrb[164].mxu1 %vm740_vm3, %v12570_v55  ;;  %8745 = vmatprep.subr.bf16.mxu0 %v14503_v2 }
0x10e1   : > { %8776 = vmatpush3.bf16.msra.mxu1 %v4992_v60  ;;  %8729 = vmatprep.mubr.msk.bf16.mxu1 %vm9984_vm2, %v14503_v2 }
0x10e2   : > { %8827 = vmatprep.subr.bf16.mxu1 %v14503_v2 }
0x10e7   : > { %8746 = vmatpush3.bf16.xpose.msra.mxu0 %v4676_v37 }
0x10e8   : > { %8730 = vmatmul.mubr.msk.bf16.gmra.mrb[168].mxu1 %vm740_vm3, %v12580_v53  ;;  %8797 = vmatprep.subr.bf16.mxu0 %v14503_v2 }
0x10e9   : > { %8733 = vmatprep.mubr.msk.bf16.mxu1 %vm9984_vm2, %v14503_v2 }
0x10ee   : > { %8748 = vmatmul.mubr.msk.bf16.vlgmr.msra.gmra.mrb[176].mxu0 %vm740_vm3, %v12590_v10 }
0x10ef   : > { %8798 = vmatpush3.bf16.msra.mxu0 %v12592_v50  ;;  %8751 = vmatprep.mubr.msk.bf16.mxu0 %vm9984_vm2, %v14503_v2 }
0x10f0   : > { %8734 = vmatmul.mubr.msk.bf16.gmra.mrb[172].mxu1 %vm740_vm3, %v12607_v5  ;;  %8799 = vmatprep.subr.bf16.mxu0 %v14503_v2 }
0x10f1   : > { %8777 = vmatprep.mubr.msk.bf16.mxu1 %vm9984_vm2, %v14503_v2 }
0x10f3   : > { %8800 = vmatpush3.bf16.msra.mxu0 %v12621_v17 }
0x10f4   : > { %8801 = vmatprep.subr.bf16.mxu0 %v14503_v2 }
0x10f6   : > { %8752 = vmatmul.mubr.msk.bf16.gmra.mrb[180].mxu0 %vm740_vm3, %v12619_v29 }
0x10f7   : > { %8802 = vmatpush3.bf16.msra.mxu0 %v12633_v49  ;;  %8755 = vmatprep.mubr.msk.bf16.mxu0 %vm9984_vm2, %v14503_v2 }
0x10f8   : > { %8803 = vmatprep.subr.bf16.mxu0 %v14503_v2 }
0x10fb   : > { %8804 = vmatpush3.bf16.msra.mxu0 %v12647_v27 }
0x10fc   : > { %8805 = vmatprep.subr.bf16.mxu0 %v14503_v2 }
0x10fe   : > { %8756 = vmatmul.mubr.msk.bf16.gmra.mrb[184].mxu0 %vm740_vm3, %v12631_v45 }
0x10ff   : > { %8806 = vmatpush3.bf16.msra.mxu0 %v5081_v46  ;;  %8759 = vmatprep.mubr.msk.bf16.mxu0 %vm9984_vm2, %v14503_v2 }
0x1100   : > { %8857 = vmatprep.subr.bf16.mxu0 %v14503_v2 }
0x1106   : > { %8760 = vmatmul.mubr.msk.bf16.gmra.mrb[188].mxu0 %vm740_vm3, %v12645_v47 }
0x1107   : > { %8763 = vmatprep.mubr.msk.bf16.mxu0 %vm9984_vm2, %v14503_v2 }
0x110e   : > { %8764 = vmatmul.mubr.msk.bf16.gmra.mrb[192].mxu0 %vm740_vm3, %v12637_v63 }
0x110f   : > { %8807 = vmatprep.mubr.msk.bf16.mxu0 %vm9984_vm2, %v14503_v2 }
0x11a3   : > { %v4595_v31 = vpop.f32.mrb[156].mxu1 }
0x11a4   : > { %v12737_v23 = vmul.f32 0.17677669, %v4595_v31  ;;  %v8719_v25 = vpop.f32.mrb[157].mxu1 }
0x11a5   : > { %v4598_v33 = vpop.f32.mrb[158].mxu1 }
0x11a6   : > { %v12739_v30 = vmul.f32 0.17677669, %v4598_v33  ;;  %v8720_v44 = vpop.f32.mrb[159].mxu1  ;;  %v4768_v24 = vsel %vm978_vm5, %v12737_v23, -inf }
0x11a7   : > { %4769 = vmax.xlane.f32.xlu0 %v4768_v24 }
0x11a8   : > { %v4771_v54 = vsel %vm978_vm5, %v12739_v30, -inf }
0x11a9   : > { %4772 = vmax.xlane.f32.xlu1 %v4771_v54 }
0x11ab   : > { %v4603_v7 = vpop.f32.mrb[160].mxu1 }
0x11ac   : > { %v8723_v52 = vpop.f32.mrb[161].mxu1  ;;  %v12749_v44 = vmul.f32 0.17677669, %v4603_v7 }
0x11ad   : > { %v4606_v20 = vpop.f32.mrb[162].mxu1 }
0x11ae   : > { %v8724_v57 = vpop.f32.mrb[163].mxu1 }
0x11b3   : > { %v4611_v58 = vpop.f32.mrb[164].mxu1 }
0x11b4   : > { %v8727_v14 = vpop.f32.mrb[165].mxu1 }
0x11b5   : > { %v4614_v6 = vpop.f32.mrb[166].mxu1  ;;  %v12755_v14 = vmul.f32 0.17677669, %v4606_v20 }
0x11b6   : > { %v8728_v39 = vpop.f32.mrb[167].mxu1 }
0x11b7   : > { %v4774_v39 = vsel %vm978_vm5, %v12749_v44, -inf }
0x11bb   : > { %v4619_v36 = vpop.f32.mrb[168].mxu1 }
0x11bc   : > { %v8731_v13 = vpop.f32.mrb[169].mxu1 }
0x11bd   : > { %v4622_v18 = vpop.f32.mrb[170].mxu1 }
0x11be   : > { %v8732_v26 = vpop.f32.mrb[171].mxu1 }
0x11c1   : > { %v4712_v62 = vpop.f32.mrb[176].mxu0 }
0x11c2   : > { %v12745_v60 = vmul.f32 0.17677669, %v4712_v62  ;;  %v8749_v34 = vpop.f32.mrb[177].mxu0 }
0x11c3   : > { %v4627_v37 = vpop.f32.mrb[172].mxu1  ;;  %v4715_v46 = vpop.f32.mrb[178].mxu0 }
0x11c4   : > { %v12747_v31 = vmul.f32 0.17677669, %v4715_v46  ;;  %v8735_v25 = vpop.f32.mrb[173].mxu1  ;;  %v8750_v33 = vpop.f32.mrb[179].mxu0  ;;  %v4795_v54 = vsel %vm978_vm5, %v12745_v60, -inf }
0x11c5   : > { %v4630_v24 = vpop.f32.mrb[174].mxu1  ;;  %4796 = vmax.xlane.f32.xlu0 %v4795_v54  ;;  %v4777_v25 = vsel %vm978_vm5, %v12755_v14, -inf  ;;  %v12765_v33 = vmul.f32 0.17677669, %v4611_v58 }
0x11c6   : > { %v8736_v52 = vpop.f32.mrb[175].mxu1  ;;  %v4798_v57 = vsel %vm978_vm5, %v12747_v31, -inf  ;;  %v12769_v24 = vmul.f32 0.17677669, %v4614_v6 }
0x11c7   : > { %4799 = vmax.xlane.f32.xlu1 %v4798_v57 }
0x11c8   : > { %v4783_v6 = vsel %vm978_vm5, %v12769_v24, -inf }
0x11c9   : > { %v4720_v13 = vpop.f32.mrb[180].mxu0  ;;  %4775 = vmax.xlane.f32.xlu0 %v4774_v39  ;;  %v4780_v39 = vsel %vm978_vm5, %v12765_v33, -inf }
0x11ca   : > { %v8753_v26 = vpop.f32.mrb[181].mxu0  ;;  %v12761_v46 = vmul.f32 0.17677669, %v4720_v13 }
0x11cb   : > { %v4723_v7 = vpop.f32.mrb[182].mxu0 }
0x11cc   : > { %v12759_v62 = vmul.f32 0.17677669, %v4723_v7  ;;  %v8754_v34 = vpop.f32.mrb[183].mxu0  ;;  %v4801_v54 = vsel %vm978_vm5, %v12761_v46, -inf }
0x11cd   : > { %4778 = vmax.xlane.f32.xlu0 %v4777_v25  ;;  %v12781_v34 = vmul.f32 0.17677669, %v4619_v36 }
0x11ce   : > { %v4804_v20 = vsel %vm978_vm5, %v12759_v62, -inf }
0x11cf   : > { %4805 = vmax.xlane.f32.xlu1 %v4804_v20  ;;  %v12785_v20 = vmul.f32 0.17677669, %v4622_v18 }
0x11d1   : > { %v4728_v52 = vpop.f32.mrb[184].mxu0  ;;  %4802 = vmax.xlane.f32.xlu0 %v4801_v54  ;;  %v4789_v18 = vsel %vm978_vm5, %v12785_v20, -inf }
0x11d2   : > { %v8757_v57 = vpop.f32.mrb[185].mxu0  ;;  %v12777_v7 = vmul.f32 0.17677669, %v4728_v52  ;;  %v4786_v52 = vsel %vm978_vm5, %v12781_v34, -inf }
0x11d3   : > { %4781 = vmax.xlane.f32.xlu1 %v4780_v39  ;;  %v4731_v13 = vpop.f32.mrb[186].mxu0 }
0x11d4   : > { %v12775_v58 = vmul.f32 0.17677669, %v4731_v13  ;;  %v8758_v26 = vpop.f32.mrb[187].mxu0  ;;  %v4807_v54 = vsel %vm978_vm5, %v12777_v7, -inf }
0x11d5   : > { %4784 = vmax.xlane.f32.xlu0 %v4783_v6 }
0x11d6   : > { %v4810_v25 = vsel %vm978_vm5, %v12775_v58, -inf }
0x11d7   : > { %4811 = vmax.xlane.f32.xlu1 %v4810_v25  ;;  %v12797_v25 = vmul.f32 0.17677669, %v4627_v37 }
0x11d9   : > { %v4736_v57 = vpop.f32.mrb[188].mxu0  ;;  %4808 = vmax.xlane.f32.xlu0 %v4807_v54 }
0x11da   : > { %v8761_v39 = vpop.f32.mrb[189].mxu0  ;;  %v12793_v6 = vmul.f32 0.17677669, %v4736_v57  ;;  %v4792_v57 = vsel %vm978_vm5, %v12797_v25, -inf }
0x11db   : > { %4787 = vmax.xlane.f32.xlu1 %v4786_v52  ;;  %v4739_v13 = vpop.f32.mrb[190].mxu0 }
0x11dc   : > { %v12791_v36 = vmul.f32 0.17677669, %v4739_v13  ;;  %v8762_v26 = vpop.f32.mrb[191].mxu0  ;;  %v4813_v39 = vsel %vm978_vm5, %v12793_v6, -inf }
0x11dd   : > { %4790 = vmax.xlane.f32.xlu0 %v4789_v18 }
0x11de   : > { %v4816_v54 = vsel %vm978_vm5, %v12791_v36, -inf }
0x11df   : > { %4817 = vmax.xlane.f32.xlu1 %v4816_v54  ;;  %v12811_v54 = vpop.permute.xlu0 %5166 }
0x11e1   : > { %v4744_v52 = vpop.f32.mrb[192].mxu0  ;;  %4814 = vmax.xlane.f32.xlu0 %v4813_v39 }
0x11e2   : > { %v12803_v13 = vmul.f32 0.17677669, %v4744_v52  ;;  %v8765_v26 = vpop.f32.mrb[193].mxu0 }
0x11e3   : > { %4793 = vmax.xlane.f32.xlu1 %v4792_v57  ;;  %v4747_v0 = vpop.f32.mrb[194].mxu0 }
0x11e4   : > { %v8766_v37 = vpop.f32.mrb[195].mxu0  ;;  %v4819_v18 = vsel %vm978_vm5, %v12803_v13, -inf }
0x11e5   : > { %4820 = vmax.xlane.f32.xlu0 %v4819_v18 }
0x11f4   : > { %5168 = vrot.lane.b32.xlu1 %v12570_v55, %s14511_s4 }
0x1234   : > { %v4770_v39 = vpop.xlane.xlu0 %4769 }
0x1235   : > { %v4822_v52 = vsub.f32 %v12737_v23, %v4770_v39 }
0x1236   : > { %v4773_v26 = vpop.xlane.xlu1 %4772 }
0x1237   : > { %v4840_v56 = vmul.f32 1.442695, %v4822_v52  ;;  %v4823_v57 = vsub.f32 %v12739_v30, %v4773_v26 }
0x1239   : > { %9616 = vpow2.f32 %v4840_v56  ;;  %v4842_v0 = vmul.f32 1.442695, %v4823_v57 }
0x123b   : > { %9618 = vpow2.f32 %v4842_v0 }
0x1243   : > { %v12817_v37 = vpop.eup %9616 }
0x1244   : > { %v4876_v18 = vsel %vm978_vm5, %v12817_v37, 0.0 }
0x1245   : > { %v12821_v35 = vpop.eup %9618  ;;  %4877 = vadd.xlane.f32.xlu1 %v4876_v18 }
0x1246   : > { %v4879_v16 = vsel %vm978_vm5, %v12821_v35, 0.0 }
0x1247   : > { %4880 = vadd.xlane.f32.xlu0 %v4879_v16 }
0x1252   : > { %v4797_v23 = vpop.xlane.xlu0 %4796 }
0x1253   : > { %v4831_v39 = vsub.f32 %v12745_v60, %v4797_v23 }
0x1254   : > { %v4800_v52 = vpop.xlane.xlu1 %4799 }
0x1255   : > { %v4832_v56 = vsub.f32 %v12747_v31, %v4800_v52  ;;  %v4858_v30 = vmul.f32 1.442695, %v4831_v39 }
0x1256   : > { %v4776_v57 = vpop.xlane.xlu0 %4775 }
0x1257   : > { %v4860_v26 = vmul.f32 1.442695, %v4832_v56  ;;  %9620 = vpow2.f32 %v4858_v30  ;;  %v4824_v0 = vsub.f32 %v12749_v44, %v4776_v57 }
0x1259   : > { %9622 = vpow2.f32 %v4860_v26  ;;  %v4844_v40 = vmul.f32 1.442695, %v4824_v0 }
0x125a   : > { %v4779_v4 = vpop.xlane.xlu0 %4778 }
0x125b   : > { %9624 = vpow2.f32 %v4844_v40  ;;  %v4825_v18 = vsub.f32 %v12755_v14, %v4779_v4 }
0x125c   : > { %v4806_v15 = vpop.xlane.xlu1 %4805 }
0x125d   : > { %v4834_v16 = vsub.f32 %v12759_v62, %v4806_v15  ;;  %v4846_v9 = vmul.f32 1.442695, %v4825_v18 }
0x125e   : > { %v4803_v23 = vpop.xlane.xlu0 %4802 }
0x125f   : > { %v4864_v60 = vmul.f32 1.442695, %v4834_v16  ;;  %9626 = vpow2.f32 %v4846_v9  ;;  %v4833_v31 = vsub.f32 %v12761_v46, %v4803_v23 }
0x1260   : > { %v4782_v39 = vpop.xlane.xlu1 %4781 }
0x1261   : > { %v4826_v52 = vsub.f32 %v12765_v33, %v4782_v39  ;;  %v12832_v56 = vpop.eup %9620  ;;  %9628 = vpow2.f32 %v4864_v60  ;;  %v4862_v44 = vmul.f32 1.442695, %v4833_v31 }
0x1262   : > { %v4785_v40 = vpop.xlane.xlu0 %4784  ;;  %v4903_v4 = vsel %vm978_vm5, %v12832_v56, 0.0 }
0x1263   : > { %v4848_v30 = vmul.f32 1.442695, %v4826_v52  ;;  %v12836_v14 = vpop.eup %9622  ;;  %9630 = vpow2.f32 %v4862_v44  ;;  %v4827_v15 = vsub.f32 %v12769_v24, %v4785_v40  ;;  %4904 = vadd.xlane.f32.xlu0 %v4903_v4 }
0x1264   : > { %v4812_v9 = vpop.xlane.xlu1 %4811  ;;  %v4906_v57 = vsel %vm978_vm5, %v12836_v14, 0.0 }
0x1265   : > { %v12839_v62 = vpop.eup %9624  ;;  %9632 = vpow2.f32 %v4848_v30  ;;  %v4850_v46 = vmul.f32 1.442695, %v4827_v15  ;;  %v4836_v33 = vsub.f32 %v12775_v58, %v4812_v9 }
0x1266   : > { %v4809_v26 = vpop.xlane.xlu0 %4808  ;;  %v4882_v0 = vsel %vm978_vm5, %v12839_v62, 0.0 }
0x1267   : > { %9634 = vpow2.f32 %v4850_v46  ;;  %v4835_v18 = vsub.f32 %v12777_v7, %v4809_v26  ;;  %4907 = vadd.xlane.f32.xlu0 %v4906_v57  ;;  %4883 = vadd.xlane.f32.xlu1 %v4882_v0  ;;  %v4868_v23 = vmul.f32 1.442695, %v4836_v33 }
0x1268   : > { %v4788_v24 = vpop.xlane.xlu1 %4787 }
0x1269   : > { %v4828_v16 = vsub.f32 %v12781_v34, %v4788_v24  ;;  %v12848_v60 = vpop.eup %9626  ;;  %v4866_v31 = vmul.f32 1.442695, %v4835_v18 }
0x126a   : > { %v4885_v39 = vsel %vm978_vm5, %v12848_v60, 0.0  ;;  %v4791_v24 = vpop.xlane.xlu0 %4790 }
0x126b   : > { %v4852_v58 = vmul.f32 1.442695, %v4828_v16  ;;  %v12852_v52 = vpop.eup %9628  ;;  %9636 = vpow2.f32 %v4866_v31  ;;  %4886 = vadd.xlane.f32.xlu0 %v4885_v39 }
0x126c   : > { %v4912_v7 = vsel %vm978_vm5, %v12852_v52, 0.0  ;;  %v4818_v18 = vpop.xlane.xlu1 %4817 }
0x126d   : > { %9638 = vpow2.f32 %v4852_v58  ;;  %v12854_v44 = vpop.eup %9630  ;;  %v4838_v16 = vsub.f32 %v12791_v36, %v4818_v18 }
0x126e   : > { %9640 = vpow2.f32 %v4868_v23  ;;  %v4909_v34 = vsel %vm978_vm5, %v12854_v44, 0.0  ;;  %v4829_v23 = vsub.f32 %v12785_v20, %v4791_v24  ;;  %v4815_v58 = vpop.xlane.xlu0 %4814 }
0x126f   : > { %v12860_v30 = vpop.eup %9632  ;;  %4913 = vadd.xlane.f32.xlu0 %v4912_v7  ;;  %4910 = vadd.xlane.f32.xlu1 %v4909_v34  ;;  %v4872_v31 = vmul.f32 1.442695, %v4838_v16  ;;  %v4837_v7 = vsub.f32 %v12793_v6, %v4815_v58 }
0x1270   : > { %v4888_v4 = vsel %vm978_vm5, %v12860_v30, 0.0  ;;  %v4854_v39 = vmul.f32 1.442695, %v4829_v23  ;;  %v4794_v34 = vpop.xlane.xlu1 %4793 }
0x1271   : > { %v12862_v40 = vpop.eup %9634  ;;  %9642 = vpow2.f32 %v4872_v31 }
0x1272   : > { %v4891_v15 = vsel %vm978_vm5, %v12862_v40, 0.0  ;;  %9644 = vpow2.f32 %v4854_v39  ;;  %v4821_v23 = vpop.xlane.xlu0 %4820 }
0x1273   : > { %4889 = vadd.xlane.f32.xlu1 %v4888_v4  ;;  %4892 = vadd.xlane.f32.xlu0 %v4891_v15  ;;  %v4870_v4 = vmul.f32 1.442695, %v4837_v7  ;;  %v4830_v15 = vsub.f32 %v12797_v25, %v4794_v34 }
0x1274   : > { %v5169_v16 = vpop.permute.xlu1 %5168 }
0x1275   : > { %v12868_v9 = vpop.eup %9636  ;;  %9646 = vpow2.f32 %v4870_v4 }
0x1276   : > { %v4915_v33 = vsel %vm978_vm5, %v12868_v9, 0.0 }
0x1277   : > { %v12870_v46 = vpop.eup %9638  ;;  %4916 = vadd.xlane.f32.xlu0 %v4915_v33  ;;  %v4856_v33 = vmul.f32 1.442695, %v4830_v15 }
0x1278   : > { %v12874_v26 = vpop.eup %9640  ;;  %v4894_v57 = vsel %vm978_vm5, %v12870_v46, 0.0 }
0x1279   : > { %4895 = vadd.xlane.f32.xlu1 %v4894_v57  ;;  %v4918_v0 = vsel %vm978_vm5, %v12874_v26, 0.0  ;;  %9648 = vpow2.f32 %v4856_v33 }
0x127b   : > { %4919 = vadd.xlane.f32.xlu0 %v4918_v0  ;;  %v12888_v57 = vpop.eup %9642 }
0x127c   : > { %v12890_v0 = vpop.eup %9644  ;;  %v4924_v20 = vsel %vm978_vm5, %v12888_v57, 0.0 }
0x127d   : > { %v4897_v36 = vsel %vm978_vm5, %v12890_v0, 0.0 }
0x127f   : > { %v12896_v6 = vpop.eup %9646 }
0x1280   : > { %v4921_v25 = vsel %vm978_vm5, %v12896_v6, 0.0 }
0x1283   : > { %v12900_v18 = vpop.eup %9648 }
0x1284   : > { %v4900_v24 = vsel %vm978_vm5, %v12900_v18, 0.0 }
0x128a   : > { %5170 = vrot.lane.b32.xlu1 %v12580_v53, %s14511_s4 }
0x1291   : > { %5172 = vrot.lane.b32.xlu0 %v12607_v5, %s14511_s4 }
0x12ae   : > { %4925 = vadd.xlane.f32.xlu1 %v4924_v20 }
0x12b0   : > { %4898 = vadd.xlane.f32.xlu0 %v4897_v36 }
0x12b4   : > { %4922 = vadd.xlane.f32.xlu0 %v4921_v25 }
0x12b8   : > { %4901 = vadd.xlane.f32.xlu0 %v4900_v24 }
0x12bf   : > { %5154 = vrot.lane.b32.xlu1 %v12550_v3, %s14512_s2 }
0x12c3   : > { %5288 = vrot.lane.b32.xlu1 %v12619_v29, %s14511_s4 }
0x12c7   : > { %5156 = vrot.lane.b32.xlu1 %v12560_v59, %s14512_s2  ;;  %v4839_v59 = vsub.f32 %v12803_v13, %v4821_v23  ;;  %v5190_v13 = vsel %vm740_vm3, %v12813_v1, 0 }
0x12cb   : > { %5158 = vrot.lane.b32.xlu1 %v12570_v55, %s14512_s2  ;;  %v4874_v55 = vmul.f32 1.442695, %v4839_v59 }
0x12ce   : > { %5286 = vrot.lane.b32.xlu0 %v12590_v10, %s14511_s4 }
0x12cf   : > { %5292 = vrot.lane.b32.xlu1 %v12645_v47, %s14511_s4 }
0x12d2   : > { %v4878_v31 = vpop.xlane.xlu1 %4877 }
0x12d3   : > { %9650 = vrcp.f32 %v4878_v31  ;;  %5160 = vrot.lane.b32.xlu1 %v12580_v53, %s14512_s2 }
0x12d4   : > { %v4881_v3 = vpop.xlane.xlu0 %4880 }
0x12d5   : > { %9652 = vrcp.f32 %v4881_v3 }
0x12d6   : > { %9654 = vpow2.f32 %v4874_v55 }
0x12d7   : > { %5294 = vrot.lane.b32.xlu1 %v12637_v63, %s14511_s4 }
0x12db   : > { %5276 = vrot.lane.b32.xlu1 %v12590_v10, %s14512_s2 }
0x12dd   : > { %v9651_v58 = vpop.eup %9650 }
0x12de   : > { %v4948_v7 = vmul.f32 %v9651_v58, %v12817_v37 }
0x12df   : > { %v9653_v39 = vpop.eup %9652  ;;  %5278 = vrot.lane.b32.xlu1 %v12619_v29, %s14512_s2 }
0x12e0   : > { %v4949_v53 = vmul.f32 %v9653_v39, %v12821_v35  ;;  %v12937_v10 = vpop.eup %9654  ;;  %v5193_v35 = vsel %vm740_vm3, %v12811_v54, 0 }
0x12e1   : > { %v4927_v1 = vsel %vm978_vm5, %v12937_v10, 0.0 }
0x12e2   : > { %v4966_v34 = vpack.c.bf16 %v4949_v53, %v4948_v7 }
0x12e3   : > { %5282 = vrot.lane.b32.xlu1 %v12645_v47, %s14512_s2 }
0x12e4   : > { %8778 = vmatmul.mubr.msk.bf16.vlgmr.msra.gmra.mrb[176].mxu1 %vm978_vm5, %v4966_v34 }
0x12e5   : > { %8828 = vmatpush3.bf16.xpose.msra.mxu1 %v5190_v13  ;;  %8781 = vmatprep.mubr.msk.bf16.mxu1 %vm9984_vm2, %v14503_v2 }
0x12e6   : > { %8829 = vmatprep.subr.bf16.mxu1 %v14503_v2 }
0x12e7   : > { %5629 = vrot.lane.b32.xlu1 %v12552_v11, %s14512_s2  ;;  %v5196_v11 = vsel %vm740_vm3, %v5169_v16, 0 }
0x12eb   : > { %5633 = vrot.lane.b32.xlu1 %v12572_v42, %s14512_s2 }
0x12ed   : > { %8830 = vmatpush3.bf16.xpose.msra.mxu1 %v5193_v35  ;;  %4928 = vadd.xlane.f32.xlu0 %v4927_v1 }
0x12ee   : > { %8831 = vmatprep.subr.bf16.mxu1 %v14503_v2 }
0x12ef   : > { %5637 = vrot.lane.b32.xlu1 %v12679_v21, %s14512_s2 }
0x12f0   : > { %v4905_v29 = vpop.xlane.xlu0 %4904 }
0x12f1   : > { %9656 = vrcp.f32 %v4905_v29 }
0x12f3   : > { %5737 = vrot.lane.b32.xlu1 %v12592_v50, %s14512_s2 }
0x12f4   : > { %v4884_v42 = vpop.xlane.xlu1 %4883  ;;  %v4908_v47 = vpop.xlane.xlu0 %4907 }
0x12f5   : > { %8832 = vmatpush3.bf16.xpose.msra.mxu1 %v5196_v11  ;;  %9658 = vrcp.f32 %v4908_v47 }
0x12f6   : > { %8833 = vmatprep.subr.bf16.mxu1 %v14503_v2  ;;  %9660 = vrcp.f32 %v4884_v42 }
0x12f8   : > { %v4887_v54 = vpop.xlane.xlu0 %4886 }
0x12f9   : > { %9662 = vrcp.f32 %v4887_v54 }
0x12fb   : > { %v9657_v21 = vpop.eup %9656 }
0x12fc   : > { %v4911_v37 = vpop.xlane.xlu1 %4910  ;;  %v4914_v4 = vpop.xlane.xlu0 %4913  ;;  %v4957_v36 = vmul.f32 %v9657_v21, %v12832_v56 }
0x12fd   : > { %9664 = vrcp.f32 %v4911_v37 }
0x12fe   : > { %9666 = vrcp.f32 %v4914_v4 }
0x12ff   : > { %v9659_v15 = vpop.eup %9658 }
0x1300   : > { %v4890_v33 = vpop.xlane.xlu1 %4889  ;;  %v4893_v50 = vpop.xlane.xlu0 %4892  ;;  %v4958_v25 = vmul.f32 %v9659_v15, %v12836_v14 }
0x1301   : > { %v9661_v20 = vpop.eup %9660  ;;  %9668 = vrcp.f32 %v4890_v33 }
0x1302   : > { %9670 = vrcp.f32 %v4893_v50  ;;  %v4971_v16 = vpack.c.bf16 %v4958_v25, %v4957_v36  ;;  %v4950_v31 = vmul.f32 %v9661_v20, %v12839_v62 }
0x1303   : > { %v9663_v24 = vpop.eup %9662  ;;  %5290 = vrot.lane.b32.xlu0 %v12631_v45, %s14511_s4 }
0x1304   : > { %v4917_v23 = vpop.xlane.xlu0 %4916  ;;  %v4951_v3 = vmul.f32 %v9663_v24, %v12848_v60  ;;  %8808 = vmatmul.mubr.msk.bf16.vlgmr.msra.gmra.mrb[196].mxu0 %vm978_vm5, %v4971_v16 }
0x1305   : > { %8811 = vmatprep.mubr.msk.bf16.mxu0 %vm9984_vm2, %v14503_v2  ;;  %9672 = vrcp.f32 %v4917_v23 }
0x1306   : > { %v4896_v59 = vpop.xlane.xlu1 %4895  ;;  %v4967_v55 = vpack.c.bf16 %v4951_v3, %v4950_v31 }
0x1307   : > { %v9665_v56 = vpop.eup %9664  ;;  %5280 = vrot.lane.b32.xlu0 %v12631_v45, %s14512_s2 }
0x1308   : > { %v9667_v14 = vpop.eup %9666  ;;  %8782 = vmatmul.mubr.msk.bf16.gmra.mrb[180].mxu1 %vm978_vm5, %v4967_v55  ;;  %v4920_v58 = vpop.xlane.xlu0 %4919  ;;  %v4959_v62 = vmul.f32 %v9665_v56, %v12854_v44 }
0x1309   : > { %9674 = vrcp.f32 %v4920_v58  ;;  %v4960_v39 = vmul.f32 %v9667_v14, %v12852_v52  ;;  %8785 = vmatprep.mubr.msk.bf16.mxu1 %vm9984_vm2, %v14503_v2 }
0x130a   : > { %v5171_v60 = vpop.permute.xlu1 %5170  ;;  %9676 = vrcp.f32 %v4896_v59 }
0x130b   : > { %v5199_v7 = vsel %vm740_vm3, %v5171_v60, 0  ;;  %v9669_v53 = vpop.eup %9668  ;;  %5162 = vrot.lane.b32.xlu0 %v12607_v5, %s14512_s2  ;;  %v4972_v45 = vpack.c.bf16 %v4960_v39, %v4959_v62 }
0x130c   : > { %8834 = vmatpush3.bf16.xpose.msra.mxu1 %v5199_v7  ;;  %v9671_v34 = vpop.eup %9670  ;;  %v4952_v13 = vmul.f32 %v9669_v53, %v12860_v30  ;;  %v5173_v44 = vpop.permute.xlu0 %5172 }
0x130d   : > { %8835 = vmatprep.subr.bf16.mxu1 %v14503_v2  ;;  %8812 = vmatmul.mubr.msk.bf16.gmra.mrb[200].mxu0 %vm978_vm5, %v4972_v45  ;;  %v4953_v52 = vmul.f32 %v9671_v34, %v12862_v40  ;;  %v5202_v1 = vsel %vm740_vm3, %v5173_v44, 0 }
0x130e   : > { %8815 = vmatprep.mubr.msk.bf16.mxu0 %vm9984_vm2, %v14503_v2 }
0x130f   : > { %5631 = vrot.lane.b32.xlu0 %v12562_v41, %s14512_s2  ;;  %v4968_v35 = vpack.c.bf16 %v4953_v52, %v4952_v13  ;;  %v9673_v5 = vpop.eup %9672 }
0x1310   : > { %v4961_v40 = vmul.f32 %v9673_v5, %v12868_v9 }
0x1311   : > { %8786 = vmatmul.mubr.msk.bf16.gmra.mrb[184].mxu1 %vm978_vm5, %v4968_v35 }
0x1312   : > { %8789 = vmatprep.mubr.msk.bf16.mxu1 %vm9984_vm2, %v14503_v2 }
0x1313   : > { %v9675_v30 = vpop.eup %9674  ;;  %5635 = vrot.lane.b32.xlu0 %v12582_v28, %s14512_s2 }
0x1314   : > { %8836 = vmatpush3.bf16.xpose.msra.mxu1 %v5202_v1  ;;  %v4962_v29 = vmul.f32 %v9675_v30, %v12874_v26  ;;  %v9677_v37 = vpop.eup %9676 }
0x1315   : > { %8887 = vmatprep.subr.bf16.mxu1 %v14503_v2  ;;  %v4954_v15 = vmul.f32 %v9677_v37, %v12870_v46 }
0x1316   : > { %v4973_v41 = vpack.c.bf16 %v4962_v29, %v4961_v40 }
0x1318   : > { %8816 = vmatmul.mubr.msk.bf16.gmra.mrb[204].mxu0 %vm978_vm5, %v4973_v41 }
0x1319   : > { %8819 = vmatprep.mubr.msk.bf16.mxu0 %vm9984_vm2, %v14503_v2 }
0x133b   : > { %v4926_v11 = vpop.xlane.xlu1 %4925 }
0x133d   : > { %v4899_v42 = vpop.xlane.xlu0 %4898 }
0x133e   : > { %9678 = vrcp.f32 %v4899_v42 }
0x133f   : > { %v5155_v47 = vpop.permute.xlu1 %5154  ;;  %9680 = vrcp.f32 %v4926_v11 }
0x1341   : > { %v4923_v28 = vpop.xlane.xlu0 %4922 }
0x1342   : > { %9682 = vrcp.f32 %v4923_v28 }
0x1343   : > { %v5289_v54 = vpop.permute.xlu1 %5288 }
0x1344   : > { %v5315_v59 = vsel %vm740_vm3, %v5289_v54, 0 }
0x1345   : > { %v4902_v9 = vpop.xlane.xlu0 %4901 }
0x1346   : > { %9684 = vrcp.f32 %v4902_v9 }
0x1347   : > { %v5157_v26 = vpop.permute.xlu1 %5156 }
0x1348   : > { %v9679_v4 = vpop.eup %9678 }
0x1349   : > { %v5287_v21 = vpop.permute.xlu0 %5286  ;;  %v4955_v33 = vmul.f32 %v9679_v4, %v12890_v0  ;;  %v9681_v50 = vpop.eup %9680 }
0x134a   : > { %v5312_v20 = vsel %vm740_vm3, %v5287_v21, 0  ;;  %v4964_v23 = vmul.f32 %v9681_v50, %v12888_v57 }
0x134b   : > { %v5159_v36 = vpop.permute.xlu1 %5158  ;;  %8858 = vmatpush3.bf16.xpose.msra.mxu0 %v5312_v20  ;;  %v4969_v25 = vpack.c.bf16 %v4955_v33, %v4954_v15 }
0x134c   : > { %v9683_v24 = vpop.eup %9682  ;;  %8859 = vmatprep.subr.bf16.mxu0 %v14503_v2 }
0x134d   : > { %8790 = vmatmul.mubr.msk.bf16.gmra.mrb[188].mxu1 %vm978_vm5, %v4969_v25  ;;  %v4963_v16 = vmul.f32 %v9683_v24, %v12896_v6 }
0x134e   : > { %8793 = vmatprep.mubr.msk.bf16.mxu1 %vm9984_vm2, %v14503_v2 }
0x134f   : > { %v5293_v31 = vpop.permute.xlu1 %5292  ;;  %v4974_v46 = vpack.c.bf16 %v4964_v23, %v4963_v16 }
0x1350   : > { %v9685_v0 = vpop.eup %9684  ;;  %v5321_v13 = vsel %vm740_vm3, %v5293_v31, 0 }
0x1351   : > { %8820 = vmatmul.mubr.msk.bf16.gmra.mrb[208].mxu0 %vm978_vm5, %v4974_v46  ;;  %v4956_v3 = vmul.f32 %v9685_v0, %v12900_v18 }
0x1352   : > { %8823 = vmatprep.mubr.msk.bf16.mxu0 %vm9984_vm2, %v14503_v2 }
0x1353   : > { %v5161_v55 = vpop.permute.xlu1 %5160  ;;  %8860 = vmatpush3.bf16.xpose.msra.mxu0 %v5315_v59  ;;  %v4970_v6 = vpack.c.bf16 %v4956_v3, %v4956_v3 }
0x1354   : > { %8861 = vmatprep.subr.bf16.mxu0 %v14503_v2 }
0x1355   : > { %8794 = vmatmul.mubr.msk.bf16.gmra.mrb[192].mxu1 %vm978_vm5, %v4970_v6 }
0x1356   : > { %8837 = vmatprep.mubr.msk.bf16.mxu1 %vm9984_vm2, %v14503_v2 }
0x1357   : > { %v5295_v57 = vpop.permute.xlu1 %5294 }
0x135b   : > { %v5277_v56 = vpop.permute.xlu1 %5276 }
0x135d   : > { %8838 = vmatmul.mubr.msk.bf16.vlgmr.msra.gmra.mrb[196].mxu1 %vm740_vm3, %v5155_v47 }
0x135e   : > { %8841 = vmatprep.mubr.msk.bf16.mxu1 %vm9984_vm2, %v14503_v2 }
0x135f   : > { %v5279_v18 = vpop.permute.xlu1 %5278 }
0x1363   : > { %v5283_v14 = vpop.permute.xlu1 %5282 }
0x1365   : > { %8842 = vmatmul.mubr.msk.bf16.gmra.mrb[200].mxu1 %vm740_vm3, %v5157_v26 }
0x1366   : > { %8845 = vmatprep.mubr.msk.bf16.mxu1 %vm9984_vm2, %v14503_v2 }
0x1367   : > { %v5630_v58 = vpop.permute.xlu1 %5629 }
0x1368   : > { %8888 = vmatpush3.bf16.msra.mxu1 %v5630_v58 }
0x1369   : > { %8889 = vmatprep.subr.bf16.mxu1 %v14503_v2 }
0x136b   : > { %v5634_v35 = vpop.permute.xlu1 %5633 }
0x136d   : > { %8846 = vmatmul.mubr.msk.bf16.gmra.mrb[204].mxu1 %vm740_vm3, %v5159_v36 }
0x136e   : > { %8849 = vmatprep.mubr.msk.bf16.mxu1 %vm9984_vm2, %v14503_v2 }
0x136f   : > { %v5638_v5 = vpop.permute.xlu1 %5637 }
0x1370   : > { %v5659_v30 = vsel %vm1202_vm4, %v5638_v5, 0 }
0x1373   : > { %v5738_v40 = vpop.permute.xlu1 %5737 }
0x1375   : > { %8850 = vmatmul.mubr.msk.bf16.gmra.mrb[208].mxu1 %vm740_vm3, %v5161_v55 }
0x1376   : > { %8853 = vmatprep.mubr.msk.bf16.mxu1 %vm9984_vm2, %v14503_v2 }
0x137a   : > { %v4929_v62 = vpop.xlane.xlu0 %4928 }
0x137b   : > { %9686 = vrcp.f32 %v4929_v62 }
0x137e   : > { %v5291_v60 = vpop.permute.xlu0 %5290 }
0x137f   : > { %v5318_v39 = vsel %vm740_vm3, %v5291_v60, 0 }
0x1380   : > { %8862 = vmatpush3.bf16.xpose.msra.mxu0 %v5318_v39 }
0x1381   : > { %8863 = vmatprep.subr.bf16.mxu0 %v14503_v2 }
0x1382   : > { %v5281_v7 = vpop.permute.xlu0 %5280 }
0x1385   : > { %v9687_v53 = vpop.eup %9686 }
0x1386   : > { %v5163_v45 = vpop.permute.xlu0 %5162  ;;  %v4965_v34 = vmul.f32 %v9687_v53, %v12937_v10  ;;  %v5324_v10 = vsel %vm740_vm3, %v5295_v57, 0 }
0x1387   : > { %8854 = vmatmul.mubr.msk.bf16.gmra.mrb[212].mxu1 %vm740_vm3, %v5163_v45 }
0x1388   : > { %8864 = vmatpush3.bf16.xpose.msra.mxu0 %v5321_v13  ;;  %v4975_v52 = vpack.c.bf16 %v4965_v34, %v4965_v34  ;;  %8897 = vmatprep.mubr.msk.bf16.mxu1 %vm9984_vm2, %v14503_v2 }
0x1389   : > { %8865 = vmatprep.subr.bf16.mxu0 %v14503_v2 }
0x138a   : > { %8824 = vmatmul.mubr.msk.bf16.gmra.mrb[212].mxu0 %vm978_vm5, %v4975_v52  ;;  %v5632_v44 = vpop.permute.xlu0 %5631 }
0x138b   : > { %8890 = vmatpush3.bf16.msra.mxu1 %v5632_v44  ;;  %8867 = vmatprep.mubr.msk.bf16.mxu0 %vm9984_vm2, %v14503_v2 }
0x138c   : > { %8891 = vmatprep.subr.bf16.mxu1 %v14503_v2 }
0x138e   : > { %v5636_v1 = vpop.permute.xlu0 %5635 }
0x138f   : > { %8892 = vmatpush3.bf16.msra.mxu1 %v5634_v35 }
0x1390   : > { %8866 = vmatpush3.bf16.xpose.msra.mxu0 %v5324_v10  ;;  %8893 = vmatprep.subr.bf16.mxu1 %v14503_v2 }
0x1391   : > { %8917 = vmatprep.subr.bf16.mxu0 %v14503_v2 }
0x1393   : > { %8894 = vmatpush3.bf16.msra.mxu1 %v5636_v1 }
0x1394   : > { %8895 = vmatprep.subr.bf16.mxu1 %v14503_v2 }
0x1397   : > { %8868 = vmatmul.mubr.msk.bf16.vlgmr.msra.gmra.mrb[216].mxu0 %vm740_vm3, %v5277_v56  ;;  %8896 = vmatpush3.bf16.msra.mxu1 %v5659_v30 }
0x1398   : > { %8918 = vmatpush3.bf16.msra.mxu0 %v5738_v40  ;;  %8871 = vmatprep.mubr.msk.bf16.mxu0 %vm9984_vm2, %v14503_v2 }
0x1399   : > { %8919 = vmatprep.subr.bf16.mxu0 %v14503_v2 }
0x139f   : > { %8872 = vmatmul.mubr.msk.bf16.gmra.mrb[220].mxu0 %vm740_vm3, %v5279_v18 }
0x13a0   : > { %8875 = vmatprep.mubr.msk.bf16.mxu0 %vm9984_vm2, %v14503_v2 }
0x13a7   : > { %8876 = vmatmul.mubr.msk.bf16.gmra.mrb[224].mxu0 %vm740_vm3, %v5281_v7 }
0x13a8   : > { %8879 = vmatprep.mubr.msk.bf16.mxu0 %vm9984_vm2, %v14503_v2 }
0x13af   : > { %8880 = vmatmul.mubr.msk.bf16.gmra.mrb[228].mxu0 %vm740_vm3, %v5283_v14 }
0x13b0   : > { %8883 = vmatprep.mubr.msk.bf16.mxu0 %vm9984_vm2, %v14503_v2 }
0x13b7   : > { %v13052_v29 = vpop.f32.mrb[176].mxu1 }
0x13b8   : > { %v8779_v41 = vpop.f32.mrb[177].mxu1 }
0x13b9   : > { %v13054_v11 = vpop.f32.mrb[178].mxu1 }
0x13ba   : > { %v8780_v42 = vpop.f32.mrb[179].mxu1 }
0x13d7   : > { %v13056_v47 = vpop.f32.mrb[196].mxu0 }
0x13d8   : > { %v8809_v28 = vpop.f32.mrb[197].mxu0 }
0x13d9   : > { %v13058_v54 = vpop.f32.mrb[198].mxu0 }
0x13da   : > { %v8810_v9 = vpop.f32.mrb[199].mxu0 }
0x13db   : > { %v13060_v37 = vpop.f32.mrb[180].mxu1 }
0x13dc   : > { %v8783_v26 = vpop.f32.mrb[181].mxu1 }
0x13dd   : > { %v13062_v4 = vpop.f32.mrb[182].mxu1 }
0x13de   : > { %v8784_v21 = vpop.f32.mrb[183].mxu1 }
0x13e0   : > { %v13064_v15 = vpop.f32.mrb[200].mxu0 }
0x13e1   : > { %v8813_v33 = vpop.f32.mrb[201].mxu0 }
0x13e2   : > { %v13066_v50 = vpop.f32.mrb[202].mxu0 }
0x13e3   : > { %v8814_v20 = vpop.f32.mrb[203].mxu0 }
0x13e4   : > { %v13068_v36 = vpop.f32.mrb[184].mxu1 }
0x13e5   : > { %v8787_v25 = vpop.f32.mrb[185].mxu1 }
0x13e6   : > { %v13070_v24 = vpop.f32.mrb[186].mxu1 }
0x13e7   : > { %v8788_v16 = vpop.f32.mrb[187].mxu1 }
0x13eb   : > { %v13072_v23 = vpop.f32.mrb[204].mxu0 }
0x13ec   : > { %v8817_v31 = vpop.f32.mrb[205].mxu0 }
0x13ed   : > { %v13074_v46 = vpop.f32.mrb[206].mxu0 }
0x13ee   : > { %v8818_v0 = vpop.f32.mrb[207].mxu0 }
0x1420   : > { %v13076_v3 = vpop.f32.mrb[188].mxu1 }
0x1421   : > { %v8791_v59 = vpop.f32.mrb[189].mxu1 }
0x1422   : > { %v13078_v55 = vpop.f32.mrb[190].mxu1 }
0x1423   : > { %v8792_v6 = vpop.f32.mrb[191].mxu1 }
0x1424   : > { %v13080_v57 = vpop.f32.mrb[208].mxu0 }
0x1425   : > { %v8821_v56 = vpop.f32.mrb[209].mxu0 }
0x1426   : > { %v13082_v18 = vpop.f32.mrb[210].mxu0 }
0x1427   : > { %v8822_v14 = vpop.f32.mrb[211].mxu0 }
0x1428   : > { %v5060_v58 = vpop.f32.mrb[192].mxu1 }
0x1429   : > { %v8795_v62 = vpop.f32.mrb[193].mxu1 }
0x142a   : > { %v5062_v60 = vpop.f32.mrb[194].mxu1 }
0x142b   : > { %v8796_v39 = vpop.f32.mrb[195].mxu1 }
0x1430   : > { %v5238_v7 = vpop.f32.mrb[196].mxu1 }
0x1431   : > { %v13084_v53 = vmul.f32 0.17677669, %v5238_v7  ;;  %v8839_v45 = vpop.f32.mrb[197].mxu1 }
0x1432   : > { %v5241_v34 = vpop.f32.mrb[198].mxu1 }
0x1433   : > { %v13086_v13 = vmul.f32 0.17677669, %v5241_v34  ;;  %v8840_v52 = vpop.f32.mrb[199].mxu1  ;;  %v5416_v44 = vsel %vm978_vm5, %v13084_v53, -inf }
0x1434   : > { %5417 = vmax.xlane.f32.xlu0 %v5416_v44 }
0x1435   : > { %v5419_v35 = vsel %vm978_vm5, %v13086_v13, -inf }
0x1436   : > { %5420 = vmax.xlane.f32.xlu1 %v5419_v35 }
0x1438   : > { %v5246_v10 = vpop.f32.mrb[200].mxu1 }
0x1439   : > { %v8843_v5 = vpop.f32.mrb[201].mxu1  ;;  %v13106_v44 = vmul.f32 0.17677669, %v5246_v10 }
0x143a   : > { %v5249_v1 = vpop.f32.mrb[202].mxu1 }
0x143b   : > { %v8844_v30 = vpop.f32.mrb[203].mxu1 }
0x1440   : > { %v5254_v40 = vpop.f32.mrb[204].mxu1 }
0x1441   : > { %v8847_v41 = vpop.f32.mrb[205].mxu1 }
0x1442   : > { %v5257_v42 = vpop.f32.mrb[206].mxu1  ;;  %v13110_v41 = vmul.f32 0.17677669, %v5249_v1 }
0x1443   : > { %v8848_v28 = vpop.f32.mrb[207].mxu1 }
0x1444   : > { %v5425_v10 = vsel %vm978_vm5, %v13110_v41, -inf }
0x1448   : > { %v5262_v9 = vpop.f32.mrb[208].mxu1 }
0x1449   : > { %v13092_v26 = vmul.f32 0.17677669, %v5262_v9  ;;  %v8851_v21 = vpop.f32.mrb[209].mxu1  ;;  %v5422_v9 = vsel %vm978_vm5, %v13106_v44, -inf }
0x144a   : > { %v5265_v33 = vpop.f32.mrb[210].mxu1 }
0x144b   : > { %v8852_v20 = vpop.f32.mrb[211].mxu1  ;;  %v5434_v25 = vsel %vm978_vm5, %v13092_v26, -inf }
0x144c   : > { %5435 = vmax.xlane.f32.xlu0 %v5434_v25 }
0x145a   : > { %v13096_v16 = vpop.f32.mrb[212].mxu1 }
0x145b   : > { %v8855_v31 = vpop.f32.mrb[213].mxu1 }
0x145c   : > { %v5273_v0 = vpop.f32.mrb[214].mxu1 }
0x145d   : > { %v5149_v59 = vpop.f32.mrb[212].mxu0  ;;  %v8856_v6 = vpop.f32.mrb[215].mxu1 }
0x145e   : > { %v8825_v56 = vpop.f32.mrb[213].mxu0  ;;  %v13122_v6 = vmul.f32 0.17677669, %v5254_v40 }
0x145f   : > { %v5151_v14 = vpop.f32.mrb[214].mxu0 }
0x1460   : > { %v8826_v58 = vpop.f32.mrb[215].mxu0 }
0x1462   : > { %5739 = vrot.lane.b32.xlu0 %v12621_v17, %s14512_s2 }
0x146a   : > { %v5360_v62 = vpop.f32.mrb[216].mxu0 }
0x146b   : > { %v13100_v60 = vmul.f32 0.17677669, %v5360_v62  ;;  %v8869_v39 = vpop.f32.mrb[217].mxu0 }
0x146c   : > { %v5363_v7 = vpop.f32.mrb[218].mxu0  ;;  %v13126_v39 = vmul.f32 0.17677669, %v5257_v42 }
0x146d   : > { %v13102_v45 = vmul.f32 0.17677669, %v5363_v7  ;;  %v8870_v34 = vpop.f32.mrb[219].mxu0  ;;  %v5443_v52 = vsel %vm978_vm5, %v13100_v60, -inf }
0x146e   : > { %5444 = vmax.xlane.f32.xlu1 %v5443_v52  ;;  %v5428_v52 = vsel %vm978_vm5, %v13122_v6, -inf }
0x146f   : > { %v5446_v35 = vsel %vm978_vm5, %v13102_v45, -inf }
0x1472   : > { %5447 = vmax.xlane.f32.xlu1 %v5446_v35  ;;  %v5368_v5 = vpop.f32.mrb[220].mxu0 }
0x1473   : > { %v8873_v17 = vpop.f32.mrb[221].mxu0  ;;  %v13114_v21 = vmul.f32 0.17677669, %v5368_v5  ;;  %v5431_v5 = vsel %vm978_vm5, %v13126_v39, -inf }
0x1474   : > { %v5371_v30 = vpop.f32.mrb[222].mxu0 }
0x1475   : > { %v8874_v28 = vpop.f32.mrb[223].mxu0  ;;  %v13118_v0 = vmul.f32 0.17677669, %v5371_v30  ;;  %v5449_v1 = vsel %vm978_vm5, %v13114_v21, -inf  ;;  %v13142_v30 = vmul.f32 0.17677669, %v5265_v33 }
0x1476   : > { %5423 = vmax.xlane.f32.xlu1 %v5422_v9 }
0x1477   : > { %v5452_v56 = vsel %vm978_vm5, %v13118_v0, -inf  ;;  %v5437_v9 = vsel %vm978_vm5, %v13142_v30, -inf }
0x147a   : > { %5426 = vmax.xlane.f32.xlu1 %v5425_v10  ;;  %v5376_v20 = vpop.f32.mrb[224].mxu0 }
0x147b   : > { %v8877_v25 = vpop.f32.mrb[225].mxu0  ;;  %v13134_v35 = vmul.f32 0.17677669, %v5376_v20 }
0x147c   : > { %v5379_v31 = vpop.f32.mrb[226].mxu0 }
0x147d   : > { %v8878_v59 = vpop.f32.mrb[227].mxu0  ;;  %v13138_v17 = vmul.f32 0.17677669, %v5379_v31  ;;  %v5455_v42 = vsel %vm978_vm5, %v13134_v35, -inf }
0x147e   : > { %5450 = vmax.xlane.f32.xlu1 %v5449_v1 }
0x147f   : > { %v5458_v28 = vsel %vm978_vm5, %v13138_v17, -inf }
0x1482   : > { %5453 = vmax.xlane.f32.xlu1 %v5452_v56  ;;  %v5384_v14 = vpop.f32.mrb[228].mxu0 }
0x1483   : > { %v8881_v58 = vpop.f32.mrb[229].mxu0  ;;  %v13152_v33 = vmul.f32 0.17677669, %v5384_v14 }
0x1484   : > { %v5387_v62 = vpop.f32.mrb[230].mxu0 }
0x1485   : > { %v13128_v7 = vmul.f32 0.17677669, %v5387_v62  ;;  %v8882_v34 = vpop.f32.mrb[231].mxu0  ;;  %v5461_v56 = vsel %vm978_vm5, %v13152_v33, -inf }
0x1486   : > { %5429 = vmax.xlane.f32.xlu1 %v5428_v52 }
0x1487   : > { %v5464_v40 = vsel %vm978_vm5, %v13128_v7, -inf }
0x1488   : > { %5465 = vmax.xlane.f32.xlu0 %v5464_v40 }
0x148a   : > { %5432 = vmax.xlane.f32.xlu1 %v5431_v5 }
0x148e   : > { %5456 = vmax.xlane.f32.xlu1 %v5455_v42 }
0x1492   : > { %5459 = vmax.xlane.f32.xlu1 %v5458_v28 }
0x1496   : > { %5438 = vmax.xlane.f32.xlu1 %v5437_v9 }
0x14a7   : > { %5741 = vrot.lane.b32.xlu1 %v12633_v49, %s14512_s2 }
0x14c1   : > { %v5418_v10 = vpop.xlane.xlu0 %5417 }
0x14c2   : > { %v5470_v20 = vsub.f32 %v13084_v53, %v5418_v10 }
0x14c3   : > { %v5421_v25 = vpop.xlane.xlu1 %5420 }
0x14c4   : > { %v5488_v31 = vmul.f32 1.442695, %v5470_v20  ;;  %v5471_v59 = vsub.f32 %v13086_v13, %v5421_v25 }
0x14c6   : > { %9688 = vpow2.f32 %v5488_v31  ;;  %v5490_v1 = vmul.f32 1.442695, %v5471_v59 }
0x14c8   : > { %9690 = vpow2.f32 %v5490_v1 }
0x14cb   : > { %5462 = vmax.xlane.f32.xlu1 %v5461_v56 }
0x14d0   : > { %v13156_v58 = vpop.eup %9688 }
0x14d1   : > { %v5524_v49 = vsel %vm978_vm5, %v13156_v58, 0.0 }
0x14d2   : > { %v13160_v62 = vpop.eup %9690  ;;  %5525 = vadd.xlane.f32.xlu1 %v5524_v49 }
0x14d3   : > { %v5527_v53 = vsel %vm978_vm5, %v13160_v62, 0.0 }
0x14d4   : > { %5528 = vadd.xlane.f32.xlu0 %v5527_v53 }
0x14d9   : > { %v5436_v13 = vpop.xlane.xlu0 %5435 }
0x14dd   : > { %v5740_v14 = vpop.permute.xlu0 %5739 }
0x14de   : > { %8920 = vmatpush3.bf16.msra.mxu0 %v5740_v14 }
0x14df   : > { %8921 = vmatprep.subr.bf16.mxu0 %v14503_v2 }
0x14fb   : > { %v5445_v34 = vpop.xlane.xlu1 %5444 }
0x14fc   : > { %v5479_v52 = vsub.f32 %v13100_v60, %v5445_v34 }
0x14fe   : > { %v5506_v40 = vmul.f32 1.442695, %v5479_v52 }
0x14ff   : > { %v5448_v5 = vpop.xlane.xlu1 %5447 }
0x1500   : > { %9692 = vpow2.f32 %v5506_v40  ;;  %v5480_v42 = vsub.f32 %v13102_v45, %v5448_v5 }
0x1502   : > { %v5508_v28 = vmul.f32 1.442695, %v5480_v42 }
0x1503   : > { %v5424_v9 = vpop.xlane.xlu1 %5423 }
0x1504   : > { %9694 = vpow2.f32 %v5508_v28  ;;  %v5472_v10 = vsub.f32 %v13106_v44, %v5424_v9 }
0x1506   : > { %v5492_v20 = vmul.f32 1.442695, %v5472_v10 }
0x1507   : > { %v5427_v25 = vpop.xlane.xlu1 %5426 }
0x1508   : > { %9696 = vpow2.f32 %v5492_v20  ;;  %v5473_v31 = vsub.f32 %v13110_v41, %v5427_v25  ;;  %v5476_v25 = vsub.f32 %v13092_v26, %v5436_v13 }
0x150a   : > { %v13169_v59 = vpop.eup %9692  ;;  %v5494_v1 = vmul.f32 1.442695, %v5473_v31 }
0x150b   : > { %v5451_v56 = vpop.xlane.xlu1 %5450  ;;  %v5551_v60 = vsel %vm978_vm5, %v13169_v59, 0.0 }
0x150c   : > { %9698 = vpow2.f32 %v5494_v1  ;;  %v5481_v45 = vsub.f32 %v13114_v21, %v5451_v56  ;;  %5552 = vadd.xlane.f32.xlu0 %v5551_v60 }
0x150e   : > { %v13174_v49 = vpop.eup %9694  ;;  %v5510_v53 = vmul.f32 1.442695, %v5481_v45  ;;  %v5500_v45 = vmul.f32 1.442695, %v5476_v25 }
0x150f   : > { %v5454_v44 = vpop.xlane.xlu1 %5453  ;;  %v5554_v14 = vsel %vm978_vm5, %v13174_v49, 0.0 }
0x1510   : > { %9700 = vpow2.f32 %v5510_v53  ;;  %v5482_v41 = vsub.f32 %v13118_v0, %v5454_v44  ;;  %5555 = vadd.xlane.f32.xlu0 %v5554_v14 }
0x1512   : > { %v13179_v34 = vpop.eup %9696  ;;  %v5512_v52 = vmul.f32 1.442695, %v5482_v41 }
0x1513   : > { %v5430_v40 = vpop.xlane.xlu1 %5429  ;;  %v5530_v5 = vsel %vm978_vm5, %v13179_v34, 0.0 }
0x1514   : > { %9702 = vpow2.f32 %v5512_v52  ;;  %v5474_v21 = vsub.f32 %v13122_v6, %v5430_v40  ;;  %5531 = vadd.xlane.f32.xlu1 %v5530_v5 }
0x1516   : > { %v13184_v42 = vpop.eup %9698  ;;  %v5496_v28 = vmul.f32 1.442695, %v5474_v21 }
0x1517   : > { %v5433_v9 = vpop.xlane.xlu1 %5432  ;;  %v5533_v10 = vsel %vm978_vm5, %v13184_v42, 0.0 }
0x1518   : > { %9704 = vpow2.f32 %v5496_v28  ;;  %v5475_v0 = vsub.f32 %v13126_v39, %v5433_v9  ;;  %5534 = vadd.xlane.f32.xlu0 %v5533_v10 }
0x151a   : > { %v13189_v20 = vpop.eup %9700  ;;  %v5498_v31 = vmul.f32 1.442695, %v5475_v0 }
0x151b   : > { %v5457_v1 = vpop.xlane.xlu1 %5456  ;;  %v5557_v6 = vsel %vm978_vm5, %v13189_v20, 0.0 }
0x151c   : > { %9706 = vpow2.f32 %v5498_v31  ;;  %v5483_v56 = vsub.f32 %v13134_v35, %v5457_v1  ;;  %5558 = vadd.xlane.f32.xlu0 %v5557_v6  ;;  %v5466_v6 = vpop.xlane.xlu0 %5465 }
0x151e   : > { %v13195_v60 = vpop.eup %9702  ;;  %v5514_v53 = vmul.f32 1.442695, %v5483_v56  ;;  %v5486_v56 = vsub.f32 %v13128_v7, %v5466_v6 }
0x151f   : > { %v5460_v44 = vpop.xlane.xlu1 %5459  ;;  %v5560_v39 = vsel %vm978_vm5, %v13195_v60, 0.0 }
0x1520   : > { %9708 = vpow2.f32 %v5514_v53  ;;  %v5484_v26 = vsub.f32 %v13138_v17, %v5460_v44  ;;  %5561 = vadd.xlane.f32.xlu0 %v5560_v39 }
0x1521   : > { %9710 = vpow2.f32 %v5500_v45  ;;  %v5520_v45 = vmul.f32 1.442695, %v5486_v56 }
0x1522   : > { %v13200_v13 = vpop.eup %9704  ;;  %v5516_v14 = vmul.f32 1.442695, %v5484_v26 }
0x1523   : > { %v5439_v41 = vpop.xlane.xlu1 %5438  ;;  %v5536_v35 = vsel %vm978_vm5, %v13200_v13, 0.0 }
0x1524   : > { %9712 = vpow2.f32 %v5516_v14  ;;  %v5477_v52 = vsub.f32 %v13142_v30, %v5439_v41  ;;  %5537 = vadd.xlane.f32.xlu1 %v5536_v35 }
0x1526   : > { %v13205_v40 = vpop.eup %9706  ;;  %v5502_v5 = vmul.f32 1.442695, %v5477_v52 }
0x1527   : > { %v5742_v21 = vpop.permute.xlu1 %5741  ;;  %v5539_v17 = vsel %vm978_vm5, %v13205_v40, 0.0 }
0x1528   : > { %9714 = vpow2.f32 %v5502_v5  ;;  %5540 = vadd.xlane.f32.xlu0 %v5539_v17  ;;  %8922 = vmatpush3.bf16.msra.mxu0 %v5742_v21 }
0x1529   : > { %8923 = vmatprep.subr.bf16.mxu0 %v14503_v2  ;;  %9716 = vpow2.f32 %v5520_v45 }
0x152a   : > { %v13210_v28 = vpop.eup %9708 }
0x152b   : > { %v5563_v9 = vsel %vm978_vm5, %v13210_v28, 0.0  ;;  %v13214_v10 = vpop.eup %9710 }
0x152c   : > { %5564 = vadd.xlane.f32.xlu1 %v5563_v9  ;;  %v5542_v25 = vsel %vm978_vm5, %v13214_v10, 0.0 }
0x152e   : > { %v13216_v30 = vpop.eup %9712 }
0x152f   : > { %v5566_v0 = vsel %vm978_vm5, %v13216_v30, 0.0 }
0x1530   : > { %5567 = vadd.xlane.f32.xlu0 %v5566_v0  ;;  %5543 = vadd.xlane.f32.xlu1 %v5542_v25 }
0x1532   : > { %v13222_v31 = vpop.eup %9714 }
0x1533   : > { %v5545_v1 = vsel %vm978_vm5, %v13222_v31, 0.0  ;;  %v13232_v41 = vpop.eup %9716 }
0x1534   : > { %5546 = vadd.xlane.f32.xlu0 %v5545_v1 }
0x1541   : > { %5743 = vrot.lane.b32.xlu1 %v12647_v27, %s14512_s2 }
0x154a   : > { %5284 = vrot.lane.b32.xlu0 %v12637_v63, %s14512_s2  ;;  %v13237_v63 = vmul.f32 0.17677669, %v13096_v16 }
0x154c   : > { %v5440_v5 = vsel %vm978_vm5, %v13237_v63, -inf }
0x1558   : > { %v5463_v53 = vpop.xlane.xlu1 %5462 }
0x1559   : > { %v5485_v44 = vsub.f32 %v13152_v33, %v5463_v53  ;;  %v5572_v33 = vsel %vm978_vm5, %v13232_v41, 0.0 }
0x155b   : > { %v5518_v39 = vmul.f32 1.442695, %v5485_v44 }
0x155d   : > { %9718 = vpow2.f32 %v5518_v39 }
0x155f   : > { %v5526_v26 = vpop.xlane.xlu1 %5525 }
0x1560   : > { %9720 = vrcp.f32 %v5526_v26 }
0x1561   : > { %v5529_v14 = vpop.xlane.xlu0 %5528 }
0x1562   : > { %9722 = vrcp.f32 %v5529_v14 }
0x1567   : > { %v13234_v27 = vpop.eup %9718 }
0x1568   : > { %v5569_v7 = vsel %vm978_vm5, %v13234_v27, 0.0 }
0x1569   : > { %5570 = vadd.xlane.f32.xlu1 %v5569_v7  ;;  %5573 = vadd.xlane.f32.xlu0 %v5572_v33 }
0x156a   : > { %v9721_v35 = vpop.eup %9720 }
0x156b   : > { %v5596_v21 = vmul.f32 %v9721_v35, %v13156_v58 }
0x156c   : > { %v9723_v52 = vpop.eup %9722 }
0x156d   : > { %v5597_v17 = vmul.f32 %v9723_v52, %v13160_v62  ;;  %5441 = vmax.xlane.f32.xlu0 %v5440_v5 }
0x156f   : > { %v5614_v16 = vpack.c.bf16 %v5597_v17, %v5596_v21 }
0x1571   : > { %8898 = vmatmul.mubr.msk.bf16.vlgmr.msra.gmra.mrb[216].mxu1 %vm978_vm5, %v5614_v16 }
0x1572   : > { %8901 = vmatprep.mubr.msk.bf16.mxu1 %vm9984_vm2, %v14503_v2 }
0x157a   : > { %5745 = vrot.lane.b32.xlu1 %v12718_v61, %s14512_s2 }
0x1599   : > { %v5553_v9 = vpop.xlane.xlu0 %5552 }
0x159a   : > { %9724 = vrcp.f32 %v5553_v9 }
0x159d   : > { %v5556_v0 = vpop.xlane.xlu0 %5555 }
0x159e   : > { %9726 = vrcp.f32 %v5556_v0 }
0x15a1   : > { %v5532_v25 = vpop.xlane.xlu1 %5531 }
0x15a2   : > { %9728 = vrcp.f32 %v5532_v25 }
0x15a4   : > { %v9725_v58 = vpop.eup %9724 }
0x15a5   : > { %v5535_v1 = vpop.xlane.xlu0 %5534  ;;  %v13253_v6 = vmul.f32 %v9725_v58, %v13169_v59 }
0x15a6   : > { %9730 = vrcp.f32 %v5535_v1 }
0x15a8   : > { %v9727_v62 = vpop.eup %9726 }
0x15a9   : > { %v13256_v56 = vmul.f32 %v9727_v62, %v13174_v49  ;;  %v5559_v45 = vpop.xlane.xlu0 %5558 }
0x15aa   : > { %9732 = vrcp.f32 %v5559_v45 }
0x15ab   : > { %v5619_v61 = vpack.c.bf16 %v13256_v56, %v13253_v6 }
0x15ac   : > { %v9729_v44 = vpop.eup %9728 }
0x15ad   : > { %v5562_v53 = vpop.xlane.xlu0 %5561  ;;  %v5598_v14 = vmul.f32 %v9729_v44, %v13179_v34 }
0x15ae   : > { %9734 = vrcp.f32 %v5562_v53 }
0x15b0   : > { %v9731_v39 = vpop.eup %9730 }
0x15b1   : > { %v5538_v26 = vpop.xlane.xlu1 %5537  ;;  %v5599_v7 = vmul.f32 %v9731_v39, %v13184_v42 }
0x15b2   : > { %9736 = vrcp.f32 %v5538_v26 }
0x15b3   : > { %v5615_v33 = vpack.c.bf16 %v5599_v7, %v5598_v14 }
0x15b4   : > { %v9733_v49 = vpop.eup %9732 }
0x15b5   : > { %8902 = vmatmul.mubr.msk.bf16.gmra.mrb[220].mxu1 %vm978_vm5, %v5615_v33  ;;  %v5541_v59 = vpop.xlane.xlu0 %5540  ;;  %v5607_v5 = vmul.f32 %v9733_v49, %v13189_v20 }
0x15b6   : > { %9738 = vrcp.f32 %v5541_v59  ;;  %8905 = vmatprep.mubr.msk.bf16.mxu1 %vm9984_vm2, %v14503_v2 }
0x15b8   : > { %v9735_v35 = vpop.eup %9734 }
0x15b9   : > { %v5565_v52 = vpop.xlane.xlu1 %5564  ;;  %v5608_v21 = vmul.f32 %v9735_v35, %v13195_v60 }
0x15ba   : > { %9740 = vrcp.f32 %v5565_v52 }
0x15bb   : > { %v5620_v17 = vpack.c.bf16 %v5608_v21, %v5607_v5 }
0x15bc   : > { %v9737_v16 = vpop.eup %9736 }
0x15bd   : > { %v5544_v34 = vpop.xlane.xlu1 %5543  ;;  %v5568_v42 = vpop.xlane.xlu0 %5567  ;;  %v5600_v1 = vmul.f32 %v9737_v16, %v13200_v13 }
0x15be   : > { %9742 = vrcp.f32 %v5568_v42 }
0x15bf   : > { %9744 = vrcp.f32 %v5544_v34 }
0x15c0   : > { %v9739_v9 = vpop.eup %9738 }
0x15c1   : > { %v5744_v0 = vpop.permute.xlu1 %5743  ;;  %v5547_v25 = vpop.xlane.xlu0 %5546  ;;  %v5601_v58 = vmul.f32 %v9739_v9, %v13205_v40  ;;  %v9272_v9 = vld [vmem:[%s14424_s14 + $0x20] sm:$0xff]  }
0x15c2   : > { %9746 = vrcp.f32 %v5547_v25  ;;  %8924 = vmatpush3.bf16.msra.mxu0 %v5744_v0  ;;  %8947 = vmatprep.subr.bf16.mxu1 %v9272_v9 }
0x15c3   : > { %v5616_v62 = vpack.c.bf16 %v5601_v58, %v5600_v1  ;;  %8925 = vmatprep.subr.bf16.mxu0 %v14503_v2  ;;  %8948 = vmatpush3.bf16.msra.mxu1 %v9272_v9 }
0x15c4   : > { %v9741_v60 = vpop.eup %9740 }
0x15c5   : > { %8906 = vmatmul.mubr.msk.bf16.gmra.mrb[224].mxu1 %vm978_vm5, %v5616_v62  ;;  %v5285_v20 = vpop.permute.xlu0 %5284  ;;  %v5609_v40 = vmul.f32 %v9741_v60, %v13210_v28 }
0x15c6   : > { %8884 = vmatmul.mubr.msk.bf16.gmra.mrb[232].mxu0 %vm740_vm3, %v5285_v20  ;;  %8909 = vmatprep.mubr.msk.bf16.mxu1 %vm9984_vm2, %v14503_v2 }
0x15c7   : > { %8927 = vmatprep.mubr.msk.bf16.mxu0 %vm9984_vm2, %v14503_v2 }
0x15c8   : > { %v9743_v13 = vpop.eup %9742 }
0x15c9   : > { %v9745_v6 = vpop.eup %9744  ;;  %v5610_v56 = vmul.f32 %v9743_v13, %v13216_v30 }
0x15ca   : > { %v5602_v44 = vmul.f32 %v9745_v6, %v13214_v10 }
0x15cb   : > { %v5621_v53 = vpack.c.bf16 %v5610_v56, %v5609_v40 }
0x15cc   : > { %v9747_v45 = vpop.eup %9746 }
0x15cd   : > { %v5603_v39 = vmul.f32 %v9747_v45, %v13222_v31 }
0x15cf   : > { %v5617_v26 = vpack.c.bf16 %v5603_v39, %v5602_v44 }
0x15d1   : > { %8910 = vmatmul.mubr.msk.bf16.gmra.mrb[228].mxu1 %vm978_vm5, %v5617_v26 }
0x15d2   : > { %8913 = vmatprep.mubr.msk.bf16.mxu1 %vm9984_vm2, %v14503_v2 }
0x15f6   : > { %v5571_v14 = vpop.xlane.xlu1 %5570  ;;  %v5574_v7 = vpop.xlane.xlu0 %5573 }
0x15fa   : > { %v5746_v33 = vpop.permute.xlu1 %5745  ;;  %v5442_v59 = vpop.xlane.xlu0 %5441 }
0x15fb   : > { %v5767_v28 = vsel %vm1202_vm4, %v5746_v33, 0  ;;  %v5478_v30 = vsub.f32 %v13237_v63, %v5442_v59 }
0x15fc   : > { %8926 = vmatpush3.bf16.msra.mxu0 %v5767_v28 }
0x15fd   : > { %v5504_v49 = vmul.f32 1.442695, %v5478_v30 }
0x15ff   : > { %9748 = vpow2.f32 %v5504_v49  ;;  %8928 = vmatmul.mubr.msk.bf16.vlgmr.msra.gmra.mrb[236].mxu0 %vm978_vm5, %v5619_v61 }
0x1600   : > { %8931 = vmatprep.mubr.msk.bf16.mxu0 %vm9984_vm2, %v14503_v2  ;;  %9750 = vrcp.f32 %v5571_v14 }
0x1601   : > { %9752 = vrcp.f32 %v5574_v7 }
0x1607   : > { %8932 = vmatmul.mubr.msk.bf16.gmra.mrb[240].mxu0 %vm978_vm5, %v5620_v17 }
0x1608   : > { %8935 = vmatprep.mubr.msk.bf16.mxu0 %vm9984_vm2, %v14503_v2 }
0x1609   : > { %v9749_v10 = vpop.eup %9748 }
0x160a   : > { %v5548_v31 = vsel %vm978_vm5, %v9749_v10, 0.0  ;;  %v9751_v63 = vpop.eup %9750 }
0x160b   : > { %5549 = vadd.xlane.f32.xlu0 %v5548_v31  ;;  %v9753_v35 = vpop.eup %9752  ;;  %v5611_v61 = vmul.f32 %v9751_v63, %v13234_v27  ;;  %v9275_v27 = vld [vmem:[%s14424_s14 + $0x38] sm:$0xff]  }
0x160c   : > { %v5612_v52 = vmul.f32 %v9753_v35, %v13232_v41  ;;  %v9273_v41 = vld [vmem:[%s14424_s14 + $0x28] sm:$0xff]  }
0x160d   : > { %8949 = vmatprep.subr.bf16.mxu1 %v9273_v41 }
0x160e   : > { %v5622_v5 = vpack.c.bf16 %v5612_v52, %v5611_v61  ;;  %8950 = vmatpush3.bf16.msra.mxu1 %v9273_v41 }
0x160f   : > { %8936 = vmatmul.mubr.msk.bf16.gmra.mrb[244].mxu0 %vm978_vm5, %v5621_v53 }
0x1610   : > { %8939 = vmatprep.mubr.msk.bf16.mxu0 %vm9984_vm2, %v14503_v2 }
0x1617   : > { %8940 = vmatmul.mubr.msk.bf16.gmra.mrb[248].mxu0 %vm978_vm5, %v5622_v5 }
0x1618   : > { %8943 = vmatprep.mubr.msk.bf16.mxu0 %vm9984_vm2, %v14503_v2  ;;  %v9274_v2 = vld [vmem:[%s14424_s14 + $0x30] sm:$0xff]  }
0x1619   : > { %8951 = vmatprep.subr.bf16.mxu1 %v9274_v2 }
0x161a   : > { %8952 = vmatpush3.bf16.msra.mxu1 %v9274_v2 }
0x161b   : > { %8953 = vmatprep.subr.bf16.mxu1 %v9275_v27 }
0x161e   : > { %8954 = vmatpush3.bf16.msra.mxu1 %v9275_v27 }
0x1644   : > { %v5695_v21 = vpop.f32.mrb[216].mxu1 }
0x1645   : > { %v8899_v17 = vpop.f32.mrb[217].mxu1 }
0x1646   : > { %v5698_v34 = vpop.f32.mrb[218].mxu1 }
0x1647   : > { %v9119_v42 = vpack.i.bf16 %v5698_v34, %v5695_v21  ;;  %v8900_v16 = vpop.f32.mrb[219].mxu1 }
0x1649   : > { %9120 = vrot.lane.b32.xlu1 %v9119_v42, %s14511_s4 }
0x1688   : > { %v5703_v0 = vpop.f32.mrb[220].mxu1 }
0x1689   : > { %v8903_v25 = vpop.f32.mrb[221].mxu1 }
0x168a   : > { %v5706_v1 = vpop.f32.mrb[222].mxu1 }
0x168b   : > { %v9124_v58 = vpack.i.bf16 %v5706_v1, %v5703_v0  ;;  %v8904_v62 = vpop.f32.mrb[223].mxu1 }
0x168d   : > { %9125 = vrot.lane.b32.xlu0 %v9124_v58, %s14511_s4 }
0x1698   : > { %v5711_v20 = vpop.f32.mrb[224].mxu1  ;;  %v5550_v60 = vpop.xlane.xlu0 %5549 }
0x1699   : > { %9754 = vrcp.f32 %v5550_v60  ;;  %v5392_v13 = vpop.f32.mrb[232].mxu0  ;;  %v8907_v6 = vpop.f32.mrb[225].mxu1 }
0x169a   : > { %v8885_v40 = vpop.f32.mrb[233].mxu0  ;;  %v5714_v56 = vpop.f32.mrb[226].mxu1 }
0x169b   : > { %v9129_v45 = vpack.i.bf16 %v5714_v56, %v5711_v20  ;;  %v5395_v53 = vpop.f32.mrb[234].mxu0  ;;  %v8908_v44 = vpop.f32.mrb[227].mxu1 }
0x169c   : > { %v8886_v39 = vpop.f32.mrb[235].mxu0 }
0x169d   : > { %9130 = vrot.lane.b32.xlu1 %v9129_v45, %s14511_s4 }
0x16a3   : > { %v9755_v26 = vpop.eup %9754 }
0x16a4   : > { %v5719_v14 = vpop.f32.mrb[228].mxu1  ;;  %v5604_v7 = vmul.f32 %v9755_v26, %v9749_v10  ;;  %v13331_v26 = vmul.f32 0.17677669, %v5392_v13 }
0x16a5   : > { %v8911_v33 = vpop.f32.mrb[229].mxu1 }
0x16a6   : > { %v5722_v59 = vpop.f32.mrb[230].mxu1  ;;  %v5618_v28 = vpack.c.bf16 %v5604_v7, %v5604_v7 }
0x16a7   : > { %v9134_v30 = vpack.i.bf16 %v5722_v59, %v5719_v14  ;;  %v8912_v49 = vpop.f32.mrb[231].mxu1  ;;  %v5467_v14 = vsel %vm978_vm5, %v13331_v26, -inf }
0x16a8   : > { %8914 = vmatmul.mubr.msk.bf16.gmra.mrb[232].mxu1 %vm978_vm5, %v5618_v28 }
0x16a9   : > { %9135 = vrot.lane.b32.xlu1 %v9134_v30, %s14511_s4 }
0x16bb   : > { %v9121_v31 = vpop.permute.xlu1 %9120 }
0x16bc   : > { %v9123_v63 = vunpack.i.h.bf16 %v9121_v31  ;;  %v9122_v35 = vunpack.i.l.bf16 %v9121_v31 }
0x16be   : > { %v5905_v61 = vsel %vm740_vm3, %v13054_v11, %v9123_v63  ;;  %v5904_v52 = vsel %vm740_vm3, %v13052_v29, %v9122_v35 }
0x16bf   : > { %v5920_v5 = vpack.c.bf16 %v5905_v61, %v5904_v52 }
0x16c1   : > { %8955 = vmatprep.mubr.msk.bf16.mxu1 %vm237_vm1, %v5920_v5 }
0x16d2   : > { %v5803_v10 = vpop.f32.mrb[236].mxu0 }
0x16d3   : > { %v8929_v21 = vpop.f32.mrb[237].mxu0 }
0x16d4   : > { %v5806_v17 = vpop.f32.mrb[238].mxu0 }
0x16d5   : > { %v9139_v34 = vpack.i.bf16 %v5806_v17, %v5803_v10  ;;  %v8930_v42 = vpop.f32.mrb[239].mxu0 }
0x16d7   : > { %9140 = vrot.lane.b32.xlu1 %v9139_v34, %s14511_s4 }
0x16da   : > { %v5811_v16 = vpop.f32.mrb[240].mxu0 }
0x16db   : > { %v8933_v9 = vpop.f32.mrb[241].mxu0 }
0x16dc   : > { %v5814_v41 = vpop.f32.mrb[242].mxu0 }
0x16dd   : > { %v9144_v2 = vpack.i.bf16 %v5814_v41, %v5811_v16  ;;  %v8934_v27 = vpop.f32.mrb[243].mxu0 }
0x16df   : > { %9145 = vrot.lane.b32.xlu1 %v9144_v2, %s14511_s4 }
0x16e2   : > { %v5819_v11 = vpop.f32.mrb[244].mxu0 }
0x16e3   : > { %v8937_v0 = vpop.f32.mrb[245].mxu0 }
0x16e4   : > { %v5822_v29 = vpop.f32.mrb[246].mxu0 }
0x16e5   : > { %v9149_v25 = vpack.i.bf16 %v5822_v29, %v5819_v11  ;;  %v8938_v1 = vpop.f32.mrb[247].mxu0 }
0x16e7   : > { %9150 = vrot.lane.b32.xlu1 %v9149_v25, %s14511_s4 }
0x16ea   : > { %v5827_v58 = vpop.f32.mrb[248].mxu0 }
0x16eb   : > { %v8941_v62 = vpop.f32.mrb[249].mxu0 }
0x16ec   : > { %v5830_v20 = vpop.f32.mrb[250].mxu0 }
0x16ed   : > { %v9154_v60 = vpack.i.bf16 %v5830_v20, %v5827_v58  ;;  %v8942_v6 = vpop.f32.mrb[251].mxu0  ;;  %v13368_v58 = vld [vmem:[%s14425_s15 + $0x1] ss:$0 sm:$0xff]  ;;  %v13371_v20 = vld [vmem:[%s10356_s7 + $0x8] sm:$0x3f] }
0x16ef   : > { %9155 = vrot.lane.b32.xlu0 %v9154_v60, %s14511_s4  ;;  %s7710_s4 = sshll.u32 %s9978_s1, 1  ;;  %s112_s1 = sadd.s32 1, %s9978_s1  }
0x16f0   : > { %p109_p5 = scmp.ge.s32.totalorder %s112_s1, 28  }
0x16ff   : > { %v9126_v40 = vpop.permute.xlu0 %9125 }
0x1700   : > { %v9128_v56 = vunpack.i.h.bf16 %v9126_v40  ;;  %v9127_v45 = vunpack.i.l.bf16 %v9126_v40 }
0x1702   : > { %v5907_v53 = vsel %vm740_vm3, %v13062_v4, %v9128_v56  ;;  %v5906_v44 = vsel %vm740_vm3, %v13060_v37, %v9127_v45 }
0x1703   : > { %v5921_v39 = vpack.c.bf16 %v5907_v53, %v5906_v44 }
0x1705   : > { %8956 = vmatmul.mubr.msk.bf16.vlgmr.msra.gmra.mrb[236].mxu1 %vm237_vm1, %v5921_v39 }
0x170b   : > { %5468 = vmax.xlane.f32.xlu1 %v5467_v14 }
0x170f   : > { %v9131_v7 = vpop.permute.xlu1 %9130 }
0x1710   : > { %v9133_v33 = vunpack.i.h.bf16 %v9131_v7  ;;  %v9132_v59 = vunpack.i.l.bf16 %v9131_v7 }
0x1712   : > { %v5909_v28 = vsel %vm740_vm3, %v13070_v24, %v9133_v33  ;;  %v5908_v4 = vsel %vm740_vm3, %v13068_v36, %v9132_v59 }
0x1713   : > { %v5922_v30 = vpack.c.bf16 %v5909_v28, %v5908_v4 }
0x1715   : > { %8959 = vmatprep.mubr.msk.bf16.mxu1 %vm237_vm1, %v5922_v30 }
0x171b   : > { %v9136_v37 = vpop.permute.xlu1 %9135 }
0x171c   : > { %v9138_v49 = vunpack.i.h.bf16 %v9136_v37  ;;  %v9137_v13 = vunpack.i.l.bf16 %v9136_v37 }
0x171e   : > { %v5911_v31 = vsel %vm740_vm3, %v13078_v55, %v9138_v49  ;;  %v5910_v63 = vsel %vm740_vm3, %v13076_v3, %v9137_v13 }
0x171f   : > { %v5923_v35 = vpack.c.bf16 %v5911_v31, %v5910_v63 }
0x1721   : > { %8960 = vmatmul.mubr.msk.bf16.gmra.mrb[240].mxu1 %vm237_vm1, %v5923_v35 }
0x1749   : > { %v9141_v61 = vpop.permute.xlu1 %9140 }
0x174a   : > { %v9143_v24 = vunpack.i.h.bf16 %v9141_v61  ;;  %v9142_v52 = vunpack.i.l.bf16 %v9141_v61 }
0x174c   : > { %v5913_v36 = vsel %vm740_vm3, %v13058_v54, %v9143_v24  ;;  %v5912_v5 = vsel %vm740_vm3, %v13056_v47, %v9142_v52 }
0x174d   : > { %v5924_v10 = vpack.c.bf16 %v5913_v36, %v5912_v5 }
0x174f   : > { %8963 = vmatprep.mubr.msk.bf16.mxu1 %vm237_vm1, %v5924_v10 }
0x1751   : > { %v9146_v21 = vpop.permute.xlu1 %9145 }
0x1752   : > { %v9148_v55 = vunpack.i.h.bf16 %v9146_v21  ;;  %v9147_v17 = vunpack.i.l.bf16 %v9146_v21 }
0x1754   : > { %v5915_v3 = vsel %vm740_vm3, %v13066_v50, %v9148_v55  ;;  %v5914_v34 = vsel %vm740_vm3, %v13064_v15, %v9147_v17 }
0x1755   : > { %v5925_v42 = vpack.c.bf16 %v5915_v3, %v5914_v34 }
0x1757   : > { %8964 = vmatmul.mubr.msk.bf16.gmra.mrb[244].mxu1 %vm237_vm1, %v5925_v42 }
0x1759   : > { %v9151_v16 = vpop.permute.xlu1 %9150 }
0x175a   : > { %v9153_v54 = vunpack.i.h.bf16 %v9151_v16  ;;  %v9152_v9 = vunpack.i.l.bf16 %v9151_v16 }
0x175c   : > { %v5917_v47 = vsel %vm740_vm3, %v13074_v46, %v9153_v54  ;;  %v5916_v41 = vsel %vm740_vm3, %v13072_v23, %v9152_v9 }
0x175d   : > { %v5926_v2 = vpack.c.bf16 %v5917_v47, %v5916_v41 }
0x175f   : > { %8967 = vmatprep.mubr.msk.bf16.mxu1 %vm237_vm1, %v5926_v2 }
0x1761   : > { %v9156_v50 = vpop.permute.xlu0 %9155 }
0x1762   : > { %v9158_v27 = vunpack.i.h.bf16 %v9156_v50  ;;  %v9157_v11 = vunpack.i.l.bf16 %v9156_v50 }
0x1764   : > { %v5919_v15 = vsel %vm740_vm3, %v13082_v18, %v9158_v27  ;;  %v5918_v0 = vsel %vm740_vm3, %v13080_v57, %v9157_v11  ;;  %v13375_v18 = vrot.slane %v13371_v20, %v11313_v22 }
0x1765   : > { %v5927_v29 = vpack.c.bf16 %v5919_v15, %v5918_v0 }
0x1767   : > { %8968 = vmatmul.mubr.msk.bf16.gmra.mrb[248].mxu1 %vm237_vm1, %v5927_v29 }
0x177b   : > { %v5727_v46 = vpop.f32.mrb[232].mxu1 }
0x177c   : > { %v8915_v25 = vpop.f32.mrb[233].mxu1 }
0x177d   : > { %v5729_v1 = vpop.f32.mrb[234].mxu1 }
0x177e   : > { %v8916_v23 = vpop.f32.mrb[235].mxu1 }
0x17d8   : > { %v8957_v62 = vpop.f32.mrb[236].mxu1 }
0x17d9   : > { %v6036_v57 = vadd.f32 %v8957_v62, %v13368_v58  ;;  %v6027_v60 = vpop.f32.mrb[237].mxu1 }
0x17da   : > { %v6028_v6 = vadd.f32 %v13368_v58, %v6027_v60  ;;  %v8958_v40 = vpop.f32.mrb[238].mxu1 }
0x17db   : > { %v6039_v56 = vadd.f32 %v8958_v40, %v13368_v58  ;;  %v6030_v45 = vpop.f32.mrb[239].mxu1  ;;  %v6096_v44 = vmul.f32 %v13375_v18, %v6036_v57 }
0x17dc   : > { %v6031_v53 = vadd.f32 %v13368_v58, %v6030_v45  ;;  %v6094_v14 = vmul.f32 %v13375_v18, %v6028_v6 }
0x17dd   : > { %v6097_v39 = vmul.f32 %v13375_v18, %v6039_v56 }
0x17de   : > { %v6095_v22 = vmul.f32 %v13375_v18, %v6031_v53 }
0x17df   : > { %v6111_v7 = vpack.c.bf16 %v6097_v39, %v6096_v44 }
0x17e0   : > { %v6110_v33 = vpack.c.bf16 %v6095_v22, %v6094_v14  ;;  %v5469_v14 = vpop.xlane.xlu1 %5468 }
0x17e1   : > { %v13386_v59 = vadd.bf16 %v6111_v7, %v12160_v32 }
0x17e2   : > { %v13389_v28 = vadd.bf16 %v6110_v33, %v12145_v19 }
0x17e3   : > { %v6128_v4 = vunpack.c.l.bf16 %v13386_v59  ;;  %v6129_v32 = vunpack.c.h.bf16 %v13386_v59 }
0x17e4   : > { %v6126_v30 = vunpack.c.l.bf16 %v13389_v28  ;;  %v6127_v13 = vunpack.c.h.bf16 %v13389_v28 }
0x17e5   : > { %v6148_v37 = vsel %vm237_vm1, %v6128_v4, 0.0  ;;  %v6151_v31 = vsel %vm237_vm1, %v6129_v32, 0.0 }
0x17e6   : > { %6149 = vadd.xlane.f32.xlu1 %v6148_v37  ;;  %v6142_v49 = vsel %vm237_vm1, %v6126_v30, 0.0  ;;  %v6145_v19 = vsel %vm237_vm1, %v6127_v13, 0.0  ;;  %v5487_v37 = vsub.f32 %v13331_v26, %v5469_v14 }
0x17e7   : > { %6143 = vadd.xlane.f32.xlu0 %v6142_v49 }
0x17eb   : > { %6146 = vadd.xlane.f32.xlu0 %v6145_v19 }
0x17ef   : > { %6152 = vadd.xlane.f32.xlu0 %v6151_v31 }
0x17f4   : > { %v8961_v63 = vpop.f32.mrb[240].mxu1 }
0x17f5   : > { %v6052_v35 = vadd.f32 %v8961_v63, %v13368_v58  ;;  %v6043_v61 = vpop.f32.mrb[241].mxu1 }
0x17f6   : > { %v6044_v24 = vadd.f32 %v13368_v58, %v6043_v61  ;;  %v8962_v52 = vpop.f32.mrb[242].mxu1 }
0x17f7   : > { %v6055_v36 = vadd.f32 %v8962_v52, %v13368_v58  ;;  %v6046_v5 = vpop.f32.mrb[243].mxu1  ;;  %v6100_v21 = vmul.f32 %v13375_v18, %v6052_v35 }
0x17f8   : > { %v6047_v10 = vadd.f32 %v13368_v58, %v6046_v5  ;;  %v6098_v17 = vmul.f32 %v13375_v18, %v6044_v24 }
0x17f9   : > { %v6101_v55 = vmul.f32 %v13375_v18, %v6055_v36  ;;  %v5522_v36 = vmul.f32 1.442695, %v5487_v37 }
0x17fa   : > { %v6099_v3 = vmul.f32 %v13375_v18, %v6047_v10 }
0x17fb   : > { %v6113_v34 = vpack.c.bf16 %v6101_v55, %v6100_v21  ;;  %9756 = vpow2.f32 %v5522_v36 }
0x17fc   : > { %v6112_v42 = vpack.c.bf16 %v6099_v3, %v6098_v17 }
0x17fd   : > { %v13416_v16 = vadd.bf16 %v6113_v34, %v12189_v48 }
0x17fe   : > { %v13419_v54 = vadd.bf16 %v6112_v42, %v12175_v8 }
0x17ff   : > { %v6132_v50 = vunpack.c.l.bf16 %v13416_v16  ;;  %v6133_v48 = vunpack.c.h.bf16 %v13416_v16 }
0x1800   : > { %v6130_v9 = vunpack.c.l.bf16 %v13419_v54  ;;  %v6131_v47 = vunpack.c.h.bf16 %v13419_v54 }
0x1801   : > { %v6160_v8 = vsel %vm237_vm1, %v6132_v50, 0.0  ;;  %v6163_v27 = vsel %vm237_vm1, %v6133_v48, 0.0 }
0x1802   : > { %v6154_v41 = vsel %vm237_vm1, %v6130_v9, 0.0  ;;  %v6157_v2 = vsel %vm237_vm1, %v6131_v47, 0.0 }
0x1803   : > { %6155 = vadd.xlane.f32.xlu1 %v6154_v41  ;;  %6158 = vadd.xlane.f32.xlu0 %v6157_v2 }
0x1807   : > { %6161 = vadd.xlane.f32.xlu1 %v6160_v8  ;;  %6164 = vadd.xlane.f32.xlu0 %v6163_v27 }
0x182a   : > { %v8965_v11 = vpop.f32.mrb[244].mxu1 }
0x182b   : > { %v6068_v15 = vadd.f32 %v8965_v11, %v13368_v58  ;;  %v6059_v0 = vpop.f32.mrb[245].mxu1  ;;  %v13498_v11 = vpop.eup %9756 }
0x182c   : > { %v6060_v29 = vadd.f32 %v13368_v58, %v6059_v0  ;;  %v8966_v46 = vpop.f32.mrb[246].mxu1 }
0x182d   : > { %v6071_v25 = vadd.f32 %v8966_v46, %v13368_v58  ;;  %v6062_v1 = vpop.f32.mrb[247].mxu1  ;;  %v6104_v62 = vmul.f32 %v13375_v18, %v6068_v15  ;;  %v5575_v15 = vsel %vm978_vm5, %v13498_v11, 0.0 }
0x182e   : > { %v6063_v23 = vadd.f32 %v13368_v58, %v6062_v1  ;;  %v6102_v60 = vmul.f32 %v13375_v18, %v6060_v29 }
0x182f   : > { %v6105_v57 = vmul.f32 %v13375_v18, %v6071_v25 }
0x1830   : > { %v6103_v6 = vmul.f32 %v13375_v18, %v6063_v23 }
0x1831   : > { %v6115_v40 = vpack.c.bf16 %v6105_v57, %v6104_v62 }
0x1832   : > { %v6114_v56 = vpack.c.bf16 %v6103_v6, %v6102_v60 }
0x1833   : > { %v13446_v45 = vadd.bf16 %v6115_v40, %v12235_v38 }
0x1834   : > { %v13449_v53 = vadd.bf16 %v6114_v56, %v12205_v43 }
0x1835   : > { %v6136_v33 = vunpack.c.l.bf16 %v13446_v45  ;;  %v6137_v38 = vunpack.c.h.bf16 %v13446_v45 }
0x1836   : > { %v6134_v44 = vunpack.c.l.bf16 %v13449_v53  ;;  %v6135_v39 = vunpack.c.h.bf16 %v13449_v53 }
0x1837   : > { %v6172_v35 = vsel %vm237_vm1, %v6136_v33, 0.0  ;;  %v6175_v61 = vsel %vm237_vm1, %v6137_v38, 0.0 }
0x1838   : > { %v6166_v22 = vsel %vm237_vm1, %v6134_v44, 0.0  ;;  %v6169_v7 = vsel %vm237_vm1, %v6135_v39, 0.0 }
0x1839   : > { %6167 = vadd.xlane.f32.xlu1 %v6166_v22  ;;  %6170 = vadd.xlane.f32.xlu0 %v6169_v7 }
0x183a   : > { %v8969_v43 = vpop.f32.mrb[248].mxu1 }
0x183b   : > { %v6084_v49 = vadd.f32 %v8969_v43, %v13368_v58  ;;  %v6075_v19 = vpop.f32.mrb[249].mxu1 }
0x183c   : > { %v6076_v31 = vadd.f32 %v13368_v58, %v6075_v19  ;;  %v8970_v63 = vpop.f32.mrb[250].mxu1 }
0x183d   : > { %v6087_v24 = vadd.f32 %v8970_v63, %v13368_v58  ;;  %v6078_v52 = vpop.f32.mrb[251].mxu1  ;;  %6173 = vadd.xlane.f32.xlu1 %v6172_v35  ;;  %6176 = vadd.xlane.f32.xlu0 %v6175_v61  ;;  %v6108_v5 = vmul.f32 %v13375_v18, %v6084_v49 }
0x183e   : > { %v6079_v26 = vadd.f32 %v13368_v58, %v6078_v52  ;;  %v6106_v21 = vmul.f32 %v13375_v18, %v6076_v31 }
0x183f   : > { %v6109_v10 = vmul.f32 %v13375_v18, %v6087_v24 }
0x1840   : > { %v6107_v55 = vmul.f32 %v13375_v18, %v6079_v26 }
0x1841   : > { %v6117_v17 = vpack.c.bf16 %v6109_v10, %v6108_v5 }
0x1842   : > { %v6116_v3 = vpack.c.bf16 %v6107_v55, %v6106_v21  ;;  %v9278_v55 = vld [vmem:[%s14428_s18 + $0x44] ss:$8 sps:$4 sm:$0xff]  }
0x1843   : > { %v13477_v34 = vadd.bf16 %v6117_v17, %v12258_v12  ;;  %v9276_v17 = vld [vmem:[%s14428_s18 + $0x40] ss:$8 sps:$4 sm:$0xff]   ;;  %6484 = vmatprep.subr.bf16.mxu0 %v9278_v55 }
0x1844   : > { %v13480_v42 = vadd.bf16 %v6116_v3, %v12247_v51  ;;  %6485 = vmatpush1.bf16.msra.mxu0 %v9276_v17 }
0x1845   : > { %v6140_v8 = vunpack.c.l.bf16 %v13477_v34  ;;  %v6141_v12 = vunpack.c.h.bf16 %v13477_v34 }
0x1846   : > { %v6138_v58 = vunpack.c.l.bf16 %v13480_v42  ;;  %v6139_v41 = vunpack.c.h.bf16 %v13480_v42 }
0x1847   : > { %v6184_v51 = vsel %vm237_vm1, %v6140_v8, 0.0  ;;  %v6187_v27 = vsel %vm237_vm1, %v6141_v12, 0.0 }
0x1848   : > { %v6178_v2 = vsel %vm237_vm1, %v6138_v58, 0.0  ;;  %v6181_v18 = vsel %vm237_vm1, %v6139_v41, 0.0 }
0x1849   : > { %6179 = vadd.xlane.f32.xlu1 %v6178_v2  ;;  %6182 = vadd.xlane.f32.xlu0 %v6181_v18  ;;  %v9281_v18 = vld [vmem:[%s14428_s18 + $0x54] ss:$8 sps:$4 sm:$0xff]  }
0x184a   : > { %6486 = vmatprep.subr.bf16.mxu0 %v9281_v18 }
0x184d   : > { %6185 = vadd.xlane.f32.xlu1 %v6184_v51  ;;  %6188 = vadd.xlane.f32.xlu0 %v6187_v27  ;;  %v9279_v51 = vld [vmem:[%s14428_s18 + $0x50] ss:$8 sps:$4 sm:$0xff]   ;;  %v9284_v27 = vld [vmem:[%s14428_s18 + $0x64] ss:$8 sps:$4 sm:$0xff]  }
0x184e   : > { %6487 = vmatpush1.bf16.msra.mxu0 %v9279_v51 }
0x184f   : > { %6488 = vmatprep.subr.bf16.mxu0 %v9284_v27 }
0x1851   : > { %5576 = vadd.xlane.f32.xlu1 %v5575_v15  ;;  %v9282_v15 = vld [vmem:[%s14428_s18 + $0x60] ss:$8 sps:$4 sm:$0xff]  }
0x1852   : > { %6489 = vmatpush1.bf16.msra.mxu0 %v9282_v15 }
0x1873   : > { %v6150_v0 = vpop.xlane.xlu1 %6149 }
0x1874   : > { %v6192_v29 = vmul.f32 0.015625, %v6150_v0  ;;  %v6144_v46 = vpop.xlane.xlu0 %6143  ;;  %v9287_v0 = vld [vmem:[%s14428_s18 + $0x74] ss:$8 sps:$4 sm:$0xff]  }
0x1875   : > { %v6190_v25 = vmul.f32 0.015625, %v6144_v46  ;;  %6490 = vmatprep.subr.bf16.mxu0 %v9287_v0  ;;  %v14513_v0 = vmov 0  }
0x1876   : > { %v13504_v1 = vsub.f32 %v6128_v4, %v6192_v29  ;;  %v9285_v29 = vld [vmem:[%s14428_s18 + $0x70] ss:$8 sps:$4 sm:$0xff]  }
0x1877   : > { %v13508_v23 = vsub.f32 %v6126_v30, %v6190_v25  ;;  %6491 = vmatpush1.bf16.msra.mxu0 %v9285_v29 }
0x1878   : > { %v6147_v62 = vpop.xlane.xlu0 %6146  ;;  %v6224_v56 = vmul.f32 %v13504_v1, %v13504_v1 }
0x1879   : > { %v6191_v57 = vmul.f32 0.015625, %v6147_v62  ;;  %v6222_v60 = vmul.f32 %v13508_v23, %v13508_v23 }
0x187a   : > { %v6244_v7 = vsel %vm237_vm1, %v6224_v56, 0.0 }
0x187b   : > { %v13514_v6 = vsub.f32 %v6127_v13, %v6191_v57  ;;  %v6238_v40 = vsel %vm237_vm1, %v6222_v60, 0.0 }
0x187c   : > { %6239 = vadd.xlane.f32.xlu0 %v6238_v40  ;;  %v6153_v4 = vpop.xlane.xlu0 %6152 }
0x187d   : > { %v6193_v14 = vmul.f32 0.015625, %v6153_v4  ;;  %v6223_v30 = vmul.f32 %v13514_v6, %v13514_v6 }
0x187f   : > { %v13523_v22 = vsub.f32 %v6129_v32, %v6193_v14  ;;  %v6241_v13 = vsel %vm237_vm1, %v6223_v30, 0.0 }
0x1880   : > { %6245 = vadd.xlane.f32.xlu0 %v6244_v7  ;;  %6242 = vadd.xlane.f32.xlu1 %v6241_v13 }
0x1881   : > { %v6225_v43 = vmul.f32 %v13523_v22, %v13523_v22 }
0x1883   : > { %v6247_v37 = vsel %vm237_vm1, %v6225_v43, 0.0 }
0x1884   : > { %6248 = vadd.xlane.f32.xlu1 %v6247_v37 }
0x1890   : > { %v6156_v49 = vpop.xlane.xlu1 %6155  ;;  %v6159_v19 = vpop.xlane.xlu0 %6158 }
0x1891   : > { %v6194_v31 = vmul.f32 0.015625, %v6156_v49  ;;  %v6195_v63 = vmul.f32 0.015625, %v6159_v19 }
0x1893   : > { %v13532_v32 = vsub.f32 %v6130_v9, %v6194_v31  ;;  %v13536_v35 = vsub.f32 %v6131_v47, %v6195_v63 }
0x1894   : > { %v6162_v61 = vpop.xlane.xlu1 %6161  ;;  %v6165_v24 = vpop.xlane.xlu0 %6164 }
0x1895   : > { %v6196_v52 = vmul.f32 0.015625, %v6162_v61  ;;  %v6197_v26 = vmul.f32 0.015625, %v6165_v24  ;;  %v6226_v36 = vmul.f32 %v13532_v32, %v13532_v32  ;;  %v6227_v5 = vmul.f32 %v13536_v35, %v13536_v35 }
0x1897   : > { %v13544_v10 = vsub.f32 %v6132_v50, %v6196_v52  ;;  %v13548_v9 = vsub.f32 %v6133_v48, %v6197_v26  ;;  %v6250_v47 = vsel %vm237_vm1, %v6226_v36, 0.0  ;;  %v6253_v21 = vsel %vm237_vm1, %v6227_v5, 0.0 }
0x1898   : > { %6251 = vadd.xlane.f32.xlu0 %v6250_v47  ;;  %6254 = vadd.xlane.f32.xlu1 %v6253_v21 }
0x1899   : > { %v6228_v50 = vmul.f32 %v13544_v10, %v13544_v10  ;;  %v6229_v48 = vmul.f32 %v13548_v9, %v13548_v9 }
0x189b   : > { %v6256_v3 = vsel %vm237_vm1, %v6228_v50, 0.0  ;;  %v6259_v2 = vsel %vm237_vm1, %v6229_v48, 0.0 }
0x189c   : > { %6257 = vadd.xlane.f32.xlu0 %v6256_v3  ;;  %6260 = vadd.xlane.f32.xlu1 %v6259_v2 }
0x18c6   : > { %v6168_v46 = vpop.xlane.xlu1 %6167  ;;  %v6171_v25 = vpop.xlane.xlu0 %6170 }
0x18c7   : > { %v6198_v62 = vmul.f32 0.015625, %v6168_v46  ;;  %v6199_v57 = vmul.f32 0.015625, %v6171_v25 }
0x18c9   : > { %v13584_v60 = vsub.f32 %v6134_v44, %v6198_v62  ;;  %v13588_v40 = vsub.f32 %v6135_v39, %v6199_v57 }
0x18ca   : > { %v6174_v56 = vpop.xlane.xlu1 %6173  ;;  %v6177_v4 = vpop.xlane.xlu0 %6176 }
0x18cb   : > { %v6200_v14 = vmul.f32 0.015625, %v6174_v56  ;;  %v6201_v30 = vmul.f32 0.015625, %v6177_v4  ;;  %v6230_v7 = vmul.f32 %v13584_v60, %v13584_v60  ;;  %v6231_v13 = vmul.f32 %v13588_v40, %v13588_v40 }
0x18cd   : > { %v13596_v43 = vsub.f32 %v6136_v33, %v6200_v14  ;;  %v13600_v44 = vsub.f32 %v6137_v38, %v6201_v30  ;;  %v6262_v39 = vsel %vm237_vm1, %v6230_v7, 0.0  ;;  %v6265_v37 = vsel %vm237_vm1, %v6231_v13, 0.0 }
0x18ce   : > { %6263 = vadd.xlane.f32.xlu0 %v6262_v39  ;;  %6266 = vadd.xlane.f32.xlu1 %v6265_v37  ;;  %v14514_v37 = vld [vmem:[#allocation17_spill] sm:$0xff] }
0x18cf   : > { %v6232_v49 = vmul.f32 %v13596_v43, %v13596_v43  ;;  %v6233_v19 = vmul.f32 %v13600_v44, %v13600_v44 }
0x18d1   : > { %v6268_v31 = vsel %vm237_vm1, %v6232_v49, 0.0  ;;  %v6271_v33 = vsel %vm237_vm1, %v6233_v19, 0.0  ;;  %v14515_v49 = vld [vmem:[#allocation20_spill] sm:$0xff] }
0x18d2   : > { %6269 = vadd.xlane.f32.xlu0 %v6268_v31  ;;  %6272 = vadd.xlane.f32.xlu1 %v6271_v33  ;;  %v13643_v19 = vrot.slane %v14515_v49, %v14514_v37 }
0x18d6   : > { %v6180_v38 = vpop.xlane.xlu1 %6179  ;;  %v6183_v63 = vpop.xlane.xlu0 %6182 }
0x18d7   : > { %v6202_v61 = vmul.f32 0.015625, %v6180_v38  ;;  %v6203_v24 = vmul.f32 0.015625, %v6183_v63  ;;  %v14516_v38 = vld [vmem:[#allocation18_spill] sm:$0xff] }
0x18d8   : > { %v13648_v63 = vrot.slane %v13371_v20, %v14516_v38 }
0x18d9   : > { %v13612_v52 = vsub.f32 %v6138_v58, %v6202_v61  ;;  %v13616_v26 = vsub.f32 %v6139_v41, %v6203_v24 }
0x18da   : > { %v6186_v36 = vpop.xlane.xlu1 %6185  ;;  %v6189_v5 = vpop.xlane.xlu0 %6188 }
0x18db   : > { %v6204_v47 = vmul.f32 0.015625, %v6186_v36  ;;  %v6205_v21 = vmul.f32 0.015625, %v6189_v5  ;;  %v6234_v55 = vmul.f32 %v13612_v52, %v13612_v52  ;;  %v6235_v17 = vmul.f32 %v13616_v26, %v13616_v26 }
0x18dd   : > { %v13624_v50 = vsub.f32 %v6140_v8, %v6204_v47  ;;  %v13628_v58 = vsub.f32 %v6141_v12, %v6205_v21  ;;  %v6274_v41 = vsel %vm237_vm1, %v6234_v55, 0.0  ;;  %v6277_v48 = vsel %vm237_vm1, %v6235_v17, 0.0 }
0x18de   : > { %v5577_v3 = vpop.xlane.xlu1 %5576  ;;  %6275 = vadd.xlane.f32.xlu0 %v6274_v41  ;;  %6278 = vadd.xlane.f32.xlu1 %v6277_v48 }
0x18df   : > { %9758 = vrcp.f32 %v5577_v3  ;;  %v6236_v2 = vmul.f32 %v13624_v50, %v13624_v50  ;;  %v6237_v18 = vmul.f32 %v13628_v58, %v13628_v58 }
0x18e1   : > { %v6280_v8 = vsel %vm237_vm1, %v6236_v2, 0.0  ;;  %v6283_v51 = vsel %vm237_vm1, %v6237_v18, 0.0 }
0x18e2   : > { %6281 = vadd.xlane.f32.xlu0 %v6280_v8  ;;  %6284 = vadd.xlane.f32.xlu1 %v6283_v51 }
0x18e9   : > { %v9759_v12 = vpop.eup %9758 }
0x18ea   : > { %v5613_v27 = vmul.f32 %v9759_v12, %v13498_v11 }
0x18ec   : > { %v5623_v15 = vpack.c.bf16 %v5613_v27, %v5613_v27 }
0x18ee   : > { %8944 = vmatmul.mubr.msk.bf16.gmra.mrb[252].mxu0 %vm978_vm5, %v5623_v15 }
0x18ef   : > { %6516 = vmatprep.mubr.bf16.mxu0 %v14513_v0 }
0x1909   : > { %v6240_v29 = vpop.xlane.xlu0 %6239 }
0x190a   : > { %v6286_v46 = vmul.f32 0.015625, %v6240_v29 }
0x190c   : > { %v6302_v25 = vadd.f32 1e-06, %v6286_v46 }
0x190d   : > { %v6243_v62 = vpop.xlane.xlu1 %6242  ;;  %v6246_v57 = vpop.xlane.xlu0 %6245 }
0x190e   : > { %9760 = vrsqrt.f32 %v6302_v25  ;;  %v6287_v56 = vmul.f32 0.015625, %v6243_v62  ;;  %v6288_v4 = vmul.f32 0.015625, %v6246_v57 }
0x1910   : > { %v6303_v14 = vadd.f32 1e-06, %v6287_v56  ;;  %v6304_v30 = vadd.f32 1e-06, %v6288_v4 }
0x1911   : > { %v6249_v7 = vpop.xlane.xlu1 %6248 }
0x1912   : > { %9762 = vrsqrt.f32 %v6303_v14  ;;  %v6289_v13 = vmul.f32 0.015625, %v6249_v7 }
0x1913   : > { %9764 = vrsqrt.f32 %v6304_v30 }
0x1914   : > { %v6305_v11 = vadd.f32 1e-06, %v6289_v13 }
0x1916   : > { %9766 = vrsqrt.f32 %v6305_v11 }
0x1918   : > { %v9761_v39 = vpop.eup %9760 }
0x1919   : > { %v6334_v31 = vmul.f32 %v9761_v39, %v13508_v23 }
0x191b   : > { %v6354_v61 = vmul.f32 %v13643_v19, %v6334_v31 }
0x191c   : > { %v9763_v33 = vpop.eup %9762 }
0x191d   : > { %v6335_v24 = vmul.f32 %v9763_v33, %v13514_v6  ;;  %v9765_v36 = vpop.eup %9764  ;;  %v6374_v21 = vadd.f32 %v13648_v63, %v6354_v61 }
0x191e   : > { %v6336_v17 = vmul.f32 %v9765_v36, %v13504_v1 }
0x191f   : > { %v6355_v5 = vmul.f32 %v13643_v19, %v6335_v24 }
0x1920   : > { %v9767_v47 = vpop.eup %9766  ;;  %v6356_v48 = vmul.f32 %v13643_v19, %v6336_v17 }
0x1921   : > { %v6375_v55 = vadd.f32 %v13648_v63, %v6355_v5  ;;  %v6337_v23 = vmul.f32 %v9767_v47, %v13523_v22 }
0x1922   : > { %v6376_v1 = vadd.f32 %v13648_v63, %v6356_v48 }
0x1923   : > { %v6390_v41 = vpack.c.bf16 %v6375_v55, %v6374_v21  ;;  %v6357_v20 = vmul.f32 %v13643_v19, %v6337_v23 }
0x1925   : > { %v6255_v3 = vpop.xlane.xlu1 %6254  ;;  %7987 = vmatmul.mubr.msk.bf16.vlgmr.msra.gmra.mrb[0].mxu0 %vm237_vm1, %v6390_v41  ;;  %v6252_v6 = vpop.xlane.xlu0 %6251  ;;  %v6377_v8 = vadd.f32 %v13648_v63, %v6357_v20 }
0x1926   : > { %v6291_v2 = vmul.f32 0.015625, %v6255_v3  ;;  %v6290_v18 = vmul.f32 0.015625, %v6252_v6  ;;  %6526 = vmatprep.mubr.bf16.mxu0 %v14513_v0 }
0x1927   : > { %v6391_v46 = vpack.c.bf16 %v6377_v8, %v6376_v1 }
0x1928   : > { %v6307_v51 = vadd.f32 1e-06, %v6291_v2  ;;  %v6306_v12 = vadd.f32 1e-06, %v6290_v18 }
0x1929   : > { %v6261_v22 = vpop.xlane.xlu1 %6260  ;;  %v6258_v27 = vpop.xlane.xlu0 %6257 }
0x192a   : > { %9768 = vrsqrt.f32 %v6307_v51  ;;  %v6293_v15 = vmul.f32 0.015625, %v6261_v22  ;;  %v6292_v29 = vmul.f32 0.015625, %v6258_v27 }
0x192b   : > { %9770 = vrsqrt.f32 %v6306_v12 }
0x192c   : > { %v6309_v25 = vadd.f32 1e-06, %v6293_v15  ;;  %v6308_v62 = vadd.f32 1e-06, %v6292_v29 }
0x192d   : > { %7988 = vmatmul.mubr.msk.bf16.gmra.mrb[4].mxu0 %vm237_vm1, %v6391_v46 }
0x192e   : > { %9772 = vrsqrt.f32 %v6309_v25  ;;  %6536 = vmatprep.mubr.bf16.mxu0 %v14513_v0 }
0x192f   : > { %9774 = vrsqrt.f32 %v6308_v62 }
0x1934   : > { %v9769_v57 = vpop.eup %9768 }
0x1935   : > { %v9771_v56 = vpop.eup %9770  ;;  %v6339_v4 = vmul.f32 %v9769_v57, %v13536_v35 }
0x1936   : > { %v6338_v14 = vmul.f32 %v9771_v56, %v13532_v32 }
0x1937   : > { %v6359_v30 = vmul.f32 %v13643_v19, %v6339_v4 }
0x1938   : > { %v9773_v7 = vpop.eup %9772  ;;  %v6358_v13 = vmul.f32 %v13643_v19, %v6338_v14 }
0x1939   : > { %v9775_v11 = vpop.eup %9774  ;;  %v6379_v39 = vadd.f32 %v13648_v63, %v6359_v30  ;;  %v6341_v37 = vmul.f32 %v9773_v7, %v13548_v9 }
0x193a   : > { %v6378_v49 = vadd.f32 %v13648_v63, %v6358_v13  ;;  %v6340_v31 = vmul.f32 %v9775_v11, %v13544_v10 }
0x193b   : > { %v6361_v38 = vmul.f32 %v13643_v19, %v6341_v37 }
0x193c   : > { %v6392_v33 = vpack.c.bf16 %v6379_v39, %v6378_v49  ;;  %v6360_v35 = vmul.f32 %v13643_v19, %v6340_v31 }
0x193d   : > { %v6381_v32 = vadd.f32 %v13648_v63, %v6361_v38 }
0x193e   : > { %7989 = vmatmul.mubr.msk.bf16.gmra.mrb[8].mxu0 %vm237_vm1, %v6392_v33  ;;  %v6380_v61 = vadd.f32 %v13648_v63, %v6360_v35 }
0x193f   : > { %6546 = vmatprep.mubr.bf16.mxu0 %v14513_v0 }
0x1940   : > { %v6393_v24 = vpack.c.bf16 %v6381_v32, %v6380_v61 }
0x1946   : > { %7990 = vmatmul.mubr.msk.bf16.gmra.mrb[12].mxu0 %vm237_vm1, %v6393_v24 }
0x1947   : > { %6556 = vmatprep.mubr.bf16.mxu0 %v14513_v0 }
0x195b   : > { %v6267_v9 = vpop.xlane.xlu1 %6266  ;;  %v6264_v10 = vpop.xlane.xlu0 %6263 }
0x195c   : > { %v6295_v36 = vmul.f32 0.015625, %v6267_v9  ;;  %v6294_v5 = vmul.f32 0.015625, %v6264_v10  ;;  %v9288_v9 = vld [vmem:[%s14430_s20 + $0xc0] sm:$0xff]  }
0x195d   : > { %8345 = vmatprep.subr.bf16.mxu1 %v9288_v9 }
0x195e   : > { %v6311_v47 = vadd.f32 1e-06, %v6295_v36  ;;  %v6310_v21 = vadd.f32 1e-06, %v6294_v5 }
0x195f   : > { %v6273_v55 = vpop.xlane.xlu1 %6272  ;;  %v6270_v17 = vpop.xlane.xlu0 %6269 }
0x1960   : > { %9776 = vrsqrt.f32 %v6311_v47  ;;  %v6297_v23 = vmul.f32 0.015625, %v6273_v55  ;;  %v6296_v41 = vmul.f32 0.015625, %v6270_v17 }
0x1961   : > { %9778 = vrsqrt.f32 %v6310_v21 }
0x1962   : > { %v6313_v20 = vadd.f32 1e-06, %v6297_v23  ;;  %v6312_v48 = vadd.f32 1e-06, %v6296_v41  ;;  %v9290_v23 = vld [vmem:[%s14430_s20 + $0xc8] sm:$0xff]  }
0x1964   : > { %9780 = vrsqrt.f32 %v6313_v20  ;;  %v9293_v20 = vld [vmem:[%s14430_s20 + $0x90] sm:$0xff]  }
0x1965   : > { %9782 = vrsqrt.f32 %v6312_v48 }
0x196a   : > { %v9777_v3 = vpop.eup %9776 }
0x196b   : > { %v9779_v6 = vpop.eup %9778  ;;  %v6343_v2 = vmul.f32 %v9777_v3, %v13588_v40  ;;  %v6279_v18 = vpop.xlane.xlu1 %6278  ;;  %v9295_v3 = vld [vmem:[%s14430_s20 + $0x98] sm:$0xff]  }
0x196c   : > { %v6276_v8 = vpop.xlane.xlu0 %6275  ;;  %v6342_v51 = vmul.f32 %v9779_v6, %v13584_v60  ;;  %v6299_v12 = vmul.f32 0.015625, %v6279_v18  ;;  %v9297_v6 = vld [vmem:[%s14430_s20 + $0xa0] sm:$0xff]   ;;  %v9299_v18 = vld [vmem:[%s14430_s20 + $0xa8] sm:$0xff]  }
0x196d   : > { %v6298_v1 = vmul.f32 0.015625, %v6276_v8  ;;  %v6363_v22 = vmul.f32 %v13643_v19, %v6343_v2  ;;  %v9298_v2 = vld [vmem:[%s14430_s20 + $0xe8] sm:$0xff]   ;;  %v9300_v8 = vld [vmem:[%s14430_s20 + $0xf0] sm:$0xff]  }
0x196e   : > { %v9781_v27 = vpop.eup %9780  ;;  %v6362_v15 = vmul.f32 %v13643_v19, %v6342_v51  ;;  %v6315_v29 = vadd.f32 1e-06, %v6299_v12  ;;  %v9301_v51 = vld [vmem:[%s14430_s20 + $0xb0] sm:$0xff]   ;;  %v9302_v12 = vld [vmem:[%s14430_s20 + $0xf8] sm:$0xff]  }
0x196f   : > { %v6314_v46 = vadd.f32 1e-06, %v6298_v1  ;;  %v9783_v25 = vpop.eup %9782  ;;  %v6383_v62 = vadd.f32 %v13648_v63, %v6363_v22  ;;  %v6345_v57 = vmul.f32 %v9781_v27, %v13600_v44  ;;  %v6285_v56 = vpop.xlane.xlu1 %6284  ;;  %v9303_v1 = vld [vmem:[%s14430_s20 + $0xb8] sm:$0xff]  }
0x1970   : > { %v6282_v40 = vpop.xlane.xlu0 %6281  ;;  %v6382_v4 = vadd.f32 %v13648_v63, %v6362_v15  ;;  %v6344_v60 = vmul.f32 %v9783_v25, %v13596_v43  ;;  %9784 = vrsqrt.f32 %v6315_v29  ;;  %v6301_v14 = vmul.f32 0.015625, %v6285_v56  ;;  %v14517_v25 = vld [vmem:[#allocation16_spill] sm:$0xff] }
0x1971   : > { %9786 = vrsqrt.f32 %v6314_v46  ;;  %v6300_v30 = vmul.f32 0.015625, %v6282_v40  ;;  %v6365_v13 = vmul.f32 %v13643_v19, %v6345_v57  ;;  %v7978_v46 = vld [vmem:[%s14429_s19 + $0x2] sm:$0x3]  ;;  %v14518_v57 = vld [vmem:[#allocation15_spill] sm:$0xff] }
0x1972   : > { %v6394_v7 = vpack.c.bf16 %v6383_v62, %v6382_v4  ;;  %v6364_v11 = vmul.f32 %v13643_v19, %v6344_v60  ;;  %v6317_v39 = vadd.f32 1e-06, %v6301_v14  ;;  %v13764_v62 = vrot.slane %v7978_v46, %v14517_v25 }
0x1973   : > { %v6316_v37 = vadd.f32 1e-06, %v6300_v30  ;;  %v6385_v44 = vadd.f32 %v13648_v63, %v6365_v13  ;;  %v13767_v56 = vrot.slane %v7978_v46, %v14518_v57 }
0x1974   : > { %9788 = vrsqrt.f32 %v6317_v39  ;;  %7991 = vmatmul.mubr.msk.bf16.gmra.mrb[16].mxu0 %vm237_vm1, %v6394_v7  ;;  %v6384_v43 = vadd.f32 %v13648_v63, %v6364_v11 }
0x1975   : > { %9790 = vrsqrt.f32 %v6316_v37  ;;  %6566 = vmatprep.mubr.bf16.mxu0 %v14513_v0 }
0x1976   : > { %v6395_v31 = vpack.c.bf16 %v6385_v44, %v6384_v43 }
0x197a   : > { %v9785_v49 = vpop.eup %9784 }
0x197b   : > { %v9787_v33 = vpop.eup %9786  ;;  %v6347_v38 = vmul.f32 %v9785_v49, %v13616_v26 }
0x197c   : > { %v6346_v35 = vmul.f32 %v9787_v33, %v13612_v52  ;;  %7992 = vmatmul.mubr.msk.bf16.gmra.mrb[20].mxu0 %vm237_vm1, %v6395_v31  ;;  %v9289_v52 = vld [vmem:[%s14430_s20 + $0x80] sm:$0xff]  }
0x197d   : > { %v6367_v32 = vmul.f32 %v13643_v19, %v6347_v38  ;;  %6576 = vmatprep.mubr.bf16.mxu0 %v14513_v0  ;;  %8346 = vmatpush3.bf16.msra.mxu1 %v9289_v52 }
0x197e   : > { %v9789_v61 = vpop.eup %9788  ;;  %v6366_v24 = vmul.f32 %v13643_v19, %v6346_v35  ;;  %8347 = vmatprep.subr.bf16.mxu1 %v9290_v23 }
0x197f   : > { %v9791_v10 = vpop.eup %9790  ;;  %v6387_v36 = vadd.f32 %v13648_v63, %v6367_v32  ;;  %v6349_v26 = vmul.f32 %v9789_v61, %v13628_v58  ;;  %v9291_v58 = vld [vmem:[%s14430_s20 + $0x88] sm:$0xff]  }
0x1980   : > { %v6386_v5 = vadd.f32 %v13648_v63, %v6366_v24  ;;  %v6348_v47 = vmul.f32 %v9791_v10, %v13624_v50 }
0x1981   : > { %v6369_v55 = vmul.f32 %v13643_v19, %v6349_v26  ;;  %8348 = vmatpush3.bf16.msra.mxu1 %v9291_v58 }
0x1982   : > { %v6396_v21 = vpack.c.bf16 %v6387_v36, %v6386_v5  ;;  %v6368_v17 = vmul.f32 %v13643_v19, %v6348_v47  ;;  %v9292_v19 = vld [vmem:[%s14430_s20 + $0xd0] sm:$0xff]  }
0x1983   : > { %v6389_v50 = vadd.f32 %v13648_v63, %v6369_v55  ;;  %8349 = vmatprep.subr.bf16.mxu1 %v9292_v19 }
0x1984   : > { %7993 = vmatmul.mubr.msk.bf16.gmra.mrb[24].mxu0 %vm237_vm1, %v6396_v21  ;;  %v6388_v41 = vadd.f32 %v13648_v63, %v6368_v17  ;;  %v9296_v63 = vld [vmem:[%s14430_s20 + $0xe0] sm:$0xff]  }
0x1985   : > { %6586 = vmatprep.mubr.bf16.mxu0 %v14513_v0  ;;  %8350 = vmatpush3.bf16.msra.mxu1 %v9293_v20  ;;  %v9294_v0 = vld [vmem:[%s14430_s20 + $0xd8] sm:$0xff]  }
0x1986   : > { %v6397_v48 = vpack.c.bf16 %v6389_v50, %v6388_v41  ;;  %8351 = vmatprep.subr.bf16.mxu1 %v9294_v0 }
0x1989   : > { %8352 = vmatpush3.bf16.msra.mxu1 %v9295_v3 }
0x198a   : > { %8353 = vmatprep.subr.bf16.mxu1 %v9296_v63 }
0x198c   : > { %7994 = vmatmul.mubr.msk.bf16.gmra.mrb[28].mxu0 %vm237_vm1, %v6397_v48 }
0x198d   : > { %8354 = vmatpush3.bf16.msra.mxu1 %v9297_v6 }
0x198e   : > { %8355 = vmatprep.subr.bf16.mxu1 %v9298_v2 }
0x1991   : > { %8356 = vmatpush3.bf16.msra.mxu1 %v9299_v18 }
0x1992   : > { %8357 = vmatprep.subr.bf16.mxu1 %v9300_v8 }
0x1995   : > { %8358 = vmatpush3.bf16.msra.mxu1 %v9301_v51 }
0x1996   : > { %8359 = vmatprep.subr.bf16.mxu1 %v9302_v12 }
0x1999   : > { %8360 = vmatpush3.bf16.msra.mxu1 %v9303_v1 }
0x19c1   : > { %v5835_v22 = vpop.f32.mrb[252].mxu0 }
0x19c2   : > { %v8945_v27 = vpop.f32.mrb[253].mxu0 }
0x19c3   : > { %v5837_v15 = vpop.f32.mrb[254].mxu0 }
0x19c4   : > { %v8946_v29 = vpop.f32.mrb[255].mxu0 }
0x19f8   : > { %v6518_v40 = vpop.f32.mrb[0].mxu0 }
0x19f9   : > { %v13770_v4 = vadd.f32 %v6518_v40, %v13764_v62  ;;  %v6520_v60 = vpop.f32.mrb[1].mxu0 }
0x19fa   : > { %v13773_v14 = vadd.f32 %v6520_v60, %v13767_v56  ;;  %v6522_v30 = vpop.f32.mrb[2].mxu0 }
0x19fb   : > { %v6597_v7 = vmul.f32 %v13770_v4, %v13770_v4  ;;  %v13778_v13 = vadd.f32 %v6522_v30, %v13764_v62  ;;  %v6524_v11 = vpop.f32.mrb[3].mxu0 }
0x19fc   : > { %v6598_v39 = vmul.f32 %v13773_v14, %v13773_v14  ;;  %v13783_v37 = vadd.f32 %v6524_v11, %v13767_v56 }
0x19fd   : > { %v6629_v44 = vmul.f32 %v6597_v7, %v13770_v4  ;;  %v6599_v43 = vmul.f32 %v13778_v13, %v13778_v13 }
0x19fe   : > { %v6630_v49 = vmul.f32 %v6598_v39, %v13773_v14  ;;  %v6600_v31 = vmul.f32 %v13783_v37, %v13783_v37 }
0x19ff   : > { %v6661_v33 = vmul.f32 0.044715, %v6629_v44  ;;  %v6631_v38 = vmul.f32 %v6599_v43, %v13778_v13 }
0x1a00   : > { %v6662_v35 = vmul.f32 0.044715, %v6630_v49  ;;  %v6632_v32 = vmul.f32 %v6600_v31, %v13783_v37  ;;  %v6528_v61 = vpop.f32.mrb[4].mxu0 }
0x1a01   : > { %v6693_v24 = vadd.f32 %v6661_v33, %v13770_v4  ;;  %v6663_v9 = vmul.f32 0.044715, %v6631_v38  ;;  %v13795_v10 = vadd.f32 %v6528_v61, %v13764_v62  ;;  %v6530_v36 = vpop.f32.mrb[5].mxu0 }
0x1a02   : > { %v6694_v26 = vadd.f32 %v6662_v35, %v13773_v14  ;;  %v6664_v52 = vmul.f32 0.044715, %v6632_v32  ;;  %v13799_v5 = vadd.f32 %v6530_v36, %v13767_v56  ;;  %v6532_v47 = vpop.f32.mrb[6].mxu0 }
0x1a03   : > { %v6725_v21 = vmul.f32 0.7978846, %v6693_v24  ;;  %v6695_v55 = vadd.f32 %v6663_v9, %v13778_v13  ;;  %v6601_v17 = vmul.f32 %v13795_v10, %v13795_v10  ;;  %v13805_v23 = vadd.f32 %v6532_v47, %v13764_v62  ;;  %v6534_v58 = vpop.f32.mrb[7].mxu0 }
0x1a04   : > { %v6726_v50 = vmul.f32 0.7978846, %v6694_v26  ;;  %v6696_v41 = vadd.f32 %v6664_v52, %v13783_v37  ;;  %v6602_v19 = vmul.f32 %v13799_v5, %v13799_v5  ;;  %v13811_v20 = vadd.f32 %v6534_v58, %v13767_v56 }
0x1a05   : > { %9792 = vtanh.f32 %v6725_v21  ;;  %v6727_v48 = vmul.f32 0.7978846, %v6695_v55  ;;  %v6633_v0 = vmul.f32 %v6601_v17, %v13795_v10  ;;  %v6603_v3 = vmul.f32 %v13805_v23, %v13805_v23 }
0x1a06   : > { %9794 = vtanh.f32 %v6726_v50  ;;  %v6728_v63 = vmul.f32 0.7978846, %v6696_v41  ;;  %v6634_v6 = vmul.f32 %v6602_v19, %v13799_v5  ;;  %v6604_v2 = vmul.f32 %v13811_v20, %v13811_v20 }
0x1a07   : > { %9796 = vtanh.f32 %v6727_v48  ;;  %v6665_v18 = vmul.f32 0.044715, %v6633_v0  ;;  %v6635_v8 = vmul.f32 %v6603_v3, %v13805_v23 }
0x1a08   : > { %9798 = vtanh.f32 %v6728_v63  ;;  %v6666_v51 = vmul.f32 0.044715, %v6634_v6  ;;  %v6636_v12 = vmul.f32 %v6604_v2, %v13811_v20 }
0x1a09   : > { %v6697_v1 = vadd.f32 %v6665_v18, %v13795_v10  ;;  %v6667_v22 = vmul.f32 0.044715, %v6635_v8 }
0x1a0a   : > { %v6698_v27 = vadd.f32 %v6666_v51, %v13799_v5  ;;  %v6668_v15 = vmul.f32 0.044715, %v6636_v12 }
0x1a0b   : > { %v6729_v29 = vmul.f32 0.7978846, %v6697_v1  ;;  %v6699_v46 = vadd.f32 %v6667_v22, %v13805_v23 }
0x1a0c   : > { %v6730_v40 = vmul.f32 0.7978846, %v6698_v27  ;;  %v6700_v60 = vadd.f32 %v6668_v15, %v13811_v20 }
0x1a0d   : > { %9800 = vtanh.f32 %v6729_v29  ;;  %v6731_v30 = vmul.f32 0.7978846, %v6699_v46 }
0x1a0e   : > { %9802 = vtanh.f32 %v6730_v40  ;;  %v6732_v44 = vmul.f32 0.7978846, %v6700_v60 }
0x1a0f   : > { %v9793_v7 = vpop.eup %9792  ;;  %9804 = vtanh.f32 %v6731_v30 }
0x1a10   : > { %v9795_v11 = vpop.eup %9794  ;;  %v6789_v39 = vadd.f32 1.0, %v9793_v7  ;;  %9806 = vtanh.f32 %v6732_v44 }
0x1a11   : > { %v9797_v43 = vpop.eup %9796  ;;  %v6538_v49 = vpop.f32.mrb[8].mxu0  ;;  %v6790_v31 = vadd.f32 1.0, %v9795_v11 }
0x1a12   : > { %v9799_v33 = vpop.eup %9798  ;;  %v6821_v38 = vmul.f32 0.5, %v6789_v39  ;;  %v6791_v35 = vadd.f32 1.0, %v9797_v43  ;;  %v13826_v32 = vadd.f32 %v6538_v49, %v13764_v62  ;;  %v6540_v61 = vpop.f32.mrb[9].mxu0 }
0x1a13   : > { %v13829_v24 = vadd.f32 %v6540_v61, %v13767_v56  ;;  %v6542_v9 = vpop.f32.mrb[10].mxu0  ;;  %v6792_v36 = vadd.f32 1.0, %v9799_v33  ;;  %v6822_v26 = vmul.f32 0.5, %v6790_v31 }
0x1a14   : > { %v6823_v52 = vmul.f32 0.5, %v6791_v35  ;;  %v6605_v47 = vmul.f32 %v13826_v32, %v13826_v32  ;;  %v13834_v21 = vadd.f32 %v6542_v9, %v13764_v62  ;;  %v6544_v55 = vpop.f32.mrb[11].mxu0  ;;  %v6853_v41 = vmul.f32 %v6821_v38, %v13770_v4 }
0x1a15   : > { %v6606_v17 = vmul.f32 %v13829_v24, %v13829_v24  ;;  %v13839_v58 = vadd.f32 %v6544_v55, %v13767_v56  ;;  %v6824_v50 = vmul.f32 0.5, %v6792_v36  ;;  %v6854_v2 = vmul.f32 %v6822_v26, %v13773_v14 }
0x1a16   : > { %v6855_v19 = vmul.f32 %v6823_v52, %v13778_v13  ;;  %v6637_v48 = vmul.f32 %v6605_v47, %v13826_v32  ;;  %v6607_v0 = vmul.f32 %v13834_v21, %v13834_v21 }
0x1a17   : > { %v9801_v3 = vpop.eup %9800  ;;  %v6638_v63 = vmul.f32 %v6606_v17, %v13829_v24  ;;  %v6608_v6 = vmul.f32 %v13839_v58, %v13839_v58  ;;  %v6856_v18 = vmul.f32 %v6824_v50, %v13783_v37 }
0x1a18   : > { %v9803_v8 = vpop.eup %9802  ;;  %v6885_v51 = vpack.c.bf16 %v6855_v19, %v6853_v41  ;;  %v6793_v4 = vadd.f32 1.0, %v9801_v3  ;;  %v6669_v12 = vmul.f32 0.044715, %v6637_v48  ;;  %v6639_v13 = vmul.f32 %v6607_v0, %v13834_v21 }
0x1a19   : > { %v9805_v1 = vpop.eup %9804  ;;  %v6670_v22 = vmul.f32 0.044715, %v6638_v63  ;;  %v6640_v27 = vmul.f32 %v6608_v6, %v13839_v58  ;;  %v6548_v15 = vpop.f32.mrb[12].mxu0  ;;  %v6886_v29 = vpack.c.bf16 %v6856_v18, %v6854_v2  ;;  %v6794_v46 = vadd.f32 1.0, %v9803_v8 }
0x1a1a   : > { %v6825_v40 = vmul.f32 0.5, %v6793_v4  ;;  %v6795_v60 = vadd.f32 1.0, %v9805_v1  ;;  %v6701_v30 = vadd.f32 %v6669_v12, %v13826_v32  ;;  %v6671_v14 = vmul.f32 0.044715, %v6639_v13  ;;  %v6550_v7 = vpop.f32.mrb[13].mxu0  ;;  %v9807_v52 = vpop.eup %9806 }
0x1a1b   : > { %v6702_v37 = vadd.f32 %v6670_v22, %v13829_v24  ;;  %v6672_v11 = vmul.f32 0.044715, %v6640_v27  ;;  %v13856_v39 = vadd.f32 %v6548_v15, %v13764_v62  ;;  %v13859_v44 = vadd.f32 %v6550_v7, %v13767_v56  ;;  %v6552_v43 = vpop.f32.mrb[14].mxu0  ;;  %7070 = vmatprep.mubr.bf16.mxu1 %v6886_v29 }
0x1a1c   : > { %v6857_v49 = vmul.f32 %v6825_v40, %v13795_v10  ;;  %v6827_v31 = vmul.f32 0.5, %v6795_v60  ;;  %v6733_v33 = vmul.f32 0.7978846, %v6701_v30  ;;  %v6703_v38 = vadd.f32 %v6671_v14, %v13834_v21  ;;  %v6554_v35 = vpop.f32.mrb[15].mxu0  ;;  %7071 = vmatmul.mubr.bf16.vlgmr.msra.gmra.mrb[252].mxu1 %v6885_v51 }
0x1a1d   : > { %v6734_v61 = vmul.f32 0.7978846, %v6702_v37  ;;  %v6704_v9 = vadd.f32 %v6672_v11, %v13839_v58  ;;  %v6609_v36 = vmul.f32 %v13856_v39, %v13856_v39  ;;  %v6610_v26 = vmul.f32 %v13859_v44, %v13859_v44 }
0x1a1e   : > { %v6859_v47 = vmul.f32 %v6827_v31, %v13805_v23  ;;  %9808 = vtanh.f32 %v6733_v33  ;;  %v6735_v10 = vmul.f32 0.7978846, %v6703_v38  ;;  %v13870_v55 = vadd.f32 %v6552_v43, %v13764_v62 }
0x1a1f   : > { %9810 = vtanh.f32 %v6734_v61  ;;  %v6736_v17 = vmul.f32 0.7978846, %v6704_v9  ;;  %v6641_v50 = vmul.f32 %v6609_v36, %v13856_v39  ;;  %v6642_v41 = vmul.f32 %v6610_v26, %v13859_v44 }
0x1a20   : > { %v6887_v19 = vpack.c.bf16 %v6859_v47, %v6857_v49  ;;  %9812 = vtanh.f32 %v6735_v10  ;;  %v6611_v48 = vmul.f32 %v13870_v55, %v13870_v55  ;;  %v13877_v0 = vadd.f32 %v6554_v35, %v13767_v56 }
0x1a21   : > { %9814 = vtanh.f32 %v6736_v17  ;;  %v6673_v23 = vmul.f32 0.044715, %v6641_v50  ;;  %v6674_v3 = vmul.f32 0.044715, %v6642_v41  ;;  %v6796_v63 = vadd.f32 1.0, %v9807_v52 }
0x1a22   : > { %v6643_v6 = vmul.f32 %v6611_v48, %v13870_v55  ;;  %v6612_v2 = vmul.f32 %v13877_v0, %v13877_v0  ;;  %v6826_v18 = vmul.f32 0.5, %v6794_v46 }
0x1a23   : > { %v6705_v8 = vadd.f32 %v6673_v23, %v13856_v39  ;;  %v6706_v51 = vadd.f32 %v6674_v3, %v13859_v44  ;;  %v6828_v4 = vmul.f32 0.5, %v6796_v63 }
0x1a24   : > { %v6675_v12 = vmul.f32 0.044715, %v6643_v6  ;;  %v6644_v13 = vmul.f32 %v6612_v2, %v13877_v0  ;;  %v6858_v27 = vmul.f32 %v6826_v18, %v13799_v5 }
0x1a25   : > { %v6737_v1 = vmul.f32 0.7978846, %v6705_v8  ;;  %v6738_v22 = vmul.f32 0.7978846, %v6706_v51  ;;  %v6860_v15 = vmul.f32 %v6828_v4, %v13811_v20 }
0x1a26   : > { %v6707_v29 = vadd.f32 %v6675_v12, %v13870_v55  ;;  %v6676_v40 = vmul.f32 0.044715, %v6644_v13 }
0x1a27   : > { %9816 = vtanh.f32 %v6737_v1  ;;  %v6888_v60 = vpack.c.bf16 %v6860_v15, %v6858_v27 }
0x1a28   : > { %v9809_v46 = vpop.eup %9808  ;;  %9818 = vtanh.f32 %v6738_v22  ;;  %v6739_v30 = vmul.f32 0.7978846, %v6707_v29  ;;  %v6708_v14 = vadd.f32 %v6676_v40, %v13877_v0 }
0x1a29   : > { %v9811_v7 = vpop.eup %9810  ;;  %v6797_v37 = vadd.f32 1.0, %v9809_v46  ;;  %7078 = vmatprep.mubr.bf16.mxu1 %v6888_v60 }
0x1a2a   : > { %v9813_v11 = vpop.eup %9812  ;;  %9820 = vtanh.f32 %v6739_v30  ;;  %v6740_v43 = vmul.f32 0.7978846, %v6708_v14  ;;  %7079 = vmatmul.mubr.bf16.gmra.mrb[0].mxu1 %v6887_v19  ;;  %v6798_v5 = vadd.f32 1.0, %v9811_v7 }
0x1a2b   : > { %v9815_v49 = vpop.eup %9814  ;;  %v6829_v20 = vmul.f32 0.5, %v6797_v37  ;;  %v6799_v31 = vadd.f32 1.0, %v9813_v11 }
0x1a2c   : > { %9822 = vtanh.f32 %v6740_v43  ;;  %v6800_v33 = vadd.f32 1.0, %v9815_v49  ;;  %v6830_v38 = vmul.f32 0.5, %v6798_v5 }
0x1a2d   : > { %v6831_v35 = vmul.f32 0.5, %v6799_v31  ;;  %v6861_v9 = vmul.f32 %v6829_v20, %v13826_v32 }
0x1a2e   : > { %v6832_v61 = vmul.f32 0.5, %v6800_v33  ;;  %v6862_v26 = vmul.f32 %v6830_v38, %v13829_v24 }
0x1a2f   : > { %v6863_v36 = vmul.f32 %v6831_v35, %v13834_v21 }
0x1a30   : > { %v6864_v52 = vmul.f32 %v6832_v61, %v13839_v58 }
0x1a31   : > { %v9817_v47 = vpop.eup %9816  ;;  %v6889_v10 = vpack.c.bf16 %v6863_v36, %v6861_v9 }
0x1a32   : > { %v9819_v17 = vpop.eup %9818  ;;  %v6801_v50 = vadd.f32 1.0, %v9817_v47  ;;  %v6890_v41 = vpack.c.bf16 %v6864_v52, %v6862_v26 }
0x1a33   : > { %v6802_v19 = vadd.f32 1.0, %v9819_v17 }
0x1a34   : > { %v9821_v48 = vpop.eup %9820  ;;  %7086 = vmatprep.mubr.bf16.mxu1 %v6890_v41  ;;  %v6833_v23 = vmul.f32 0.5, %v6801_v50 }
0x1a35   : > { %v6803_v3 = vadd.f32 1.0, %v9821_v48  ;;  %7087 = vmatmul.mubr.bf16.gmra.mrb[4].mxu1 %v6889_v10  ;;  %v6834_v2 = vmul.f32 0.5, %v6802_v19 }
0x1a36   : > { %v9823_v63 = vpop.eup %9822  ;;  %v6865_v21 = vmul.f32 %v6833_v23, %v13856_v39 }
0x1a37   : > { %v6835_v6 = vmul.f32 0.5, %v6803_v3  ;;  %v6804_v32 = vadd.f32 1.0, %v9823_v63  ;;  %v6866_v8 = vmul.f32 %v6834_v2, %v13859_v44 }
0x1a39   : > { %v6867_v24 = vmul.f32 %v6835_v6, %v13870_v55  ;;  %v6836_v58 = vmul.f32 0.5, %v6804_v32 }
0x1a3b   : > { %v6891_v18 = vpack.c.bf16 %v6867_v24, %v6865_v21  ;;  %v6868_v51 = vmul.f32 %v6836_v58, %v13877_v0 }
0x1a3d   : > { %v6892_v4 = vpack.c.bf16 %v6868_v51, %v6866_v8 }
0x1a3f   : > { %7094 = vmatprep.mubr.bf16.mxu1 %v6892_v4 }
0x1a40   : > { %7095 = vmatmul.mubr.bf16.gmra.mrb[8].mxu1 %v6891_v18 }
0x1a47   : > { %v6558_v12 = vpop.f32.mrb[16].mxu0 }
0x1a48   : > { %v13898_v13 = vadd.f32 %v6558_v12, %v13764_v62  ;;  %v6560_v1 = vpop.f32.mrb[17].mxu0 }
0x1a49   : > { %v13901_v22 = vadd.f32 %v6560_v1, %v13767_v56  ;;  %v6562_v39 = vpop.f32.mrb[18].mxu0 }
0x1a4a   : > { %v6613_v55 = vmul.f32 %v13898_v13, %v13898_v13  ;;  %v13906_v27 = vadd.f32 %v6562_v39, %v13764_v62  ;;  %v6564_v44 = vpop.f32.mrb[19].mxu0 }
0x1a4b   : > { %v6614_v0 = vmul.f32 %v13901_v22, %v13901_v22  ;;  %v13911_v15 = vadd.f32 %v6564_v44, %v13767_v56 }
0x1a4c   : > { %v6645_v29 = vmul.f32 %v6613_v55, %v13898_v13  ;;  %v6615_v40 = vmul.f32 %v13906_v27, %v13906_v27 }
0x1a4d   : > { %v6646_v60 = vmul.f32 %v6614_v0, %v13901_v22  ;;  %v6616_v46 = vmul.f32 %v13911_v15, %v13911_v15 }
0x1a4e   : > { %v6677_v30 = vmul.f32 0.044715, %v6645_v29  ;;  %v6647_v14 = vmul.f32 %v6615_v40, %v13906_v27 }
0x1a4f   : > { %v6678_v7 = vmul.f32 0.044715, %v6646_v60  ;;  %v6648_v37 = vmul.f32 %v6616_v46, %v13911_v15  ;;  %v6568_v11 = vpop.f32.mrb[20].mxu0 }
0x1a50   : > { %v6709_v43 = vadd.f32 %v6677_v30, %v13898_v13  ;;  %v6679_v5 = vmul.f32 0.044715, %v6647_v14  ;;  %v13923_v49 = vadd.f32 %v6568_v11, %v13764_v62  ;;  %v6570_v20 = vpop.f32.mrb[21].mxu0 }
0x1a51   : > { %v6710_v31 = vadd.f32 %v6678_v7, %v13901_v22  ;;  %v6680_v33 = vmul.f32 0.044715, %v6648_v37  ;;  %v13927_v38 = vadd.f32 %v6570_v20, %v13767_v56  ;;  %v6572_v35 = vpop.f32.mrb[22].mxu0 }
0x1a52   : > { %v6741_v61 = vmul.f32 0.7978846, %v6709_v43  ;;  %v6711_v9 = vadd.f32 %v6679_v5, %v13906_v27  ;;  %v6617_v36 = vmul.f32 %v13923_v49, %v13923_v49  ;;  %v13933_v26 = vadd.f32 %v6572_v35, %v13764_v62  ;;  %v6574_v52 = vpop.f32.mrb[23].mxu0 }
0x1a53   : > { %v6742_v47 = vmul.f32 0.7978846, %v6710_v31  ;;  %v6712_v10 = vadd.f32 %v6680_v33, %v13911_v15  ;;  %v6618_v17 = vmul.f32 %v13927_v38, %v13927_v38  ;;  %v13939_v50 = vadd.f32 %v6574_v52, %v13767_v56 }
0x1a54   : > { %9824 = vtanh.f32 %v6741_v61  ;;  %v6743_v41 = vmul.f32 0.7978846, %v6711_v9  ;;  %v6649_v19 = vmul.f32 %v6617_v36, %v13923_v49  ;;  %v6619_v48 = vmul.f32 %v13933_v26, %v13933_v26 }
0x1a55   : > { %9826 = vtanh.f32 %v6742_v47  ;;  %v6744_v23 = vmul.f32 0.7978846, %v6712_v10  ;;  %v6650_v3 = vmul.f32 %v6618_v17, %v13927_v38  ;;  %v6620_v63 = vmul.f32 %v13939_v50, %v13939_v50 }
0x1a56   : > { %9828 = vtanh.f32 %v6743_v41  ;;  %v6681_v6 = vmul.f32 0.044715, %v6649_v19  ;;  %v6651_v32 = vmul.f32 %v6619_v48, %v13933_v26 }
0x1a57   : > { %v6682_v2 = vmul.f32 0.044715, %v6650_v3  ;;  %v6652_v21 = vmul.f32 %v6620_v63, %v13939_v50  ;;  %v6578_v24 = vpop.f32.mrb[24].mxu0  ;;  %9830 = vtanh.f32 %v6744_v23 }
0x1a58   : > { %v6713_v58 = vadd.f32 %v6681_v6, %v13923_v49  ;;  %v6683_v18 = vmul.f32 0.044715, %v6651_v32  ;;  %v13951_v8 = vadd.f32 %v6578_v24, %v13764_v62  ;;  %v6580_v51 = vpop.f32.mrb[25].mxu0 }
0x1a59   : > { %v6714_v4 = vadd.f32 %v6682_v2, %v13927_v38  ;;  %v6684_v12 = vmul.f32 0.044715, %v6652_v21  ;;  %v13955_v1 = vadd.f32 %v6580_v51, %v13767_v56  ;;  %v6582_v39 = vpop.f32.mrb[26].mxu0 }
0x1a5a   : > { %v6745_v55 = vmul.f32 0.7978846, %v6713_v58  ;;  %v6715_v44 = vadd.f32 %v6683_v18, %v13933_v26  ;;  %v6621_v0 = vmul.f32 %v13951_v8, %v13951_v8  ;;  %v13961_v29 = vadd.f32 %v6582_v39, %v13764_v62  ;;  %v6584_v40 = vpop.f32.mrb[27].mxu0 }
0x1a5b   : > { %v6746_v60 = vmul.f32 0.7978846, %v6714_v4  ;;  %v6716_v46 = vadd.f32 %v6684_v12, %v13939_v50  ;;  %v6622_v30 = vmul.f32 %v13955_v1, %v13955_v1  ;;  %v13967_v14 = vadd.f32 %v6584_v40, %v13767_v56 }
0x1a5c   : > { %9832 = vtanh.f32 %v6745_v55  ;;  %v6747_v7 = vmul.f32 0.7978846, %v6715_v44  ;;  %v6653_v37 = vmul.f32 %v6621_v0, %v13951_v8  ;;  %v6623_v11 = vmul.f32 %v13961_v29, %v13961_v29 }
0x1a5d   : > { %9834 = vtanh.f32 %v6746_v60  ;;  %v6748_v43 = vmul.f32 0.7978846, %v6716_v46  ;;  %v6654_v5 = vmul.f32 %v6622_v30, %v13955_v1  ;;  %v6624_v20 = vmul.f32 %v13967_v14, %v13967_v14 }
0x1a5e   : > { %v9825_v31 = vpop.eup %9824  ;;  %9836 = vtanh.f32 %v6747_v7  ;;  %v6685_v33 = vmul.f32 0.044715, %v6653_v37  ;;  %v6655_v35 = vmul.f32 %v6623_v11, %v13961_v29 }
0x1a5f   : > { %v9827_v61 = vpop.eup %9826  ;;  %v6805_v9 = vadd.f32 1.0, %v9825_v31  ;;  %9838 = vtanh.f32 %v6748_v43  ;;  %v6686_v36 = vmul.f32 0.044715, %v6654_v5  ;;  %v6656_v52 = vmul.f32 %v6624_v20, %v13967_v14  ;;  %v6588_v47 = vpop.f32.mrb[28].mxu0 }
0x1a60   : > { %v9829_v10 = vpop.eup %9828  ;;  %v6717_v17 = vadd.f32 %v6685_v33, %v13951_v8  ;;  %v6687_v41 = vmul.f32 0.044715, %v6655_v35  ;;  %v13979_v19 = vadd.f32 %v6588_v47, %v13764_v62  ;;  %v6590_v48 = vpop.f32.mrb[29].mxu0  ;;  %v6806_v23 = vadd.f32 1.0, %v9827_v61 }
0x1a61   : > { %v6837_v3 = vmul.f32 0.5, %v6805_v9  ;;  %v6807_v63 = vadd.f32 1.0, %v9829_v10  ;;  %v6718_v6 = vadd.f32 %v6686_v36, %v13955_v1  ;;  %v6688_v32 = vmul.f32 0.044715, %v6656_v52  ;;  %v6592_v2 = vpop.f32.mrb[30].mxu0  ;;  %v9831_v4 = vpop.eup %9830 }
0x1a62   : > { %v6749_v21 = vmul.f32 0.7978846, %v6717_v17  ;;  %v6719_v24 = vadd.f32 %v6687_v41, %v13961_v29  ;;  %v6625_v58 = vmul.f32 %v13979_v19, %v13979_v19  ;;  %v13986_v18 = vadd.f32 %v6590_v48, %v13767_v56  ;;  %v6594_v51 = vpop.f32.mrb[31].mxu0 }
0x1a63   : > { %v13989_v12 = vmul.f32 %v6837_v3, %v13898_v13  ;;  %v6839_v39 = vmul.f32 0.5, %v6807_v63  ;;  %v6750_v55 = vmul.f32 0.7978846, %v6718_v6  ;;  %v6720_v44 = vadd.f32 %v6688_v32, %v13967_v14 }
0x1a64   : > { %9840 = vtanh.f32 %v6749_v21  ;;  %v6751_v0 = vmul.f32 0.7978846, %v6719_v24  ;;  %v6657_v40 = vmul.f32 %v6625_v58, %v13979_v19  ;;  %v6626_v60 = vmul.f32 %v13986_v18, %v13986_v18 }
0x1a65   : > { %v6871_v46 = vmul.f32 %v6839_v39, %v13906_v27  ;;  %9842 = vtanh.f32 %v6750_v55  ;;  %v6752_v30 = vmul.f32 0.7978846, %v6720_v44  ;;  %v13997_v7 = vadd.f32 %v6592_v2, %v13764_v62 }
0x1a66   : > { %v9833_v13 = vpop.eup %9832  ;;  %9844 = vtanh.f32 %v6751_v0  ;;  %v6689_v37 = vmul.f32 0.044715, %v6657_v40  ;;  %v6658_v11 = vmul.f32 %v6626_v60, %v13986_v18  ;;  %v14001_v43 = vadd.f32 %v6594_v51, %v13767_v56 }
0x1a67   : > { %v9835_v5 = vpop.eup %9834  ;;  %v6893_v20 = vpack.c.bf16 %v6871_v46, %v13989_v12  ;;  %v6809_v31 = vadd.f32 1.0, %v9833_v13  ;;  %9846 = vtanh.f32 %v6752_v30  ;;  %v6627_v27 = vmul.f32 %v13997_v7, %v13997_v7 }
0x1a68   : > { %v9837_v33 = vpop.eup %9836  ;;  %v6721_v62 = vadd.f32 %v6689_v37, %v13979_v19  ;;  %v6690_v35 = vmul.f32 0.044715, %v6658_v11  ;;  %v6628_v61 = vmul.f32 %v14001_v43, %v14001_v43  ;;  %v6808_v9 = vadd.f32 1.0, %v9831_v4 }
0x1a69   : > { %v9839_v36 = vpop.eup %9838  ;;  %v6841_v52 = vmul.f32 0.5, %v6809_v31  ;;  %v6811_v56 = vadd.f32 1.0, %v9837_v33  ;;  %v6659_v47 = vmul.f32 %v6627_v27, %v13997_v7  ;;  %v6838_v10 = vmul.f32 0.5, %v6806_v23 }
0x1a6a   : > { %v6753_v17 = vmul.f32 0.7978846, %v6721_v62  ;;  %v6722_v41 = vadd.f32 %v6690_v35, %v13986_v18  ;;  %v6660_v48 = vmul.f32 %v6628_v61, %v14001_v43  ;;  %v6840_v3 = vmul.f32 0.5, %v6808_v9 }
0x1a6b   : > { %v6873_v63 = vmul.f32 %v6841_v52, %v13923_v49  ;;  %v6843_v6 = vmul.f32 0.5, %v6811_v56  ;;  %v6691_v32 = vmul.f32 0.044715, %v6659_v47  ;;  %v6870_v2 = vmul.f32 %v6838_v10, %v13901_v22 }
0x1a6c   : > { %9848 = vtanh.f32 %v6753_v17  ;;  %v6754_v21 = vmul.f32 0.7978846, %v6722_v41  ;;  %v6692_v24 = vmul.f32 0.044715, %v6660_v48  ;;  %v6872_v58 = vmul.f32 %v6840_v3, %v13911_v15 }
0x1a6d   : > { %v6875_v51 = vmul.f32 %v6843_v6, %v13933_v26  ;;  %v6723_v23 = vadd.f32 %v6691_v32, %v13997_v7  ;;  %v6810_v4 = vadd.f32 1.0, %v9835_v5  ;;  %v6812_v12 = vadd.f32 1.0, %v9839_v36 }
0x1a6e   : > { %v9841_v39 = vpop.eup %9840  ;;  %9850 = vtanh.f32 %v6754_v21  ;;  %v6724_v55 = vadd.f32 %v6692_v24, %v14001_v43  ;;  %v6894_v49 = vpack.c.bf16 %v6872_v58, %v6870_v2 }
0x1a6f   : > { %v9843_v44 = vpop.eup %9842  ;;  %v6895_v0 = vpack.c.bf16 %v6875_v51, %v6873_v63  ;;  %v6813_v40 = vadd.f32 1.0, %v9841_v39  ;;  %v6755_v22 = vmul.f32 0.7978846, %v6723_v23  ;;  %v6842_v60 = vmul.f32 0.5, %v6810_v4  ;;  %v14031_v23 = vld [vmem:[%s14431_s21 + $0x1] ss:$0 sm:$0xff] }
0x1a70   : > { %v9845_v46 = vpop.eup %9844  ;;  %v6756_v30 = vmul.f32 0.7978846, %v6724_v55  ;;  %7102 = vmatprep.mubr.bf16.mxu1 %v6894_v49  ;;  %v6844_v15 = vmul.f32 0.5, %v6812_v12  ;;  %v6814_v13 = vadd.f32 1.0, %v9843_v44  ;;  %v14519_v55 = vld [vmem:[#allocation19_spill] sm:$0xff] }
0x1a71   : > { %v9847_v26 = vpop.eup %9846  ;;  %v6845_v37 = vmul.f32 0.5, %v6813_v40  ;;  %v6815_v11 = vadd.f32 1.0, %v9845_v46  ;;  %9852 = vtanh.f32 %v6755_v22  ;;  %7103 = vmatmul.mubr.bf16.gmra.mrb[12].mxu1 %v6893_v20  ;;  %v6874_v5 = vmul.f32 %v6842_v60, %v13927_v38 }
0x1a72   : > { %9854 = vtanh.f32 %v6756_v30  ;;  %v6876_v31 = vmul.f32 %v6844_v15, %v13939_v50  ;;  %v6816_v27 = vadd.f32 1.0, %v9847_v26  ;;  %v6846_v33 = vmul.f32 0.5, %v6814_v13 }
0x1a73   : > { %v6847_v62 = vmul.f32 0.5, %v6815_v11  ;;  %v6877_v9 = vmul.f32 %v6845_v37, %v13951_v8 }
0x1a74   : > { %v6896_v35 = vpack.c.bf16 %v6876_v31, %v6874_v5  ;;  %v6848_v61 = vmul.f32 0.5, %v6816_v27  ;;  %v6878_v56 = vmul.f32 %v6846_v33, %v13955_v1 }
0x1a75   : > { %v6879_v36 = vmul.f32 %v6847_v62, %v13961_v29 }
0x1a76   : > { %v9849_v52 = vpop.eup %9848  ;;  %7110 = vmatprep.mubr.bf16.mxu1 %v6896_v35  ;;  %v6880_v20 = vmul.f32 %v6848_v61, %v13967_v14 }
0x1a77   : > { %v6897_v47 = vpack.c.bf16 %v6879_v36, %v6877_v9  ;;  %v6817_v10 = vadd.f32 1.0, %v9849_v52 }
0x1a78   : > { %v9851_v38 = vpop.eup %9850  ;;  %v6898_v17 = vpack.c.bf16 %v6880_v20, %v6878_v56 }
0x1a79   : > { %7111 = vmatmul.mubr.bf16.gmra.mrb[16].mxu1 %v6895_v0  ;;  %v6818_v50 = vadd.f32 1.0, %v9851_v38  ;;  %v6849_v3 = vmul.f32 0.5, %v6817_v10 }
0x1a7a   : > { %7118 = vmatprep.mubr.bf16.mxu1 %v6898_v17 }
0x1a7b   : > { %v9853_v41 = vpop.eup %9852  ;;  %v6850_v6 = vmul.f32 0.5, %v6818_v50  ;;  %v6881_v1 = vmul.f32 %v6849_v3, %v13979_v19 }
0x1a7c   : > { %v9855_v48 = vpop.eup %9854  ;;  %v6819_v63 = vadd.f32 1.0, %v9853_v41 }
0x1a7d   : > { %v6820_v8 = vadd.f32 1.0, %v9855_v48  ;;  %v6882_v2 = vmul.f32 %v6850_v6, %v13986_v18 }
0x1a7e   : > { %v6851_v29 = vmul.f32 0.5, %v6819_v63 }
0x1a7f   : > { %v6852_v32 = vmul.f32 0.5, %v6820_v8 }
0x1a80   : > { %v6883_v14 = vmul.f32 %v6851_v29, %v13997_v7  ;;  %v9893_v7 = vld [vmem:[%s10356_s7 + $0x8] sm:$0x3f]  ;;  %s7171_s7 = scalar_lea.vmem %s14521_s30, %s7710_s4 }
0x1a81   : > { %7119 = vmatmul.mubr.bf16.gmra.mrb[20].mxu1 %v6897_v47  ;;  %v6884_v21 = vmul.f32 %v6852_v32, %v14001_v43  ;;  %v14035_v49 = vrot.slane %v9893_v7, %v14519_v55 }
0x1a82   : > { %v6899_v24 = vpack.c.bf16 %v6883_v14, %v6881_v1 }
0x1a83   : > { %v6900_v58 = vpack.c.bf16 %v6884_v21, %v6882_v2 }
0x1a85   : > { %7126 = vmatprep.mubr.bf16.mxu1 %v6900_v58 }
0x1a89   : > { %7127 = vmatmul.mubr.bf16.gmra.mrb[24].mxu1 %v6899_v24 }
0x1aef   : > { %v8361_v51 = vpop.f32.mrb[252].mxu1 }
0x1af0   : > { %v8362_v4 = vpop.f32.mrb[253].mxu1 }
0x1af1   : > { %v8363_v12 = vadd.f32 %v8362_v4, %v8361_v51  ;;  %v8364_v19 = vpop.f32.mrb[254].mxu1 }
0x1af2   : > { %v8365_v39 = vpop.f32.mrb[255].mxu1 }
0x1af3   : > { %v7073_v18 = vadd.f32 %v8363_v12, %v14031_v23  ;;  %v8366_v43 = vadd.f32 %v8365_v39, %v8364_v19 }
0x1af5   : > { %v7076_v44 = vadd.f32 %v8366_v43, %v14031_v23  ;;  %v7139_v0 = vmul.f32 %v14035_v49, %v7073_v18 }
0x1af7   : > { %v7140_v40 = vmul.f32 %v14035_v49, %v7076_v44 }
0x1af9   : > { %v7155_v22 = vpack.c.bf16 %v7140_v40, %v7139_v0 }
0x1afb   : > { %v14042_v60 = vadd.bf16 %v7155_v22, %v13389_v28 }
0x1afd   : > { %v8367_v46 = vpop.f32.mrb[0].mxu1  ;;  %v7174_v30 = vunpack.c.h.bf16 %v14042_v60  ;;  %v7173_v15 = vunpack.c.l.bf16 %v14042_v60 }
0x1afe   : > { %v8368_v13 = vpop.f32.mrb[1].mxu1 }
0x1aff   : > { %v8369_v26 = vadd.f32 %v8368_v13, %v8367_v46  ;;  %v8370_v37 = vpop.f32.mrb[2].mxu1  ;;  %v7192_v11 = vsel %vm237_vm1, %v7174_v30, 0.0  ;;  %v7189_v5 = vsel %vm237_vm1, %v7173_v15, 0.0 }
0x1b00   : > { %v8371_v31 = vpop.f32.mrb[3].mxu1  ;;  %7193 = vadd.xlane.f32.xlu1 %v7192_v11  ;;  %7190 = vadd.xlane.f32.xlu0 %v7189_v5 }
0x1b01   : > { %v7081_v28 = vadd.f32 %v8369_v26, %v14031_v23  ;;  %v8372_v27 = vadd.f32 %v8371_v31, %v8370_v37 }
0x1b03   : > { %v7084_v33 = vadd.f32 %v8372_v27, %v14031_v23  ;;  %v7141_v62 = vmul.f32 %v14035_v49, %v7081_v28 }
0x1b05   : > { %v7142_v35 = vmul.f32 %v14035_v49, %v7084_v33 }
0x1b07   : > { %v7156_v61 = vpack.c.bf16 %v7142_v35, %v7141_v62 }
0x1b08   : > { %v8373_v9 = vpop.f32.mrb[4].mxu1 }
0x1b09   : > { %v14057_v36 = vadd.bf16 %v7156_v61, %v13386_v59  ;;  %v8374_v52 = vpop.f32.mrb[5].mxu1 }
0x1b0a   : > { %v8375_v56 = vadd.f32 %v8374_v52, %v8373_v9  ;;  %v8376_v20 = vpop.f32.mrb[6].mxu1 }
0x1b0b   : > { %v7176_v47 = vunpack.c.h.bf16 %v14057_v36  ;;  %v7175_v38 = vunpack.c.l.bf16 %v14057_v36  ;;  %v8377_v10 = vpop.f32.mrb[7].mxu1 }
0x1b0c   : > { %v7089_v17 = vadd.f32 %v8375_v56, %v14031_v23  ;;  %v8378_v50 = vadd.f32 %v8377_v10, %v8376_v20 }
0x1b0d   : > { %v7198_v41 = vsel %vm237_vm1, %v7176_v47, 0.0  ;;  %v7195_v59 = vsel %vm237_vm1, %v7175_v38, 0.0 }
0x1b0e   : > { %7199 = vadd.xlane.f32.xlu1 %v7198_v41  ;;  %7196 = vadd.xlane.f32.xlu0 %v7195_v59  ;;  %v7092_v48 = vadd.f32 %v8378_v50, %v14031_v23  ;;  %v7143_v3 = vmul.f32 %v14035_v49, %v7089_v17 }
0x1b10   : > { %v7144_v63 = vmul.f32 %v14035_v49, %v7092_v48 }
0x1b12   : > { %v7157_v8 = vpack.c.bf16 %v7144_v63, %v7143_v3 }
0x1b13   : > { %v8379_v6 = vpop.f32.mrb[8].mxu1 }
0x1b14   : > { %v8380_v29 = vpop.f32.mrb[9].mxu1  ;;  %v14072_v32 = vadd.bf16 %v7157_v8, %v13419_v54 }
0x1b15   : > { %v8381_v1 = vadd.f32 %v8380_v29, %v8379_v6  ;;  %v8382_v14 = vpop.f32.mrb[10].mxu1 }
0x1b16   : > { %v8383_v2 = vpop.f32.mrb[11].mxu1  ;;  %v7178_v21 = vunpack.c.h.bf16 %v14072_v32  ;;  %v7177_v24 = vunpack.c.l.bf16 %v14072_v32 }
0x1b17   : > { %v7097_v58 = vadd.f32 %v8381_v1, %v14031_v23  ;;  %v8384_v51 = vadd.f32 %v8383_v2, %v8382_v14 }
0x1b18   : > { %v7204_v4 = vsel %vm237_vm1, %v7178_v21, 0.0  ;;  %v7201_v12 = vsel %vm237_vm1, %v7177_v24, 0.0 }
0x1b19   : > { %v7100_v54 = vadd.f32 %v8384_v51, %v14031_v23  ;;  %7205 = vadd.xlane.f32.xlu1 %v7204_v4  ;;  %7202 = vadd.xlane.f32.xlu0 %v7201_v12  ;;  %v7145_v19 = vmul.f32 %v14035_v49, %v7097_v58 }
0x1b1b   : > { %v7146_v39 = vmul.f32 %v14035_v49, %v7100_v54 }
0x1b1d   : > { %v7158_v7 = vpack.c.bf16 %v7146_v39, %v7145_v19 }
0x1b1f   : > { %v14087_v55 = vadd.bf16 %v7158_v7, %v13416_v16 }
0x1b21   : > { %v7180_v18 = vunpack.c.h.bf16 %v14087_v55  ;;  %v7179_v43 = vunpack.c.l.bf16 %v14087_v55  ;;  %v9305_v55 = vld [vmem:[%s14520_s10 + $0x8] sm:$0xff]  }
0x1b23   : > { %v7210_v44 = vsel %vm237_vm1, %v7180_v18, 0.0  ;;  %v7207_v0 = vsel %vm237_vm1, %v7179_v43, 0.0 }
0x1b24   : > { %7211 = vadd.xlane.f32.xlu1 %v7210_v44  ;;  %7208 = vadd.xlane.f32.xlu0 %v7207_v0 }
0x1b44   : > { %v8385_v40 = vpop.f32.mrb[12].mxu1 }
0x1b45   : > { %v8386_v22 = vpop.f32.mrb[13].mxu1 }
0x1b46   : > { %v8387_v46 = vadd.f32 %v8386_v22, %v8385_v40  ;;  %v8388_v13 = vpop.f32.mrb[14].mxu1 }
0x1b47   : > { %v8389_v16 = vpop.f32.mrb[15].mxu1 }
0x1b48   : > { %v7105_v26 = vadd.f32 %v8387_v46, %v14031_v23  ;;  %v8390_v37 = vadd.f32 %v8389_v16, %v8388_v13 }
0x1b4a   : > { %v7108_v11 = vadd.f32 %v8390_v37, %v14031_v23  ;;  %v7147_v5 = vmul.f32 %v14035_v49, %v7105_v26 }
0x1b4c   : > { %v7148_v31 = vmul.f32 %v14035_v49, %v7108_v11  ;;  %v8391_v28 = vpop.f32.mrb[16].mxu1 }
0x1b4d   : > { %v8392_v27 = vpop.f32.mrb[17].mxu1 }
0x1b4e   : > { %v7159_v33 = vpack.c.bf16 %v7148_v31, %v7147_v5  ;;  %v8393_v62 = vadd.f32 %v8392_v27, %v8391_v28  ;;  %v8394_v35 = vpop.f32.mrb[18].mxu1 }
0x1b4f   : > { %v8395_v61 = vpop.f32.mrb[19].mxu1 }
0x1b50   : > { %v7113_v9 = vadd.f32 %v8393_v62, %v14031_v23  ;;  %v8396_v52 = vadd.f32 %v8395_v61, %v8394_v35  ;;  %v14103_v56 = vadd.bf16 %v7159_v33, %v13449_v53 }
0x1b52   : > { %v7116_v20 = vadd.f32 %v8396_v52, %v14031_v23  ;;  %v7182_v10 = vunpack.c.h.bf16 %v14103_v56  ;;  %v7181_v17 = vunpack.c.l.bf16 %v14103_v56  ;;  %v7149_v50 = vmul.f32 %v14035_v49, %v7113_v9 }
0x1b54   : > { %v7150_v41 = vmul.f32 %v14035_v49, %v7116_v20  ;;  %v8397_v59 = vpop.f32.mrb[20].mxu1  ;;  %v7216_v48 = vsel %vm237_vm1, %v7182_v10, 0.0  ;;  %v7213_v53 = vsel %vm237_vm1, %v7181_v17, 0.0 }
0x1b55   : > { %7217 = vadd.xlane.f32.xlu1 %v7216_v48  ;;  %7214 = vadd.xlane.f32.xlu0 %v7213_v53  ;;  %v8398_v3 = vpop.f32.mrb[21].mxu1 }
0x1b56   : > { %v7160_v63 = vpack.c.bf16 %v7150_v41, %v7149_v50  ;;  %v8399_v8 = vadd.f32 %v8398_v3, %v8397_v59  ;;  %v8400_v6 = vpop.f32.mrb[22].mxu1 }
0x1b57   : > { %v8401_v29 = vpop.f32.mrb[23].mxu1 }
0x1b58   : > { %v7121_v1 = vadd.f32 %v8399_v8, %v14031_v23  ;;  %v8402_v14 = vadd.f32 %v8401_v29, %v8400_v6  ;;  %v14118_v2 = vadd.bf16 %v7160_v63, %v13446_v45 }
0x1b5a   : > { %v7124_v58 = vadd.f32 %v8402_v14, %v14031_v23  ;;  %v7184_v51 = vunpack.c.h.bf16 %v14118_v2  ;;  %v7183_v4 = vunpack.c.l.bf16 %v14118_v2  ;;  %v7151_v12 = vmul.f32 %v14035_v49, %v7121_v1 }
0x1b5c   : > { %v7152_v54 = vmul.f32 %v14035_v49, %v7124_v58  ;;  %v8403_v19 = vpop.f32.mrb[24].mxu1  ;;  %v7222_v39 = vsel %vm237_vm1, %v7184_v51, 0.0  ;;  %v7219_v45 = vsel %vm237_vm1, %v7183_v4, 0.0 }
0x1b5d   : > { %7223 = vadd.xlane.f32.xlu1 %v7222_v39  ;;  %7220 = vadd.xlane.f32.xlu0 %v7219_v45  ;;  %v8404_v7 = vpop.f32.mrb[25].mxu1 }
0x1b5e   : > { %v7161_v44 = vpack.c.bf16 %v7152_v54, %v7151_v12  ;;  %v8405_v0 = vadd.f32 %v8404_v7, %v8403_v19  ;;  %v8406_v40 = vpop.f32.mrb[26].mxu1 }
0x1b5f   : > { %v8407_v22 = vpop.f32.mrb[27].mxu1 }
0x1b60   : > { %v7129_v46 = vadd.f32 %v8405_v0, %v14031_v23  ;;  %v8408_v13 = vadd.f32 %v8407_v22, %v8406_v40  ;;  %v14133_v16 = vadd.bf16 %v7161_v44, %v13480_v42 }
0x1b62   : > { %v7132_v26 = vadd.f32 %v8408_v13, %v14031_v23  ;;  %v7186_v37 = vunpack.c.h.bf16 %v14133_v16  ;;  %v7185_v11 = vunpack.c.l.bf16 %v14133_v16  ;;  %v7153_v5 = vmul.f32 %v14035_v49, %v7129_v46 }
0x1b64   : > { %v7154_v31 = vmul.f32 %v14035_v49, %v7132_v26  ;;  %v7228_v28 = vsel %vm237_vm1, %v7186_v37, 0.0  ;;  %v7225_v27 = vsel %vm237_vm1, %v7185_v11, 0.0 }
0x1b65   : > { %7229 = vadd.xlane.f32.xlu1 %v7228_v28  ;;  %7226 = vadd.xlane.f32.xlu0 %v7225_v27 }
0x1b66   : > { %v7162_v42 = vpack.c.bf16 %v7154_v31, %v7153_v5  ;;  %v9304_v5 = vld [vmem:[%s14520_s10] sm:$0xff]  }
0x1b67   : > { %8971 = vmatprep.subr.bf16.mxu0 %v9304_v5 }
0x1b68   : > { %v14147_v23 = vadd.bf16 %v7162_v42, %v13477_v34  ;;  %8972 = vmatpush3.bf16.msra.mxu0 %v9304_v5 }
0x1b69   : > { %8973 = vmatprep.subr.bf16.mxu0 %v9305_v55 }
0x1b6a   : > { %v7188_v33 = vunpack.c.h.bf16 %v14147_v23  ;;  %v7187_v62 = vunpack.c.l.bf16 %v14147_v23 }
0x1b6c   : > { %v7234_v49 = vsel %vm237_vm1, %v7188_v33, 0.0  ;;  %v7231_v35 = vsel %vm237_vm1, %v7187_v62, 0.0  ;;  %8974 = vmatpush3.bf16.msra.mxu0 %v9305_v55 }
0x1b6d   : > { %7235 = vadd.xlane.f32.xlu1 %v7234_v49  ;;  %7232 = vadd.xlane.f32.xlu0 %v7231_v35 }
0x1b8d   : > { %v7194_v61 = vpop.xlane.xlu1 %7193  ;;  %v7191_v9 = vpop.xlane.xlu0 %7190 }
0x1b8e   : > { %v7238_v52 = vmul.f32 0.015625, %v7194_v61  ;;  %v7237_v20 = vmul.f32 0.015625, %v7191_v9 }
0x1b90   : > { %v14159_v34 = vsub.f32 %v7174_v30, %v7238_v52  ;;  %v14163_v50 = vsub.f32 %v7173_v15, %v7237_v20 }
0x1b92   : > { %v7270_v41 = vmul.f32 %v14159_v34, %v14159_v34  ;;  %v7269_v59 = vmul.f32 %v14163_v50, %v14163_v50 }
0x1b94   : > { %v7288_v48 = vsel %vm237_vm1, %v7270_v41, 0.0  ;;  %v7285_v53 = vsel %vm237_vm1, %v7269_v59, 0.0 }
0x1b95   : > { %7289 = vadd.xlane.f32.xlu1 %v7288_v48  ;;  %7286 = vadd.xlane.f32.xlu0 %v7285_v53 }
0x1b9b   : > { %v7200_v3 = vpop.xlane.xlu1 %7199  ;;  %v7197_v63 = vpop.xlane.xlu0 %7196 }
0x1b9c   : > { %v7240_v30 = vmul.f32 0.015625, %v7200_v3  ;;  %v7239_v8 = vmul.f32 0.015625, %v7197_v63 }
0x1b9e   : > { %v14173_v60 = vsub.f32 %v7176_v47, %v7240_v30  ;;  %v14177_v15 = vsub.f32 %v7175_v38, %v7239_v8 }
0x1ba0   : > { %v7272_v6 = vmul.f32 %v14173_v60, %v14173_v60  ;;  %v7271_v29 = vmul.f32 %v14177_v15, %v14177_v15 }
0x1ba2   : > { %v7294_v1 = vsel %vm237_vm1, %v7272_v6, 0.0  ;;  %v7291_v14 = vsel %vm237_vm1, %v7271_v29, 0.0 }
0x1ba3   : > { %7295 = vadd.xlane.f32.xlu1 %v7294_v1  ;;  %7292 = vadd.xlane.f32.xlu0 %v7291_v14 }
0x1ba6   : > { %v7206_v58 = vpop.xlane.xlu1 %7205  ;;  %v7203_v12 = vpop.xlane.xlu0 %7202 }
0x1ba7   : > { %v7242_v47 = vmul.f32 0.015625, %v7206_v58  ;;  %v7241_v54 = vmul.f32 0.015625, %v7203_v12 }
0x1ba9   : > { %v14187_v36 = vsub.f32 %v7178_v21, %v7242_v47  ;;  %v14191_v38 = vsub.f32 %v7177_v24, %v7241_v54 }
0x1bab   : > { %v7274_v19 = vmul.f32 %v14187_v36, %v14187_v36  ;;  %v7273_v39 = vmul.f32 %v14191_v38, %v14191_v38 }
0x1bad   : > { %v7300_v45 = vsel %vm237_vm1, %v7274_v19, 0.0  ;;  %v7297_v7 = vsel %vm237_vm1, %v7273_v39, 0.0 }
0x1bae   : > { %7301 = vadd.xlane.f32.xlu1 %v7300_v45  ;;  %7298 = vadd.xlane.f32.xlu0 %v7297_v7 }
0x1bb1   : > { %v7212_v44 = vpop.xlane.xlu1 %7211  ;;  %v7209_v0 = vpop.xlane.xlu0 %7208 }
0x1bb2   : > { %v7244_v21 = vmul.f32 0.015625, %v7212_v44  ;;  %v7243_v40 = vmul.f32 0.015625, %v7209_v0 }
0x1bb4   : > { %v14201_v32 = vsub.f32 %v7180_v18, %v7244_v21  ;;  %v14205_v24 = vsub.f32 %v7179_v43, %v7243_v40  ;;  %v9306_v18 = vld [vmem:[%s14520_s10 + $0x10] sm:$0xff]   ;;  %v9307_v43 = vld [vmem:[%s14520_s10 + $0x18] sm:$0xff]  }
0x1bb5   : > { %8975 = vmatprep.subr.bf16.mxu0 %v9306_v18 }
0x1bb6   : > { %v7276_v22 = vmul.f32 %v14201_v32, %v14201_v32  ;;  %v7275_v46 = vmul.f32 %v14205_v24, %v14205_v24  ;;  %8976 = vmatpush3.bf16.msra.mxu0 %v9306_v18 }
0x1bb7   : > { %8977 = vmatprep.subr.bf16.mxu0 %v9307_v43 }
0x1bb8   : > { %v7306_v13 = vsel %vm237_vm1, %v7276_v22, 0.0  ;;  %v7303_v26 = vsel %vm237_vm1, %v7275_v46, 0.0  ;;  %v7172_v22 = vld [vmem:[%s7171_s7] sm:$0x3] }
0x1bb9   : > { %7307 = vadd.xlane.f32.xlu1 %v7306_v13  ;;  %7304 = vadd.xlane.f32.xlu0 %v7303_v26  ;;  %v7397_v46 = vadd.f32 1.0, %v7172_v22 }
0x1bba   : > { %8978 = vmatpush3.bf16.msra.mxu0 %v9307_v43 }
0x1bbb   : > { %v14286_v13 = vrot.slane %v7397_v46, %v14518_v57 }
0x1be2   : > { %v7218_v31 = vpop.xlane.xlu1 %7217  ;;  %v7215_v28 = vpop.xlane.xlu0 %7214 }
0x1be3   : > { %v7246_v27 = vmul.f32 0.015625, %v7218_v31  ;;  %v7245_v42 = vmul.f32 0.015625, %v7215_v28  ;;  %v14289_v28 = vrot.slane %v7172_v22, %v14517_v25 }
0x1be5   : > { %v14227_v49 = vsub.f32 %v7182_v10, %v7246_v27  ;;  %v14231_v35 = vsub.f32 %v7181_v17, %v7245_v42 }
0x1be7   : > { %v7278_v61 = vmul.f32 %v14227_v49, %v14227_v49  ;;  %v7277_v9 = vmul.f32 %v14231_v35, %v14231_v35 }
0x1be9   : > { %v7312_v52 = vsel %vm237_vm1, %v7278_v61, 0.0  ;;  %v7309_v20 = vsel %vm237_vm1, %v7277_v9, 0.0 }
0x1bea   : > { %v7224_v41 = vpop.xlane.xlu1 %7223  ;;  %7313 = vadd.xlane.f32.xlu1 %v7312_v52  ;;  %7310 = vadd.xlane.f32.xlu0 %v7309_v20  ;;  %v7221_v59 = vpop.xlane.xlu0 %7220 }
0x1beb   : > { %v7248_v10 = vmul.f32 0.015625, %v7224_v41  ;;  %v7247_v48 = vmul.f32 0.015625, %v7221_v59 }
0x1bed   : > { %v14241_v56 = vsub.f32 %v7184_v51, %v7248_v10  ;;  %v14245_v17 = vsub.f32 %v7183_v4, %v7247_v48 }
0x1bef   : > { %v7280_v53 = vmul.f32 %v14241_v56, %v14241_v56  ;;  %v7279_v3 = vmul.f32 %v14245_v17, %v14245_v17 }
0x1bf1   : > { %v7318_v63 = vsel %vm237_vm1, %v7280_v53, 0.0  ;;  %v7315_v30 = vsel %vm237_vm1, %v7279_v3, 0.0 }
0x1bf2   : > { %v7230_v8 = vpop.xlane.xlu1 %7229  ;;  %7319 = vadd.xlane.f32.xlu1 %v7318_v63  ;;  %7316 = vadd.xlane.f32.xlu0 %v7315_v30  ;;  %v7227_v6 = vpop.xlane.xlu0 %7226 }
0x1bf3   : > { %v7250_v51 = vmul.f32 0.015625, %v7230_v8  ;;  %v7249_v29 = vmul.f32 0.015625, %v7227_v6 }
0x1bf5   : > { %v14255_v2 = vsub.f32 %v7186_v37, %v7250_v51  ;;  %v14259_v4 = vsub.f32 %v7185_v11, %v7249_v29 }
0x1bf7   : > { %v7282_v1 = vmul.f32 %v14255_v2, %v14255_v2  ;;  %v7281_v14 = vmul.f32 %v14259_v4, %v14259_v4 }
0x1bf9   : > { %v7324_v58 = vsel %vm237_vm1, %v7282_v1, 0.0  ;;  %v7321_v12 = vsel %vm237_vm1, %v7281_v14, 0.0 }
0x1bfa   : > { %7325 = vadd.xlane.f32.xlu1 %v7324_v58  ;;  %v7236_v47 = vpop.xlane.xlu1 %7235  ;;  %7322 = vadd.xlane.f32.xlu0 %v7321_v12  ;;  %v7233_v37 = vpop.xlane.xlu0 %7232 }
0x1bfb   : > { %v7252_v54 = vmul.f32 0.015625, %v7236_v47  ;;  %v7251_v19 = vmul.f32 0.015625, %v7233_v37 }
0x1bfd   : > { %v14269_v16 = vsub.f32 %v7188_v33, %v7252_v54  ;;  %v14273_v11 = vsub.f32 %v7187_v62, %v7251_v19 }
0x1bff   : > { %v7284_v39 = vmul.f32 %v14269_v16, %v14269_v16  ;;  %v7283_v45 = vmul.f32 %v14273_v11, %v14273_v11 }
0x1c01   : > { %v7330_v7 = vsel %vm237_vm1, %v7284_v39, 0.0  ;;  %v7327_v44 = vsel %vm237_vm1, %v7283_v45, 0.0 }
0x1c02   : > { %7331 = vadd.xlane.f32.xlu1 %v7330_v7  ;;  %7328 = vadd.xlane.f32.xlu0 %v7327_v44 }
0x1c22   : > { %v7290_v0 = vpop.xlane.xlu1 %7289  ;;  %v7287_v21 = vpop.xlane.xlu0 %7286 }
0x1c23   : > { %v7334_v33 = vmul.f32 0.015625, %v7290_v0  ;;  %v7333_v40 = vmul.f32 0.015625, %v7287_v21 }
0x1c25   : > { %v7350_v23 = vadd.f32 1e-06, %v7334_v33  ;;  %v7349_v62 = vadd.f32 1e-06, %v7333_v40 }
0x1c27   : > { %9856 = vrsqrt.f32 %v7350_v23 }
0x1c28   : > { %9858 = vrsqrt.f32 %v7349_v62 }
0x1c30   : > { %v7296_v26 = vpop.xlane.xlu1 %7295  ;;  %v7293_v5 = vpop.xlane.xlu0 %7292 }
0x1c31   : > { %v9857_v55 = vpop.eup %9856  ;;  %v7336_v18 = vmul.f32 0.015625, %v7296_v26  ;;  %v7335_v43 = vmul.f32 0.015625, %v7293_v5 }
0x1c32   : > { %v9859_v31 = vpop.eup %9858  ;;  %v7382_v27 = vmul.f32 %v9857_v55, %v14159_v34 }
0x1c33   : > { %v7381_v42 = vmul.f32 %v9859_v31, %v14163_v50  ;;  %v7352_v61 = vadd.f32 1e-06, %v7336_v18  ;;  %v7351_v9 = vadd.f32 1e-06, %v7335_v43 }
0x1c34   : > { %v7403_v52 = vmul.f32 %v14286_v13, %v7382_v27 }
0x1c35   : > { %9860 = vrsqrt.f32 %v7352_v61  ;;  %v7402_v57 = vmul.f32 %v14286_v13, %v7381_v42 }
0x1c36   : > { %9862 = vrsqrt.f32 %v7351_v9  ;;  %v7423_v20 = vadd.f32 %v14289_v28, %v7403_v52 }
0x1c37   : > { %v7422_v41 = vadd.f32 %v14289_v28, %v7402_v57 }
0x1c39   : > { %v7438_v59 = vpack.c.bf16 %v7423_v20, %v7422_v41 }
0x1c3b   : > { %v7302_v10 = vpop.xlane.xlu1 %7301  ;;  %8979 = vmatprep.mubr.msk.bf16.mxu0 %vm237_vm1, %v7438_v59  ;;  %v7299_v25 = vpop.xlane.xlu0 %7298 }
0x1c3c   : > { %v7338_v34 = vmul.f32 0.015625, %v7302_v10  ;;  %v7337_v48 = vmul.f32 0.015625, %v7299_v25 }
0x1c3e   : > { %v7354_v50 = vadd.f32 1e-06, %v7338_v34  ;;  %v7353_v53 = vadd.f32 1e-06, %v7337_v48 }
0x1c3f   : > { %v9861_v3 = vpop.eup %9860 }
0x1c40   : > { %v9863_v63 = vpop.eup %9862  ;;  %v7384_v30 = vmul.f32 %v9861_v3, %v14173_v60  ;;  %9864 = vrsqrt.f32 %v7354_v50 }
0x1c41   : > { %v7383_v8 = vmul.f32 %v9863_v63, %v14177_v15  ;;  %9866 = vrsqrt.f32 %v7353_v53 }
0x1c42   : > { %v7405_v6 = vmul.f32 %v14286_v13, %v7384_v30 }
0x1c43   : > { %v7404_v51 = vmul.f32 %v14286_v13, %v7383_v8 }
0x1c44   : > { %v7425_v29 = vadd.f32 %v14289_v28, %v7405_v6 }
0x1c45   : > { %v7424_v1 = vadd.f32 %v14289_v28, %v7404_v51 }
0x1c46   : > { %v7308_v14 = vpop.xlane.xlu1 %7307  ;;  %v7305_v58 = vpop.xlane.xlu0 %7304 }
0x1c47   : > { %v7439_v12 = vpack.c.bf16 %v7425_v29, %v7424_v1  ;;  %v7340_v47 = vmul.f32 0.015625, %v7308_v14  ;;  %v7339_v37 = vmul.f32 0.015625, %v7305_v58 }
0x1c49   : > { %v7356_v54 = vadd.f32 1e-06, %v7340_v47  ;;  %8980 = vmatmul.mubr.msk.bf16.vlgmr.msra.gmra.mrb[32].mxu0 %vm237_vm1, %v7439_v12  ;;  %v7355_v60 = vadd.f32 1e-06, %v7339_v37 }
0x1c4a   : > { %v9865_v19 = vpop.eup %9864 }
0x1c4b   : > { %v9867_v15 = vpop.eup %9866  ;;  %v7386_v39 = vmul.f32 %v9865_v19, %v14187_v36  ;;  %9868 = vrsqrt.f32 %v7356_v54 }
0x1c4c   : > { %v7385_v45 = vmul.f32 %v9867_v15, %v14191_v38  ;;  %9870 = vrsqrt.f32 %v7355_v60 }
0x1c4d   : > { %v7407_v7 = vmul.f32 %v14286_v13, %v7386_v39 }
0x1c4e   : > { %v7406_v44 = vmul.f32 %v14286_v13, %v7385_v45 }
0x1c4f   : > { %v7427_v0 = vadd.f32 %v14289_v28, %v7407_v7 }
0x1c50   : > { %v7426_v21 = vadd.f32 %v14289_v28, %v7406_v44 }
0x1c52   : > { %v7440_v33 = vpack.c.bf16 %v7427_v0, %v7426_v21 }
0x1c54   : > { %8983 = vmatprep.mubr.msk.bf16.mxu0 %vm237_vm1, %v7440_v33 }
0x1c55   : > { %v9869_v40 = vpop.eup %9868 }
0x1c56   : > { %v9871_v23 = vpop.eup %9870  ;;  %v7388_v62 = vmul.f32 %v9869_v40, %v14201_v32 }
0x1c57   : > { %v7387_v36 = vmul.f32 %v9871_v23, %v14205_v24 }
0x1c58   : > { %v7409_v38 = vmul.f32 %v14286_v13, %v7388_v62 }
0x1c59   : > { %v7408_v22 = vmul.f32 %v14286_v13, %v7387_v36 }
0x1c5a   : > { %v7429_v46 = vadd.f32 %v14289_v28, %v7409_v38 }
0x1c5b   : > { %v7428_v26 = vadd.f32 %v14289_v28, %v7408_v22 }
0x1c5d   : > { %v7441_v5 = vpack.c.bf16 %v7429_v46, %v7428_v26 }
0x1c5f   : > { %8984 = vmatmul.mubr.msk.bf16.gmra.mrb[36].mxu0 %vm237_vm1, %v7441_v5 }
0x1c77   : > { %v7314_v55 = vpop.xlane.xlu1 %7313  ;;  %v7311_v18 = vpop.xlane.xlu0 %7310 }
0x1c78   : > { %v7342_v43 = vmul.f32 0.015625, %v7314_v55  ;;  %v7341_v31 = vmul.f32 0.015625, %v7311_v18 }
0x1c7a   : > { %v7358_v27 = vadd.f32 1e-06, %v7342_v43  ;;  %v7357_v42 = vadd.f32 1e-06, %v7341_v31 }
0x1c7c   : > { %9872 = vrsqrt.f32 %v7358_v27 }
0x1c7d   : > { %9874 = vrsqrt.f32 %v7357_v42 }
0x1c7f   : > { %v7320_v32 = vpop.xlane.xlu1 %7319  ;;  %v7317_v24 = vpop.xlane.xlu0 %7316 }
0x1c80   : > { %v7344_v61 = vmul.f32 0.015625, %v7320_v32  ;;  %v7343_v9 = vmul.f32 0.015625, %v7317_v24  ;;  %v8045_v32 = vld [vmem:[%s14522_s28] ss:$0 sm:$0xff] }
0x1c82   : > { %v7360_v52 = vadd.f32 1e-06, %v7344_v61  ;;  %v7359_v57 = vadd.f32 1e-06, %v7343_v9 }
0x1c84   : > { %9876 = vrsqrt.f32 %v7360_v52 }
0x1c85   : > { %9878 = vrsqrt.f32 %v7359_v57 }
0x1c86   : > { %v9873_v20 = vpop.eup %9872 }
0x1c87   : > { %v9875_v41 = vpop.eup %9874  ;;  %v7390_v59 = vmul.f32 %v9873_v20, %v14227_v49  ;;  %v7326_v10 = vpop.xlane.xlu1 %7325 }
0x1c88   : > { %v7323_v25 = vpop.xlane.xlu0 %7322  ;;  %v7389_v34 = vmul.f32 %v9875_v41, %v14231_v35  ;;  %v7346_v48 = vmul.f32 0.015625, %v7326_v10 }
0x1c89   : > { %v7345_v50 = vmul.f32 0.015625, %v7323_v25  ;;  %v7411_v53 = vmul.f32 %v14286_v13, %v7390_v59 }
0x1c8a   : > { %v7362_v3 = vadd.f32 1e-06, %v7346_v48  ;;  %v7410_v30 = vmul.f32 %v14286_v13, %v7389_v34 }
0x1c8b   : > { %v7361_v63 = vadd.f32 1e-06, %v7345_v50  ;;  %v7431_v8 = vadd.f32 %v14289_v28, %v7411_v53 }
0x1c8c   : > { %9880 = vrsqrt.f32 %v7362_v3  ;;  %v7430_v6 = vadd.f32 %v14289_v28, %v7410_v30  ;;  %v7630_v3 = vstv %s121_s29 }
0x1c8d   : > { %9882 = vrsqrt.f32 %v7361_v63 }
0x1c8e   : > { %v9877_v51 = vpop.eup %9876  ;;  %v7442_v49 = vpack.c.bf16 %v7431_v8, %v7430_v6 }
0x1c8f   : > { %v9879_v29 = vpop.eup %9878  ;;  %v7392_v1 = vmul.f32 %v9877_v51, %v14241_v56  ;;  %v7332_v35 = vpop.xlane.xlu1 %7331 }
0x1c90   : > { %v7329_v14 = vpop.xlane.xlu0 %7328  ;;  %v7391_v58 = vmul.f32 %v9879_v29, %v14245_v17  ;;  %v7348_v12 = vmul.f32 0.015625, %v7332_v35  ;;  %8987 = vmatprep.mubr.msk.bf16.mxu0 %vm237_vm1, %v7442_v49 }
0x1c91   : > { %v7347_v47 = vmul.f32 0.015625, %v7329_v14  ;;  %v7413_v37 = vmul.f32 %v14286_v13, %v7392_v1 }
0x1c92   : > { %v7412_v54 = vmul.f32 %v14286_v13, %v7391_v58  ;;  %v7364_v60 = vadd.f32 1e-06, %v7348_v12  ;;  %v14523_v58 = vld [vmem:[#allocation12_spill] sm:$0xff] }
0x1c93   : > { %v7363_v19 = vadd.f32 1e-06, %v7347_v47  ;;  %v7433_v15 = vadd.f32 %v14289_v28, %v7413_v37  ;;  %v14524_v37 = vld [vmem:[#allocation14_spill] sm:$0xff] }
0x1c94   : > { %v7432_v39 = vadd.f32 %v14289_v28, %v7412_v54  ;;  %9884 = vrsqrt.f32 %v7364_v60 }
0x1c95   : > { %9886 = vrsqrt.f32 %v7363_v19  ;;  %v14525_v19 = vld [vmem:[#allocation11_spill] sm:$0xff] }
0x1c96   : > { %v9881_v56 = vpop.eup %9880  ;;  %v7443_v45 = vpack.c.bf16 %v7433_v15, %v7432_v39  ;;  %v14526_v39 = vld [vmem:[#allocation13_spill] sm:$0xff] }
0x1c97   : > { %v9883_v7 = vpop.eup %9882  ;;  %v7394_v17 = vmul.f32 %v9881_v56, %v14255_v2 }
0x1c98   : > { %v7393_v44 = vmul.f32 %v9883_v7, %v14259_v4  ;;  %8988 = vmatmul.mubr.msk.bf16.gmra.mrb[40].mxu0 %vm237_vm1, %v7443_v45 }
0x1c99   : > { %v7415_v0 = vmul.f32 %v14286_v13, %v7394_v17 }
0x1c9a   : > { %v7414_v21 = vmul.f32 %v14286_v13, %v7393_v44 }
0x1c9b   : > { %v7435_v33 = vadd.f32 %v14289_v28, %v7415_v0 }
0x1c9c   : > { %v7434_v40 = vadd.f32 %v14289_v28, %v7414_v21 }
0x1c9e   : > { %v9885_v23 = vpop.eup %9884  ;;  %v7444_v62 = vpack.c.bf16 %v7435_v33, %v7434_v40 }
0x1c9f   : > { %v9887_v36 = vpop.eup %9886  ;;  %v7396_v38 = vmul.f32 %v9885_v23, %v14269_v16 }
0x1ca0   : > { %v7395_v22 = vmul.f32 %v9887_v36, %v14273_v11  ;;  %8991 = vmatprep.mubr.msk.bf16.mxu0 %vm237_vm1, %v7444_v62 }
0x1ca1   : > { %v7417_v2 = vmul.f32 %v14286_v13, %v7396_v38 }
0x1ca2   : > { %v7416_v4 = vmul.f32 %v14286_v13, %v7395_v22 }
0x1ca3   : > { %v7437_v46 = vadd.f32 %v14289_v28, %v7417_v2 }
0x1ca4   : > { %v7436_v26 = vadd.f32 %v14289_v28, %v7416_v4 }
0x1ca6   : > { %v7445_v5 = vpack.c.bf16 %v7437_v46, %v7436_v26 }
0x1ca8   : > { %8992 = vmatmul.mubr.msk.bf16.gmra.mrb[44].mxu0 %vm237_vm1, %v7445_v5 }
0x1d1c   : > { %v8981_v55 = vpop.f32.mrb[32].mxu0 }
0x1d1d   : > { %v7543_v18 = vpop.f32.mrb[33].mxu0  ;;  %v7552_v24 = vadd.f32 %v8981_v55, %v8045_v32 }
0x1d1e   : > { %v8982_v43 = vpop.f32.mrb[34].mxu0  ;;  %v7544_v9 = vadd.f32 %v8045_v32, %v7543_v18 }
0x1d1f   : > { %v7546_v16 = vpop.f32.mrb[35].mxu0  ;;  %v7555_v20 = vadd.f32 %v8982_v43, %v8045_v32 }
0x1d20   : > { %v7547_v25 = vadd.f32 %v8045_v32, %v7546_v16 }
0x1d32   : > { %v8985_v31 = vpop.f32.mrb[36].mxu0 }
0x1d33   : > { %v7559_v11 = vpop.f32.mrb[37].mxu0  ;;  %v7568_v7 = vadd.f32 %v8985_v31, %v8045_v32 }
0x1d34   : > { %v8986_v27 = vpop.f32.mrb[38].mxu0  ;;  %v7560_v0 = vadd.f32 %v8045_v32, %v7559_v11 }
0x1d35   : > { %v7562_v42 = vpop.f32.mrb[39].mxu0  ;;  %v7571_v40 = vadd.f32 %v8986_v27, %v8045_v32 }
0x1d36   : > { %v7563_v38 = vadd.f32 %v8045_v32, %v7562_v42 }
0x1d6b   : > { %v8989_v13 = vpop.f32.mrb[40].mxu0 }
0x1d6c   : > { %v7584_v61 = vadd.f32 %v8989_v13, %v8045_v32  ;;  %v7575_v28 = vpop.f32.mrb[41].mxu0 }
0x1d6d   : > { %v7576_v52 = vadd.f32 %v8045_v32, %v7575_v28  ;;  %v8990_v57 = vpop.f32.mrb[42].mxu0 }
0x1d6e   : > { %v7608_v41 = vsub.f32 %v7552_v24, %v7584_v61  ;;  %v7587_v59 = vadd.f32 %v8990_v57, %v8045_v32  ;;  %v7578_v10 = vpop.f32.mrb[43].mxu0  ;;  %v14529_v57 = vld [vmem:[#allocation7_spill] sm:$0xff] }
0x1d6f   : > { %v7606_v34 = vsub.f32 %v7544_v9, %v7576_v52  ;;  %v7579_v48 = vadd.f32 %v8045_v32, %v7578_v10  ;;  %v14528_v9 = vld [vmem:[#allocation10_spill] sm:$0xff] }
0x1d70   : > { %v7616_v50 = vmul.f32 7.0, %v7608_v41  ;;  %v7609_v53 = vsub.f32 %v7555_v20, %v7587_v59  ;;  %v14530_v20 = vld [vmem:[#allocation9_spill] sm:$0xff] }
0x1d71   : > { %v7614_v63 = vmul.f32 7.0, %v7606_v34  ;;  %v7607_v30 = vsub.f32 %v7547_v25, %v7579_v48 }
0x1d72   : > { %v7624_v8 = vadd.f32 %v7616_v50, %v7584_v61  ;;  %v7617_v6 = vmul.f32 7.0, %v7609_v53  ;;  %v14527_v61 = vld [vmem:[#allocation8_spill] sm:$0xff] }
0x1d73   : > { %v7622_v51 = vadd.f32 %v7614_v63, %v7576_v52  ;;  %v7615_v49 = vmul.f32 7.0, %v7607_v30 }
0x1d74   : > { %v7633_v29 = vmul.f32 %v7630_v3, %v7624_v8  ;;  %v7625_v1 = vadd.f32 %v7617_v6, %v7587_v59 }
0x1d75   : > { %v7631_v35 = vmul.f32 %v7630_v3, %v7622_v51  ;;  %v7623_v14 = vadd.f32 %v7615_v49, %v7579_v48 }
0x1d76   : > { %v7641_v12 = vadd.f32 %v14523_v58, %v7633_v29   ;;  %v7634_v47 = vmul.f32 %v7630_v3, %v7625_v1 }
0x1d77   : > { %v7639_v54 = vadd.f32 %v14524_v37, %v7631_v35   ;;  %v7632_v60 = vmul.f32 %v7630_v3, %v7623_v14 }
0x1d78   : > { %v7642_v15 = vadd.f32 %v14525_v19, %v7634_v47   ;;  %7650 = vst.msk [vmem:[%s14436_s26 + $0x10] sm:$0xff] (%p109_p5), %vm141_vm0, %v7641_v12 }
0x1d79   : > { %v7640_v56 = vadd.f32 %v14526_v39, %v7632_v60   ;;  %7648 = vst.msk [vmem:[%s14436_s26] sm:$0xff] (%p109_p5), %vm141_vm0, %v7639_v54 }
0x1d7a   :  { %7651 = vst.msk [vmem:[%s14436_s26 + $0x18] sm:$0xff] (%p109_p5), %vm141_vm0, %v7642_v15 }
0x1d7b   : > { %v8993_v45 = vpop.f32.mrb[44].mxu0  ;;  %7649 = vst.msk [vmem:[%s14436_s26 + $0x8] sm:$0xff] (%p109_p5), %vm141_vm0, %v7640_v56 }
0x1d7c   : > { %v7600_v17 = vadd.f32 %v8993_v45, %v8045_v32  ;;  %v7591_v44 = vpop.f32.mrb[45].mxu0 }
0x1d7d   : > { %v7592_v21 = vadd.f32 %v8045_v32, %v7591_v44  ;;  %v8994_v33 = vpop.f32.mrb[46].mxu0 }
0x1d7e   : > { %v7612_v23 = vsub.f32 %v7568_v7, %v7600_v17  ;;  %v7603_v62 = vadd.f32 %v8994_v33, %v8045_v32  ;;  %v7594_v36 = vpop.f32.mrb[47].mxu0 }
0x1d7f   : > { %v7610_v22 = vsub.f32 %v7560_v0, %v7592_v21  ;;  %v7595_v2 = vadd.f32 %v8045_v32, %v7594_v36 }
0x1d80   : > { %v7620_v4 = vmul.f32 7.0, %v7612_v23  ;;  %v7613_v46 = vsub.f32 %v7571_v40, %v7603_v62 }
0x1d81   : > { %v7618_v26 = vmul.f32 7.0, %v7610_v22  ;;  %v7611_v5 = vsub.f32 %v7563_v38, %v7595_v2 }
0x1d82   : > { %v7628_v55 = vadd.f32 %v7620_v4, %v7600_v17  ;;  %v7621_v18 = vmul.f32 7.0, %v7613_v46  ;;  %v14536_v4 = vmov %v7641_v12 }
0x1d83   : > { %v7626_v43 = vadd.f32 %v7618_v26, %v7592_v21  ;;  %v7619_v16 = vmul.f32 7.0, %v7611_v5  ;;  %v14535_v5 = vmov %v7642_v15 }
0x1d84   : > { %v7637_v31 = vmul.f32 %v7630_v3, %v7628_v55  ;;  %v7629_v13 = vadd.f32 %v7621_v18, %v7603_v62 }
0x1d85   : > { %v7635_v11 = vmul.f32 %v7630_v3, %v7626_v43  ;;  %v7627_v24 = vadd.f32 %v7619_v16, %v7595_v2  ;;  %v14538_v2 = vmov %v7639_v54  ;;  %111 = sbr.rel (!%p109_p5) target bundleno = 42 (0x2a), region = 150 }
0x1d86   : > { %v7645_v27 = vadd.f32 %v14527_v61, %v7637_v31   ;;  %v7638_v28 = vmul.f32 %v7630_v3, %v7629_v13 }
0x1d87   : > { %v7643_v52 = vadd.f32 %v14528_v9, %v7635_v11   ;;  %v7636_v42 = vmul.f32 %v7630_v3, %v7627_v24  ;;  %v14537_v3 = vmov %v7640_v56 }
0x1d88   : > { %v7646_v32 = vadd.f32 %v14529_v57, %v7638_v28   ;;  %v14532_v8 = vmov %v7645_v27  ;;  %7654 = vst.msk [vmem:[%s14436_s26 + $0x30] sm:$0xff] (%p109_p5), %vm141_vm0, %v7645_v27 }
0x1d89   : > { %v7644_v41 = vadd.f32 %v14530_v20, %v7636_v42   ;;  %v14534_v6 = vmov %v7643_v52  ;;  %7652 = vst.msk [vmem:[%s14436_s26 + $0x20] sm:$0xff] (%p109_p5), %vm141_vm0, %v7643_v52 }
0x1d8a   : > { %v14531_v9 = vmov %v7646_v32  ;;  %7655 = vst.msk [vmem:[%s14436_s26 + $0x38] sm:$0xff] (%p109_p5), %vm141_vm0, %v7646_v32 }
0x1d8b   : > { %v14533_v7 = vmov %v7644_v41  ;;  %7653 = vst.msk [vmem:[%s14436_s26 + $0x28] sm:$0xff] (%p109_p5), %vm141_vm0, %v7644_v41 }
0x1d8c   :  { %7660 = vsyncpa [#allocation3], 1 }

</bundles_post_ra>
